<compile_context>
chip_gen: v5e
topology: v5e:2x2
jax: 0.10.0
libtpu: 0.0.40
codegen_flags: <defaults>
</compile_context>

<pallas_src>
import jax
import jax.numpy as jnp
from jax.experimental import pallas as pl
from jax.experimental.pallas import tpu as pltpu


VMEM_LIMIT = 32 * 1024 * 1024   # explicit scoped-VMEM limit (v5e default is 16 MiB)
HEAD_PAD = 128                  # padded width of the tiny 3-wide action head


def _round_up(x, m):
    return ((x + m - 1) // m) * m


# ----------------------------- Pallas kernels ------------------------------ #

def _conv_gemm_kernel(x_ref, w_ref, b_ref, o_ref):
    """One M-tile of relu(patches @ w + b). bf16 in, f32 MXU accumulate, bf16 out."""
    acc = jnp.dot(x_ref[...], w_ref[...], preferred_element_type=jnp.float32)
    acc = acc + b_ref[...]                       # (1, N) broadcasts over rows
    o_ref[...] = jnp.maximum(acc, 0.0).astype(o_ref.dtype)


def _mlp_head_kernel(x_ref, w1_ref, b1_ref, w2_ref, b2_ref, w3_ref, b3_ref, o_ref):
    """Fused linear1 -> relu -> linear2 -> relu -> linear3 -> tanh/sigmoid head.

    All weights are VMEM-resident; a single grid step per M tile (no K stream).
    """
    h1 = jnp.dot(x_ref[...], w1_ref[...], preferred_element_type=jnp.float32)
    h1 = jnp.maximum(h1 + b1_ref[...], 0.0).astype(jnp.bfloat16)
    h2 = jnp.dot(h1, w2_ref[...], preferred_element_type=jnp.float32)
    h2 = jnp.maximum(h2 + b2_ref[...], 0.0).astype(jnp.bfloat16)
    y = jnp.dot(h2, w3_ref[...], preferred_element_type=jnp.float32) + b3_ref[...]
    # column 0 -> tanh (steering), other columns -> sigmoid (gas/brake; pad
    # columns are sliced away by the caller).
    col = jax.lax.broadcasted_iota(jnp.int32, y.shape, 1)
    o_ref[...] = jnp.where(col == 0, jnp.tanh(y), jax.nn.sigmoid(y))


# ------------------------------ Pallas wrappers ---------------------------- #

def _choose_conv_tile(M, max_tm=512):
    """Adaptive M tile: as few grid steps as possible (<=512 rows), minimal padding."""
    steps = -(-M // max_tm)
    tm = _round_up(-(-M // steps), 128)
    return tm


def conv_gemm(patches, w, b):
    """relu(patches @ w + b) with an M-tiled, pipelined Pallas GEMM.

    patches: (M, K) bf16, w: (K, N) bf16, b: (1, N) f32.  Returns (M, N) bf16.
    """
    M, K = patches.shape
    N = w.shape[1]
    tm = _choose_conv_tile(M)
    Mp = _round_up(M, tm)
    if Mp != M:
        patches = jnp.pad(patches, ((0, Mp - M), (0, 0)))

    out = pl.pallas_call(
        _conv_gemm_kernel,
        out_shape=jax.ShapeDtypeStruct((Mp, N), jnp.bfloat16),
        grid_spec=pltpu.PrefetchScalarGridSpec(
            num_scalar_prefetch=0,
            grid=(Mp // tm,),
            in_specs=[
                pl.BlockSpec((tm, K), lambda i: (i, 0)),   # patch tile (streams)
                pl.BlockSpec((K, N), lambda i: (0, 0)),    # weight (resident)
                pl.BlockSpec((1, N), lambda i: (0, 0)),    # bias   (resident)
            ],
            out_specs=pl.BlockSpec((tm, N), lambda i: (i, 0)),
        ),
        compiler_params=pltpu.CompilerParams(
            dimension_semantics=("parallel",),
            vmem_limit_bytes=VMEM_LIMIT),
    )(patches, w, b)
    if Mp != M:
        out = out[:M]
    return out


def mlp_head(x, w1, b1, w2, b2, w3, b3):
    """Fused lin1/lin2/lin3 + head.  x: (B, 4096) bf16.  Returns (Mp, 128) f32."""
    M, K = x.shape
    H1 = w1.shape[1]                    # 512
    H2 = w2.shape[1]                    # 256
    N = w3.shape[1]                     # 128 (padded head width)

    tm = _round_up(M, 16) if M <= 256 else 256      # bf16-friendly sublane padding
    Mp = _round_up(M, tm)
    if Mp != M:
        x = jnp.pad(x, ((0, Mp - M), (0, 0)))

    out = pl.pallas_call(
        _mlp_head_kernel,
        out_shape=jax.ShapeDtypeStruct((Mp, N), jnp.float32),
        grid_spec=pltpu.PrefetchScalarGridSpec(
            num_scalar_prefetch=0,
            grid=(Mp // tm,),
            in_specs=[
                pl.BlockSpec((tm, K), lambda i: (i, 0)),    # activations
                pl.BlockSpec((K, H1), lambda i: (0, 0)),    # lin1 weight (resident, 4 MB)
                pl.BlockSpec((1, H1), lambda i: (0, 0)),
                pl.BlockSpec((H1, H2), lambda i: (0, 0)),   # lin2 weight (resident)
                pl.BlockSpec((1, H2), lambda i: (0, 0)),
                pl.BlockSpec((H2, N), lambda i: (0, 0)),    # lin3 weight (resident)
                pl.BlockSpec((1, N), lambda i: (0, 0)),
            ],
            out_specs=pl.BlockSpec((tm, N), lambda i: (i, 0)),
        ),
        compiler_params=pltpu.CompilerParams(
            dimension_semantics=("parallel",),
            vmem_limit_bytes=VMEM_LIMIT),
    )(x, w1, b1, w2, b2, w3, b3)
    return out


# ------------------------------ conv as GEMM ------------------------------- #

def _im2col_nhwc(x, ksize, stride):
    """x: (B, H, W, C) NHWC -> patches (B*OH*OW, KH*KW*C), flattened (KH, KW, C)."""
    B, H, W, C = x.shape
    OH = (H - ksize) // stride + 1
    OW = (W - ksize) // stride + 1
    cols = []
    for i in range(ksize):
        for j in range(ksize):
            cols.append(
                x[:, i:i + stride * (OH - 1) + 1:stride,
                     j:j + stride * (OW - 1) + 1:stride, :])   # (B, OH, OW, C)
    p = jnp.stack(cols, axis=3)                                # (B, OH, OW, K*K, C)
    p = p.reshape(B * OH * OW, ksize * ksize * C)
    return p, OH, OW


def conv_block(x, w, b, *, ksize, stride):
    """NHWC conv + ReLU via im2col + Pallas GEMM.  Output stays NHWC bf16."""
    B = x.shape[0]
    patches, OH, OW = _im2col_nhwc(x, ksize, stride)
    N = w.shape[1]
    out = conv_gemm(patches, w, b)                 # (B*OH*OW, N) bf16
    return out.reshape(B, OH, OW, N)


# ------------------------------- parameters -------------------------------- #

def init_params(key, input_channels, output_actions):
    """Synthetic PyTorch-layout parameters (uniform(-1/sqrt(fan_in), ...))."""
    def uni(k, shape, fan_in):
        bound = 1.0 / jnp.sqrt(jnp.float32(fan_in))
        return jax.random.uniform(k, shape, jnp.float32, -bound, bound)

    ks = jax.random.split(key, 12)
    p = {}
    p["conv1_w"] = uni(ks[0], (32, input_channels, 8, 8), input_channels * 64)
    p["conv1_b"] = uni(ks[1], (32,), input_channels * 64)
    p["conv2_w"] = uni(ks[2], (64, 32, 4, 4), 32 * 16)
    p["conv2_b"] = uni(ks[3], (64,), 32 * 16)
    p["conv3_w"] = uni(ks[4], (64, 64, 3, 3), 64 * 9)
    p["conv3_b"] = uni(ks[5], (64,), 64 * 9)
    # Linear weights stored (in, out); lin1 "in" index follows PyTorch flatten
    # order of the NCHW feature map: in = c*64 + h*8 + w.
    p["lin1_w"] = uni(ks[6], (8 * 8 * 64, 512), 8 * 8 * 64)
    p["lin1_b"] = uni(ks[7], (512,), 8 * 8 * 64)
    p["lin2_w"] = uni(ks[8], (512, 256), 512)
    p["lin2_b"] = uni(ks[9], (256,), 512)
    p["lin3_w"] = uni(ks[10], (256, output_actions), 256)
    p["lin3_b"] = uni(ks[11], (output_actions,), 256)
    return p


def prepare_params(p, input_channels, output_actions):
    """One-time conversion: im2col weight layout, bf16 cast, head padding.

    No channel zero-padding anywhere: conv GEMM K dims stay at the true
    8*8*Cin / 4*4*32 / 3*3*64 sizes.
    """
    def prep_conv(w, b):
        cout, cin, kh, kw = w.shape
        w = jnp.transpose(w, (2, 3, 1, 0))                       # (KH, KW, Cin, Cout)
        w = w.reshape(kh * kw * cin, cout).astype(jnp.bfloat16)
        b = b.reshape(1, cout).astype(jnp.float32)
        return w, b

    q = {}
    q["c1_w"], q["c1_b"] = prep_conv(p["conv1_w"], p["conv1_b"])   # (256, 32)
    q["c2_w"], q["c2_b"] = prep_conv(p["conv2_w"], p["conv2_b"])   # (512, 64)
    q["c3_w"], q["c3_b"] = prep_conv(p["conv3_w"], p["conv3_b"])   # (576, 64)

    # lin1: remap PyTorch NCHW flatten order (c*64 + h*8 + w) to our NHWC
    # flatten order (h*8*64 + w*64 + c).
    w1 = p["lin1_w"].reshape(64, 8, 8, 512).transpose(1, 2, 0, 3).reshape(4096, 512)
    q["l1_w"] = w1.astype(jnp.bfloat16)
    q["l1_b"] = p["lin1_b"].reshape(1, 512).astype(jnp.float32)
    q["l2_w"] = p["lin2_w"].astype(jnp.bfloat16)
    q["l2_b"] = p["lin2_b"].reshape(1, 256).astype(jnp.float32)

    q["l3_w"] = jnp.pad(p["lin3_w"],
                        ((0, 0), (0, HEAD_PAD - output_actions))).astype(jnp.bfloat16)
    q["l3_b"] = jnp.pad(p["lin3_b"],
                        (0, HEAD_PAD - output_actions)).reshape(1, HEAD_PAD).astype(jnp.float32)
    return q


# --------------------------------- model ----------------------------------- #

def car_racing_cnn_forward(prepared, x, output_actions=3):
    """Forward pass matching CarRacingCNN.forward. x is NCHW at the boundary."""
    B = x.shape[0]
    x = x.reshape(B, -1, 96, 96)
    x = jnp.transpose(x, (0, 2, 3, 1)).astype(jnp.bfloat16)      # -> NHWC bf16

    x = conv_block(x, prepared["c1_w"], prepared["c1_b"], ksize=8, stride=4)  # (B,23,23,32)
    x = conv_block(x, prepared["c2_w"], prepared["c2_b"], ksize=4, stride=2)  # (B,10,10,64)
    x = conv_block(x, prepared["c3_w"], prepared["c3_b"], ksize=3, stride=1)  # (B, 8, 8,64)

    x = x.reshape(B, 8 * 8 * 64)                                  # NHWC flatten (bf16)
    out = mlp_head(x, prepared["l1_w"], prepared["l1_b"],
                   prepared["l2_w"], prepared["l2_b"],
                   prepared["l3_w"], prepared["l3_b"])            # (Mp, 128) f32
    return out[:B, :output_actions]


# ---------------------------------- main ------------------------------------ #

if __name__ == "__main__":
    key = jax.random.PRNGKey(0)
    k_params, k_x = jax.random.split(key)

    input_channels = 4
    output_actions = 3
    batch = 2

    params = init_params(k_params, input_channels, output_actions)
    prepared = prepare_params(params, input_channels, output_actions)

    # CarRacingCNN hard-codes a 96x96 spatial grid (reshape + 8*8*64 linear),
    # so the spatial size cannot be shrunk.
    x = jax.random.uniform(k_x, (batch, input_channels, 96, 96), jnp.float32)

    fwd = jax.jit(lambda p, xx: car_racing_cnn_forward(p, xx, output_actions))
    out = jax.block_until_ready(fwd(prepared, x))

    assert out.shape == (batch, output_actions), out.shape
    assert bool(jnp.all(jnp.isfinite(out)))
    # steering in [-1, 1], gas/brake in [0, 1]
    assert bool(jnp.all(jnp.abs(out[:, 0]) <= 1.0))
    assert bool(jnp.all((out[:, 1:] >= 0.0) & (out[:, 1:] <= 1.0)))
    print("KERNEL_OK")
</pallas_src>

<mosaic_0001>
module attributes {stable_mosaic.version = 11 : i64} {
  func.func @_conv_gemm_kernel(%arg0: i32, %arg1: memref<384x256xbf16, #tpu.memory_space<vmem>>, %arg2: memref<256x32xbf16, #tpu.memory_space<vmem>>, %arg3: memref<1x32xf32, #tpu.memory_space<vmem>>, %arg4: memref<384x32xbf16, #tpu.memory_space<vmem>>) attributes {dimension_semantics = [#tpu.dimension_semantics<parallel>], iteration_bounds = array<i64: 3>, scalar_prefetch = 0 : i64, scratch_operands = 0 : i64, tpu.core_type = #tpu.core_type<tc>, window_params = [{transform_indices = @transform_0, window_bounds = array<i64: 384, 256>}, {pipeline_mode = #tpu.pipeline_mode<synchronous>, transform_indices = @transform_1, window_bounds = array<i64: 256, 32>}, {pipeline_mode = #tpu.pipeline_mode<synchronous>, transform_indices = @transform_2, window_bounds = array<i64: 1, 32>}, {transform_indices = @transform_3, window_bounds = array<i64: 384, 32>}]} {
    %c0 = arith.constant 0 : index
    %c0_0 = arith.constant 0 : index
    %0 = vector.load %arg1[%c0, %c0_0] : memref<384x256xbf16, #tpu.memory_space<vmem>>, vector<384x256xbf16>
    %c0_1 = arith.constant 0 : index
    %c0_2 = arith.constant 0 : index
    %1 = vector.load %arg2[%c0_1, %c0_2] : memref<256x32xbf16, #tpu.memory_space<vmem>>, vector<256x32xbf16>
    %cst = arith.constant dense<0.000000e+00> : vector<384x32xf32>
    %2 = tpu.matmul %0, %1, %cst {dimension_numbers = #tpu.dot_dimension_numbers<[1], [0], [0], [1], [0, 0, 1, 1], [], []>} : vector<384x256xbf16>, vector<256x32xbf16>, vector<384x32xf32> -> vector<384x32xf32>
    %c0_3 = arith.constant 0 : index
    %c0_4 = arith.constant 0 : index
    %3 = vector.load %arg3[%c0_3, %c0_4] : memref<1x32xf32, #tpu.memory_space<vmem>>, vector<1x32xf32>
    %4 = vector.broadcast %3 : vector<1x32xf32> to vector<384x32xf32>
    %5 = arith.addf %2, %4 : vector<384x32xf32>
    %cst_5 = arith.constant 0.000000e+00 : f32
    %6 = vector.broadcast %cst_5 : f32 to vector<384x32xf32>
    %7 = arith.maximumf %5, %6 : vector<384x32xf32>
    %8 = arith.truncf %7 : vector<384x32xf32> to vector<384x32xbf16>
    %c0_6 = arith.constant 0 : index
    %c0_7 = arith.constant 0 : index
    %9 = vector.load %arg4[%c0_6, %c0_7] : memref<384x32xbf16, #tpu.memory_space<vmem>>, vector<384x32xbf16>
    tpu.vector_store %arg4[%c0_6, %c0_7], %8 {strides = array<i32>} : memref<384x32xbf16, #tpu.memory_space<vmem>>, vector<384x32xbf16>,
    return
  }
  func.func @transform_0(%arg0: i32) -> (i32, i32) {
    %c0_i32 = arith.constant 0 : i32
    %c0_i32_0 = arith.constant 0 : i32
    return %arg0, %c0_i32 : i32, i32
  }
  func.func @transform_1(%arg0: i32) -> (i32, i32) {
    %c0_i32 = arith.constant 0 : i32
    %c0_i32_0 = arith.constant 0 : i32
    %c0_i32_1 = arith.constant 0 : i32
    return %c0_i32, %c0_i32_0 : i32, i32
  }
  func.func @transform_2(%arg0: i32) -> (i32, i32) {
    %c0_i32 = arith.constant 0 : i32
    %c0_i32_0 = arith.constant 0 : i32
    %c0_i32_1 = arith.constant 0 : i32
    return %c0_i32, %c0_i32_0 : i32, i32
  }
  func.func @transform_3(%arg0: i32) -> (i32, i32) {
    %c0_i32 = arith.constant 0 : i32
    %c0_i32_0 = arith.constant 0 : i32
    return %arg0, %c0_i32 : i32, i32
  }
}

module attributes {stable_mosaic.version = 11 : i64} {
  func.func @_conv_gemm_kernel(%arg0: i32, %arg1: memref<256x512xbf16, #tpu.memory_space<vmem>>, %arg2: memref<512x64xbf16, #tpu.memory_space<vmem>>, %arg3: memref<1x64xf32, #tpu.memory_space<vmem>>, %arg4: memref<256x64xbf16, #tpu.memory_space<vmem>>) attributes {dimension_semantics = [#tpu.dimension_semantics<parallel>], iteration_bounds = array<i64: 1>, scalar_prefetch = 0 : i64, scratch_operands = 0 : i64, tpu.core_type = #tpu.core_type<tc>, window_params = [{transform_indices = @transform_0, window_bounds = array<i64: 256, 512>}, {pipeline_mode = #tpu.pipeline_mode<synchronous>, transform_indices = @transform_1, window_bounds = array<i64: 512, 64>}, {pipeline_mode = #tpu.pipeline_mode<synchronous>, transform_indices = @transform_2, window_bounds = array<i64: 1, 64>}, {transform_indices = @transform_3, window_bounds = array<i64: 256, 64>}]} {
    %c0 = arith.constant 0 : index
    %c0_0 = arith.constant 0 : index
    %0 = vector.load %arg1[%c0, %c0_0] : memref<256x512xbf16, #tpu.memory_space<vmem>>, vector<256x512xbf16>
    %c0_1 = arith.constant 0 : index
    %c0_2 = arith.constant 0 : index
    %1 = vector.load %arg2[%c0_1, %c0_2] : memref<512x64xbf16, #tpu.memory_space<vmem>>, vector<512x64xbf16>
    %cst = arith.constant dense<0.000000e+00> : vector<256x64xf32>
    %2 = tpu.matmul %0, %1, %cst {dimension_numbers = #tpu.dot_dimension_numbers<[1], [0], [0], [1], [0, 0, 1, 1], [], []>} : vector<256x512xbf16>, vector<512x64xbf16>, vector<256x64xf32> -> vector<256x64xf32>
    %c0_3 = arith.constant 0 : index
    %c0_4 = arith.constant 0 : index
    %3 = vector.load %arg3[%c0_3, %c0_4] : memref<1x64xf32, #tpu.memory_space<vmem>>, vector<1x64xf32>
    %4 = vector.broadcast %3 : vector<1x64xf32> to vector<256x64xf32>
    %5 = arith.addf %2, %4 : vector<256x64xf32>
    %cst_5 = arith.constant 0.000000e+00 : f32
    %6 = vector.broadcast %cst_5 : f32 to vector<256x64xf32>
    %7 = arith.maximumf %5, %6 : vector<256x64xf32>
    %8 = arith.truncf %7 : vector<256x64xf32> to vector<256x64xbf16>
    %c0_6 = arith.constant 0 : index
    %c0_7 = arith.constant 0 : index
    %9 = vector.load %arg4[%c0_6, %c0_7] : memref<256x64xbf16, #tpu.memory_space<vmem>>, vector<256x64xbf16>
    tpu.vector_store %arg4[%c0_6, %c0_7], %8 {strides = array<i32>} : memref<256x64xbf16, #tpu.memory_space<vmem>>, vector<256x64xbf16>,
    return
  }
  func.func @transform_0(%arg0: i32) -> (i32, i32) {
    %c0_i32 = arith.constant 0 : i32
    %c0_i32_0 = arith.constant 0 : i32
    return %arg0, %c0_i32 : i32, i32
  }
  func.func @transform_1(%arg0: i32) -> (i32, i32) {
    %c0_i32 = arith.constant 0 : i32
    %c0_i32_0 = arith.constant 0 : i32
    %c0_i32_1 = arith.constant 0 : i32
    return %c0_i32, %c0_i32_0 : i32, i32
  }
  func.func @transform_2(%arg0: i32) -> (i32, i32) {
    %c0_i32 = arith.constant 0 : i32
    %c0_i32_0 = arith.constant 0 : i32
    %c0_i32_1 = arith.constant 0 : i32
    return %c0_i32, %c0_i32_0 : i32, i32
  }
  func.func @transform_3(%arg0: i32) -> (i32, i32) {
    %c0_i32 = arith.constant 0 : i32
    %c0_i32_0 = arith.constant 0 : i32
    return %arg0, %c0_i32 : i32, i32
  }
}

module attributes {stable_mosaic.version = 11 : i64} {
  func.func @_conv_gemm_kernel(%arg0: i32, %arg1: memref<128x576xbf16, #tpu.memory_space<vmem>>, %arg2: memref<576x64xbf16, #tpu.memory_space<vmem>>, %arg3: memref<1x64xf32, #tpu.memory_space<vmem>>, %arg4: memref<128x64xbf16, #tpu.memory_space<vmem>>) attributes {dimension_semantics = [#tpu.dimension_semantics<parallel>], iteration_bounds = array<i64: 1>, scalar_prefetch = 0 : i64, scratch_operands = 0 : i64, tpu.core_type = #tpu.core_type<tc>, window_params = [{transform_indices = @transform_0, window_bounds = array<i64: 128, 576>}, {pipeline_mode = #tpu.pipeline_mode<synchronous>, transform_indices = @transform_1, window_bounds = array<i64: 576, 64>}, {pipeline_mode = #tpu.pipeline_mode<synchronous>, transform_indices = @transform_2, window_bounds = array<i64: 1, 64>}, {transform_indices = @transform_3, window_bounds = array<i64: 128, 64>}]} {
    %c0 = arith.constant 0 : index
    %c0_0 = arith.constant 0 : index
    %0 = vector.load %arg1[%c0, %c0_0] : memref<128x576xbf16, #tpu.memory_space<vmem>>, vector<128x576xbf16>
    %c0_1 = arith.constant 0 : index
    %c0_2 = arith.constant 0 : index
    %1 = vector.load %arg2[%c0_1, %c0_2] : memref<576x64xbf16, #tpu.memory_space<vmem>>, vector<576x64xbf16>
    %cst = arith.constant dense<0.000000e+00> : vector<128x64xf32>
    %2 = tpu.matmul %0, %1, %cst {dimension_numbers = #tpu.dot_dimension_numbers<[1], [0], [0], [1], [0, 0, 1, 1], [], []>} : vector<128x576xbf16>, vector<576x64xbf16>, vector<128x64xf32> -> vector<128x64xf32>
    %c0_3 = arith.constant 0 : index
    %c0_4 = arith.constant 0 : index
    %3 = vector.load %arg3[%c0_3, %c0_4] : memref<1x64xf32, #tpu.memory_space<vmem>>, vector<1x64xf32>
    %4 = vector.broadcast %3 : vector<1x64xf32> to vector<128x64xf32>
    %5 = arith.addf %2, %4 : vector<128x64xf32>
    %cst_5 = arith.constant 0.000000e+00 : f32
    %6 = vector.broadcast %cst_5 : f32 to vector<128x64xf32>
    %7 = arith.maximumf %5, %6 : vector<128x64xf32>
    %8 = arith.truncf %7 : vector<128x64xf32> to vector<128x64xbf16>
    %c0_6 = arith.constant 0 : index
    %c0_7 = arith.constant 0 : index
    %9 = vector.load %arg4[%c0_6, %c0_7] : memref<128x64xbf16, #tpu.memory_space<vmem>>, vector<128x64xbf16>
    tpu.vector_store %arg4[%c0_6, %c0_7], %8 {strides = array<i32>} : memref<128x64xbf16, #tpu.memory_space<vmem>>, vector<128x64xbf16>,
    return
  }
  func.func @transform_0(%arg0: i32) -> (i32, i32) {
    %c0_i32 = arith.constant 0 : i32
    %c0_i32_0 = arith.constant 0 : i32
    return %arg0, %c0_i32 : i32, i32
  }
  func.func @transform_1(%arg0: i32) -> (i32, i32) {
    %c0_i32 = arith.constant 0 : i32
    %c0_i32_0 = arith.constant 0 : i32
    %c0_i32_1 = arith.constant 0 : i32
    return %c0_i32, %c0_i32_0 : i32, i32
  }
  func.func @transform_2(%arg0: i32) -> (i32, i32) {
    %c0_i32 = arith.constant 0 : i32
    %c0_i32_0 = arith.constant 0 : i32
    %c0_i32_1 = arith.constant 0 : i32
    return %c0_i32, %c0_i32_0 : i32, i32
  }
  func.func @transform_3(%arg0: i32) -> (i32, i32) {
    %c0_i32 = arith.constant 0 : i32
    %c0_i32_0 = arith.constant 0 : i32
    return %arg0, %c0_i32 : i32, i32
  }
}

module attributes {stable_mosaic.version = 11 : i64} {
  func.func @_mlp_head_kernel(%arg0: i32, %arg1: memref<16x4096xbf16, #tpu.memory_space<vmem>>, %arg2: memref<4096x512xbf16, #tpu.memory_space<vmem>>, %arg3: memref<1x512xf32, #tpu.memory_space<vmem>>, %arg4: memref<512x256xbf16, #tpu.memory_space<vmem>>, %arg5: memref<1x256xf32, #tpu.memory_space<vmem>>, %arg6: memref<256x128xbf16, #tpu.memory_space<vmem>>, %arg7: memref<1x128xf32, #tpu.memory_space<vmem>>, %arg8: memref<16x128xf32, #tpu.memory_space<vmem>>) attributes {dimension_semantics = [#tpu.dimension_semantics<parallel>], iteration_bounds = array<i64: 1>, scalar_prefetch = 0 : i64, scratch_operands = 0 : i64, tpu.core_type = #tpu.core_type<tc>, window_params = [{transform_indices = @transform_0, window_bounds = array<i64: 16, 4096>}, {pipeline_mode = #tpu.pipeline_mode<synchronous>, transform_indices = @transform_1, window_bounds = array<i64: 4096, 512>}, {pipeline_mode = #tpu.pipeline_mode<synchronous>, transform_indices = @transform_2, window_bounds = array<i64: 1, 512>}, {pipeline_mode = #tpu.pipeline_mode<synchronous>, transform_indices = @transform_3, window_bounds = array<i64: 512, 256>}, {pipeline_mode = #tpu.pipeline_mode<synchronous>, transform_indices = @transform_4, window_bounds = array<i64: 1, 256>}, {pipeline_mode = #tpu.pipeline_mode<synchronous>, transform_indices = @transform_5, window_bounds = array<i64: 256, 128>}, {pipeline_mode = #tpu.pipeline_mode<synchronous>, transform_indices = @transform_6, window_bounds = array<i64: 1, 128>}, {transform_indices = @transform_7, window_bounds = array<i64: 16, 128>}]} {
    %c0 = arith.constant 0 : index
    %c0_0 = arith.constant 0 : index
    %0 = vector.load %arg1[%c0, %c0_0] : memref<16x4096xbf16, #tpu.memory_space<vmem>>, vector<16x4096xbf16>
    %c0_1 = arith.constant 0 : index
    %c0_2 = arith.constant 0 : index
    %1 = vector.load %arg2[%c0_1, %c0_2] : memref<4096x512xbf16, #tpu.memory_space<vmem>>, vector<4096x512xbf16>
    %cst = arith.constant dense<0.000000e+00> : vector<16x512xf32>
    %2 = tpu.matmul %0, %1, %cst {dimension_numbers = #tpu.dot_dimension_numbers<[1], [0], [0], [1], [0, 0, 1, 1], [], []>} : vector<16x4096xbf16>, vector<4096x512xbf16>, vector<16x512xf32> -> vector<16x512xf32>
    %c0_3 = arith.constant 0 : index
    %c0_4 = arith.constant 0 : index
    %3 = vector.load %arg3[%c0_3, %c0_4] : memref<1x512xf32, #tpu.memory_space<vmem>>, vector<1x512xf32>
    %4 = vector.broadcast %3 : vector<1x512xf32> to vector<16x512xf32>
    %5 = arith.addf %2, %4 : vector<16x512xf32>
    %cst_5 = arith.constant 0.000000e+00 : f32
    %6 = vector.broadcast %cst_5 : f32 to vector<16x512xf32>
    %7 = arith.maximumf %5, %6 : vector<16x512xf32>
    %8 = arith.truncf %7 : vector<16x512xf32> to vector<16x512xbf16>
    %c0_6 = arith.constant 0 : index
    %c0_7 = arith.constant 0 : index
    %9 = vector.load %arg4[%c0_6, %c0_7] : memref<512x256xbf16, #tpu.memory_space<vmem>>, vector<512x256xbf16>
    %cst_8 = arith.constant dense<0.000000e+00> : vector<16x256xf32>
    %10 = tpu.matmul %8, %9, %cst_8 {dimension_numbers = #tpu.dot_dimension_numbers<[1], [0], [0], [1], [0, 0, 1, 1], [], []>} : vector<16x512xbf16>, vector<512x256xbf16>, vector<16x256xf32> -> vector<16x256xf32>
    %c0_9 = arith.constant 0 : index
    %c0_10 = arith.constant 0 : index
    %11 = vector.load %arg5[%c0_9, %c0_10] : memref<1x256xf32, #tpu.memory_space<vmem>>, vector<1x256xf32>
    %12 = vector.broadcast %11 : vector<1x256xf32> to vector<16x256xf32>
    %13 = arith.addf %10, %12 : vector<16x256xf32>
    %cst_11 = arith.constant 0.000000e+00 : f32
    %14 = vector.broadcast %cst_11 : f32 to vector<16x256xf32>
    %15 = arith.maximumf %13, %14 : vector<16x256xf32>
    %16 = arith.truncf %15 : vector<16x256xf32> to vector<16x256xbf16>
    %c0_12 = arith.constant 0 : index
    %c0_13 = arith.constant 0 : index
    %17 = vector.load %arg6[%c0_12, %c0_13] : memref<256x128xbf16, #tpu.memory_space<vmem>>, vector<256x128xbf16>
    %cst_14 = arith.constant dense<0.000000e+00> : vector<16x128xf32>
    %18 = tpu.matmul %16, %17, %cst_14 {dimension_numbers = #tpu.dot_dimension_numbers<[1], [0], [0], [1], [0, 0, 1, 1], [], []>} : vector<16x256xbf16>, vector<256x128xbf16>, vector<16x128xf32> -> vector<16x128xf32>
    %c0_15 = arith.constant 0 : index
    %c0_16 = arith.constant 0 : index
    %19 = vector.load %arg7[%c0_15, %c0_16] : memref<1x128xf32, #tpu.memory_space<vmem>>, vector<1x128xf32>
    %20 = vector.broadcast %19 : vector<1x128xf32> to vector<16x128xf32>
    %21 = arith.addf %18, %20 : vector<16x128xf32>
    %22 = tpu.iota {dimensions = array<i32: 1>} : vector<16x128xi32>
    %c0_i32 = arith.constant 0 : i32
    %23 = vector.broadcast %c0_i32 : i32 to vector<16x128xi32>
    %24 = arith.cmpi eq, %22, %23 : vector<16x128xi32>
    %25 = math.tanh %21 : vector<16x128xf32>
    %26 = arith.negf %21 : vector<16x128xf32>
    %27 = math.exp %26 : vector<16x128xf32>
    %cst_17 = arith.constant 1.000000e+00 : f32
    %28 = vector.broadcast %cst_17 : f32 to vector<16x128xf32>
    %29 = arith.addf %28, %27 : vector<16x128xf32>
    %30 = arith.divf %28, %29 : vector<16x128xf32>
    %31 = arith.select %24, %25, %30 : vector<16x128xi1>, vector<16x128xf32>
    %c0_18 = arith.constant 0 : index
    %c0_19 = arith.constant 0 : index
    %32 = vector.load %arg8[%c0_18, %c0_19] : memref<16x128xf32, #tpu.memory_space<vmem>>, vector<16x128xf32>
    tpu.vector_store %arg8[%c0_18, %c0_19], %31 {strides = array<i32>} : memref<16x128xf32, #tpu.memory_space<vmem>>, vector<16x128xf32>,
    return
  }
  func.func @transform_0(%arg0: i32) -> (i32, i32) {
    %c0_i32 = arith.constant 0 : i32
    %c0_i32_0 = arith.constant 0 : i32
    return %arg0, %c0_i32 : i32, i32
  }
  func.func @transform_1(%arg0: i32) -> (i32, i32) {
    %c0_i32 = arith.constant 0 : i32
    %c0_i32_0 = arith.constant 0 : i32
    %c0_i32_1 = arith.constant 0 : i32
    return %c0_i32, %c0_i32_0 : i32, i32
  }
  func.func @transform_2(%arg0: i32) -> (i32, i32) {
    %c0_i32 = arith.constant 0 : i32
    %c0_i32_0 = arith.constant 0 : i32
    %c0_i32_1 = arith.constant 0 : i32
    return %c0_i32, %c0_i32_0 : i32, i32
  }
  func.func @transform_3(%arg0: i32) -> (i32, i32) {
    %c0_i32 = arith.constant 0 : i32
    %c0_i32_0 = arith.constant 0 : i32
    %c0_i32_1 = arith.constant 0 : i32
    return %c0_i32, %c0_i32_0 : i32, i32
  }
  func.func @transform_4(%arg0: i32) -> (i32, i32) {
    %c0_i32 = arith.constant 0 : i32
    %c0_i32_0 = arith.constant 0 : i32
    %c0_i32_1 = arith.constant 0 : i32
    return %c0_i32, %c0_i32_0 : i32, i32
  }
  func.func @transform_5(%arg0: i32) -> (i32, i32) {
    %c0_i32 = arith.constant 0 : i32
    %c0_i32_0 = arith.constant 0 : i32
    %c0_i32_1 = arith.constant 0 : i32
    return %c0_i32, %c0_i32_0 : i32, i32
  }
  func.func @transform_6(%arg0: i32) -> (i32, i32) {
    %c0_i32 = arith.constant 0 : i32
    %c0_i32_0 = arith.constant 0 : i32
    %c0_i32_1 = arith.constant 0 : i32
    return %c0_i32, %c0_i32_0 : i32, i32
  }
  func.func @transform_7(%arg0: i32) -> (i32, i32) {
    %c0_i32 = arith.constant 0 : i32
    %c0_i32_0 = arith.constant 0 : i32
    return %arg0, %c0_i32 : i32, i32
  }
}

</mosaic_0001>

<bundles_post_ra>
// kernel: _lambda_.4
= control target key start
LH: loop header
LB: loop body
LE: loop exit
PB: predicated region body
PF: predicated region fallthrough
CT: control target
= control target key end

     0   :  { %s1440_s12 = smov 0   ;;  %s1758_s0 = inlined_call_operand.vmem [shape: bf16[1152,256], index: 0, kind: input, shape index: {}]   ;;  %s1759_s1 = inlined_call_operand.vmem [shape: bf16[256,32], index: 1, kind: input, shape index: {}]   ;;  %s1760_s2 = inlined_call_operand.vmem [shape: f32[1,32], index: 2, kind: input, shape index: {}]   ;;  %s1761_s3 = inlined_call_operand.vmem [shape: bf16[1152,32], index: 3, kind: output, shape index: {}]  }
   0x1 LB: > { %s1056_s13 = sadd.s32 4294967295, %s1418_s12   ;;  %p1060_p0 = scmp.ge.s32.totalorder %s1418_s12, 1  ;;  %s1418_s12 = sphi %s1440_s12, %s13_s12  }
   0x2   : > { %p139_p1 = scmp.lt.s32.totalorder %s1418_s12, 4 }
   0x4   : > { %p140_p2 = pnand %p1060_p0, %p139_p1 }
   0x5   : > { %s164_s26 = smul.u32 (!%p140_p2), 48, %s1056_s13 }
   0x6   : > { %143 = sbr.rel (%p140_p2) target bundleno = 368 (0x170), region = 32 }
   0x7   : > { %p165_p3 = scmp.lt.s32.totalorder (!%p140_p2), %s164_s26, 143 }
   0xb   : > { %v1378_v0 = vld [vmem:[%s1759_s1 + $0x38] sm:$0xff]  ;;  %v1377_v2 = vld [vmem:[%s1759_s1 + $0x30] sm:$0xff]  ;;  %v1376_v4 = vld [vmem:[%s1759_s1 + $0x28] sm:$0xff]  ;;  %s1763_s26 = smov (!%p165_p3, %s164_s26), 143  ;;  %vm951_vm0 = vcmask 257024  }
   0xc   : > { %v1386_v1 = vld [vmem:[%s1759_s1 + $0x78] sm:$0xff]  ;;  %597 = vmatpush.bf16.msra.mxu0 %v1378_v0  ;;  %1387 = vmatpush.bf16.msra.mxu2 %v1378_v0  ;;  %v1385_v3 = vld [vmem:[%s1759_s1 + $0x70] sm:$0xff]  ;;  %v1384_v5 = vld [vmem:[%s1759_s1 + $0x68] sm:$0xff]  ;;  %s1322_s13 = sshll.u32 %s1763_s26, 3  ;;  %s1063_s28 = sshll.u32 %s1763_s26, 2 }
   0xd   : > { %726 = vmatpush.bf16.msra.mxu1 %v1386_v1  ;;  %1395 = vmatpush.bf16.msra.mxu3 %v1386_v1  ;;  %v1375_v6 = vld [vmem:[%s1759_s1 + $0x20] sm:$0xff]  ;;  %v1374_v8 = vld [vmem:[%s1759_s1 + $0x18] sm:$0xff]  ;;  %v1373_v10 = vld [vmem:[%s1759_s1 + $0x10] sm:$0xff]  ;;  %s1493_s18 = scalar_lea.vmem %s1758_s0, %s1322_s13  ;;  %s1586_s4 = scalar_lea.vmem %s1761_s3, %s1063_s28 }
   0xe   : > { %v1383_v7 = vld [vmem:[%s1759_s1 + $0x60] sm:$0xff]  ;;  %v1382_v9 = vld [vmem:[%s1759_s1 + $0x58] sm:$0xff]  ;;  %v1381_v11 = vld [vmem:[%s1759_s1 + $0x50] sm:$0xff] }
   0xf   : > { %v1372_v12 = vld [vmem:[%s1759_s1 + $0x8] sm:$0xff]  ;;  %v1371_v14 = vld [vmem:[%s1759_s1] sm:$0xff]  ;;  %v1074_v28 = vld [vmem:[%s1493_s18 + $0x10] sm:$0xf] }
  0x10   : > { %598 = vmatpush.bf16.msra.mxu0 %v1377_v2  ;;  %1388 = vmatpush.bf16.msra.mxu2 %v1377_v2  ;;  %v1380_v13 = vld [vmem:[%s1759_s1 + $0x48] sm:$0xff]  ;;  %v1379_v15 = vld [vmem:[%s1759_s1 + $0x40] sm:$0xff]  ;;  %v1326_v29 = vld [vmem:[%s1493_s18 + $0x14] sm:$0xf0] }
  0x11   : > { %727 = vmatpush.bf16.msra.mxu1 %v1385_v3  ;;  %1396 = vmatpush.bf16.msra.mxu3 %v1385_v3  ;;  %v1066_v16 = vld [vmem:[%s1493_s18] sm:$0xf]  ;;  %v1324_v17 = vld [vmem:[%s1493_s18 + $0x4] sm:$0xf0]  ;;  %v1323_v20 = vld [vmem:[%s1493_s18 + $0x4] sm:$0xf]  ;;  %v1075_v36 = vor.u32 %v1326_v29, %v1074_v28 }
  0x12   : > { %v1162_v18 = vld [vmem:[%s1493_s18 + $0xc0] sm:$0xf]  ;;  %v1348_v19 = vld [vmem:[%s1493_s18 + $0xc4] sm:$0xf0]  ;;  %v1068_v21 = vld [vmem:[%s1493_s18 + $0x8] sm:$0xf0]  ;;  %v1067_v24 = vor.u32 %v1324_v17, %v1066_v16 }
  0x13   : > { %v1347_v22 = vld [vmem:[%s1493_s18 + $0xc4] sm:$0xf]  ;;  %v1164_v23 = vld [vmem:[%s1493_s18 + $0xc8] sm:$0xf0]  ;;  %v1163_v25 = vor.u32 %v1348_v19, %v1162_v18  ;;  %v1071_v26 = vor.u32 %v1323_v20, %v1068_v21  ;;  %v1170_v30 = vld [vmem:[%s1493_s18 + $0xd0] sm:$0xf] }
  0x14   : > { %599 = vmatpush.bf16.msra.mxu0 %v1376_v4  ;;  %1389 = vmatpush.bf16.msra.mxu2 %v1376_v4  ;;  %v1167_v27 = vor.u32 %v1347_v22, %v1164_v23  ;;  %v1350_v31 = vld [vmem:[%s1493_s18 + $0xd4] sm:$0xf0]  ;;  %v1325_v32 = vld [vmem:[%s1493_s18 + $0x14] sm:$0xf]  ;;  %v1076_v33 = vld [vmem:[%s1493_s18 + $0x18] sm:$0xf0] }
  0x15   : > { %728 = vmatpush.bf16.msra.mxu1 %v1384_v5  ;;  %1397 = vmatpush.bf16.msra.mxu3 %v1384_v5  ;;  %v1349_v34 = vld [vmem:[%s1493_s18 + $0xd4] sm:$0xf]  ;;  %v1172_v35 = vld [vmem:[%s1493_s18 + $0xd8] sm:$0xf0]  ;;  %v1171_v37 = vor.u32 %v1350_v31, %v1170_v30  ;;  %v1079_v38 = vor.u32 %v1325_v32, %v1076_v33  ;;  %v1082_v40 = vld [vmem:[%s1493_s18 + $0x20] sm:$0xf] }
  0x16   : > { %v1175_v39 = vor.u32 %v1349_v34, %v1172_v35  ;;  %v1328_v41 = vld [vmem:[%s1493_s18 + $0x24] sm:$0xf0]  ;;  %v1178_v42 = vld [vmem:[%s1493_s18 + $0xe0] sm:$0xf]  ;;  %v1327_v44 = vld [vmem:[%s1493_s18 + $0x24] sm:$0xf] }
  0x17   : > { %v1352_v43 = vld [vmem:[%s1493_s18 + $0xe4] sm:$0xf0]  ;;  %v1084_v45 = vld [vmem:[%s1493_s18 + $0x28] sm:$0xf0]  ;;  %v1351_v46 = vld [vmem:[%s1493_s18 + $0xe4] sm:$0xf]  ;;  %v1083_v48 = vor.u32 %v1328_v41, %v1082_v40 }
  0x18   : > { %600 = vmatpush.bf16.msra.mxu0 %v1375_v6  ;;  %1390 = vmatpush.bf16.msra.mxu2 %v1375_v6  ;;  %v1180_v47 = vld [vmem:[%s1493_s18 + $0xe8] sm:$0xf0]  ;;  %v1179_v49 = vor.u32 %v1352_v43, %v1178_v42  ;;  %v1087_v50 = vor.u32 %v1327_v44, %v1084_v45  ;;  %v1090_v52 = vld [vmem:[%s1493_s18 + $0x30] sm:$0xf]  ;;  %v1330_v53 = vld [vmem:[%s1493_s18 + $0x34] sm:$0xf0] }
  0x19   : > { %729 = vmatpush.bf16.msra.mxu1 %v1383_v7  ;;  %1398 = vmatpush.bf16.msra.mxu3 %v1383_v7  ;;  %v1183_v51 = vor.u32 %v1351_v46, %v1180_v47  ;;  %v1186_v54 = vld [vmem:[%s1493_s18 + $0xf0] sm:$0xf]  ;;  %v1354_v55 = vld [vmem:[%s1493_s18 + $0xf4] sm:$0xf0]  ;;  %v1329_v56 = vld [vmem:[%s1493_s18 + $0x34] sm:$0xf]  ;;  %v1091_v60 = vor.u32 %v1330_v53, %v1090_v52 }
  0x1a   : > { %v1092_v57 = vld [vmem:[%s1493_s18 + $0x38] sm:$0xf0]  ;;  %v1353_v58 = vld [vmem:[%s1493_s18 + $0xf4] sm:$0xf]  ;;  %v1187_v61 = vor.u32 %v1354_v55, %v1186_v54  ;;  %v1098_v0 = vld [vmem:[%s1493_s18 + $0x40] sm:$0xf] }
  0x1b   : > { %v1188_v59 = vld [vmem:[%s1493_s18 + $0xf8] sm:$0xf0]  ;;  %v1095_v62 = vor.u32 %v1329_v56, %v1092_v57  ;;  %v1332_v1 = vld [vmem:[%s1493_s18 + $0x44] sm:$0xf0]  ;;  %v1194_v2 = vld [vmem:[%s1493_s18 + $0x100] sm:$0xf] }
  0x1c   : > { %601 = vmatpush.bf16.msra.mxu0 %v1374_v8  ;;  %1391 = vmatpush.bf16.msra.mxu2 %v1374_v8  ;;  %v1191_v63 = vor.u32 %v1353_v58, %v1188_v59  ;;  %v1356_v3 = vld [vmem:[%s1493_s18 + $0x104] sm:$0xf0]  ;;  %v1331_v4 = vld [vmem:[%s1493_s18 + $0x44] sm:$0xf]  ;;  %v1100_v5 = vld [vmem:[%s1493_s18 + $0x48] sm:$0xf0]  ;;  %v1099_v8 = vor.u32 %v1332_v1, %v1098_v0 }
  0x1d   : > { %730 = vmatpush.bf16.msra.mxu1 %v1382_v9  ;;  %1399 = vmatpush.bf16.msra.mxu3 %v1382_v9  ;;  %v1355_v6 = vld [vmem:[%s1493_s18 + $0x104] sm:$0xf]  ;;  %v1196_v7 = vld [vmem:[%s1493_s18 + $0x108] sm:$0xf0]  ;;  %v1195_v9 = vor.u32 %v1356_v3, %v1194_v2  ;;  %v1333_v16 = vld [vmem:[%s1493_s18 + $0x54] sm:$0xf] }
  0x1e   : > { %v1108_v17 = vld [vmem:[%s1493_s18 + $0x58] sm:$0xf0]  ;;  %v1357_v18 = vld [vmem:[%s1493_s18 + $0x114] sm:$0xf]  ;;  %v1335_v28 = vld [vmem:[%s1493_s18 + $0x64] sm:$0xf] }
  0x1f   : > { %v1204_v19 = vld [vmem:[%s1493_s18 + $0x118] sm:$0xf0]  ;;  %v1111_v22 = vor.u32 %v1333_v16, %v1108_v17  ;;  %v1116_v29 = vld [vmem:[%s1493_s18 + $0x68] sm:$0xf0]  ;;  %v1359_v30 = vld [vmem:[%s1493_s18 + $0x124] sm:$0xf] }
  0x20   : > { %602 = vmatpush.bf16.msra.mxu0 %v1373_v10  ;;  %1392 = vmatpush.bf16.msra.mxu2 %v1373_v10  ;;  %v1103_v10 = vor.u32 %v1331_v4, %v1100_v5  ;;  %v1207_v23 = vor.u32 %v1357_v18, %v1204_v19  ;;  %v1212_v31 = vld [vmem:[%s1493_s18 + $0x128] sm:$0xf0]  ;;  %v1119_v34 = vor.u32 %v1335_v28, %v1116_v29  ;;  %v1337_v40 = vld [vmem:[%s1493_s18 + $0x74] sm:$0xf]  ;;  %v1124_v41 = vld [vmem:[%s1493_s18 + $0x78] sm:$0xf0] }
  0x21   : > { %731 = vmatpush.bf16.msra.mxu1 %v1381_v11  ;;  %1400 = vmatpush.bf16.msra.mxu3 %v1381_v11  ;;  %v1199_v11 = vor.u32 %v1355_v6, %v1196_v7  ;;  %v1215_v35 = vor.u32 %v1359_v30, %v1212_v31  ;;  %v1361_v42 = vld [vmem:[%s1493_s18 + $0x134] sm:$0xf]  ;;  %v1220_v43 = vld [vmem:[%s1493_s18 + $0x138] sm:$0xf0]  ;;  %v1127_v46 = vor.u32 %v1337_v40, %v1124_v41  ;;  %v1364_v52 = vld [vmem:[%s1493_s18 + $0x144] sm:$0xf0] }
  0x22   : > { %v1223_v47 = vor.u32 %v1361_v42, %v1220_v43  ;;  %v1339_v53 = vld [vmem:[%s1493_s18 + $0x84] sm:$0xf]  ;;  %v1132_v54 = vld [vmem:[%s1493_s18 + $0x88] sm:$0xf0]  ;;  %v1341_v16 = vld [vmem:[%s1493_s18 + $0x94] sm:$0xf] }
  0x23   : > { %v1363_v55 = vld [vmem:[%s1493_s18 + $0x144] sm:$0xf]  ;;  %v1228_v56 = vld [vmem:[%s1493_s18 + $0x148] sm:$0xf0]  ;;  %v1140_v17 = vld [vmem:[%s1493_s18 + $0x98] sm:$0xf0] }
  0x24   : > { %603 = vmatpush.bf16.msra.mxu0 %v1372_v12  ;;  %1393 = vmatpush.bf16.msra.mxu2 %v1372_v12  ;;  %v1106_v12 = vld [vmem:[%s1493_s18 + $0x50] sm:$0xf]  ;;  %v1143_v29 = vor.u32 %v1341_v16, %v1140_v17 }
  0x25   : > { %732 = vmatpush.bf16.msra.mxu1 %v1380_v13  ;;  %1401 = vmatpush.bf16.msra.mxu3 %v1380_v13  ;;  %v1334_v13 = vld [vmem:[%s1493_s18 + $0x54] sm:$0xf0] }
  0x26   : > { %v1107_v20 = vor.u32 %v1334_v13, %v1106_v12  ;;  %v1342_v13 = vld [vmem:[%s1493_s18 + $0x94] sm:$0xf0] }
  0x28   : > { %604 = vmatpush.bf16.msra.mxu0 %v1371_v14  ;;  %1394 = vmatpush.bf16.msra.mxu2 %v1371_v14  ;;  %v1202_v14 = vld [vmem:[%s1493_s18 + $0x110] sm:$0xf] }
  0x29   : > { %733 = vmatpush.bf16.msra.mxu1 %v1379_v15  ;;  %1402 = vmatpush.bf16.msra.mxu3 %v1379_v15  ;;  %v1358_v15 = vld [vmem:[%s1493_s18 + $0x114] sm:$0xf0] }
  0x2a   : > { %v1203_v21 = vor.u32 %v1358_v15, %v1202_v14  ;;  %v1234_v14 = vld [vmem:[%s1493_s18 + $0x150] sm:$0xf]  ;;  %v1366_v15 = vld [vmem:[%s1493_s18 + $0x154] sm:$0xf0] }
  0x2b   : > { %605 = vmatmul.bf16.vlgmr.msra.gmra.mxu0 %v1067_v24  ;;  %665 = vmatmul.bf16.vlgmr.msra.gmra.mxu2 %v1163_v25  ;;  %v1114_v24 = vld [vmem:[%s1493_s18 + $0x60] sm:$0xf]  ;;  %v1336_v25 = vld [vmem:[%s1493_s18 + $0x64] sm:$0xf0] }
  0x2c   : > { %734 = vmatmul.bf16.vlgmr.msra.gmra.mxu1 %v1071_v26  ;;  %794 = vmatmul.bf16.vlgmr.msra.gmra.mxu3 %v1167_v27  ;;  %v1210_v26 = vld [vmem:[%s1493_s18 + $0x120] sm:$0xf]  ;;  %v1360_v27 = vld [vmem:[%s1493_s18 + $0x124] sm:$0xf0]  ;;  %v1115_v32 = vor.u32 %v1336_v25, %v1114_v24 }
  0x2d   : > { %v1211_v33 = vor.u32 %v1360_v27, %v1210_v26  ;;  %v1235_v27 = vor.u32 %v1366_v15, %v1234_v14 }
  0x3b   : > { %610 = vmatmul.bf16.gmra.mxu0 %v1075_v36  ;;  %670 = vmatmul.bf16.gmra.mxu2 %v1171_v37  ;;  %v1122_v36 = vld [vmem:[%s1493_s18 + $0x70] sm:$0xf]  ;;  %v1338_v37 = vld [vmem:[%s1493_s18 + $0x74] sm:$0xf0] }
  0x3c   : > { %739 = vmatmul.bf16.gmra.mxu1 %v1079_v38  ;;  %799 = vmatmul.bf16.gmra.mxu3 %v1175_v39  ;;  %v1218_v38 = vld [vmem:[%s1493_s18 + $0x130] sm:$0xf]  ;;  %v1362_v39 = vld [vmem:[%s1493_s18 + $0x134] sm:$0xf0]  ;;  %v1123_v44 = vor.u32 %v1338_v37, %v1122_v36 }
  0x3d   : > { %v1219_v45 = vor.u32 %v1362_v39, %v1218_v38 }
  0x4b   : > { %615 = vmatmul.bf16.gmra.mxu0 %v1083_v48  ;;  %675 = vmatmul.bf16.gmra.mxu2 %v1179_v49  ;;  %v1571_v48 = vld [vmem:[%s1760_s2] ss:$0 sm:$0xff] }
  0x4c   : > { %744 = vmatmul.bf16.gmra.mxu1 %v1087_v50  ;;  %804 = vmatmul.bf16.gmra.mxu3 %v1183_v51  ;;  %v1130_v49 = vld [vmem:[%s1493_s18 + $0x80] sm:$0xf]  ;;  %v1340_v50 = vld [vmem:[%s1493_s18 + $0x84] sm:$0xf0] }
  0x4d   : > { %v1226_v51 = vld [vmem:[%s1493_s18 + $0x140] sm:$0xf]  ;;  %v1131_v57 = vor.u32 %v1340_v50, %v1130_v49  ;;  %v1344_v50 = vld [vmem:[%s1493_s18 + $0xa4] sm:$0xf0] }
  0x4e   : > { %v1227_v58 = vor.u32 %v1364_v52, %v1226_v51  ;;  %v1242_v51 = vld [vmem:[%s1493_s18 + $0x160] sm:$0xf]  ;;  %v1368_v52 = vld [vmem:[%s1493_s18 + $0x164] sm:$0xf0] }
  0x5b   : > { %620 = vmatmul.bf16.gmra.mxu0 %v1091_v60  ;;  %680 = vmatmul.bf16.gmra.mxu2 %v1187_v61  ;;  %v1135_v60 = vor.u32 %v1339_v53, %v1132_v54  ;;  %v1231_v61 = vor.u32 %v1363_v55, %v1228_v56  ;;  %v1343_v53 = vld [vmem:[%s1493_s18 + $0xa4] sm:$0xf]  ;;  %v1148_v54 = vld [vmem:[%s1493_s18 + $0xa8] sm:$0xf0] }
  0x5c   : > { %749 = vmatmul.bf16.gmra.mxu1 %v1095_v62  ;;  %809 = vmatmul.bf16.gmra.mxu3 %v1191_v63 }
  0x6b   : > { %625 = vmatmul.bf16.gmra.mxu0 %v1099_v8  ;;  %685 = vmatmul.bf16.gmra.mxu2 %v1195_v9 }
  0x6c   : > { %754 = vmatmul.bf16.gmra.mxu1 %v1103_v10  ;;  %814 = vmatmul.bf16.gmra.mxu3 %v1199_v11  ;;  %v1138_v10 = vld [vmem:[%s1493_s18 + $0x90] sm:$0xf] }
  0x6d   : > { %v1139_v26 = vor.u32 %v1342_v13, %v1138_v10 }
  0x7b   : > { %630 = vmatmul.bf16.gmra.mxu0 %v1107_v20  ;;  %690 = vmatmul.bf16.gmra.mxu2 %v1203_v21  ;;  %v1365_v20 = vld [vmem:[%s1493_s18 + $0x154] sm:$0xf]  ;;  %v1236_v21 = vld [vmem:[%s1493_s18 + $0x158] sm:$0xf0] }
  0x7c   : > { %759 = vmatmul.bf16.gmra.mxu1 %v1111_v22  ;;  %819 = vmatmul.bf16.gmra.mxu3 %v1207_v23  ;;  %v1239_v30 = vor.u32 %v1365_v20, %v1236_v21 }
  0x8b   : > { %635 = vmatmul.bf16.gmra.mxu0 %v1115_v32  ;;  %695 = vmatmul.bf16.gmra.mxu2 %v1211_v33 }
  0x8c   : > { %764 = vmatmul.bf16.gmra.mxu1 %v1119_v34  ;;  %824 = vmatmul.bf16.gmra.mxu3 %v1215_v35 }
  0x9b   : > { %640 = vmatmul.bf16.gmra.mxu0 %v1123_v44  ;;  %700 = vmatmul.bf16.gmra.mxu2 %v1219_v45 }
  0x9c   : > { %769 = vmatmul.bf16.gmra.mxu1 %v1127_v46  ;;  %829 = vmatmul.bf16.gmra.mxu3 %v1223_v47  ;;  %v1146_v46 = vld [vmem:[%s1493_s18 + $0xa0] sm:$0xf] }
  0xa8   : > { %v606_v59 = vpop.f32.mrf.mxu0 }
  0xa9   : > { %v607_v62 = vadd.f32 %v1571_v48, %v606_v59  ;;  %v735_v63 = vpop.f32.mrf.mxu1 }
  0xab   : > { %v736_v0 = vadd.f32 %v735_v63, %v607_v62  ;;  %645 = vmatmul.bf16.gmra.mxu0 %v1131_v57  ;;  %705 = vmatmul.bf16.gmra.mxu2 %v1227_v58  ;;  %v1367_v57 = vld [vmem:[%s1493_s18 + $0x164] sm:$0xf]  ;;  %v1244_v58 = vld [vmem:[%s1493_s18 + $0x168] sm:$0xf0]  ;;  %v1147_v63 = vor.u32 %v1344_v50, %v1146_v46 }
  0xac   : > { %774 = vmatmul.bf16.gmra.mxu1 %v1135_v60  ;;  %834 = vmatmul.bf16.gmra.mxu3 %v1231_v61 }
  0xad   : > { %v855_v1 = vmax.f32 %v736_v0, 0.0  ;;  %v1243_v0 = vor.u32 %v1368_v52, %v1242_v51 }
  0xae   : > { %v666_v2 = vpop.f32.mrf.mxu2 }
  0xaf   : > { %v903_v3 = vpack.c.bf16 %v855_v1, %v855_v1  ;;  %v667_v4 = vadd.f32 %v1571_v48, %v666_v2  ;;  %v795_v5 = vpop.f32.mrf.mxu3  ;;  %v1151_v2 = vor.u32 %v1343_v53, %v1148_v54 }
  0xb0   : > { %v608_v6 = vpop.f32.mrf.mxu0 }
  0xb1   : > { %952 = vst.msk [vmem:[%s1586_s4] sm:$0xf] %vm951_vm0, %v903_v3  ;;  %v796_v7 = vadd.f32 %v795_v5, %v667_v4  ;;  %v609_v8 = vadd.f32 %v1571_v48, %v608_v6  ;;  %v737_v9 = vpop.f32.mrf.mxu1  ;;  %v1247_v3 = vor.u32 %v1367_v57, %v1244_v58 }
  0xb3   : > { %v879_v11 = vmax.f32 %v796_v7, 0.0  ;;  %v738_v12 = vadd.f32 %v737_v9, %v609_v8 }
  0xb5   : > { %v927_v18 = vpack.c.bf16 %v879_v11, %v879_v11  ;;  %v856_v19 = vmax.f32 %v738_v12, 0.0 }
  0xb6   : > { %v668_v22 = vpop.f32.mrf.mxu2 }
  0xb7   : > { %976 = vst.msk [vmem:[%s1586_s4 + $0x60] sm:$0xf] %vm951_vm0, %v927_v18  ;;  %v904_v23 = vpack.c.bf16 %v856_v19, %v856_v19  ;;  %v669_v24 = vadd.f32 %v1571_v48, %v668_v22  ;;  %v797_v25 = vpop.f32.mrf.mxu3  ;;  %v1154_v19 = vld [vmem:[%s1493_s18 + $0xb0] sm:$0xf]  ;;  %v1346_v22 = vld [vmem:[%s1493_s18 + $0xb4] sm:$0xf0] }
  0xb8   : > { %v611_v28 = vpop.f32.mrf.mxu0 }
  0xb9   : > { %953 = vst.msk [vmem:[%s1586_s4 + $0x4] sm:$0xf] %vm951_vm0, %v904_v23  ;;  %v798_v31 = vadd.f32 %v797_v25, %v669_v24  ;;  %v612_v32 = vadd.f32 %v1571_v48, %v611_v28  ;;  %v740_v33 = vpop.f32.mrf.mxu1  ;;  %v1250_v23 = vld [vmem:[%s1493_s18 + $0x170] sm:$0xf]  ;;  %v1370_v24 = vld [vmem:[%s1493_s18 + $0x174] sm:$0xf0] }
  0xba   : > { %v1345_v25 = vld [vmem:[%s1493_s18 + $0xb4] sm:$0xf] }
  0xbb   : > { %v880_v34 = vmax.f32 %v798_v31, 0.0  ;;  %v741_v35 = vadd.f32 %v740_v33, %v612_v32  ;;  %650 = vmatmul.bf16.gmra.mxu0 %v1139_v26  ;;  %710 = vmatmul.bf16.gmra.mxu2 %v1235_v27  ;;  %v1156_v26 = vld [vmem:[%s1493_s18 + $0xb8] sm:$0xf0] }
  0xbc   : > { %779 = vmatmul.bf16.gmra.mxu1 %v1143_v29  ;;  %839 = vmatmul.bf16.gmra.mxu3 %v1239_v30  ;;  %v1369_v29 = vld [vmem:[%s1493_s18 + $0x174] sm:$0xf]  ;;  %v1252_v30 = vld [vmem:[%s1493_s18 + $0x178] sm:$0xf0] }
  0xbd   : > { %v928_v36 = vpack.c.bf16 %v880_v34, %v880_v34  ;;  %v857_v37 = vmax.f32 %v741_v35, 0.0  ;;  %v1155_v35 = vor.u32 %v1346_v22, %v1154_v19 }
  0xbe   : > { %v671_v38 = vpop.f32.mrf.mxu2 }
  0xbf   : > { %977 = vst.msk [vmem:[%s1586_s4 + $0x64] sm:$0xf] %vm951_vm0, %v928_v36  ;;  %v905_v39 = vpack.c.bf16 %v857_v37, %v857_v37  ;;  %v672_v40 = vadd.f32 %v1571_v48, %v671_v38  ;;  %v800_v41 = vpop.f32.mrf.mxu3  ;;  %v1251_v36 = vor.u32 %v1370_v24, %v1250_v23  ;;  %v1159_v38 = vor.u32 %v1345_v25, %v1156_v26 }
  0xc0   : > { %v613_v42 = vpop.f32.mrf.mxu0 }
  0xc1   : > { %954 = vst.msk [vmem:[%s1586_s4 + $0x8] sm:$0xf] %vm951_vm0, %v905_v39  ;;  %v801_v43 = vadd.f32 %v800_v41, %v672_v40  ;;  %v614_v44 = vadd.f32 %v1571_v48, %v613_v42  ;;  %v742_v45 = vpop.f32.mrf.mxu1  ;;  %v1255_v39 = vor.u32 %v1369_v29, %v1252_v30 }
  0xc3   : > { %v881_v47 = vmax.f32 %v801_v43, 0.0  ;;  %v743_v49 = vadd.f32 %v742_v45, %v614_v44 }
  0xc5   : > { %v929_v55 = vpack.c.bf16 %v881_v47, %v881_v47  ;;  %v858_v56 = vmax.f32 %v743_v49, 0.0 }
  0xc6   : > { %v673_v59 = vpop.f32.mrf.mxu2 }
  0xc7   : > { %978 = vst.msk [vmem:[%s1586_s4 + $0x68] sm:$0xf] %vm951_vm0, %v929_v55  ;;  %v906_v60 = vpack.c.bf16 %v858_v56, %v858_v56  ;;  %v674_v61 = vadd.f32 %v1571_v48, %v673_v59  ;;  %v802_v62 = vpop.f32.mrf.mxu3 }
  0xc8   : > { %v616_v1 = vpop.f32.mrf.mxu0 }
  0xc9   : > { %955 = vst.msk [vmem:[%s1586_s4 + $0xc] sm:$0xf] %vm951_vm0, %v906_v60  ;;  %v803_v4 = vadd.f32 %v802_v62, %v674_v61  ;;  %v617_v5 = vadd.f32 %v1571_v48, %v616_v1  ;;  %v745_v6 = vpop.f32.mrf.mxu1 }
  0xcb   : > { %v882_v7 = vmax.f32 %v803_v4, 0.0  ;;  %v746_v8 = vadd.f32 %v745_v6, %v617_v5  ;;  %655 = vmatmul.bf16.gmra.mxu0 %v1147_v63  ;;  %715 = vmatmul.bf16.gmra.mxu2 %v1243_v0 }
  0xcc   : > { %784 = vmatmul.bf16.gmra.mxu1 %v1151_v2  ;;  %844 = vmatmul.bf16.gmra.mxu3 %v1247_v3 }
  0xcd   : > { %v930_v9 = vpack.c.bf16 %v882_v7, %v882_v7  ;;  %v859_v10 = vmax.f32 %v746_v8, 0.0 }
  0xce   : > { %v676_v11 = vpop.f32.mrf.mxu2 }
  0xcf   : > { %979 = vst.msk [vmem:[%s1586_s4 + $0x6c] sm:$0xf] %vm951_vm0, %v930_v9  ;;  %v907_v12 = vpack.c.bf16 %v859_v10, %v859_v10  ;;  %v677_v13 = vadd.f32 %v1571_v48, %v676_v11  ;;  %v805_v14 = vpop.f32.mrf.mxu3 }
  0xd0   : > { %v618_v15 = vpop.f32.mrf.mxu0 }
  0xd1   : > { %956 = vst.msk [vmem:[%s1586_s4 + $0x10] sm:$0xf] %vm951_vm0, %v907_v12  ;;  %v806_v16 = vadd.f32 %v805_v14, %v677_v13  ;;  %v619_v17 = vadd.f32 %v1571_v48, %v618_v15  ;;  %v747_v18 = vpop.f32.mrf.mxu1 }
  0xd3   : > { %v883_v20 = vmax.f32 %v806_v16, 0.0  ;;  %v748_v21 = vadd.f32 %v747_v18, %v619_v17 }
  0xd5   : > { %v931_v27 = vpack.c.bf16 %v883_v20, %v883_v20  ;;  %v860_v28 = vmax.f32 %v748_v21, 0.0 }
  0xd6   : > { %v678_v31 = vpop.f32.mrf.mxu2 }
  0xd7   : > { %980 = vst.msk [vmem:[%s1586_s4 + $0x70] sm:$0xf] %vm951_vm0, %v931_v27  ;;  %v908_v32 = vpack.c.bf16 %v860_v28, %v860_v28  ;;  %v679_v33 = vadd.f32 %v1571_v48, %v678_v31  ;;  %v807_v34 = vpop.f32.mrf.mxu3 }
  0xd8   : > { %v621_v37 = vpop.f32.mrf.mxu0 }
  0xd9   : > { %957 = vst.msk [vmem:[%s1586_s4 + $0x14] sm:$0xf] %vm951_vm0, %v908_v32  ;;  %v808_v40 = vadd.f32 %v807_v34, %v679_v33  ;;  %v622_v41 = vadd.f32 %v1571_v48, %v621_v37  ;;  %v750_v42 = vpop.f32.mrf.mxu1 }
  0xdb   : > { %v884_v43 = vmax.f32 %v808_v40, 0.0  ;;  %v751_v44 = vadd.f32 %v750_v42, %v622_v41  ;;  %660 = vmatmul.bf16.gmra.mxu0 %v1155_v35  ;;  %720 = vmatmul.bf16.gmra.mxu2 %v1251_v36 }
  0xdc   : > { %789 = vmatmul.bf16.gmra.mxu1 %v1159_v38  ;;  %849 = vmatmul.bf16.gmra.mxu3 %v1255_v39 }
  0xdd   : > { %v932_v45 = vpack.c.bf16 %v884_v43, %v884_v43  ;;  %v861_v46 = vmax.f32 %v751_v44, 0.0 }
  0xde   : > { %v681_v47 = vpop.f32.mrf.mxu2 }
  0xdf   : > { %981 = vst.msk [vmem:[%s1586_s4 + $0x74] sm:$0xf] %vm951_vm0, %v932_v45  ;;  %v909_v49 = vpack.c.bf16 %v861_v46, %v861_v46  ;;  %v682_v50 = vadd.f32 %v1571_v48, %v681_v47  ;;  %v810_v51 = vpop.f32.mrf.mxu3 }
  0xe0   : > { %v623_v52 = vpop.f32.mrf.mxu0 }
  0xe1   : > { %958 = vst.msk [vmem:[%s1586_s4 + $0x18] sm:$0xf] %vm951_vm0, %v909_v49  ;;  %v811_v53 = vadd.f32 %v810_v51, %v682_v50  ;;  %v624_v54 = vadd.f32 %v1571_v48, %v623_v52  ;;  %v752_v55 = vpop.f32.mrf.mxu1 }
  0xe3   : > { %v885_v56 = vmax.f32 %v811_v53, 0.0  ;;  %v753_v57 = vadd.f32 %v752_v55, %v624_v54 }
  0xe5   : > { %v933_v58 = vpack.c.bf16 %v885_v56, %v885_v56  ;;  %v862_v59 = vmax.f32 %v753_v57, 0.0 }
  0xe6   : > { %v683_v60 = vpop.f32.mrf.mxu2 }
  0xe7   : > { %982 = vst.msk [vmem:[%s1586_s4 + $0x78] sm:$0xf] %vm951_vm0, %v933_v58  ;;  %v910_v61 = vpack.c.bf16 %v862_v59, %v862_v59  ;;  %v684_v62 = vadd.f32 %v1571_v48, %v683_v60  ;;  %v812_v63 = vpop.f32.mrf.mxu3 }
  0xe8   : > { %v626_v0 = vpop.f32.mrf.mxu0 }
  0xe9   : > { %959 = vst.msk [vmem:[%s1586_s4 + $0x1c] sm:$0xf] %vm951_vm0, %v910_v61  ;;  %v813_v1 = vadd.f32 %v812_v63, %v684_v62  ;;  %v627_v2 = vadd.f32 %v1571_v48, %v626_v0  ;;  %v755_v3 = vpop.f32.mrf.mxu1 }
  0xeb   : > { %v886_v4 = vmax.f32 %v813_v1, 0.0  ;;  %v756_v5 = vadd.f32 %v755_v3, %v627_v2 }
  0xed   : > { %v934_v6 = vpack.c.bf16 %v886_v4, %v886_v4  ;;  %v863_v7 = vmax.f32 %v756_v5, 0.0 }
  0xee   : > { %v686_v8 = vpop.f32.mrf.mxu2 }
  0xef   : > { %983 = vst.msk [vmem:[%s1586_s4 + $0x7c] sm:$0xf] %vm951_vm0, %v934_v6  ;;  %v911_v9 = vpack.c.bf16 %v863_v7, %v863_v7  ;;  %v687_v10 = vadd.f32 %v1571_v48, %v686_v8  ;;  %v815_v11 = vpop.f32.mrf.mxu3 }
  0xf0   : > { %v628_v12 = vpop.f32.mrf.mxu0 }
  0xf1   : > { %960 = vst.msk [vmem:[%s1586_s4 + $0x20] sm:$0xf] %vm951_vm0, %v911_v9  ;;  %v816_v13 = vadd.f32 %v815_v11, %v687_v10  ;;  %v629_v14 = vadd.f32 %v1571_v48, %v628_v12  ;;  %v757_v15 = vpop.f32.mrf.mxu1 }
  0xf3   : > { %v887_v16 = vmax.f32 %v816_v13, 0.0  ;;  %v758_v17 = vadd.f32 %v757_v15, %v629_v14 }
  0xf5   : > { %v935_v18 = vpack.c.bf16 %v887_v16, %v887_v16  ;;  %v864_v19 = vmax.f32 %v758_v17, 0.0 }
  0xf6   : > { %v688_v20 = vpop.f32.mrf.mxu2 }
  0xf7   : > { %984 = vst.msk [vmem:[%s1586_s4 + $0x80] sm:$0xf] %vm951_vm0, %v935_v18  ;;  %v912_v21 = vpack.c.bf16 %v864_v19, %v864_v19  ;;  %v689_v22 = vadd.f32 %v1571_v48, %v688_v20  ;;  %v817_v23 = vpop.f32.mrf.mxu3 }
  0xf8   : > { %v631_v24 = vpop.f32.mrf.mxu0 }
  0xf9   : > { %961 = vst.msk [vmem:[%s1586_s4 + $0x24] sm:$0xf] %vm951_vm0, %v912_v21  ;;  %v818_v25 = vadd.f32 %v817_v23, %v689_v22  ;;  %v632_v26 = vadd.f32 %v1571_v48, %v631_v24  ;;  %v760_v27 = vpop.f32.mrf.mxu1 }
  0xfb   : > { %v888_v28 = vmax.f32 %v818_v25, 0.0  ;;  %v761_v29 = vadd.f32 %v760_v27, %v632_v26 }
  0xfd   : > { %v936_v30 = vpack.c.bf16 %v888_v28, %v888_v28  ;;  %v865_v31 = vmax.f32 %v761_v29, 0.0 }
  0xfe   : > { %v691_v32 = vpop.f32.mrf.mxu2 }
  0xff   : > { %985 = vst.msk [vmem:[%s1586_s4 + $0x84] sm:$0xf] %vm951_vm0, %v936_v30  ;;  %v913_v33 = vpack.c.bf16 %v865_v31, %v865_v31  ;;  %v692_v34 = vadd.f32 %v1571_v48, %v691_v32  ;;  %v820_v35 = vpop.f32.mrf.mxu3 }
 0x100   : > { %v633_v36 = vpop.f32.mrf.mxu0 }
 0x101   : > { %962 = vst.msk [vmem:[%s1586_s4 + $0x28] sm:$0xf] %vm951_vm0, %v913_v33  ;;  %v821_v37 = vadd.f32 %v820_v35, %v692_v34  ;;  %v634_v38 = vadd.f32 %v1571_v48, %v633_v36  ;;  %v762_v39 = vpop.f32.mrf.mxu1 }
 0x103   : > { %v889_v40 = vmax.f32 %v821_v37, 0.0  ;;  %v763_v41 = vadd.f32 %v762_v39, %v634_v38 }
 0x105   : > { %v937_v42 = vpack.c.bf16 %v889_v40, %v889_v40  ;;  %v866_v43 = vmax.f32 %v763_v41, 0.0 }
 0x106   : > { %v693_v44 = vpop.f32.mrf.mxu2 }
 0x107   : > { %986 = vst.msk [vmem:[%s1586_s4 + $0x88] sm:$0xf] %vm951_vm0, %v937_v42  ;;  %v914_v45 = vpack.c.bf16 %v866_v43, %v866_v43  ;;  %v694_v46 = vadd.f32 %v1571_v48, %v693_v44  ;;  %v822_v47 = vpop.f32.mrf.mxu3 }
 0x108   : > { %v636_v49 = vpop.f32.mrf.mxu0 }
 0x109   : > { %963 = vst.msk [vmem:[%s1586_s4 + $0x2c] sm:$0xf] %vm951_vm0, %v914_v45  ;;  %v823_v50 = vadd.f32 %v822_v47, %v694_v46  ;;  %v637_v51 = vadd.f32 %v1571_v48, %v636_v49  ;;  %v765_v52 = vpop.f32.mrf.mxu1 }
 0x10b   : > { %v890_v53 = vmax.f32 %v823_v50, 0.0  ;;  %v766_v54 = vadd.f32 %v765_v52, %v637_v51 }
 0x10d   : > { %v938_v55 = vpack.c.bf16 %v890_v53, %v890_v53  ;;  %v867_v56 = vmax.f32 %v766_v54, 0.0 }
 0x10e   : > { %v696_v57 = vpop.f32.mrf.mxu2 }
 0x10f   : > { %987 = vst.msk [vmem:[%s1586_s4 + $0x8c] sm:$0xf] %vm951_vm0, %v938_v55  ;;  %v915_v58 = vpack.c.bf16 %v867_v56, %v867_v56  ;;  %v697_v59 = vadd.f32 %v1571_v48, %v696_v57  ;;  %v825_v60 = vpop.f32.mrf.mxu3 }
 0x110   : > { %v638_v61 = vpop.f32.mrf.mxu0 }
 0x111   : > { %964 = vst.msk [vmem:[%s1586_s4 + $0x30] sm:$0xf] %vm951_vm0, %v915_v58  ;;  %v826_v62 = vadd.f32 %v825_v60, %v697_v59  ;;  %v639_v63 = vadd.f32 %v1571_v48, %v638_v61  ;;  %v767_v0 = vpop.f32.mrf.mxu1 }
 0x113   : > { %v891_v1 = vmax.f32 %v826_v62, 0.0  ;;  %v768_v2 = vadd.f32 %v767_v0, %v639_v63 }
 0x115   : > { %v939_v3 = vpack.c.bf16 %v891_v1, %v891_v1  ;;  %v868_v4 = vmax.f32 %v768_v2, 0.0 }
 0x116   : > { %v698_v5 = vpop.f32.mrf.mxu2 }
 0x117   : > { %988 = vst.msk [vmem:[%s1586_s4 + $0x90] sm:$0xf] %vm951_vm0, %v939_v3  ;;  %v916_v6 = vpack.c.bf16 %v868_v4, %v868_v4  ;;  %v699_v7 = vadd.f32 %v1571_v48, %v698_v5  ;;  %v827_v8 = vpop.f32.mrf.mxu3 }
 0x118   : > { %v641_v9 = vpop.f32.mrf.mxu0 }
 0x119   : > { %965 = vst.msk [vmem:[%s1586_s4 + $0x34] sm:$0xf] %vm951_vm0, %v916_v6  ;;  %v828_v10 = vadd.f32 %v827_v8, %v699_v7  ;;  %v642_v11 = vadd.f32 %v1571_v48, %v641_v9  ;;  %v770_v12 = vpop.f32.mrf.mxu1 }
 0x11b   : > { %v892_v13 = vmax.f32 %v828_v10, 0.0  ;;  %v771_v14 = vadd.f32 %v770_v12, %v642_v11 }
 0x11d   : > { %v940_v15 = vpack.c.bf16 %v892_v13, %v892_v13  ;;  %v869_v16 = vmax.f32 %v771_v14, 0.0 }
 0x11e   : > { %v701_v17 = vpop.f32.mrf.mxu2 }
 0x11f   : > { %989 = vst.msk [vmem:[%s1586_s4 + $0x94] sm:$0xf] %vm951_vm0, %v940_v15  ;;  %v917_v18 = vpack.c.bf16 %v869_v16, %v869_v16  ;;  %v702_v19 = vadd.f32 %v1571_v48, %v701_v17  ;;  %v830_v20 = vpop.f32.mrf.mxu3 }
 0x120   : > { %v643_v21 = vpop.f32.mrf.mxu0 }
 0x121   : > { %966 = vst.msk [vmem:[%s1586_s4 + $0x38] sm:$0xf] %vm951_vm0, %v917_v18  ;;  %v831_v22 = vadd.f32 %v830_v20, %v702_v19  ;;  %v644_v23 = vadd.f32 %v1571_v48, %v643_v21  ;;  %v772_v24 = vpop.f32.mrf.mxu1 }
 0x123   : > { %v893_v25 = vmax.f32 %v831_v22, 0.0  ;;  %v773_v26 = vadd.f32 %v772_v24, %v644_v23 }
 0x125   : > { %v941_v27 = vpack.c.bf16 %v893_v25, %v893_v25  ;;  %v870_v28 = vmax.f32 %v773_v26, 0.0 }
 0x126   : > { %v703_v29 = vpop.f32.mrf.mxu2 }
 0x127   : > { %990 = vst.msk [vmem:[%s1586_s4 + $0x98] sm:$0xf] %vm951_vm0, %v941_v27  ;;  %v918_v30 = vpack.c.bf16 %v870_v28, %v870_v28  ;;  %v704_v31 = vadd.f32 %v1571_v48, %v703_v29  ;;  %v832_v32 = vpop.f32.mrf.mxu3 }
 0x128   : > { %v646_v33 = vpop.f32.mrf.mxu0 }
 0x129   : > { %967 = vst.msk [vmem:[%s1586_s4 + $0x3c] sm:$0xf] %vm951_vm0, %v918_v30  ;;  %v833_v34 = vadd.f32 %v832_v32, %v704_v31  ;;  %v647_v35 = vadd.f32 %v1571_v48, %v646_v33  ;;  %v775_v36 = vpop.f32.mrf.mxu1 }
 0x12b   : > { %v894_v37 = vmax.f32 %v833_v34, 0.0  ;;  %v776_v38 = vadd.f32 %v775_v36, %v647_v35 }
 0x12d   : > { %v942_v39 = vpack.c.bf16 %v894_v37, %v894_v37  ;;  %v871_v40 = vmax.f32 %v776_v38, 0.0 }
 0x12e   : > { %v706_v41 = vpop.f32.mrf.mxu2 }
 0x12f   : > { %991 = vst.msk [vmem:[%s1586_s4 + $0x9c] sm:$0xf] %vm951_vm0, %v942_v39  ;;  %v919_v42 = vpack.c.bf16 %v871_v40, %v871_v40  ;;  %v707_v43 = vadd.f32 %v1571_v48, %v706_v41  ;;  %v835_v44 = vpop.f32.mrf.mxu3 }
 0x130   : > { %v648_v45 = vpop.f32.mrf.mxu0 }
 0x131   : > { %968 = vst.msk [vmem:[%s1586_s4 + $0x40] sm:$0xf] %vm951_vm0, %v919_v42  ;;  %v836_v46 = vadd.f32 %v835_v44, %v707_v43  ;;  %v649_v47 = vadd.f32 %v1571_v48, %v648_v45  ;;  %v777_v49 = vpop.f32.mrf.mxu1 }
 0x133   : > { %v895_v50 = vmax.f32 %v836_v46, 0.0  ;;  %v778_v51 = vadd.f32 %v777_v49, %v649_v47 }
 0x135   : > { %v943_v52 = vpack.c.bf16 %v895_v50, %v895_v50  ;;  %v872_v53 = vmax.f32 %v778_v51, 0.0 }
 0x136   : > { %v708_v54 = vpop.f32.mrf.mxu2 }
 0x137   : > { %992 = vst.msk [vmem:[%s1586_s4 + $0xa0] sm:$0xf] %vm951_vm0, %v943_v52  ;;  %v920_v55 = vpack.c.bf16 %v872_v53, %v872_v53  ;;  %v709_v56 = vadd.f32 %v1571_v48, %v708_v54  ;;  %v837_v57 = vpop.f32.mrf.mxu3 }
 0x138   : > { %v651_v58 = vpop.f32.mrf.mxu0 }
 0x139   : > { %969 = vst.msk [vmem:[%s1586_s4 + $0x44] sm:$0xf] %vm951_vm0, %v920_v55  ;;  %v838_v59 = vadd.f32 %v837_v57, %v709_v56  ;;  %v652_v60 = vadd.f32 %v1571_v48, %v651_v58  ;;  %v780_v61 = vpop.f32.mrf.mxu1 }
 0x13b   : > { %v896_v62 = vmax.f32 %v838_v59, 0.0  ;;  %v781_v63 = vadd.f32 %v780_v61, %v652_v60 }
 0x13d   : > { %v944_v0 = vpack.c.bf16 %v896_v62, %v896_v62  ;;  %v873_v1 = vmax.f32 %v781_v63, 0.0 }
 0x13e   : > { %v711_v2 = vpop.f32.mrf.mxu2 }
 0x13f   : > { %993 = vst.msk [vmem:[%s1586_s4 + $0xa4] sm:$0xf] %vm951_vm0, %v944_v0  ;;  %v921_v3 = vpack.c.bf16 %v873_v1, %v873_v1  ;;  %v712_v4 = vadd.f32 %v1571_v48, %v711_v2  ;;  %v840_v5 = vpop.f32.mrf.mxu3 }
 0x140   : > { %v653_v6 = vpop.f32.mrf.mxu0 }
 0x141   : > { %970 = vst.msk [vmem:[%s1586_s4 + $0x48] sm:$0xf] %vm951_vm0, %v921_v3  ;;  %v841_v7 = vadd.f32 %v840_v5, %v712_v4  ;;  %v654_v8 = vadd.f32 %v1571_v48, %v653_v6  ;;  %v782_v9 = vpop.f32.mrf.mxu1 }
 0x143   : > { %v897_v10 = vmax.f32 %v841_v7, 0.0  ;;  %v783_v11 = vadd.f32 %v782_v9, %v654_v8 }
 0x145   : > { %v945_v12 = vpack.c.bf16 %v897_v10, %v897_v10  ;;  %v874_v13 = vmax.f32 %v783_v11, 0.0 }
 0x146   : > { %v713_v14 = vpop.f32.mrf.mxu2 }
 0x147   : > { %994 = vst.msk [vmem:[%s1586_s4 + $0xa8] sm:$0xf] %vm951_vm0, %v945_v12  ;;  %v922_v15 = vpack.c.bf16 %v874_v13, %v874_v13  ;;  %v714_v16 = vadd.f32 %v1571_v48, %v713_v14  ;;  %v842_v17 = vpop.f32.mrf.mxu3 }
 0x148   : > { %v656_v18 = vpop.f32.mrf.mxu0 }
 0x149   : > { %971 = vst.msk [vmem:[%s1586_s4 + $0x4c] sm:$0xf] %vm951_vm0, %v922_v15  ;;  %v843_v19 = vadd.f32 %v842_v17, %v714_v16  ;;  %v657_v20 = vadd.f32 %v1571_v48, %v656_v18  ;;  %v785_v21 = vpop.f32.mrf.mxu1 }
 0x14b   : > { %v898_v22 = vmax.f32 %v843_v19, 0.0  ;;  %v786_v23 = vadd.f32 %v785_v21, %v657_v20 }
 0x14d   : > { %v946_v24 = vpack.c.bf16 %v898_v22, %v898_v22  ;;  %v875_v25 = vmax.f32 %v786_v23, 0.0 }
 0x14e   : > { %v716_v26 = vpop.f32.mrf.mxu2 }
 0x14f   : > { %995 = vst.msk [vmem:[%s1586_s4 + $0xac] sm:$0xf] %vm951_vm0, %v946_v24  ;;  %v923_v27 = vpack.c.bf16 %v875_v25, %v875_v25  ;;  %v717_v28 = vadd.f32 %v1571_v48, %v716_v26  ;;  %v845_v29 = vpop.f32.mrf.mxu3 }
 0x150   : > { %v658_v30 = vpop.f32.mrf.mxu0 }
 0x151   : > { %972 = vst.msk [vmem:[%s1586_s4 + $0x50] sm:$0xf] %vm951_vm0, %v923_v27  ;;  %v846_v31 = vadd.f32 %v845_v29, %v717_v28  ;;  %v659_v32 = vadd.f32 %v1571_v48, %v658_v30  ;;  %v787_v33 = vpop.f32.mrf.mxu1 }
 0x153   : > { %v899_v34 = vmax.f32 %v846_v31, 0.0  ;;  %v788_v35 = vadd.f32 %v787_v33, %v659_v32 }
 0x155   : > { %v947_v36 = vpack.c.bf16 %v899_v34, %v899_v34  ;;  %v876_v37 = vmax.f32 %v788_v35, 0.0 }
 0x156   : > { %v718_v38 = vpop.f32.mrf.mxu2 }
 0x157   : > { %996 = vst.msk [vmem:[%s1586_s4 + $0xb0] sm:$0xf] %vm951_vm0, %v947_v36  ;;  %v924_v39 = vpack.c.bf16 %v876_v37, %v876_v37  ;;  %v719_v40 = vadd.f32 %v1571_v48, %v718_v38  ;;  %v847_v41 = vpop.f32.mrf.mxu3 }
 0x158   : > { %v661_v42 = vpop.f32.mrf.mxu0 }
 0x159   : > { %973 = vst.msk [vmem:[%s1586_s4 + $0x54] sm:$0xf] %vm951_vm0, %v924_v39  ;;  %v848_v43 = vadd.f32 %v847_v41, %v719_v40  ;;  %v662_v44 = vadd.f32 %v1571_v48, %v661_v42  ;;  %v790_v45 = vpop.f32.mrf.mxu1 }
 0x15b   : > { %v900_v46 = vmax.f32 %v848_v43, 0.0  ;;  %v791_v47 = vadd.f32 %v790_v45, %v662_v44 }
 0x15d   : > { %v948_v49 = vpack.c.bf16 %v900_v46, %v900_v46  ;;  %v877_v50 = vmax.f32 %v791_v47, 0.0 }
 0x15e   : > { %v721_v51 = vpop.f32.mrf.mxu2 }
 0x15f   : > { %997 = vst.msk [vmem:[%s1586_s4 + $0xb4] sm:$0xf] %vm951_vm0, %v948_v49  ;;  %v925_v52 = vpack.c.bf16 %v877_v50, %v877_v50  ;;  %v722_v53 = vadd.f32 %v1571_v48, %v721_v51  ;;  %v850_v54 = vpop.f32.mrf.mxu3 }
 0x160   : > { %v663_v55 = vpop.f32.mrf.mxu0 }
 0x161   : > { %974 = vst.msk [vmem:[%s1586_s4 + $0x58] sm:$0xf] %vm951_vm0, %v925_v52  ;;  %v851_v56 = vadd.f32 %v850_v54, %v722_v53  ;;  %v664_v57 = vadd.f32 %v1571_v48, %v663_v55  ;;  %v792_v58 = vpop.f32.mrf.mxu1 }
 0x163   : > { %v901_v59 = vmax.f32 %v851_v56, 0.0  ;;  %v793_v60 = vadd.f32 %v792_v58, %v664_v57 }
 0x165   : > { %v949_v61 = vpack.c.bf16 %v901_v59, %v901_v59  ;;  %v878_v62 = vmax.f32 %v793_v60, 0.0 }
 0x166   : > { %v723_v63 = vpop.f32.mrf.mxu2 }
 0x167   : > { %998 = vst.msk [vmem:[%s1586_s4 + $0xb8] sm:$0xf] %vm951_vm0, %v949_v61  ;;  %v926_v0 = vpack.c.bf16 %v878_v62, %v878_v62  ;;  %v724_v1 = vadd.f32 %v1571_v48, %v723_v63  ;;  %v852_v2 = vpop.f32.mrf.mxu3 }
 0x169   : > { %975 = vst.msk [vmem:[%s1586_s4 + $0x5c] sm:$0xf] %vm951_vm0, %v926_v0  ;;  %v853_v3 = vadd.f32 %v852_v2, %v724_v1 }
 0x16b   : > { %v902_v4 = vmax.f32 %v853_v3, 0.0 }
 0x16d   : > { %v950_v5 = vpack.c.bf16 %v902_v4, %v902_v4 }
 0x16f   : > { %999 = vst.msk [vmem:[%s1586_s4 + $0xbc] sm:$0xf] %vm951_vm0, %v950_v5 }
 0x170 PF: > { %s13_s12 = sadd.s32 1, %s1418_s12  }
 0x171   : > { %p10_p4 = scmp.ge.s32.totalorder %s13_s12, 5  }
 0x173   :  { %12 = sbr.rel (!%p10_p4) target bundleno = 1 (0x1), region = 62 }

// kernel: _lambda_.5
= control target key start
LH: loop header
LB: loop body
LE: loop exit
PB: predicated region body
PF: predicated region fallthrough
CT: control target
= control target key end

     0   :  { %vm1078_vm0 = vcmask 519168   ;;  %s2261_s1 = inlined_call_operand.vmem [shape: bf16[512,64], index: 1, kind: input, shape index: {}]   ;;  %s2262_s2 = inlined_call_operand.vmem [shape: f32[1,64], index: 2, kind: input, shape index: {}]   ;;  %s2263_s0 = inlined_call_operand.vmem [shape: bf16[256,512], index: 0, kind: input, shape index: {}]   ;;  %s2264_s3 = inlined_call_operand.vmem [shape: bf16[256,64], index: 3, kind: output, shape index: {}]  }
   0x1   :  { %v1570_v0 = vld [vmem:[%s2261_s1 + $0x38] sm:$0xff]  ;;  %v1569_v4 = vld [vmem:[%s2261_s1 + $0x30] sm:$0xff]  ;;  %v1568_v8 = vld [vmem:[%s2261_s1 + $0x28] sm:$0xff] }
   0x2   :  { %v1578_v1 = vld [vmem:[%s2261_s1 + $0x78] sm:$0xff]  ;;  %658 = vmatpush.bf16.msra.mxu0 %v1570_v0  ;;  %v1577_v5 = vld [vmem:[%s2261_s1 + $0x70] sm:$0xff]  ;;  %v1576_v9 = vld [vmem:[%s2261_s1 + $0x68] sm:$0xff] }
   0x3   :  { %v1586_v2 = vld [vmem:[%s2261_s1 + $0xb8] sm:$0xff]  ;;  %747 = vmatpush.bf16.msra.mxu1 %v1578_v1  ;;  %v1585_v6 = vld [vmem:[%s2261_s1 + $0xb0] sm:$0xff]  ;;  %v1584_v10 = vld [vmem:[%s2261_s1 + $0xa8] sm:$0xff] }
   0x4   :  { %v1594_v3 = vld [vmem:[%s2261_s1 + $0xf8] sm:$0xff]  ;;  %836 = vmatpush.bf16.msra.mxu2 %v1586_v2  ;;  %v1593_v7 = vld [vmem:[%s2261_s1 + $0xf0] sm:$0xff]  ;;  %v1592_v11 = vld [vmem:[%s2261_s1 + $0xe8] sm:$0xff] }
   0x5   :  { %925 = vmatpush.bf16.msra.mxu3 %v1594_v3  ;;  %v1567_v12 = vld [vmem:[%s2261_s1 + $0x20] sm:$0xff]  ;;  %v1566_v16 = vld [vmem:[%s2261_s1 + $0x18] sm:$0xff]  ;;  %v1565_v20 = vld [vmem:[%s2261_s1 + $0x10] sm:$0xff] }
   0x6   :  { %659 = vmatpush.bf16.msra.mxu0 %v1569_v4  ;;  %v1575_v13 = vld [vmem:[%s2261_s1 + $0x60] sm:$0xff]  ;;  %v1574_v17 = vld [vmem:[%s2261_s1 + $0x58] sm:$0xff]  ;;  %v1573_v21 = vld [vmem:[%s2261_s1 + $0x50] sm:$0xff] }
   0x7   :  { %748 = vmatpush.bf16.msra.mxu1 %v1577_v5  ;;  %v1583_v14 = vld [vmem:[%s2261_s1 + $0xa0] sm:$0xff]  ;;  %v1582_v18 = vld [vmem:[%s2261_s1 + $0x98] sm:$0xff]  ;;  %v1581_v22 = vld [vmem:[%s2261_s1 + $0x90] sm:$0xff] }
   0x8   :  { %837 = vmatpush.bf16.msra.mxu2 %v1585_v6  ;;  %v1591_v15 = vld [vmem:[%s2261_s1 + $0xe0] sm:$0xff]  ;;  %v1590_v19 = vld [vmem:[%s2261_s1 + $0xd8] sm:$0xff]  ;;  %v1589_v23 = vld [vmem:[%s2261_s1 + $0xd0] sm:$0xff] }
   0x9   :  { %926 = vmatpush.bf16.msra.mxu3 %v1593_v7  ;;  %v1564_v24 = vld [vmem:[%s2261_s1 + $0x8] sm:$0xff]  ;;  %v1563_v28 = vld [vmem:[%s2261_s1] sm:$0xff]  ;;  %v1501_v33 = vld [vmem:[%s2263_s0 + $0xc] sm:$0xf0] }
   0xa   :  { %660 = vmatpush.bf16.msra.mxu0 %v1568_v8  ;;  %v1572_v25 = vld [vmem:[%s2261_s1 + $0x48] sm:$0xff]  ;;  %v1571_v29 = vld [vmem:[%s2261_s1 + $0x40] sm:$0xff]  ;;  %v1119_v35 = vld [vmem:[%s2263_s0 + $0x10] sm:$0xf0] }
   0xb   :  { %749 = vmatpush.bf16.msra.mxu1 %v1576_v9  ;;  %v1580_v26 = vld [vmem:[%s2261_s1 + $0x88] sm:$0xff]  ;;  %v1579_v30 = vld [vmem:[%s2261_s1 + $0x80] sm:$0xff]  ;;  %v1502_v37 = vld [vmem:[%s2263_s0 + $0x14] sm:$0xf0] }
   0xc   :  { %838 = vmatpush.bf16.msra.mxu2 %v1584_v10  ;;  %v1588_v27 = vld [vmem:[%s2261_s1 + $0xc8] sm:$0xff]  ;;  %v1587_v31 = vld [vmem:[%s2261_s1 + $0xc0] sm:$0xff]  ;;  %v1127_v39 = vld [vmem:[%s2263_s0 + $0x18] sm:$0xf0] }
   0xd   :  { %927 = vmatpush.bf16.msra.mxu3 %v1592_v11  ;;  %v1117_v32 = vld [vmem:[%s2263_s0] sm:$0xf]  ;;  %v1499_v34 = vld [vmem:[%s2263_s0 + $0x4] sm:$0xf]  ;;  %v1125_v36 = vld [vmem:[%s2263_s0 + $0x8] sm:$0xf] }
   0xe   :  { %661 = vmatpush.bf16.msra.mxu0 %v1567_v12  ;;  %v1500_v38 = vld [vmem:[%s2263_s0 + $0xc] sm:$0xf]  ;;  %v1118_v40 = vor.u32 %v1501_v33, %v1117_v32  ;;  %v1122_v41 = vor.u32 %v1499_v34, %v1119_v35  ;;  %v1126_v42 = vor.u32 %v1502_v37, %v1125_v36  ;;  %v1133_v44 = vld [vmem:[%s2263_s0 + $0x20] sm:$0xf]  ;;  %v1505_v45 = vld [vmem:[%s2263_s0 + $0x2c] sm:$0xf0] }
   0xf   :  { %750 = vmatpush.bf16.msra.mxu1 %v1575_v13  ;;  %v1130_v43 = vor.u32 %v1500_v38, %v1127_v39  ;;  %v1503_v46 = vld [vmem:[%s2263_s0 + $0x24] sm:$0xf]  ;;  %v1135_v47 = vld [vmem:[%s2263_s0 + $0x30] sm:$0xf0]  ;;  %v1141_v48 = vld [vmem:[%s2263_s0 + $0x28] sm:$0xf]  ;;  %v1134_v52 = vor.u32 %v1505_v45, %v1133_v44 }
  0x10   :  { %839 = vmatpush.bf16.msra.mxu2 %v1583_v14  ;;  %v1506_v49 = vld [vmem:[%s2263_s0 + $0x34] sm:$0xf0]  ;;  %v1504_v50 = vld [vmem:[%s2263_s0 + $0x2c] sm:$0xf]  ;;  %v1143_v51 = vld [vmem:[%s2263_s0 + $0x38] sm:$0xf0]  ;;  %v1138_v53 = vor.u32 %v1503_v46, %v1135_v47 }
  0x11   :  { %928 = vmatpush.bf16.msra.mxu3 %v1591_v15  ;;  %v1142_v54 = vor.u32 %v1506_v49, %v1141_v48  ;;  %v1146_v55 = vor.u32 %v1504_v50, %v1143_v51  ;;  %v1149_v56 = vld [vmem:[%s2263_s0 + $0x40] sm:$0xf]  ;;  %v1509_v57 = vld [vmem:[%s2263_s0 + $0x4c] sm:$0xf0]  ;;  %v1507_v58 = vld [vmem:[%s2263_s0 + $0x44] sm:$0xf] }
  0x12   :  { %662 = vmatpush.bf16.msra.mxu0 %v1566_v16  ;;  %v1151_v59 = vld [vmem:[%s2263_s0 + $0x50] sm:$0xf0]  ;;  %v1157_v60 = vld [vmem:[%s2263_s0 + $0x48] sm:$0xf]  ;;  %v1510_v61 = vld [vmem:[%s2263_s0 + $0x54] sm:$0xf0]  ;;  %v1150_v0 = vor.u32 %v1509_v57, %v1149_v56 }
  0x13   :  { %751 = vmatpush.bf16.msra.mxu1 %v1574_v17  ;;  %v1508_v62 = vld [vmem:[%s2263_s0 + $0x4c] sm:$0xf]  ;;  %v1159_v63 = vld [vmem:[%s2263_s0 + $0x58] sm:$0xf0]  ;;  %v1154_v1 = vor.u32 %v1507_v58, %v1151_v59  ;;  %v1158_v2 = vor.u32 %v1510_v61, %v1157_v60  ;;  %v1165_v4 = vld [vmem:[%s2263_s0 + $0x60] sm:$0xf] }
  0x14   :  { %840 = vmatpush.bf16.msra.mxu2 %v1582_v18  ;;  %v1162_v3 = vor.u32 %v1508_v62, %v1159_v63  ;;  %v1513_v5 = vld [vmem:[%s2263_s0 + $0x6c] sm:$0xf0]  ;;  %v1511_v6 = vld [vmem:[%s2263_s0 + $0x64] sm:$0xf]  ;;  %v1167_v7 = vld [vmem:[%s2263_s0 + $0x70] sm:$0xf0] }
  0x15   :  { %929 = vmatpush.bf16.msra.mxu3 %v1590_v19  ;;  %v1173_v8 = vld [vmem:[%s2263_s0 + $0x68] sm:$0xf]  ;;  %v1514_v9 = vld [vmem:[%s2263_s0 + $0x74] sm:$0xf0]  ;;  %v1512_v10 = vld [vmem:[%s2263_s0 + $0x6c] sm:$0xf]  ;;  %v1166_v12 = vor.u32 %v1513_v5, %v1165_v4  ;;  %v1170_v13 = vor.u32 %v1511_v6, %v1167_v7 }
  0x16   :  { %663 = vmatpush.bf16.msra.mxu0 %v1565_v20  ;;  %v1175_v11 = vld [vmem:[%s2263_s0 + $0x78] sm:$0xf0]  ;;  %v1174_v14 = vor.u32 %v1514_v9, %v1173_v8  ;;  %v1181_v16 = vld [vmem:[%s2263_s0 + $0x80] sm:$0xf]  ;;  %v1517_v17 = vld [vmem:[%s2263_s0 + $0x8c] sm:$0xf0] }
  0x17   :  { %752 = vmatpush.bf16.msra.mxu1 %v1573_v21  ;;  %v1178_v15 = vor.u32 %v1512_v10, %v1175_v11  ;;  %v1515_v18 = vld [vmem:[%s2263_s0 + $0x84] sm:$0xf]  ;;  %v1183_v19 = vld [vmem:[%s2263_s0 + $0x90] sm:$0xf0]  ;;  %v1189_v20 = vld [vmem:[%s2263_s0 + $0x88] sm:$0xf] }
  0x18   :  { %841 = vmatpush.bf16.msra.mxu2 %v1581_v22  ;;  %v1518_v21 = vld [vmem:[%s2263_s0 + $0x94] sm:$0xf0]  ;;  %v1516_v22 = vld [vmem:[%s2263_s0 + $0x8c] sm:$0xf]  ;;  %v1205_v32 = vld [vmem:[%s2263_s0 + $0xa8] sm:$0xf] }
  0x19   :  { %930 = vmatpush.bf16.msra.mxu3 %v1589_v23  ;;  %v1191_v23 = vld [vmem:[%s2263_s0 + $0x98] sm:$0xf0]  ;;  %v1522_v33 = vld [vmem:[%s2263_s0 + $0xb4] sm:$0xf0]  ;;  %v1520_v34 = vld [vmem:[%s2263_s0 + $0xac] sm:$0xf] }
  0x1a   :  { %664 = vmatpush.bf16.msra.mxu0 %v1564_v24  ;;  %v1182_v24 = vor.u32 %v1517_v17, %v1181_v16  ;;  %v1207_v35 = vld [vmem:[%s2263_s0 + $0xb8] sm:$0xf0]  ;;  %v1206_v38 = vor.u32 %v1522_v33, %v1205_v32  ;;  %v1221_v44 = vld [vmem:[%s2263_s0 + $0xc8] sm:$0xf]  ;;  %v1526_v45 = vld [vmem:[%s2263_s0 + $0xd4] sm:$0xf0] }
  0x1b   :  { %753 = vmatpush.bf16.msra.mxu1 %v1572_v25  ;;  %v1186_v25 = vor.u32 %v1515_v18, %v1183_v19  ;;  %v1210_v39 = vor.u32 %v1520_v34, %v1207_v35  ;;  %v1524_v46 = vld [vmem:[%s2263_s0 + $0xcc] sm:$0xf]  ;;  %v1223_v47 = vld [vmem:[%s2263_s0 + $0xd8] sm:$0xf0]  ;;  %v1222_v50 = vor.u32 %v1526_v45, %v1221_v44  ;;  %v1237_v56 = vld [vmem:[%s2263_s0 + $0xe8] sm:$0xf] }
  0x1c   :  { %842 = vmatpush.bf16.msra.mxu2 %v1580_v26  ;;  %v1190_v26 = vor.u32 %v1518_v21, %v1189_v20  ;;  %v1226_v51 = vor.u32 %v1524_v46, %v1223_v47  ;;  %v1530_v57 = vld [vmem:[%s2263_s0 + $0xf4] sm:$0xf0]  ;;  %v1528_v58 = vld [vmem:[%s2263_s0 + $0xec] sm:$0xf]  ;;  %v1239_v59 = vld [vmem:[%s2263_s0 + $0xf8] sm:$0xf0] }
  0x1d   :  { %931 = vmatpush.bf16.msra.mxu3 %v1588_v27  ;;  %v1194_v27 = vor.u32 %v1516_v22, %v1191_v23  ;;  %v1238_v62 = vor.u32 %v1530_v57, %v1237_v56  ;;  %v1242_v63 = vor.u32 %v1528_v58, %v1239_v59  ;;  %v1247_v4 = vld [vmem:[%s2263_s0 + $0x110] sm:$0xf0]  ;;  %v1253_v5 = vld [vmem:[%s2263_s0 + $0x108] sm:$0xf]  ;;  %v1534_v6 = vld [vmem:[%s2263_s0 + $0x114] sm:$0xf0] }
  0x1e   :  { %665 = vmatpush.bf16.msra.mxu0 %v1563_v28  ;;  %v1197_v28 = vld [vmem:[%s2263_s0 + $0xa0] sm:$0xf]  ;;  %v1532_v7 = vld [vmem:[%s2263_s0 + $0x10c] sm:$0xf]  ;;  %v1255_v8 = vld [vmem:[%s2263_s0 + $0x118] sm:$0xf0] }
  0x1f   :  { %754 = vmatpush.bf16.msra.mxu1 %v1571_v29  ;;  %v1521_v29 = vld [vmem:[%s2263_s0 + $0xac] sm:$0xf0]  ;;  %v1271_v32 = vld [vmem:[%s2263_s0 + $0x138] sm:$0xf0]  ;;  %v1277_v56 = vld [vmem:[%s2263_s0 + $0x140] sm:$0xf] }
  0x20   :  { %843 = vmatpush.bf16.msra.mxu2 %v1579_v30  ;;  %v1519_v30 = vld [vmem:[%s2263_s0 + $0xa4] sm:$0xf]  ;;  %v1198_v36 = vor.u32 %v1521_v29, %v1197_v28  ;;  %v1263_v28 = vld [vmem:[%s2263_s0 + $0x130] sm:$0xf0]  ;;  %v1269_v29 = vld [vmem:[%s2263_s0 + $0x128] sm:$0xf] }
  0x21   :  { %932 = vmatpush.bf16.msra.mxu3 %v1587_v31  ;;  %666 = vmatmul.bf16.vlgmr.msra.gmra.mxu0 %v1118_v40  ;;  %v1199_v31 = vld [vmem:[%s2263_s0 + $0xb0] sm:$0xf0]  ;;  %v1213_v40 = vld [vmem:[%s2263_s0 + $0xc0] sm:$0xf]  ;;  %v1541_v57 = vld [vmem:[%s2263_s0 + $0x14c] sm:$0xf0] }
  0x22   :  { %755 = vmatmul.bf16.vlgmr.msra.gmra.mxu1 %v1122_v41  ;;  %v1202_v37 = vor.u32 %v1519_v30, %v1199_v31  ;;  %v1525_v41 = vld [vmem:[%s2263_s0 + $0xcc] sm:$0xf0]  ;;  %v1538_v30 = vld [vmem:[%s2263_s0 + $0x134] sm:$0xf0]  ;;  %v1536_v31 = vld [vmem:[%s2263_s0 + $0x12c] sm:$0xf] }
  0x23   :  { %844 = vmatmul.bf16.vlgmr.msra.gmra.mxu2 %v1126_v42  ;;  %v1523_v42 = vld [vmem:[%s2263_s0 + $0xc4] sm:$0xf]  ;;  %v1214_v48 = vor.u32 %v1525_v41, %v1213_v40 }
  0x24   :  { %933 = vmatmul.bf16.vlgmr.msra.gmra.mxu3 %v1130_v43  ;;  %v1215_v43 = vld [vmem:[%s2263_s0 + $0xd0] sm:$0xf0]  ;;  %v1539_v58 = vld [vmem:[%s2263_s0 + $0x144] sm:$0xf] }
  0x25   :  { %v1218_v49 = vor.u32 %v1523_v42, %v1215_v43  ;;  %v1270_v42 = vor.u32 %v1538_v30, %v1269_v29  ;;  %v1274_v43 = vor.u32 %v1536_v31, %v1271_v32  ;;  %v1295_v29 = vld [vmem:[%s2263_s0 + $0x170] sm:$0xf0]  ;;  %v1301_v30 = vld [vmem:[%s2263_s0 + $0x168] sm:$0xf]  ;;  %v1546_v31 = vld [vmem:[%s2263_s0 + $0x174] sm:$0xf0] }
  0x26   :  { %v1544_v32 = vld [vmem:[%s2263_s0 + $0x16c] sm:$0xf] }
  0x31   :  { %671 = vmatmul.bf16.gmra.mxu0 %v1134_v52  ;;  %v1229_v52 = vld [vmem:[%s2263_s0 + $0xe0] sm:$0xf] }
  0x32   :  { %760 = vmatmul.bf16.gmra.mxu1 %v1138_v53  ;;  %v1529_v53 = vld [vmem:[%s2263_s0 + $0xec] sm:$0xf0] }
  0x33   :  { %849 = vmatmul.bf16.gmra.mxu2 %v1142_v54  ;;  %v1527_v54 = vld [vmem:[%s2263_s0 + $0xe4] sm:$0xf]  ;;  %v1230_v60 = vor.u32 %v1529_v53, %v1229_v52 }
  0x34   :  { %938 = vmatmul.bf16.gmra.mxu3 %v1146_v55  ;;  %v1231_v55 = vld [vmem:[%s2263_s0 + $0xf0] sm:$0xf0] }
  0x35   :  { %v1234_v61 = vor.u32 %v1527_v54, %v1231_v55 }
  0x41   :  { %676 = vmatmul.bf16.gmra.mxu0 %v1150_v0  ;;  %v1907_v0 = vld [vmem:[%s2262_s2] ss:$0 sm:$0xff] }
  0x42   :  { %765 = vmatmul.bf16.gmra.mxu1 %v1154_v1  ;;  %v1245_v1 = vld [vmem:[%s2263_s0 + $0x100] sm:$0xf] }
  0x43   :  { %854 = vmatmul.bf16.gmra.mxu2 %v1158_v2  ;;  %v1533_v2 = vld [vmem:[%s2263_s0 + $0x10c] sm:$0xf0] }
  0x44   :  { %943 = vmatmul.bf16.gmra.mxu3 %v1162_v3  ;;  %v1531_v3 = vld [vmem:[%s2263_s0 + $0x104] sm:$0xf]  ;;  %v1246_v9 = vor.u32 %v1533_v2, %v1245_v1  ;;  %v1287_v1 = vld [vmem:[%s2263_s0 + $0x158] sm:$0xf0] }
  0x45   :  { %v1250_v10 = vor.u32 %v1531_v3, %v1247_v4 }
  0x51   :  { %681 = vmatmul.bf16.gmra.mxu0 %v1166_v12 }
  0x52   :  { %770 = vmatmul.bf16.gmra.mxu1 %v1170_v13  ;;  %v1254_v13 = vor.u32 %v1534_v6, %v1253_v5  ;;  %v1278_v6 = vor.u32 %v1541_v57, %v1277_v56  ;;  %v1309_v57 = vld [vmem:[%s2263_s0 + $0x180] sm:$0xf] }
  0x53   :  { %859 = vmatmul.bf16.gmra.mxu2 %v1174_v14  ;;  %v1258_v14 = vor.u32 %v1532_v7, %v1255_v8 }
  0x54   :  { %948 = vmatmul.bf16.gmra.mxu3 %v1178_v15 }
  0x61   :  { %686 = vmatmul.bf16.gmra.mxu0 %v1182_v24  ;;  %v1261_v24 = vld [vmem:[%s2263_s0 + $0x120] sm:$0xf] }
  0x62   :  { %775 = vmatmul.bf16.gmra.mxu1 %v1186_v25  ;;  %v1537_v25 = vld [vmem:[%s2263_s0 + $0x12c] sm:$0xf0] }
  0x63   :  { %864 = vmatmul.bf16.gmra.mxu2 %v1190_v26  ;;  %v1535_v26 = vld [vmem:[%s2263_s0 + $0x124] sm:$0xf] }
  0x64   :  { %953 = vmatmul.bf16.gmra.mxu3 %v1194_v27 }
  0x71   :  { %691 = vmatmul.bf16.gmra.mxu0 %v1198_v36 }
  0x72   :  { %780 = vmatmul.bf16.gmra.mxu1 %v1202_v37  ;;  %v1262_v37 = vor.u32 %v1537_v25, %v1261_v24  ;;  %v1293_v25 = vld [vmem:[%s2263_s0 + $0x160] sm:$0xf] }
  0x73   :  { %869 = vmatmul.bf16.gmra.mxu2 %v1206_v38  ;;  %v1266_v38 = vor.u32 %v1535_v26, %v1263_v28  ;;  %v1545_v26 = vld [vmem:[%s2263_s0 + $0x16c] sm:$0xf0] }
  0x74   :  { %958 = vmatmul.bf16.gmra.mxu3 %v1210_v39 }
  0x81   :  { %696 = vmatmul.bf16.gmra.mxu0 %v1214_v48 }
  0x82   :  { %785 = vmatmul.bf16.gmra.mxu1 %v1218_v49 }
  0x83   :  { %874 = vmatmul.bf16.gmra.mxu2 %v1222_v50 }
  0x84   :  { %963 = vmatmul.bf16.gmra.mxu3 %v1226_v51 }
  0x91   :  { %701 = vmatmul.bf16.gmra.mxu0 %v1230_v60  ;;  %v1279_v60 = vld [vmem:[%s2263_s0 + $0x150] sm:$0xf0] }
  0x92   :  { %790 = vmatmul.bf16.gmra.mxu1 %v1234_v61  ;;  %v1285_v61 = vld [vmem:[%s2263_s0 + $0x148] sm:$0xf]  ;;  %v1282_v7 = vor.u32 %v1539_v58, %v1279_v60  ;;  %v1549_v58 = vld [vmem:[%s2263_s0 + $0x18c] sm:$0xf0] }
  0x93   :  { %879 = vmatmul.bf16.gmra.mxu2 %v1238_v62  ;;  %v1542_v62 = vld [vmem:[%s2263_s0 + $0x154] sm:$0xf0] }
  0x94   :  { %968 = vmatmul.bf16.gmra.mxu3 %v1242_v63  ;;  %v1540_v63 = vld [vmem:[%s2263_s0 + $0x14c] sm:$0xf] }
  0x9e   :  { %v667_v11 = vpop.f32.mrf.mxu0 }
  0x9f   :  { %v756_v12 = vpop.f32.mrf.mxu1  ;;  %v668_v15 = vadd.f32 %v1907_v0, %v667_v11  ;;  %v1286_v11 = vor.u32 %v1542_v62, %v1285_v61  ;;  %v1311_v61 = vld [vmem:[%s2263_s0 + $0x190] sm:$0xf0]  ;;  %v1317_v62 = vld [vmem:[%s2263_s0 + $0x188] sm:$0xf] }
  0xa1   :  { %706 = vmatmul.bf16.gmra.mxu0 %v1246_v9  ;;  %v757_v16 = vadd.f32 %v756_v12, %v668_v15  ;;  %v1290_v12 = vor.u32 %v1540_v63, %v1287_v1  ;;  %v1550_v63 = vld [vmem:[%s2263_s0 + $0x194] sm:$0xf0]  ;;  %v1548_v1 = vld [vmem:[%s2263_s0 + $0x18c] sm:$0xf] }
  0xa2   :  { %795 = vmatmul.bf16.gmra.mxu1 %v1250_v10 }
  0xa3   :  { %884 = vmatmul.bf16.gmra.mxu2 %v1254_v13 }
  0xa4   :  { %973 = vmatmul.bf16.gmra.mxu3 %v1258_v14 }
  0xa6   :  { %v845_v17 = vpop.f32.mrf.mxu2  ;;  %v669_v20 = vpop.f32.mrf.mxu0 }
  0xa7   :  { %v934_v18 = vpop.f32.mrf.mxu3  ;;  %v846_v19 = vadd.f32 %v845_v17, %v757_v16  ;;  %v758_v21 = vpop.f32.mrf.mxu1  ;;  %v670_v23 = vadd.f32 %v1907_v0, %v669_v20 }
  0xa9   :  { %v935_v22 = vadd.f32 %v934_v18, %v846_v19  ;;  %v759_v34 = vadd.f32 %v758_v21, %v670_v23 }
  0xab   :  { %v1014_v27 = vmax.f32 %v935_v22, 0.0 }
  0xad   :  { %v1046_v33 = vpack.c.bf16 %v1014_v27, %v1014_v27  ;;  %v1543_v27 = vld [vmem:[%s2263_s0 + $0x164] sm:$0xf] }
  0xae   :  { %v847_v35 = vpop.f32.mrf.mxu2  ;;  %v672_v40 = vpop.f32.mrf.mxu0 }
  0xaf   :  { %v936_v36 = vpop.f32.mrf.mxu3  ;;  %1079 = vst.msk [vmem:[%s2264_s3] sm:$0xf] %vm1078_vm0, %v1046_v33  ;;  %v848_v39 = vadd.f32 %v847_v35, %v759_v34  ;;  %v761_v41 = vpop.f32.mrf.mxu1  ;;  %v673_v44 = vadd.f32 %v1907_v0, %v672_v40  ;;  %v1303_v33 = vld [vmem:[%s2263_s0 + $0x178] sm:$0xf0] }
  0xb1   :  { %v937_v45 = vadd.f32 %v936_v36, %v848_v39  ;;  %711 = vmatmul.bf16.gmra.mxu0 %v1262_v37  ;;  %v762_v47 = vadd.f32 %v761_v41, %v673_v44  ;;  %v1298_v39 = vor.u32 %v1543_v27, %v1295_v29  ;;  %v1306_v44 = vor.u32 %v1544_v32, %v1303_v33  ;;  %v1553_v27 = vld [vmem:[%s2263_s0 + $0x1ac] sm:$0xf0]  ;;  %v1554_v32 = vld [vmem:[%s2263_s0 + $0x1b4] sm:$0xf0]  ;;  %v1552_v33 = vld [vmem:[%s2263_s0 + $0x1ac] sm:$0xf] }
  0xb2   :  { %800 = vmatmul.bf16.gmra.mxu1 %v1266_v38  ;;  %v1294_v38 = vor.u32 %v1545_v26, %v1293_v25  ;;  %v1325_v26 = vld [vmem:[%s2263_s0 + $0x1a0] sm:$0xf] }
  0xb3   :  { %v1015_v46 = vmax.f32 %v937_v45, 0.0  ;;  %889 = vmatmul.bf16.gmra.mxu2 %v1270_v42 }
  0xb4   :  { %978 = vmatmul.bf16.gmra.mxu3 %v1274_v43  ;;  %v1302_v43 = vor.u32 %v1546_v31, %v1301_v30  ;;  %v1327_v30 = vld [vmem:[%s2263_s0 + $0x1b0] sm:$0xf0]  ;;  %v1333_v31 = vld [vmem:[%s2263_s0 + $0x1a8] sm:$0xf] }
  0xb5   :  { %v1047_v48 = vpack.c.bf16 %v1015_v46, %v1015_v46 }
  0xb6   :  { %v850_v49 = vpop.f32.mrf.mxu2  ;;  %v674_v52 = vpop.f32.mrf.mxu0 }
  0xb7   :  { %v939_v50 = vpop.f32.mrf.mxu3  ;;  %1080 = vst.msk [vmem:[%s2264_s3 + $0x4] sm:$0xf] %vm1078_vm0, %v1047_v48  ;;  %v851_v51 = vadd.f32 %v850_v49, %v762_v47  ;;  %v763_v53 = vpop.f32.mrf.mxu1  ;;  %v675_v55 = vadd.f32 %v1907_v0, %v674_v52 }
  0xb9   :  { %v940_v54 = vadd.f32 %v939_v50, %v851_v51  ;;  %v764_v3 = vadd.f32 %v763_v53, %v675_v55 }
  0xbb   :  { %v1016_v59 = vmax.f32 %v940_v54, 0.0 }
  0xbd   :  { %v1048_v2 = vpack.c.bf16 %v1016_v59, %v1016_v59  ;;  %v1547_v59 = vld [vmem:[%s2263_s0 + $0x184] sm:$0xf] }
  0xbe   :  { %v852_v4 = vpop.f32.mrf.mxu2  ;;  %v677_v9 = vpop.f32.mrf.mxu0 }
  0xbf   :  { %v941_v5 = vpop.f32.mrf.mxu3  ;;  %1081 = vst.msk [vmem:[%s2264_s3 + $0x8] sm:$0xf] %vm1078_vm0, %v1048_v2  ;;  %v853_v8 = vadd.f32 %v852_v4, %v764_v3  ;;  %v766_v10 = vpop.f32.mrf.mxu1  ;;  %v678_v13 = vadd.f32 %v1907_v0, %v677_v9  ;;  %v1319_v2 = vld [vmem:[%s2263_s0 + $0x198] sm:$0xf0] }
  0xc1   :  { %v942_v14 = vadd.f32 %v941_v5, %v853_v8  ;;  %716 = vmatmul.bf16.gmra.mxu0 %v1278_v6  ;;  %v767_v16 = vadd.f32 %v766_v10, %v678_v13  ;;  %v1314_v8 = vor.u32 %v1547_v59, %v1311_v61  ;;  %v1322_v13 = vor.u32 %v1548_v1, %v1319_v2  ;;  %v1557_v59 = vld [vmem:[%s2263_s0 + $0x1cc] sm:$0xf0]  ;;  %v1558_v1 = vld [vmem:[%s2263_s0 + $0x1d4] sm:$0xf0]  ;;  %v1556_v2 = vld [vmem:[%s2263_s0 + $0x1cc] sm:$0xf] }
  0xc2   :  { %805 = vmatmul.bf16.gmra.mxu1 %v1282_v7  ;;  %v1310_v7 = vor.u32 %v1549_v58, %v1309_v57  ;;  %v1341_v58 = vld [vmem:[%s2263_s0 + $0x1c0] sm:$0xf] }
  0xc3   :  { %v1017_v15 = vmax.f32 %v942_v14, 0.0  ;;  %894 = vmatmul.bf16.gmra.mxu2 %v1286_v11 }
  0xc4   :  { %983 = vmatmul.bf16.gmra.mxu3 %v1290_v12  ;;  %v1318_v12 = vor.u32 %v1550_v63, %v1317_v62  ;;  %v1343_v62 = vld [vmem:[%s2263_s0 + $0x1d0] sm:$0xf0]  ;;  %v1349_v63 = vld [vmem:[%s2263_s0 + $0x1c8] sm:$0xf] }
  0xc5   :  { %v1049_v17 = vpack.c.bf16 %v1017_v15, %v1017_v15 }
  0xc6   :  { %v855_v18 = vpop.f32.mrf.mxu2  ;;  %v679_v21 = vpop.f32.mrf.mxu0 }
  0xc7   :  { %v944_v19 = vpop.f32.mrf.mxu3  ;;  %1082 = vst.msk [vmem:[%s2264_s3 + $0xc] sm:$0xf] %vm1078_vm0, %v1049_v17  ;;  %v856_v20 = vadd.f32 %v855_v18, %v767_v16  ;;  %v768_v22 = vpop.f32.mrf.mxu1  ;;  %v680_v24 = vadd.f32 %v1907_v0, %v679_v21 }
  0xc9   :  { %v945_v23 = vadd.f32 %v944_v19, %v856_v20  ;;  %v769_v35 = vadd.f32 %v768_v22, %v680_v24 }
  0xcb   :  { %v1018_v28 = vmax.f32 %v945_v23, 0.0 }
  0xcd   :  { %v1050_v34 = vpack.c.bf16 %v1018_v28, %v1018_v28  ;;  %v1551_v28 = vld [vmem:[%s2263_s0 + $0x1a4] sm:$0xf] }
  0xce   :  { %v857_v36 = vpop.f32.mrf.mxu2  ;;  %v682_v41 = vpop.f32.mrf.mxu0 }
  0xcf   :  { %v946_v37 = vpop.f32.mrf.mxu3  ;;  %1083 = vst.msk [vmem:[%s2264_s3 + $0x10] sm:$0xf] %vm1078_vm0, %v1050_v34  ;;  %v858_v40 = vadd.f32 %v857_v36, %v769_v35  ;;  %v771_v42 = vpop.f32.mrf.mxu1  ;;  %v683_v45 = vadd.f32 %v1907_v0, %v682_v41  ;;  %v1335_v34 = vld [vmem:[%s2263_s0 + $0x1b8] sm:$0xf0] }
  0xd1   :  { %v947_v46 = vadd.f32 %v946_v37, %v858_v40  ;;  %721 = vmatmul.bf16.gmra.mxu0 %v1294_v38  ;;  %v772_v48 = vadd.f32 %v771_v42, %v683_v45  ;;  %v1330_v40 = vor.u32 %v1551_v28, %v1327_v30  ;;  %v1338_v45 = vor.u32 %v1552_v33, %v1335_v34  ;;  %v1561_v28 = vld [vmem:[%s2263_s0 + $0x1ec] sm:$0xf0]  ;;  %v1562_v33 = vld [vmem:[%s2263_s0 + $0x1f4] sm:$0xf0]  ;;  %v1560_v34 = vld [vmem:[%s2263_s0 + $0x1ec] sm:$0xf] }
  0xd2   :  { %810 = vmatmul.bf16.gmra.mxu1 %v1298_v39  ;;  %v1326_v39 = vor.u32 %v1553_v27, %v1325_v26  ;;  %v1357_v27 = vld [vmem:[%s2263_s0 + $0x1e0] sm:$0xf] }
  0xd3   :  { %v1019_v47 = vmax.f32 %v947_v46, 0.0  ;;  %899 = vmatmul.bf16.gmra.mxu2 %v1302_v43 }
  0xd4   :  { %988 = vmatmul.bf16.gmra.mxu3 %v1306_v44  ;;  %v1334_v44 = vor.u32 %v1554_v32, %v1333_v31  ;;  %v1359_v31 = vld [vmem:[%s2263_s0 + $0x1f0] sm:$0xf0]  ;;  %v1365_v32 = vld [vmem:[%s2263_s0 + $0x1e8] sm:$0xf] }
  0xd5   :  { %v1051_v49 = vpack.c.bf16 %v1019_v47, %v1019_v47 }
  0xd6   :  { %v860_v50 = vpop.f32.mrf.mxu2  ;;  %v684_v53 = vpop.f32.mrf.mxu0 }
  0xd7   :  { %v949_v51 = vpop.f32.mrf.mxu3  ;;  %1084 = vst.msk [vmem:[%s2264_s3 + $0x14] sm:$0xf] %vm1078_vm0, %v1051_v49  ;;  %v861_v52 = vadd.f32 %v860_v50, %v772_v48  ;;  %v773_v54 = vpop.f32.mrf.mxu1  ;;  %v685_v56 = vadd.f32 %v1907_v0, %v684_v53 }
  0xd9   :  { %v950_v55 = vadd.f32 %v949_v51, %v861_v52  ;;  %v774_v4 = vadd.f32 %v773_v54, %v685_v56 }
  0xdb   :  { %v1020_v60 = vmax.f32 %v950_v55, 0.0 }
  0xdd   :  { %v1052_v3 = vpack.c.bf16 %v1020_v60, %v1020_v60  ;;  %v1555_v60 = vld [vmem:[%s2263_s0 + $0x1c4] sm:$0xf] }
  0xde   :  { %v862_v5 = vpop.f32.mrf.mxu2  ;;  %v687_v10 = vpop.f32.mrf.mxu0 }
  0xdf   :  { %v951_v6 = vpop.f32.mrf.mxu3  ;;  %1085 = vst.msk [vmem:[%s2264_s3 + $0x18] sm:$0xf] %vm1078_vm0, %v1052_v3  ;;  %v863_v9 = vadd.f32 %v862_v5, %v774_v4  ;;  %v776_v11 = vpop.f32.mrf.mxu1  ;;  %v688_v14 = vadd.f32 %v1907_v0, %v687_v10  ;;  %v1351_v3 = vld [vmem:[%s2263_s0 + $0x1d8] sm:$0xf0] }
  0xe1   :  { %v952_v15 = vadd.f32 %v951_v6, %v863_v9  ;;  %726 = vmatmul.bf16.gmra.mxu0 %v1310_v7  ;;  %v777_v17 = vadd.f32 %v776_v11, %v688_v14  ;;  %v1346_v9 = vor.u32 %v1555_v60, %v1343_v62  ;;  %v1354_v14 = vor.u32 %v1556_v2, %v1351_v3 }
  0xe2   :  { %815 = vmatmul.bf16.gmra.mxu1 %v1314_v8  ;;  %v1342_v8 = vor.u32 %v1557_v59, %v1341_v58 }
  0xe3   :  { %v1021_v16 = vmax.f32 %v952_v15, 0.0  ;;  %904 = vmatmul.bf16.gmra.mxu2 %v1318_v12 }
  0xe4   :  { %993 = vmatmul.bf16.gmra.mxu3 %v1322_v13  ;;  %v1350_v13 = vor.u32 %v1558_v1, %v1349_v63 }
  0xe5   :  { %v1053_v18 = vpack.c.bf16 %v1021_v16, %v1021_v16 }
  0xe6   :  { %v865_v19 = vpop.f32.mrf.mxu2  ;;  %v689_v22 = vpop.f32.mrf.mxu0 }
  0xe7   :  { %v954_v20 = vpop.f32.mrf.mxu3  ;;  %1086 = vst.msk [vmem:[%s2264_s3 + $0x1c] sm:$0xf] %vm1078_vm0, %v1053_v18  ;;  %v866_v21 = vadd.f32 %v865_v19, %v777_v17  ;;  %v778_v23 = vpop.f32.mrf.mxu1  ;;  %v690_v25 = vadd.f32 %v1907_v0, %v689_v22 }
  0xe9   :  { %v955_v24 = vadd.f32 %v954_v20, %v866_v21  ;;  %v779_v36 = vadd.f32 %v778_v23, %v690_v25 }
  0xeb   :  { %v1022_v29 = vmax.f32 %v955_v24, 0.0 }
  0xed   :  { %v1054_v35 = vpack.c.bf16 %v1022_v29, %v1022_v29  ;;  %v1559_v29 = vld [vmem:[%s2263_s0 + $0x1e4] sm:$0xf] }
  0xee   :  { %v867_v37 = vpop.f32.mrf.mxu2  ;;  %v692_v42 = vpop.f32.mrf.mxu0 }
  0xef   :  { %v956_v38 = vpop.f32.mrf.mxu3  ;;  %1087 = vst.msk [vmem:[%s2264_s3 + $0x20] sm:$0xf] %vm1078_vm0, %v1054_v35  ;;  %v868_v41 = vadd.f32 %v867_v37, %v779_v36  ;;  %v781_v43 = vpop.f32.mrf.mxu1  ;;  %v693_v46 = vadd.f32 %v1907_v0, %v692_v42  ;;  %v1367_v35 = vld [vmem:[%s2263_s0 + $0x1f8] sm:$0xf0] }
  0xf1   :  { %v957_v47 = vadd.f32 %v956_v38, %v868_v41  ;;  %731 = vmatmul.bf16.gmra.mxu0 %v1326_v39  ;;  %v782_v49 = vadd.f32 %v781_v43, %v693_v46  ;;  %v1362_v41 = vor.u32 %v1559_v29, %v1359_v31  ;;  %v1370_v46 = vor.u32 %v1560_v34, %v1367_v35 }
  0xf2   :  { %820 = vmatmul.bf16.gmra.mxu1 %v1330_v40  ;;  %v1358_v40 = vor.u32 %v1561_v28, %v1357_v27 }
  0xf3   :  { %v1023_v48 = vmax.f32 %v957_v47, 0.0  ;;  %909 = vmatmul.bf16.gmra.mxu2 %v1334_v44 }
  0xf4   :  { %998 = vmatmul.bf16.gmra.mxu3 %v1338_v45  ;;  %v1366_v45 = vor.u32 %v1562_v33, %v1365_v32 }
  0xf5   :  { %v1055_v50 = vpack.c.bf16 %v1023_v48, %v1023_v48 }
  0xf6   :  { %v870_v51 = vpop.f32.mrf.mxu2  ;;  %v694_v54 = vpop.f32.mrf.mxu0 }
  0xf7   :  { %v959_v52 = vpop.f32.mrf.mxu3  ;;  %1088 = vst.msk [vmem:[%s2264_s3 + $0x24] sm:$0xf] %vm1078_vm0, %v1055_v50  ;;  %v871_v53 = vadd.f32 %v870_v51, %v782_v49  ;;  %v783_v55 = vpop.f32.mrf.mxu1  ;;  %v695_v57 = vadd.f32 %v1907_v0, %v694_v54 }
  0xf9   :  { %v960_v56 = vadd.f32 %v959_v52, %v871_v53  ;;  %v784_v5 = vadd.f32 %v783_v55, %v695_v57 }
  0xfb   :  { %v1024_v61 = vmax.f32 %v960_v56, 0.0 }
  0xfd   :  { %v1056_v4 = vpack.c.bf16 %v1024_v61, %v1024_v61 }
  0xfe   :  { %v872_v6 = vpop.f32.mrf.mxu2  ;;  %v697_v11 = vpop.f32.mrf.mxu0 }
  0xff   :  { %v961_v7 = vpop.f32.mrf.mxu3  ;;  %1089 = vst.msk [vmem:[%s2264_s3 + $0x28] sm:$0xf] %vm1078_vm0, %v1056_v4  ;;  %v873_v10 = vadd.f32 %v872_v6, %v784_v5  ;;  %v786_v12 = vpop.f32.mrf.mxu1  ;;  %v698_v15 = vadd.f32 %v1907_v0, %v697_v11 }
 0x101   :  { %v962_v16 = vadd.f32 %v961_v7, %v873_v10  ;;  %736 = vmatmul.bf16.gmra.mxu0 %v1342_v8  ;;  %v787_v18 = vadd.f32 %v786_v12, %v698_v15 }
 0x102   :  { %825 = vmatmul.bf16.gmra.mxu1 %v1346_v9 }
 0x103   :  { %v1025_v17 = vmax.f32 %v962_v16, 0.0  ;;  %914 = vmatmul.bf16.gmra.mxu2 %v1350_v13 }
 0x104   :  { %1003 = vmatmul.bf16.gmra.mxu3 %v1354_v14 }
 0x105   :  { %v1057_v19 = vpack.c.bf16 %v1025_v17, %v1025_v17 }
 0x106   :  { %v875_v20 = vpop.f32.mrf.mxu2  ;;  %v699_v23 = vpop.f32.mrf.mxu0 }
 0x107   :  { %v964_v21 = vpop.f32.mrf.mxu3  ;;  %1090 = vst.msk [vmem:[%s2264_s3 + $0x2c] sm:$0xf] %vm1078_vm0, %v1057_v19  ;;  %v876_v22 = vadd.f32 %v875_v20, %v787_v18  ;;  %v788_v24 = vpop.f32.mrf.mxu1  ;;  %v700_v26 = vadd.f32 %v1907_v0, %v699_v23 }
 0x109   :  { %v965_v25 = vadd.f32 %v964_v21, %v876_v22  ;;  %v789_v37 = vadd.f32 %v788_v24, %v700_v26 }
 0x10b   :  { %v1026_v30 = vmax.f32 %v965_v25, 0.0 }
 0x10d   :  { %v1058_v36 = vpack.c.bf16 %v1026_v30, %v1026_v30 }
 0x10e   :  { %v877_v38 = vpop.f32.mrf.mxu2  ;;  %v702_v43 = vpop.f32.mrf.mxu0 }
 0x10f   :  { %v966_v39 = vpop.f32.mrf.mxu3  ;;  %1091 = vst.msk [vmem:[%s2264_s3 + $0x30] sm:$0xf] %vm1078_vm0, %v1058_v36  ;;  %v878_v42 = vadd.f32 %v877_v38, %v789_v37  ;;  %v791_v44 = vpop.f32.mrf.mxu1  ;;  %v703_v47 = vadd.f32 %v1907_v0, %v702_v43 }
 0x111   :  { %v967_v48 = vadd.f32 %v966_v39, %v878_v42  ;;  %741 = vmatmul.bf16.gmra.mxu0 %v1358_v40  ;;  %v792_v50 = vadd.f32 %v791_v44, %v703_v47 }
 0x112   :  { %830 = vmatmul.bf16.gmra.mxu1 %v1362_v41 }
 0x113   :  { %v1027_v49 = vmax.f32 %v967_v48, 0.0  ;;  %919 = vmatmul.bf16.gmra.mxu2 %v1366_v45 }
 0x114   :  { %1008 = vmatmul.bf16.gmra.mxu3 %v1370_v46 }
 0x115   :  { %v1059_v51 = vpack.c.bf16 %v1027_v49, %v1027_v49 }
 0x116   :  { %v880_v52 = vpop.f32.mrf.mxu2  ;;  %v704_v55 = vpop.f32.mrf.mxu0 }
 0x117   :  { %v969_v53 = vpop.f32.mrf.mxu3  ;;  %1092 = vst.msk [vmem:[%s2264_s3 + $0x34] sm:$0xf] %vm1078_vm0, %v1059_v51  ;;  %v881_v54 = vadd.f32 %v880_v52, %v792_v50  ;;  %v793_v56 = vpop.f32.mrf.mxu1  ;;  %v705_v58 = vadd.f32 %v1907_v0, %v704_v55 }
 0x119   :  { %v970_v57 = vadd.f32 %v969_v53, %v881_v54  ;;  %v794_v61 = vadd.f32 %v793_v56, %v705_v58 }
 0x11b   :  { %v1028_v59 = vmax.f32 %v970_v57, 0.0 }
 0x11d   :  { %v1060_v60 = vpack.c.bf16 %v1028_v59, %v1028_v59 }
 0x11e   :  { %v882_v62 = vpop.f32.mrf.mxu2  ;;  %v707_v2 = vpop.f32.mrf.mxu0 }
 0x11f   :  { %v971_v63 = vpop.f32.mrf.mxu3  ;;  %1093 = vst.msk [vmem:[%s2264_s3 + $0x38] sm:$0xf] %vm1078_vm0, %v1060_v60  ;;  %v883_v1 = vadd.f32 %v882_v62, %v794_v61  ;;  %v796_v3 = vpop.f32.mrf.mxu1  ;;  %v708_v4 = vadd.f32 %v1907_v0, %v707_v2 }
 0x121   :  { %v972_v5 = vadd.f32 %v971_v63, %v883_v1  ;;  %v797_v7 = vadd.f32 %v796_v3, %v708_v4 }
 0x123   :  { %v1029_v6 = vmax.f32 %v972_v5, 0.0 }
 0x125   :  { %v1061_v8 = vpack.c.bf16 %v1029_v6, %v1029_v6 }
 0x126   :  { %v885_v9 = vpop.f32.mrf.mxu2  ;;  %v709_v12 = vpop.f32.mrf.mxu0 }
 0x127   :  { %v974_v10 = vpop.f32.mrf.mxu3  ;;  %1094 = vst.msk [vmem:[%s2264_s3 + $0x3c] sm:$0xf] %vm1078_vm0, %v1061_v8  ;;  %v886_v11 = vadd.f32 %v885_v9, %v797_v7  ;;  %v798_v13 = vpop.f32.mrf.mxu1  ;;  %v710_v15 = vadd.f32 %v1907_v0, %v709_v12 }
 0x129   :  { %v975_v14 = vadd.f32 %v974_v10, %v886_v11  ;;  %v799_v18 = vadd.f32 %v798_v13, %v710_v15 }
 0x12b   :  { %v1030_v16 = vmax.f32 %v975_v14, 0.0 }
 0x12d   :  { %v1062_v17 = vpack.c.bf16 %v1030_v16, %v1030_v16 }
 0x12e   :  { %v887_v19 = vpop.f32.mrf.mxu2  ;;  %v712_v22 = vpop.f32.mrf.mxu0 }
 0x12f   :  { %v976_v20 = vpop.f32.mrf.mxu3  ;;  %1095 = vst.msk [vmem:[%s2264_s3 + $0x40] sm:$0xf] %vm1078_vm0, %v1062_v17  ;;  %v888_v21 = vadd.f32 %v887_v19, %v799_v18  ;;  %v801_v23 = vpop.f32.mrf.mxu1  ;;  %v713_v24 = vadd.f32 %v1907_v0, %v712_v22 }
 0x131   :  { %v977_v25 = vadd.f32 %v976_v20, %v888_v21  ;;  %v802_v27 = vadd.f32 %v801_v23, %v713_v24 }
 0x133   :  { %v1031_v26 = vmax.f32 %v977_v25, 0.0 }
 0x135   :  { %v1063_v28 = vpack.c.bf16 %v1031_v26, %v1031_v26 }
 0x136   :  { %v890_v29 = vpop.f32.mrf.mxu2  ;;  %v714_v32 = vpop.f32.mrf.mxu0 }
 0x137   :  { %v979_v30 = vpop.f32.mrf.mxu3  ;;  %1096 = vst.msk [vmem:[%s2264_s3 + $0x44] sm:$0xf] %vm1078_vm0, %v1063_v28  ;;  %v891_v31 = vadd.f32 %v890_v29, %v802_v27  ;;  %v803_v33 = vpop.f32.mrf.mxu1  ;;  %v715_v35 = vadd.f32 %v1907_v0, %v714_v32 }
 0x139   :  { %v980_v34 = vadd.f32 %v979_v30, %v891_v31  ;;  %v804_v38 = vadd.f32 %v803_v33, %v715_v35 }
 0x13b   :  { %v1032_v36 = vmax.f32 %v980_v34, 0.0 }
 0x13d   :  { %v1064_v37 = vpack.c.bf16 %v1032_v36, %v1032_v36 }
 0x13e   :  { %v892_v39 = vpop.f32.mrf.mxu2  ;;  %v717_v42 = vpop.f32.mrf.mxu0 }
 0x13f   :  { %v981_v40 = vpop.f32.mrf.mxu3  ;;  %1097 = vst.msk [vmem:[%s2264_s3 + $0x48] sm:$0xf] %vm1078_vm0, %v1064_v37  ;;  %v893_v41 = vadd.f32 %v892_v39, %v804_v38  ;;  %v806_v43 = vpop.f32.mrf.mxu1  ;;  %v718_v44 = vadd.f32 %v1907_v0, %v717_v42 }
 0x141   :  { %v982_v45 = vadd.f32 %v981_v40, %v893_v41  ;;  %v807_v47 = vadd.f32 %v806_v43, %v718_v44 }
 0x143   :  { %v1033_v46 = vmax.f32 %v982_v45, 0.0 }
 0x145   :  { %v1065_v48 = vpack.c.bf16 %v1033_v46, %v1033_v46 }
 0x146   :  { %v895_v49 = vpop.f32.mrf.mxu2  ;;  %v719_v52 = vpop.f32.mrf.mxu0 }
 0x147   :  { %v984_v50 = vpop.f32.mrf.mxu3  ;;  %1098 = vst.msk [vmem:[%s2264_s3 + $0x4c] sm:$0xf] %vm1078_vm0, %v1065_v48  ;;  %v896_v51 = vadd.f32 %v895_v49, %v807_v47  ;;  %v808_v53 = vpop.f32.mrf.mxu1  ;;  %v720_v55 = vadd.f32 %v1907_v0, %v719_v52 }
 0x149   :  { %v985_v54 = vadd.f32 %v984_v50, %v896_v51  ;;  %v809_v58 = vadd.f32 %v808_v53, %v720_v55 }
 0x14b   :  { %v1034_v56 = vmax.f32 %v985_v54, 0.0 }
 0x14d   :  { %v1066_v57 = vpack.c.bf16 %v1034_v56, %v1034_v56 }
 0x14e   :  { %v897_v59 = vpop.f32.mrf.mxu2  ;;  %v722_v62 = vpop.f32.mrf.mxu0 }
 0x14f   :  { %v986_v60 = vpop.f32.mrf.mxu3  ;;  %1099 = vst.msk [vmem:[%s2264_s3 + $0x50] sm:$0xf] %vm1078_vm0, %v1066_v57  ;;  %v898_v61 = vadd.f32 %v897_v59, %v809_v58  ;;  %v811_v63 = vpop.f32.mrf.mxu1  ;;  %v723_v1 = vadd.f32 %v1907_v0, %v722_v62 }
 0x151   :  { %v987_v2 = vadd.f32 %v986_v60, %v898_v61  ;;  %v812_v4 = vadd.f32 %v811_v63, %v723_v1 }
 0x153   :  { %v1035_v3 = vmax.f32 %v987_v2, 0.0 }
 0x155   :  { %v1067_v5 = vpack.c.bf16 %v1035_v3, %v1035_v3 }
 0x156   :  { %v900_v6 = vpop.f32.mrf.mxu2  ;;  %v724_v9 = vpop.f32.mrf.mxu0 }
 0x157   :  { %v989_v7 = vpop.f32.mrf.mxu3  ;;  %1100 = vst.msk [vmem:[%s2264_s3 + $0x54] sm:$0xf] %vm1078_vm0, %v1067_v5  ;;  %v901_v8 = vadd.f32 %v900_v6, %v812_v4  ;;  %v813_v10 = vpop.f32.mrf.mxu1  ;;  %v725_v12 = vadd.f32 %v1907_v0, %v724_v9 }
 0x159   :  { %v990_v11 = vadd.f32 %v989_v7, %v901_v8  ;;  %v814_v15 = vadd.f32 %v813_v10, %v725_v12 }
 0x15b   :  { %v1036_v13 = vmax.f32 %v990_v11, 0.0 }
 0x15d   :  { %v1068_v14 = vpack.c.bf16 %v1036_v13, %v1036_v13 }
 0x15e   :  { %v902_v16 = vpop.f32.mrf.mxu2  ;;  %v727_v19 = vpop.f32.mrf.mxu0 }
 0x15f   :  { %v991_v17 = vpop.f32.mrf.mxu3  ;;  %1101 = vst.msk [vmem:[%s2264_s3 + $0x58] sm:$0xf] %vm1078_vm0, %v1068_v14  ;;  %v903_v18 = vadd.f32 %v902_v16, %v814_v15  ;;  %v816_v20 = vpop.f32.mrf.mxu1  ;;  %v728_v21 = vadd.f32 %v1907_v0, %v727_v19 }
 0x161   :  { %v992_v22 = vadd.f32 %v991_v17, %v903_v18  ;;  %v817_v24 = vadd.f32 %v816_v20, %v728_v21 }
 0x163   :  { %v1037_v23 = vmax.f32 %v992_v22, 0.0 }
 0x165   :  { %v1069_v25 = vpack.c.bf16 %v1037_v23, %v1037_v23 }
 0x166   :  { %v905_v26 = vpop.f32.mrf.mxu2  ;;  %v729_v29 = vpop.f32.mrf.mxu0 }
 0x167   :  { %v994_v27 = vpop.f32.mrf.mxu3  ;;  %1102 = vst.msk [vmem:[%s2264_s3 + $0x5c] sm:$0xf] %vm1078_vm0, %v1069_v25  ;;  %v906_v28 = vadd.f32 %v905_v26, %v817_v24  ;;  %v818_v30 = vpop.f32.mrf.mxu1  ;;  %v730_v32 = vadd.f32 %v1907_v0, %v729_v29 }
 0x169   :  { %v995_v31 = vadd.f32 %v994_v27, %v906_v28  ;;  %v819_v35 = vadd.f32 %v818_v30, %v730_v32 }
 0x16b   :  { %v1038_v33 = vmax.f32 %v995_v31, 0.0 }
 0x16d   :  { %v1070_v34 = vpack.c.bf16 %v1038_v33, %v1038_v33 }
 0x16e   :  { %v907_v36 = vpop.f32.mrf.mxu2  ;;  %v732_v39 = vpop.f32.mrf.mxu0 }
 0x16f   :  { %v996_v37 = vpop.f32.mrf.mxu3  ;;  %1103 = vst.msk [vmem:[%s2264_s3 + $0x60] sm:$0xf] %vm1078_vm0, %v1070_v34  ;;  %v908_v38 = vadd.f32 %v907_v36, %v819_v35  ;;  %v821_v40 = vpop.f32.mrf.mxu1  ;;  %v733_v41 = vadd.f32 %v1907_v0, %v732_v39 }
 0x171   :  { %v997_v42 = vadd.f32 %v996_v37, %v908_v38  ;;  %v822_v44 = vadd.f32 %v821_v40, %v733_v41 }
 0x173   :  { %v1039_v43 = vmax.f32 %v997_v42, 0.0 }
 0x175   :  { %v1071_v45 = vpack.c.bf16 %v1039_v43, %v1039_v43 }
 0x176   :  { %v910_v46 = vpop.f32.mrf.mxu2  ;;  %v734_v49 = vpop.f32.mrf.mxu0 }
 0x177   :  { %v999_v47 = vpop.f32.mrf.mxu3  ;;  %1104 = vst.msk [vmem:[%s2264_s3 + $0x64] sm:$0xf] %vm1078_vm0, %v1071_v45  ;;  %v911_v48 = vadd.f32 %v910_v46, %v822_v44  ;;  %v823_v50 = vpop.f32.mrf.mxu1  ;;  %v735_v52 = vadd.f32 %v1907_v0, %v734_v49 }
 0x179   :  { %v1000_v51 = vadd.f32 %v999_v47, %v911_v48  ;;  %v824_v55 = vadd.f32 %v823_v50, %v735_v52 }
 0x17b   :  { %v1040_v53 = vmax.f32 %v1000_v51, 0.0 }
 0x17d   :  { %v1072_v54 = vpack.c.bf16 %v1040_v53, %v1040_v53 }
 0x17e   :  { %v912_v56 = vpop.f32.mrf.mxu2  ;;  %v737_v59 = vpop.f32.mrf.mxu0 }
 0x17f   :  { %v1001_v57 = vpop.f32.mrf.mxu3  ;;  %1105 = vst.msk [vmem:[%s2264_s3 + $0x68] sm:$0xf] %vm1078_vm0, %v1072_v54  ;;  %v913_v58 = vadd.f32 %v912_v56, %v824_v55  ;;  %v826_v60 = vpop.f32.mrf.mxu1  ;;  %v738_v61 = vadd.f32 %v1907_v0, %v737_v59 }
 0x181   :  { %v1002_v62 = vadd.f32 %v1001_v57, %v913_v58  ;;  %v827_v1 = vadd.f32 %v826_v60, %v738_v61 }
 0x183   :  { %v1041_v63 = vmax.f32 %v1002_v62, 0.0 }
 0x185   :  { %v1073_v2 = vpack.c.bf16 %v1041_v63, %v1041_v63 }
 0x186   :  { %v915_v3 = vpop.f32.mrf.mxu2  ;;  %v739_v6 = vpop.f32.mrf.mxu0 }
 0x187   :  { %v1004_v4 = vpop.f32.mrf.mxu3  ;;  %1106 = vst.msk [vmem:[%s2264_s3 + $0x6c] sm:$0xf] %vm1078_vm0, %v1073_v2  ;;  %v916_v5 = vadd.f32 %v915_v3, %v827_v1  ;;  %v828_v7 = vpop.f32.mrf.mxu1  ;;  %v740_v9 = vadd.f32 %v1907_v0, %v739_v6 }
 0x189   :  { %v1005_v8 = vadd.f32 %v1004_v4, %v916_v5  ;;  %v829_v12 = vadd.f32 %v828_v7, %v740_v9 }
 0x18b   :  { %v1042_v10 = vmax.f32 %v1005_v8, 0.0 }
 0x18d   :  { %v1074_v11 = vpack.c.bf16 %v1042_v10, %v1042_v10 }
 0x18e   :  { %v917_v13 = vpop.f32.mrf.mxu2  ;;  %v742_v16 = vpop.f32.mrf.mxu0 }
 0x18f   :  { %v1006_v14 = vpop.f32.mrf.mxu3  ;;  %1107 = vst.msk [vmem:[%s2264_s3 + $0x70] sm:$0xf] %vm1078_vm0, %v1074_v11  ;;  %v918_v15 = vadd.f32 %v917_v13, %v829_v12  ;;  %v743_v17 = vadd.f32 %v1907_v0, %v742_v16  ;;  %v831_v19 = vpop.f32.mrf.mxu1 }
 0x191   :  { %v1007_v18 = vadd.f32 %v1006_v14, %v918_v15  ;;  %v832_v21 = vadd.f32 %v831_v19, %v743_v17 }
 0x193   :  { %v1043_v20 = vmax.f32 %v1007_v18, 0.0 }
 0x195   :  { %v1075_v22 = vpack.c.bf16 %v1043_v20, %v1043_v20 }
 0x196   :  { %v920_v23 = vpop.f32.mrf.mxu2  ;;  %v744_v26 = vpop.f32.mrf.mxu0 }
 0x197   :  { %v1009_v24 = vpop.f32.mrf.mxu3  ;;  %1108 = vst.msk [vmem:[%s2264_s3 + $0x74] sm:$0xf] %vm1078_vm0, %v1075_v22  ;;  %v921_v25 = vadd.f32 %v920_v23, %v832_v21  ;;  %v745_v28 = vadd.f32 %v1907_v0, %v744_v26  ;;  %v833_v30 = vpop.f32.mrf.mxu1 }
 0x199   :  { %v1010_v27 = vadd.f32 %v1009_v24, %v921_v25  ;;  %v834_v32 = vadd.f32 %v833_v30, %v745_v28 }
 0x19b   :  { %v1044_v29 = vmax.f32 %v1010_v27, 0.0 }
 0x19d   :  { %v1076_v31 = vpack.c.bf16 %v1044_v29, %v1044_v29 }
 0x19e   :  { %v922_v33 = vpop.f32.mrf.mxu2 }
 0x19f   :  { %1109 = vst.msk [vmem:[%s2264_s3 + $0x78] sm:$0xf] %vm1078_vm0, %v1076_v31  ;;  %v923_v34 = vadd.f32 %v922_v33, %v834_v32  ;;  %v1011_v35 = vpop.f32.mrf.mxu3 }
 0x1a1   :  { %v1012_v36 = vadd.f32 %v1011_v35, %v923_v34 }
 0x1a3   :  { %v1045_v37 = vmax.f32 %v1012_v36, 0.0 }
 0x1a5   :  { %v1077_v38 = vpack.c.bf16 %v1045_v37, %v1045_v37 }
 0x1a7   :  { %1110 = vst.msk [vmem:[%s2264_s3 + $0x7c] sm:$0xf] %vm1078_vm0, %v1077_v38 }

// kernel: _lambda_.6
= control target key start
LH: loop header
LB: loop body
LE: loop exit
PB: predicated region body
PF: predicated region fallthrough
CT: control target
= control target key end

     0   :  { %vm555_vm0 = vcmask 523264   ;;  %vm857_vm1 = vcmask 519168   ;;  %s1788_s1 = inlined_call_operand.vmem [shape: bf16[576,64], index: 1, kind: input, shape index: {}]   ;;  %s1789_s2 = inlined_call_operand.vmem [shape: f32[1,64], index: 2, kind: input, shape index: {}]   ;;  %s1790_s0 = inlined_call_operand.vmem [shape: bf16[128,576], index: 0, kind: input, shape index: {}]   ;;  %s1791_s3 = inlined_call_operand.vmem [shape: bf16[128,64], index: 3, kind: output, shape index: {}]  }
   0x1   :  { %v1237_v0 = vld [vmem:[%s1788_s1 + $0x38] sm:$0xff]  ;;  %v1236_v1 = vld [vmem:[%s1788_s1 + $0x30] sm:$0xff]  ;;  %v1235_v2 = vld [vmem:[%s1788_s1 + $0x28] sm:$0xff] }
   0x2   :  { %1266 = vmatpush.bf16.msra.mxu1 %v1237_v0  ;;  %1267 = vmatpush.bf16.msra.mxu2 %v1237_v0  ;;  %v1234_v3 = vld [vmem:[%s1788_s1 + $0x20] sm:$0xff]  ;;  %v1233_v4 = vld [vmem:[%s1788_s1 + $0x18] sm:$0xff]  ;;  %v1232_v5 = vld [vmem:[%s1788_s1 + $0x10] sm:$0xff] }
   0x3   :  { %1268 = vmatpush.bf16.msra.mxu3 %v1237_v0  ;;  %580 = vmatpush.bf16.msra.mxu0 %v1237_v0  ;;  %v1231_v6 = vld [vmem:[%s1788_s1 + $0x8] sm:$0xff]  ;;  %v1230_v7 = vld [vmem:[%s1788_s1] sm:$0xff]  ;;  %v920_v8 = vld [vmem:[%s1790_s0 + $0x50] sm:$0xf] }
   0x4   :  { %v1202_v9 = vld [vmem:[%s1790_s0 + $0x60] sm:$0xf0]  ;;  %v960_v10 = vld [vmem:[%s1790_s0 + $0xa0] sm:$0xf]  ;;  %v1212_v11 = vld [vmem:[%s1790_s0 + $0xb0] sm:$0xf0] }
   0x5   :  { %v1000_v12 = vld [vmem:[%s1790_s0 + $0xf0] sm:$0xf]  ;;  %v1222_v13 = vld [vmem:[%s1790_s0 + $0x100] sm:$0xf0]  ;;  %v880_v14 = vld [vmem:[%s1790_s0] sm:$0xf]  ;;  %v921_v18 = vor.u32 %v1202_v9, %v920_v8  ;;  %v961_v19 = vor.u32 %v1212_v11, %v960_v10 }
   0x6   :  { %1269 = vmatpush.bf16.msra.mxu1 %v1236_v1  ;;  %1270 = vmatpush.bf16.msra.mxu2 %v1236_v1  ;;  %v1192_v15 = vld [vmem:[%s1790_s0 + $0x10] sm:$0xf0]  ;;  %v1253_v16 = vld [vmem:[%s1788_s1 + $0xb8] sm:$0xff]  ;;  %v1001_v20 = vor.u32 %v1222_v13, %v1000_v12  ;;  %v1251_v28 = vld [vmem:[%s1788_s1 + $0xa8] sm:$0xff] }
   0x7   :  { %1271 = vmatpush.bf16.msra.mxu3 %v1236_v1  ;;  %581 = vmatpush.bf16.msra.mxu0 %v1236_v1  ;;  %v1245_v17 = vld [vmem:[%s1788_s1 + $0x78] sm:$0xff]  ;;  %v881_v21 = vor.u32 %v1192_v15, %v880_v14  ;;  %v1252_v24 = vld [vmem:[%s1788_s1 + $0xb0] sm:$0xff]  ;;  %v1243_v29 = vld [vmem:[%s1788_s1 + $0x68] sm:$0xff] }
   0x8   :  { %v1261_v22 = vld [vmem:[%s1788_s1 + $0xf8] sm:$0xff]  ;;  %v1244_v25 = vld [vmem:[%s1788_s1 + $0x70] sm:$0xff]  ;;  %v1259_v30 = vld [vmem:[%s1788_s1 + $0xe8] sm:$0xff] }
   0x9   :  { %v1265_v23 = vld [vmem:[%s1788_s1 + $0x118] sm:$0xff]  ;;  %v1260_v26 = vld [vmem:[%s1788_s1 + $0xf0] sm:$0xff]  ;;  %v1263_v31 = vld [vmem:[%s1788_s1 + $0x108] sm:$0xff] }
   0xa   :  { %1272 = vmatpush.bf16.msra.mxu1 %v1235_v2  ;;  %1273 = vmatpush.bf16.msra.mxu2 %v1235_v2  ;;  %v1264_v27 = vld [vmem:[%s1788_s1 + $0x110] sm:$0xff]  ;;  %v1250_v32 = vld [vmem:[%s1788_s1 + $0xa0] sm:$0xff]  ;;  %v940_v35 = vld [vmem:[%s1790_s0 + $0x78] sm:$0xf] }
   0xb   :  { %1274 = vmatpush.bf16.msra.mxu3 %v1235_v2  ;;  %582 = vmatpush.bf16.msra.mxu0 %v1235_v2  ;;  %v1242_v33 = vld [vmem:[%s1788_s1 + $0x60] sm:$0xff]  ;;  %v1207_v36 = vld [vmem:[%s1790_s0 + $0x88] sm:$0xf0]  ;;  %v980_v37 = vld [vmem:[%s1790_s0 + $0xc8] sm:$0xf] }
   0xc   :  { %v1258_v34 = vld [vmem:[%s1788_s1 + $0xe0] sm:$0xff]  ;;  %v1217_v38 = vld [vmem:[%s1790_s0 + $0xd8] sm:$0xf0]  ;;  %v1020_v39 = vld [vmem:[%s1790_s0 + $0x118] sm:$0xf]  ;;  %v941_v46 = vor.u32 %v1207_v36, %v940_v35 }
   0xd   :  { %v1227_v40 = vld [vmem:[%s1790_s0 + $0x128] sm:$0xf0]  ;;  %v900_v41 = vld [vmem:[%s1790_s0 + $0x28] sm:$0xf]  ;;  %v1197_v42 = vld [vmem:[%s1790_s0 + $0x38] sm:$0xf0]  ;;  %v981_v47 = vor.u32 %v1217_v38, %v980_v37 }
   0xe   :  { %1275 = vmatpush.bf16.msra.mxu1 %v1234_v3  ;;  %1276 = vmatpush.bf16.msra.mxu2 %v1234_v3  ;;  %v1262_v43 = vld [vmem:[%s1788_s1 + $0x100] sm:$0xff]  ;;  %v1249_v44 = vld [vmem:[%s1788_s1 + $0x98] sm:$0xff]  ;;  %v1021_v48 = vor.u32 %v1227_v40, %v1020_v39  ;;  %v901_v49 = vor.u32 %v1197_v42, %v900_v41  ;;  %v1248_v51 = vld [vmem:[%s1788_s1 + $0x90] sm:$0xff] }
   0xf   :  { %1277 = vmatpush.bf16.msra.mxu3 %v1234_v3  ;;  %583 = vmatpush.bf16.msra.mxu0 %v1234_v3  ;;  %v1241_v45 = vld [vmem:[%s1788_s1 + $0x58] sm:$0xff]  ;;  %v1240_v52 = vld [vmem:[%s1788_s1 + $0x50] sm:$0xff]  ;;  %v1247_v54 = vld [vmem:[%s1788_s1 + $0x88] sm:$0xff] }
  0x10   :  { %v1257_v50 = vld [vmem:[%s1788_s1 + $0xd8] sm:$0xff]  ;;  %v1256_v53 = vld [vmem:[%s1788_s1 + $0xd0] sm:$0xff]  ;;  %v1239_v55 = vld [vmem:[%s1788_s1 + $0x48] sm:$0xff] }
  0x11   :  { %v1255_v56 = vld [vmem:[%s1788_s1 + $0xc8] sm:$0xff]  ;;  %v1246_v57 = vld [vmem:[%s1788_s1 + $0x80] sm:$0xff]  ;;  %v882_v61 = vld [vmem:[%s1790_s0 + $0x14] sm:$0xf0] }
  0x12   :  { %1278 = vmatpush.bf16.msra.mxu1 %v1233_v4  ;;  %1279 = vmatpush.bf16.msra.mxu2 %v1233_v4  ;;  %v1238_v58 = vld [vmem:[%s1788_s1 + $0x40] sm:$0xff]  ;;  %v888_v62 = vld [vmem:[%s1790_s0 + $0x8] sm:$0xf]  ;;  %v1193_v63 = vld [vmem:[%s1790_s0 + $0x18] sm:$0xf0] }
  0x13   :  { %1280 = vmatpush.bf16.msra.mxu3 %v1233_v4  ;;  %584 = vmatpush.bf16.msra.mxu0 %v1233_v4  ;;  %v1254_v59 = vld [vmem:[%s1788_s1 + $0xc0] sm:$0xff]  ;;  %v1191_v0 = vld [vmem:[%s1790_s0 + $0xc] sm:$0xf]  ;;  %v896_v2 = vld [vmem:[%s1790_s0 + $0x10] sm:$0xf] }
  0x14   :  { %v1190_v60 = vld [vmem:[%s1790_s0 + $0x4] sm:$0xf]  ;;  %v890_v1 = vld [vmem:[%s1790_s0 + $0x1c] sm:$0xf0]  ;;  %v1195_v8 = vld [vmem:[%s1790_s0 + $0x2c] sm:$0xf] }
  0x15   :  { %v1194_v3 = vld [vmem:[%s1790_s0 + $0x20] sm:$0xf0]  ;;  %v885_v4 = vor.u32 %v1190_v60, %v882_v61  ;;  %v902_v9 = vld [vmem:[%s1790_s0 + $0x3c] sm:$0xf0]  ;;  %v908_v10 = vld [vmem:[%s1790_s0 + $0x30] sm:$0xf] }
  0x16   :  { %1281 = vmatpush.bf16.msra.mxu1 %v1232_v5  ;;  %1282 = vmatpush.bf16.msra.mxu2 %v1232_v5  ;;  %v1198_v11 = vld [vmem:[%s1790_s0 + $0x40] sm:$0xf0]  ;;  %v1196_v12 = vld [vmem:[%s1790_s0 + $0x34] sm:$0xf]  ;;  %v910_v13 = vld [vmem:[%s1790_s0 + $0x44] sm:$0xf0] }
  0x17   :  { %1283 = vmatpush.bf16.msra.mxu3 %v1232_v5  ;;  %585 = vmatpush.bf16.msra.mxu0 %v1232_v5  ;;  %v889_v5 = vor.u32 %v1193_v63, %v888_v62  ;;  %v916_v14 = vld [vmem:[%s1790_s0 + $0x38] sm:$0xf]  ;;  %v1199_v15 = vld [vmem:[%s1790_s0 + $0x48] sm:$0xf0]  ;;  %v1208_v35 = vld [vmem:[%s1790_s0 + $0x90] sm:$0xf0] }
  0x18   :  { %v1206_v36 = vld [vmem:[%s1790_s0 + $0x84] sm:$0xf]  ;;  %v950_v37 = vld [vmem:[%s1790_s0 + $0x94] sm:$0xf0]  ;;  %v956_v38 = vld [vmem:[%s1790_s0 + $0x88] sm:$0xf] }
  0x19   :  { %v1209_v39 = vld [vmem:[%s1790_s0 + $0x98] sm:$0xf0]  ;;  %v953_v42 = vor.u32 %v1206_v36, %v950_v37  ;;  %v1216_v60 = vld [vmem:[%s1790_s0 + $0xd4] sm:$0xf]  ;;  %v990_v61 = vld [vmem:[%s1790_s0 + $0xe4] sm:$0xf0] }
  0x1a   :  { %1284 = vmatpush.bf16.msra.mxu1 %v1231_v6  ;;  %1285 = vmatpush.bf16.msra.mxu2 %v1231_v6  ;;  %v996_v62 = vld [vmem:[%s1790_s0 + $0xd8] sm:$0xf]  ;;  %v1219_v63 = vld [vmem:[%s1790_s0 + $0xe8] sm:$0xf0] }
  0x1b   :  { %1286 = vmatpush.bf16.msra.mxu3 %v1231_v6  ;;  %586 = vmatpush.bf16.msra.mxu0 %v1231_v6  ;;  %v893_v6 = vor.u32 %v1191_v0, %v890_v1 }
  0x1e   :  { %1287 = vmatpush.bf16.msra.mxu1 %v1230_v7  ;;  %1288 = vmatpush.bf16.msra.mxu2 %v1230_v7 }
  0x1f   :  { %1289 = vmatpush.bf16.msra.mxu3 %v1230_v7  ;;  %587 = vmatpush.bf16.msra.mxu0 %v1230_v7  ;;  %v897_v7 = vor.u32 %v1194_v3, %v896_v2  ;;  %v993_v2 = vor.u32 %v1216_v60, %v990_v61  ;;  %v997_v3 = vor.u32 %v1219_v63, %v996_v62 }
  0x21   :  { %598 = vmatmul.bf16.vlgmr.msra.gmra.mxu1 %v921_v18  ;;  %608 = vmatmul.bf16.vlgmr.msra.gmra.mxu2 %v961_v19  ;;  %v913_v18 = vor.u32 %v1196_v12, %v910_v13  ;;  %v917_v19 = vor.u32 %v1199_v15, %v916_v14 }
  0x22   :  { %678 = vmatpush.bf16.msrb.mxu2 %v1253_v16  ;;  %629 = vmatpush.bf16.msrb.mxu1 %v1245_v17  ;;  %v905_v16 = vor.u32 %v1195_v8, %v902_v9  ;;  %v909_v17 = vor.u32 %v1198_v11, %v908_v10  ;;  %v1221_v8 = vld [vmem:[%s1790_s0 + $0xfc] sm:$0xf]  ;;  %v1010_v9 = vld [vmem:[%s1790_s0 + $0x10c] sm:$0xf0]  ;;  %v1016_v10 = vld [vmem:[%s1790_s0 + $0x100] sm:$0xf] }
  0x23   :  { %618 = vmatmul.bf16.vlgmr.msra.gmra.mxu3 %v1001_v20  ;;  %588 = vmatmul.bf16.vlgmr.msra.gmra.mxu0 %v881_v21  ;;  %v1200_v20 = vld [vmem:[%s1790_s0 + $0x54] sm:$0xf]  ;;  %v922_v21 = vld [vmem:[%s1790_s0 + $0x64] sm:$0xf0]  ;;  %v1013_v15 = vor.u32 %v1221_v8, %v1010_v9 }
  0x24   :  { %727 = vmatpush.bf16.msrb.mxu3 %v1261_v22  ;;  %780 = vmatpush.bf16.msrb.mxu0 %v1265_v23  ;;  %v928_v22 = vld [vmem:[%s1790_s0 + $0x58] sm:$0xf]  ;;  %v1203_v23 = vld [vmem:[%s1790_s0 + $0x68] sm:$0xf0]  ;;  %v1224_v11 = vld [vmem:[%s1790_s0 + $0x110] sm:$0xf0] }
  0x26   :  { %679 = vmatpush.bf16.msrb.mxu2 %v1252_v24  ;;  %630 = vmatpush.bf16.msrb.mxu1 %v1244_v25  ;;  %v1201_v24 = vld [vmem:[%s1790_s0 + $0x5c] sm:$0xf]  ;;  %v930_v25 = vld [vmem:[%s1790_s0 + $0x6c] sm:$0xf0] }
  0x28   :  { %728 = vmatpush.bf16.msrb.mxu3 %v1260_v26  ;;  %781 = vmatpush.bf16.msrb.mxu0 %v1264_v27  ;;  %v936_v26 = vld [vmem:[%s1790_s0 + $0x60] sm:$0xf]  ;;  %v1204_v27 = vld [vmem:[%s1790_s0 + $0x70] sm:$0xf0] }
  0x2a   :  { %680 = vmatpush.bf16.msrb.mxu2 %v1251_v28  ;;  %631 = vmatpush.bf16.msrb.mxu1 %v1243_v29  ;;  %v925_v28 = vor.u32 %v1200_v20, %v922_v21  ;;  %v929_v29 = vor.u32 %v1203_v23, %v928_v22 }
  0x2c   :  { %729 = vmatpush.bf16.msrb.mxu3 %v1259_v30  ;;  %782 = vmatpush.bf16.msrb.mxu0 %v1263_v31  ;;  %v933_v30 = vor.u32 %v1201_v24, %v930_v25  ;;  %v937_v31 = vor.u32 %v1204_v27, %v936_v26  ;;  %v1225_v25 = vld [vmem:[%s1790_s0 + $0x11c] sm:$0xf]  ;;  %v1022_v26 = vld [vmem:[%s1790_s0 + $0x12c] sm:$0xf0]  ;;  %v1028_v27 = vld [vmem:[%s1790_s0 + $0x120] sm:$0xf] }
  0x2d   :  { %v1025_v36 = vor.u32 %v1225_v25, %v1022_v26 }
  0x2e   :  { %681 = vmatpush.bf16.msrb.mxu2 %v1250_v32  ;;  %632 = vmatpush.bf16.msrb.mxu1 %v1242_v33  ;;  %v1205_v32 = vld [vmem:[%s1790_s0 + $0x7c] sm:$0xf]  ;;  %v942_v33 = vld [vmem:[%s1790_s0 + $0x8c] sm:$0xf0] }
  0x2f   :  { %v945_v40 = vor.u32 %v1205_v32, %v942_v33  ;;  %v1229_v32 = vld [vmem:[%s1790_s0 + $0x138] sm:$0xf0] }
  0x30   :  { %730 = vmatpush.bf16.msrb.mxu3 %v1258_v34  ;;  %783 = vmatpush.bf16.msrb.mxu0 %v1262_v43  ;;  %v948_v34 = vld [vmem:[%s1790_s0 + $0x80] sm:$0xf]  ;;  %v957_v43 = vor.u32 %v1209_v39, %v956_v38 }
  0x31   :  { %603 = vmatmul.bf16.gmra.mxu1 %v941_v46  ;;  %613 = vmatmul.bf16.gmra.mxu2 %v981_v47  ;;  %v949_v41 = vor.u32 %v1208_v35, %v948_v34  ;;  %v968_v46 = vld [vmem:[%s1790_s0 + $0xa8] sm:$0xf]  ;;  %v1213_v47 = vld [vmem:[%s1790_s0 + $0xb8] sm:$0xf0] }
  0x32   :  { %682 = vmatpush.bf16.msrb.mxu2 %v1249_v44  ;;  %633 = vmatpush.bf16.msrb.mxu1 %v1241_v45  ;;  %v1210_v44 = vld [vmem:[%s1790_s0 + $0xa4] sm:$0xf]  ;;  %v962_v45 = vld [vmem:[%s1790_s0 + $0xb4] sm:$0xf0] }
  0x33   :  { %623 = vmatmul.bf16.gmra.mxu3 %v1021_v48  ;;  %593 = vmatmul.bf16.gmra.mxu0 %v901_v49  ;;  %v1211_v48 = vld [vmem:[%s1790_s0 + $0xac] sm:$0xf]  ;;  %v970_v49 = vld [vmem:[%s1790_s0 + $0xbc] sm:$0xf0] }
  0x34   :  { %731 = vmatpush.bf16.msrb.mxu3 %v1257_v50  ;;  %v976_v50 = vld [vmem:[%s1790_s0 + $0xb0] sm:$0xf] }
  0x36   :  { %683 = vmatpush.bf16.msrb.mxu2 %v1248_v51  ;;  %634 = vmatpush.bf16.msrb.mxu1 %v1240_v52  ;;  %v1214_v51 = vld [vmem:[%s1790_s0 + $0xc0] sm:$0xf0]  ;;  %v965_v52 = vor.u32 %v1210_v44, %v962_v45 }
  0x38   :  { %732 = vmatpush.bf16.msrb.mxu3 %v1256_v53  ;;  %v969_v53 = vor.u32 %v1213_v47, %v968_v46 }
  0x3a   :  { %684 = vmatpush.bf16.msrb.mxu2 %v1247_v54  ;;  %635 = vmatpush.bf16.msrb.mxu1 %v1239_v55  ;;  %v973_v54 = vor.u32 %v1211_v48, %v970_v49  ;;  %v977_v55 = vor.u32 %v1214_v51, %v976_v50 }
  0x3c   :  { %733 = vmatpush.bf16.msrb.mxu3 %v1255_v56  ;;  %v1215_v56 = vld [vmem:[%s1790_s0 + $0xcc] sm:$0xf] }
  0x3e   :  { %685 = vmatpush.bf16.msrb.mxu2 %v1246_v57  ;;  %636 = vmatpush.bf16.msrb.mxu1 %v1238_v58  ;;  %v982_v57 = vld [vmem:[%s1790_s0 + $0xdc] sm:$0xf0]  ;;  %v988_v58 = vld [vmem:[%s1790_s0 + $0xd0] sm:$0xf] }
  0x3f   :  { %v985_v0 = vor.u32 %v1215_v56, %v982_v57 }
  0x40   :  { %734 = vmatpush.bf16.msrb.mxu3 %v1254_v59  ;;  %v1218_v59 = vld [vmem:[%s1790_s0 + $0xe0] sm:$0xf0] }
  0x41   :  { %637 = vmatmul.bf16.vlgmr.msrb.gmra.mxu1 %v885_v4  ;;  %686 = vmatmul.bf16.vlgmr.msrb.gmra.mxu2 %v889_v5  ;;  %v989_v1 = vor.u32 %v1218_v59, %v988_v58  ;;  %v1220_v4 = vld [vmem:[%s1790_s0 + $0xf4] sm:$0xf]  ;;  %v1002_v5 = vld [vmem:[%s1790_s0 + $0x104] sm:$0xf0] }
  0x42   :  { %v1005_v12 = vor.u32 %v1220_v4, %v1002_v5 }
  0x43   :  { %735 = vmatmul.bf16.vlgmr.msrb.gmra.mxu3 %v893_v6  ;;  %1182 = vmatmul.msk.bf16.vlgmr.msrb.gmra.mxu0 %vm555_vm0, %v897_v7  ;;  %v1008_v6 = vld [vmem:[%s1790_s0 + $0xf8] sm:$0xf]  ;;  %v1223_v7 = vld [vmem:[%s1790_s0 + $0x108] sm:$0xf0] }
  0x44   :  { %v1009_v13 = vor.u32 %v1223_v7, %v1008_v6 }
  0x51   :  { %642 = vmatmul.bf16.gmra.mxu1 %v905_v16  ;;  %691 = vmatmul.bf16.gmra.mxu2 %v909_v17  ;;  %v1017_v16 = vor.u32 %v1224_v11, %v1016_v10 }
  0x53   :  { %740 = vmatmul.bf16.gmra.mxu3 %v913_v18  ;;  %1183 = vmatmul.msk.bf16.gmra.mxu0 %vm555_vm0, %v917_v19  ;;  %v1647_v18 = vld [vmem:[%s1789_s2] ss:$0 sm:$0xff] }
  0x61   :  { %647 = vmatmul.bf16.gmra.mxu1 %v925_v28  ;;  %696 = vmatmul.bf16.gmra.mxu2 %v929_v29  ;;  %v1228_v28 = vld [vmem:[%s1790_s0 + $0x130] sm:$0xf0]  ;;  %v1226_v29 = vld [vmem:[%s1790_s0 + $0x124] sm:$0xf] }
  0x62   :  { %v1029_v37 = vor.u32 %v1228_v28, %v1028_v27 }
  0x63   :  { %745 = vmatmul.bf16.gmra.mxu3 %v933_v30  ;;  %1184 = vmatmul.msk.bf16.gmra.mxu0 %vm555_vm0, %v937_v31  ;;  %v1030_v30 = vld [vmem:[%s1790_s0 + $0x134] sm:$0xf0]  ;;  %v1036_v31 = vld [vmem:[%s1790_s0 + $0x128] sm:$0xf] }
  0x71   :  { %652 = vmatmul.bf16.gmra.mxu1 %v945_v40  ;;  %701 = vmatmul.bf16.gmra.mxu2 %v949_v41  ;;  %v1033_v40 = vor.u32 %v1226_v29, %v1030_v30  ;;  %v1037_v41 = vor.u32 %v1229_v32, %v1036_v31 }
  0x73   :  { %750 = vmatmul.bf16.gmra.mxu3 %v953_v42  ;;  %1185 = vmatmul.msk.bf16.gmra.mxu0 %vm555_vm0, %v957_v43 }
  0x81   :  { %657 = vmatmul.bf16.gmra.mxu1 %v965_v52  ;;  %706 = vmatmul.bf16.gmra.mxu2 %v969_v53 }
  0x83   :  { %755 = vmatmul.bf16.gmra.mxu3 %v973_v54  ;;  %1186 = vmatmul.msk.bf16.gmra.mxu0 %vm555_vm0, %v977_v55 }
  0x91   :  { %662 = vmatmul.bf16.gmra.mxu1 %v985_v0  ;;  %711 = vmatmul.bf16.gmra.mxu2 %v989_v1 }
  0x93   :  { %760 = vmatmul.bf16.gmra.mxu3 %v993_v2  ;;  %1187 = vmatmul.msk.bf16.gmra.mxu0 %vm555_vm0, %v997_v3 }
  0x9e   :  { %v1641_v14 = vpop.f32.mrf.mxu1 }
  0xa0   :  { %v589_v17 = vpop.f32.mrf.mxu0 }
  0xa1   :  { %667 = vmatmul.bf16.gmra.mxu1 %v1005_v12  ;;  %716 = vmatmul.bf16.gmra.mxu2 %v1009_v13  ;;  %v590_v55 = vadd.f32 %v1647_v18, %v589_v17 }
  0xa3   :  { %765 = vmatmul.bf16.gmra.mxu3 %v1013_v15  ;;  %1188 = vmatmul.msk.bf16.gmra.mxu0 %vm555_vm0, %v1017_v16 }
  0xa4   :  { %v609_v19 = vpop.f32.mrf.mxu2 }
  0xa5   :  { %v1650_v20 = vadd.f32 %v1647_v18, %v609_v19 }
  0xa6   :  { %v619_v21 = vpop.f32.mrf.mxu3  ;;  %v1655_v23 = vpop.f32.mrf.mxu1 }
  0xa7   :  { %v1653_v22 = vadd.f32 %v1647_v18, %v619_v21 }
  0xa8   :  { %v591_v24 = vpop.f32.mrf.mxu0 }
  0xa9   :  { %v592_v63 = vadd.f32 %v1647_v18, %v591_v24 }
  0xac   :  { %v611_v33 = vpop.f32.mrf.mxu2 }
  0xad   :  { %v1682_v34 = vadd.f32 %v1647_v18, %v611_v33 }
  0xae   :  { %v621_v35 = vpop.f32.mrf.mxu3  ;;  %v1687_v39 = vpop.f32.mrf.mxu1 }
  0xaf   :  { %v1685_v38 = vadd.f32 %v1647_v18, %v621_v35 }
  0xb0   :  { %v594_v42 = vpop.f32.mrf.mxu0 }
  0xb1   :  { %672 = vmatmul.bf16.gmra.mxu1 %v1025_v36  ;;  %721 = vmatmul.bf16.gmra.mxu2 %v1029_v37  ;;  %v595_v10 = vadd.f32 %v1647_v18, %v594_v42 }
  0xb3   :  { %770 = vmatmul.bf16.gmra.mxu3 %v1033_v40  ;;  %1189 = vmatmul.msk.bf16.gmra.mxu0 %vm555_vm0, %v1037_v41  ;;  %v600_v40 = vadd.f32 %v1647_v18, %v1641_v14 }
  0xb4   :  { %v614_v43 = vpop.f32.mrf.mxu2 }
  0xb5   :  { %v1691_v44 = vadd.f32 %v1647_v18, %v614_v43 }
  0xb6   :  { %v624_v45 = vpop.f32.mrf.mxu3  ;;  %v1696_v47 = vpop.f32.mrf.mxu1 }
  0xb7   :  { %v1694_v46 = vadd.f32 %v1647_v18, %v624_v45 }
  0xb8   :  { %v596_v48 = vpop.f32.mrf.mxu0 }
  0xb9   :  { %v597_v26 = vadd.f32 %v1647_v18, %v596_v48 }
  0xbc   :  { %v616_v49 = vpop.f32.mrf.mxu2 }
  0xbd   :  { %v1699_v50 = vadd.f32 %v1647_v18, %v616_v49 }
  0xbe   :  { %v626_v51 = vpop.f32.mrf.mxu3  ;;  %v638_v53 = vpop.f32.mrf.mxu1 }
  0xbf   :  { %v1702_v52 = vadd.f32 %v1647_v18, %v626_v51  ;;  %v639_v56 = vadd.f32 %v638_v53, %v590_v55 }
  0xc0   :  { %v785_v54 = vpop.f32.mrf.mxu0 }
  0xc4   :  { %v687_v57 = vpop.f32.mrf.mxu2 }
  0xc5   :  { %v688_v58 = vadd.f32 %v687_v57, %v639_v56  ;;  %v602_v56 = vadd.f32 %v1647_v18, %v1655_v23 }
  0xc6   :  { %v736_v59 = vpop.f32.mrf.mxu3  ;;  %v640_v60 = vpop.f32.mrf.mxu1 }
  0xc7   :  { %v737_v61 = vadd.f32 %v736_v59, %v688_v58  ;;  %v641_v2 = vadd.f32 %v640_v60, %v592_v63 }
  0xc8   :  { %v787_v62 = vpop.f32.mrf.mxu0 }
  0xc9   :  { %v786_v0 = vadd.f32 %v785_v54, %v737_v61 }
  0xcb   :  { %v825_v1 = vmax.f32 %v786_v0, 0.0 }
  0xcc   :  { %v689_v3 = vpop.f32.mrf.mxu2 }
  0xcd   :  { %v841_v4 = vpack.c.bf16 %v825_v1, %v825_v1  ;;  %v690_v5 = vadd.f32 %v689_v3, %v641_v2  ;;  %v605_v2 = vadd.f32 %v1647_v18, %v1687_v39 }
  0xce   :  { %v738_v6 = vpop.f32.mrf.mxu3  ;;  %v643_v7 = vpop.f32.mrf.mxu1 }
  0xcf   :  { %858 = vst.msk [vmem:[%s1791_s3] sm:$0xf] %vm857_vm1, %v841_v4  ;;  %v739_v8 = vadd.f32 %v738_v6, %v690_v5  ;;  %v644_v13 = vadd.f32 %v643_v7, %v595_v10 }
  0xd0   :  { %v790_v9 = vpop.f32.mrf.mxu0 }
  0xd1   :  { %v788_v11 = vadd.f32 %v787_v62, %v739_v8 }
  0xd3   :  { %v826_v12 = vmax.f32 %v788_v11, 0.0 }
  0xd4   :  { %v692_v15 = vpop.f32.mrf.mxu2 }
  0xd5   :  { %v842_v16 = vpack.c.bf16 %v826_v12, %v826_v12  ;;  %v693_v17 = vadd.f32 %v692_v15, %v644_v13  ;;  %v607_v12 = vadd.f32 %v1647_v18, %v1696_v47 }
  0xd6   :  { %v741_v19 = vpop.f32.mrf.mxu3  ;;  %v645_v21 = vpop.f32.mrf.mxu1 }
  0xd7   :  { %859 = vst.msk [vmem:[%s1791_s3 + $0x4] sm:$0xf] %vm857_vm1, %v842_v16  ;;  %v742_v24 = vadd.f32 %v741_v19, %v693_v17  ;;  %v646_v29 = vadd.f32 %v645_v21, %v597_v26 }
  0xd8   :  { %v792_v25 = vpop.f32.mrf.mxu0 }
  0xd9   :  { %v791_v27 = vadd.f32 %v790_v9, %v742_v24 }
  0xdb   :  { %v827_v28 = vmax.f32 %v791_v27, 0.0 }
  0xdc   :  { %v694_v30 = vpop.f32.mrf.mxu2 }
  0xdd   :  { %v843_v31 = vpack.c.bf16 %v827_v28, %v827_v28  ;;  %v695_v32 = vadd.f32 %v694_v30, %v646_v29 }
  0xde   :  { %v743_v33 = vpop.f32.mrf.mxu3  ;;  %v648_v35 = vpop.f32.mrf.mxu1 }
  0xdf   :  { %860 = vst.msk [vmem:[%s1791_s3 + $0x8] sm:$0xf] %vm857_vm1, %v843_v31  ;;  %v744_v36 = vadd.f32 %v743_v33, %v695_v32  ;;  %v649_v43 = vadd.f32 %v648_v35, %v600_v40 }
  0xe0   :  { %v795_v37 = vpop.f32.mrf.mxu0 }
  0xe1   :  { %v793_v41 = vadd.f32 %v792_v25, %v744_v36 }
  0xe3   :  { %v828_v42 = vmax.f32 %v793_v41, 0.0 }
  0xe4   :  { %v697_v45 = vpop.f32.mrf.mxu2 }
  0xe5   :  { %v844_v48 = vpack.c.bf16 %v828_v42, %v828_v42  ;;  %v698_v49 = vadd.f32 %v697_v45, %v649_v43 }
  0xe6   :  { %v746_v51 = vpop.f32.mrf.mxu3  ;;  %v650_v53 = vpop.f32.mrf.mxu1 }
  0xe7   :  { %861 = vst.msk [vmem:[%s1791_s3 + $0xc] sm:$0xf] %vm857_vm1, %v844_v48  ;;  %v747_v54 = vadd.f32 %v746_v51, %v698_v49  ;;  %v651_v58 = vadd.f32 %v650_v53, %v602_v56 }
  0xe8   :  { %v797_v55 = vpop.f32.mrf.mxu0 }
  0xe9   :  { %v796_v57 = vadd.f32 %v795_v37, %v747_v54 }
  0xeb   :  { %v829_v14 = vmax.f32 %v796_v57, 0.0 }
  0xec   :  { %v699_v59 = vpop.f32.mrf.mxu2 }
  0xed   :  { %v845_v60 = vpack.c.bf16 %v829_v14, %v829_v14  ;;  %v700_v61 = vadd.f32 %v699_v59, %v651_v58 }
  0xee   :  { %v748_v62 = vpop.f32.mrf.mxu3  ;;  %v653_v63 = vpop.f32.mrf.mxu1 }
  0xef   :  { %862 = vst.msk [vmem:[%s1791_s3 + $0x10] sm:$0xf] %vm857_vm1, %v845_v60  ;;  %v749_v0 = vadd.f32 %v748_v62, %v700_v61  ;;  %v654_v4 = vadd.f32 %v653_v63, %v605_v2 }
  0xf0   :  { %v800_v1 = vpop.f32.mrf.mxu0 }
  0xf1   :  { %v798_v3 = vadd.f32 %v797_v55, %v749_v0 }
  0xf3   :  { %v830_v23 = vmax.f32 %v798_v3, 0.0 }
  0xf4   :  { %v702_v5 = vpop.f32.mrf.mxu2 }
  0xf5   :  { %v846_v6 = vpack.c.bf16 %v830_v23, %v830_v23  ;;  %v703_v7 = vadd.f32 %v702_v5, %v654_v4 }
  0xf6   :  { %v751_v8 = vpop.f32.mrf.mxu3  ;;  %v655_v9 = vpop.f32.mrf.mxu1 }
  0xf7   :  { %863 = vst.msk [vmem:[%s1791_s3 + $0x14] sm:$0xf] %vm857_vm1, %v846_v6  ;;  %v752_v10 = vadd.f32 %v751_v8, %v703_v7  ;;  %v656_v15 = vadd.f32 %v655_v9, %v607_v12 }
  0xf8   :  { %v802_v11 = vpop.f32.mrf.mxu0 }
  0xf9   :  { %v801_v13 = vadd.f32 %v800_v1, %v752_v10 }
  0xfb   :  { %v831_v39 = vmax.f32 %v801_v13, 0.0 }
  0xfc   :  { %v704_v16 = vpop.f32.mrf.mxu2 }
  0xfd   :  { %v847_v17 = vpack.c.bf16 %v831_v39, %v831_v39  ;;  %v705_v19 = vadd.f32 %v704_v16, %v656_v15 }
  0xfe   :  { %v753_v21 = vpop.f32.mrf.mxu3  ;;  %v658_v24 = vpop.f32.mrf.mxu1 }
  0xff   :  { %864 = vst.msk [vmem:[%s1791_s3 + $0x18] sm:$0xf] %vm857_vm1, %v847_v17  ;;  %v754_v25 = vadd.f32 %v753_v21, %v705_v19  ;;  %v659_v29 = vadd.f32 %v658_v24, %v1650_v20 }
 0x100   :  { %v805_v26 = vpop.f32.mrf.mxu0 }
 0x101   :  { %v803_v27 = vadd.f32 %v802_v11, %v754_v25 }
 0x103   :  { %v832_v28 = vmax.f32 %v803_v27, 0.0 }
 0x104   :  { %v707_v18 = vpop.f32.mrf.mxu2 }
 0x105   :  { %v848_v47 = vpack.c.bf16 %v832_v28, %v832_v28  ;;  %v708_v30 = vadd.f32 %v707_v18, %v659_v29 }
 0x106   :  { %v756_v31 = vpop.f32.mrf.mxu3  ;;  %v660_v32 = vpop.f32.mrf.mxu1 }
 0x107   :  { %865 = vst.msk [vmem:[%s1791_s3 + $0x1c] sm:$0xf] %vm857_vm1, %v848_v47  ;;  %v757_v33 = vadd.f32 %v756_v31, %v708_v30  ;;  %v661_v40 = vadd.f32 %v660_v32, %v1682_v34 }
 0x108   :  { %v807_v35 = vpop.f32.mrf.mxu0 }
 0x109   :  { %v806_v36 = vadd.f32 %v805_v26, %v757_v33 }
 0x10b   :  { %v833_v37 = vmax.f32 %v806_v36, 0.0 }
 0x10c   :  { %v709_v41 = vpop.f32.mrf.mxu2 }
 0x10d   :  { %v849_v42 = vpack.c.bf16 %v833_v37, %v833_v37  ;;  %v710_v43 = vadd.f32 %v709_v41, %v661_v40 }
 0x10e   :  { %v758_v20 = vpop.f32.mrf.mxu3  ;;  %v663_v45 = vpop.f32.mrf.mxu1 }
 0x10f   :  { %866 = vst.msk [vmem:[%s1791_s3 + $0x20] sm:$0xf] %vm857_vm1, %v849_v42  ;;  %v759_v48 = vadd.f32 %v758_v20, %v710_v43  ;;  %v664_v54 = vadd.f32 %v663_v45, %v1691_v44 }
 0x110   :  { %v810_v49 = vpop.f32.mrf.mxu0 }
 0x111   :  { %v808_v51 = vadd.f32 %v807_v35, %v759_v48 }
 0x113   :  { %v834_v53 = vmax.f32 %v808_v51, 0.0 }
 0x114   :  { %v712_v55 = vpop.f32.mrf.mxu2 }
 0x115   :  { %v850_v56 = vpack.c.bf16 %v834_v53, %v834_v53  ;;  %v713_v57 = vadd.f32 %v712_v55, %v664_v54 }
 0x116   :  { %v761_v34 = vpop.f32.mrf.mxu3  ;;  %v665_v14 = vpop.f32.mrf.mxu1 }
 0x117   :  { %867 = vst.msk [vmem:[%s1791_s3 + $0x24] sm:$0xf] %vm857_vm1, %v850_v56  ;;  %v762_v58 = vadd.f32 %v761_v34, %v713_v57  ;;  %v666_v62 = vadd.f32 %v665_v14, %v1699_v50 }
 0x118   :  { %v812_v59 = vpop.f32.mrf.mxu0 }
 0x119   :  { %v811_v60 = vadd.f32 %v810_v49, %v762_v58 }
 0x11b   :  { %v835_v61 = vmax.f32 %v811_v60, 0.0 }
 0x11c   :  { %v714_v63 = vpop.f32.mrf.mxu2 }
 0x11d   :  { %v851_v0 = vpack.c.bf16 %v835_v61, %v835_v61  ;;  %v715_v1 = vadd.f32 %v714_v63, %v666_v62 }
 0x11e   :  { %v763_v44 = vpop.f32.mrf.mxu3  ;;  %v668_v2 = vpop.f32.mrf.mxu1 }
 0x11f   :  { %868 = vst.msk [vmem:[%s1791_s3 + $0x28] sm:$0xf] %vm857_vm1, %v851_v0  ;;  %v764_v3 = vadd.f32 %v763_v44, %v715_v1  ;;  %v669_v6 = vadd.f32 %v668_v2, %v1653_v22 }
 0x120   :  { %v815_v4 = vpop.f32.mrf.mxu0 }
 0x121   :  { %v813_v23 = vadd.f32 %v812_v59, %v764_v3 }
 0x123   :  { %v836_v5 = vmax.f32 %v813_v23, 0.0 }
 0x124   :  { %v717_v7 = vpop.f32.mrf.mxu2 }
 0x125   :  { %v852_v8 = vpack.c.bf16 %v836_v5, %v836_v5  ;;  %v718_v9 = vadd.f32 %v717_v7, %v669_v6 }
 0x126   :  { %v766_v50 = vpop.f32.mrf.mxu3  ;;  %v670_v10 = vpop.f32.mrf.mxu1 }
 0x127   :  { %869 = vst.msk [vmem:[%s1791_s3 + $0x2c] sm:$0xf] %vm857_vm1, %v852_v8  ;;  %v767_v11 = vadd.f32 %v766_v50, %v718_v9  ;;  %v671_v39 = vadd.f32 %v670_v10, %v1685_v38 }
 0x128   :  { %v817_v15 = vpop.f32.mrf.mxu0 }
 0x129   :  { %v816_v12 = vadd.f32 %v815_v4, %v767_v11 }
 0x12b   :  { %v837_v13 = vmax.f32 %v816_v12, 0.0 }
 0x12c   :  { %v719_v16 = vpop.f32.mrf.mxu2 }
 0x12d   :  { %v853_v17 = vpack.c.bf16 %v837_v13, %v837_v13  ;;  %v720_v19 = vadd.f32 %v719_v16, %v671_v39 }
 0x12e   :  { %v768_v22 = vpop.f32.mrf.mxu3  ;;  %v673_v21 = vpop.f32.mrf.mxu1 }
 0x12f   :  { %870 = vst.msk [vmem:[%s1791_s3 + $0x30] sm:$0xf] %vm857_vm1, %v853_v17  ;;  %v769_v24 = vadd.f32 %v768_v22, %v720_v19  ;;  %v674_v27 = vadd.f32 %v673_v21, %v1694_v46 }
 0x130   :  { %v820_v47 = vpop.f32.mrf.mxu0 }
 0x131   :  { %v818_v25 = vadd.f32 %v817_v15, %v769_v24 }
 0x133   :  { %v838_v26 = vmax.f32 %v818_v25, 0.0 }
 0x134   :  { %v722_v28 = vpop.f32.mrf.mxu2 }
 0x135   :  { %v854_v29 = vpack.c.bf16 %v838_v26, %v838_v26  ;;  %v723_v18 = vadd.f32 %v722_v28, %v674_v27 }
 0x136   :  { %v771_v38 = vpop.f32.mrf.mxu3  ;;  %v675_v31 = vpop.f32.mrf.mxu1 }
 0x137   :  { %871 = vst.msk [vmem:[%s1791_s3 + $0x34] sm:$0xf] %vm857_vm1, %v854_v29  ;;  %v772_v30 = vadd.f32 %v771_v38, %v723_v18  ;;  %v676_v35 = vadd.f32 %v675_v31, %v1702_v52 }
 0x138   :  { %v822_v42 = vpop.f32.mrf.mxu0 }
 0x139   :  { %v821_v32 = vadd.f32 %v820_v47, %v772_v30 }
 0x13b   :  { %v839_v33 = vmax.f32 %v821_v32, 0.0 }
 0x13c   :  { %v724_v36 = vpop.f32.mrf.mxu2 }
 0x13d   :  { %v855_v37 = vpack.c.bf16 %v839_v33, %v839_v33  ;;  %v725_v40 = vadd.f32 %v724_v36, %v676_v35 }
 0x13e   :  { %v773_v46 = vpop.f32.mrf.mxu3 }
 0x13f   :  { %872 = vst.msk [vmem:[%s1791_s3 + $0x38] sm:$0xf] %vm857_vm1, %v855_v37  ;;  %v774_v41 = vadd.f32 %v773_v46, %v725_v40 }
 0x141   :  { %v823_v43 = vadd.f32 %v822_v42, %v774_v41 }
 0x143   :  { %v840_v20 = vmax.f32 %v823_v43, 0.0 }
 0x145   :  { %v856_v45 = vpack.c.bf16 %v840_v20, %v840_v20 }
 0x147   :  { %873 = vst.msk [vmem:[%s1791_s3 + $0x3c] sm:$0xf] %vm857_vm1, %v856_v45 }

// kernel: _lambda_.7
= control target key start
LH: loop header
LB: loop body
LE: loop exit
PB: predicated region body
PF: predicated region fallthrough
CT: control target
= control target key end

     0   :  { %s22075_s1 = inlined_call_operand.vmem [shape: bf16[4096,512], index: 1, kind: input, shape index: {}]   ;;  %s22076_s0 = inlined_call_operand.vmem [shape: bf16[16,4096], index: 0, kind: input, shape index: {}]   ;;  %s22077_s2 = inlined_call_operand.vmem [shape: f32[1,512], index: 2, kind: input, shape index: {}]   ;;  %s22078_s3 = inlined_call_operand.vmem [shape: bf16[512,256], index: 3, kind: input, shape index: {}]   ;;  %s22079_s5 = inlined_call_operand.vmem [shape: bf16[256,128], index: 5, kind: input, shape index: {}]   ;;  %s22080_s6 = inlined_call_operand.vmem [shape: f32[1,128], index: 6, kind: input, shape index: {}]   ;;  %s22081_s4 = inlined_call_operand.vmem [shape: f32[1,256], index: 4, kind: input, shape index: {}]   ;;  %s22082_s7 = inlined_call_operand.vmem [shape: f32[16,128], index: 7, kind: output, shape index: {}]  }
   0x1   :  { %v9137_v0 = vld [vmem:[%s22075_s1 + $0xe0] sm:$0xf]  ;;  %v13503_v1 = vld [vmem:[%s22075_s1 + $0xec] sm:$0xf0] }
   0x2   :  { %v9265_v2 = vld [vmem:[%s22075_s1 + $0x1e0] sm:$0xf]  ;;  %v9138_v3 = vor.u32 %v13503_v1, %v9137_v0  ;;  %v13535_v4 = vld [vmem:[%s22075_s1 + $0x1ec] sm:$0xf0] }
   0x3   :  { %v9393_v5 = vld [vmem:[%s22075_s1 + $0x2e0] sm:$0xf]  ;;  %v13567_v6 = vld [vmem:[%s22075_s1 + $0x2ec] sm:$0xf0]  ;;  %v9266_v7 = vor.u32 %v13535_v4, %v9265_v2 }
   0x4   :  { %v9394_v8 = vor.u32 %v13567_v6, %v9393_v5  ;;  %v9521_v9 = vld [vmem:[%s22075_s1 + $0x3e0] sm:$0xf]  ;;  %v13599_v10 = vld [vmem:[%s22075_s1 + $0x3ec] sm:$0xf0]  ;;  %6372 = vmatpush.bf16.msra.mxu0 %v9138_v3 }
   0x5   :  { %v9121_v11 = vld [vmem:[%s22075_s1 + $0xc0] sm:$0xf]  ;;  %v9522_v12 = vor.u32 %v13599_v10, %v9521_v9  ;;  %v13499_v13 = vld [vmem:[%s22075_s1 + $0xcc] sm:$0xf0]  ;;  %6386 = vmatpush.bf16.msra.mxu1 %v9266_v7 }
   0x6   :  { %v9249_v14 = vld [vmem:[%s22075_s1 + $0x1c0] sm:$0xf]  ;;  %v13531_v15 = vld [vmem:[%s22075_s1 + $0x1cc] sm:$0xf0]  ;;  %6400 = vmatpush.bf16.msra.mxu2 %v9394_v8  ;;  %v9122_v16 = vor.u32 %v13499_v13, %v9121_v11 }
   0x7   :  { %v9250_v17 = vor.u32 %v13531_v15, %v9249_v14  ;;  %v9377_v18 = vld [vmem:[%s22075_s1 + $0x2c0] sm:$0xf]  ;;  %v13563_v19 = vld [vmem:[%s22075_s1 + $0x2cc] sm:$0xf0]  ;;  %6414 = vmatpush.bf16.msra.mxu3 %v9522_v12 }
   0x8   :  { %v9505_v20 = vld [vmem:[%s22075_s1 + $0x3c0] sm:$0xf]  ;;  %v9378_v21 = vor.u32 %v13563_v19, %v9377_v18  ;;  %v13595_v22 = vld [vmem:[%s22075_s1 + $0x3cc] sm:$0xf0]  ;;  %6373 = vmatpush.bf16.msra.mxu0 %v9122_v16 }
   0x9   :  { %v9105_v23 = vld [vmem:[%s22075_s1 + $0xa0] sm:$0xf]  ;;  %v13495_v24 = vld [vmem:[%s22075_s1 + $0xac] sm:$0xf0]  ;;  %v9506_v25 = vor.u32 %v13595_v22, %v9505_v20  ;;  %6387 = vmatpush.bf16.msra.mxu1 %v9250_v17 }
   0xa   :  { %v9233_v26 = vld [vmem:[%s22075_s1 + $0x1a0] sm:$0xf]  ;;  %v13527_v27 = vld [vmem:[%s22075_s1 + $0x1ac] sm:$0xf0]  ;;  %v9106_v29 = vor.u32 %v13495_v24, %v9105_v23  ;;  %6401 = vmatpush.bf16.msra.mxu2 %v9378_v21 }
   0xb   :  { %v9361_v28 = vld [vmem:[%s22075_s1 + $0x2a0] sm:$0xf]  ;;  %v13559_v30 = vld [vmem:[%s22075_s1 + $0x2ac] sm:$0xf0]  ;;  %v9234_v33 = vor.u32 %v13527_v27, %v9233_v26  ;;  %6415 = vmatpush.bf16.msra.mxu3 %v9506_v25 }
   0xc   :  { %v9489_v31 = vld [vmem:[%s22075_s1 + $0x3a0] sm:$0xf]  ;;  %v13591_v32 = vld [vmem:[%s22075_s1 + $0x3ac] sm:$0xf0]  ;;  %v9362_v34 = vor.u32 %v13559_v30, %v9361_v28  ;;  %6374 = vmatpush.bf16.msra.mxu0 %v9106_v29 }
   0xd   :  { %v9089_v35 = vld [vmem:[%s22075_s1 + $0x80] sm:$0xf]  ;;  %v13491_v36 = vld [vmem:[%s22075_s1 + $0x8c] sm:$0xf0]  ;;  %v9490_v38 = vor.u32 %v13591_v32, %v9489_v31  ;;  %6388 = vmatpush.bf16.msra.mxu1 %v9234_v33 }
   0xe   :  { %v9217_v37 = vld [vmem:[%s22075_s1 + $0x180] sm:$0xf]  ;;  %v13523_v39 = vld [vmem:[%s22075_s1 + $0x18c] sm:$0xf0]  ;;  %v9090_v44 = vor.u32 %v13491_v36, %v9089_v35  ;;  %6402 = vmatpush.bf16.msra.mxu2 %v9362_v34 }
   0xf   :  { %v9345_v40 = vld [vmem:[%s22075_s1 + $0x280] sm:$0xf]  ;;  %v13555_v41 = vld [vmem:[%s22075_s1 + $0x28c] sm:$0xf0]  ;;  %v9218_v45 = vor.u32 %v13523_v39, %v9217_v37  ;;  %6416 = vmatpush.bf16.msra.mxu3 %v9490_v38 }
  0x10   :  { %v9473_v42 = vld [vmem:[%s22075_s1 + $0x380] sm:$0xf]  ;;  %v13587_v43 = vld [vmem:[%s22075_s1 + $0x38c] sm:$0xf0]  ;;  %v9346_v46 = vor.u32 %v13555_v41, %v9345_v40  ;;  %6375 = vmatpush.bf16.msra.mxu0 %v9090_v44 }
  0x11   :  { %v9073_v47 = vld [vmem:[%s22075_s1 + $0x60] sm:$0xf]  ;;  %v13487_v48 = vld [vmem:[%s22075_s1 + $0x6c] sm:$0xf0]  ;;  %v9474_v50 = vor.u32 %v13587_v43, %v9473_v42  ;;  %6389 = vmatpush.bf16.msra.mxu1 %v9218_v45 }
  0x12   :  { %v9201_v49 = vld [vmem:[%s22075_s1 + $0x160] sm:$0xf]  ;;  %v13519_v51 = vld [vmem:[%s22075_s1 + $0x16c] sm:$0xf0]  ;;  %v9074_v56 = vor.u32 %v13487_v48, %v9073_v47  ;;  %6403 = vmatpush.bf16.msra.mxu2 %v9346_v46 }
  0x13   :  { %v9329_v52 = vld [vmem:[%s22075_s1 + $0x260] sm:$0xf]  ;;  %v13551_v53 = vld [vmem:[%s22075_s1 + $0x26c] sm:$0xf0]  ;;  %v9202_v57 = vor.u32 %v13519_v51, %v9201_v49  ;;  %6417 = vmatpush.bf16.msra.mxu3 %v9474_v50 }
  0x14   :  { %v9457_v54 = vld [vmem:[%s22075_s1 + $0x360] sm:$0xf]  ;;  %v13583_v55 = vld [vmem:[%s22075_s1 + $0x36c] sm:$0xf0]  ;;  %v9330_v58 = vor.u32 %v13551_v53, %v9329_v52  ;;  %6376 = vmatpush.bf16.msra.mxu0 %v9074_v56 }
  0x15   :  { %v9057_v59 = vld [vmem:[%s22075_s1 + $0x40] sm:$0xf]  ;;  %v13483_v60 = vld [vmem:[%s22075_s1 + $0x4c] sm:$0xf0]  ;;  %v9458_v62 = vor.u32 %v13583_v55, %v9457_v54  ;;  %6390 = vmatpush.bf16.msra.mxu1 %v9202_v57  ;;  %v8905_v54 = vld [vmem:[%s22076_s0 + $0x8] sm:$0xf] }
  0x16   :  { %v9185_v61 = vld [vmem:[%s22075_s1 + $0x140] sm:$0xf]  ;;  %v13515_v63 = vld [vmem:[%s22075_s1 + $0x14c] sm:$0xf0]  ;;  %v9058_v4 = vor.u32 %v13483_v60, %v9057_v59  ;;  %6404 = vmatpush.bf16.msra.mxu2 %v9330_v58  ;;  %v13458_v59 = vld [vmem:[%s22076_s0 + $0x84] sm:$0xf0] }
  0x17   :  { %v9313_v0 = vld [vmem:[%s22075_s1 + $0x240] sm:$0xf]  ;;  %v13547_v1 = vld [vmem:[%s22075_s1 + $0x24c] sm:$0xf0]  ;;  %v9186_v5 = vor.u32 %v13515_v63, %v9185_v61  ;;  %6418 = vmatpush.bf16.msra.mxu3 %v9458_v62 }
  0x18   :  { %v9441_v2 = vld [vmem:[%s22075_s1 + $0x340] sm:$0xf]  ;;  %v13579_v3 = vld [vmem:[%s22075_s1 + $0x34c] sm:$0xf0]  ;;  %v9314_v6 = vor.u32 %v13547_v1, %v9313_v0  ;;  %6377 = vmatpush.bf16.msra.mxu0 %v9058_v4  ;;  %v14902_v1 = vor.u32 %v13458_v59, %v8905_v54 }
  0x19   :  { %v9041_v7 = vld [vmem:[%s22075_s1 + $0x20] sm:$0xf]  ;;  %v13479_v8 = vld [vmem:[%s22075_s1 + $0x2c] sm:$0xf0]  ;;  %v9442_v10 = vor.u32 %v13579_v3, %v9441_v2  ;;  %6391 = vmatpush.bf16.msra.mxu1 %v9186_v5 }
  0x1a   :  { %v9169_v9 = vld [vmem:[%s22075_s1 + $0x120] sm:$0xf]  ;;  %v13511_v11 = vld [vmem:[%s22075_s1 + $0x12c] sm:$0xf0]  ;;  %v9042_v16 = vor.u32 %v13479_v8, %v9041_v7  ;;  %6405 = vmatpush.bf16.msra.mxu2 %v9314_v6  ;;  %v13441_v6 = vld [vmem:[%s22076_s0 + $0x4] sm:$0xf] }
  0x1b   :  { %v9297_v12 = vld [vmem:[%s22075_s1 + $0x220] sm:$0xf]  ;;  %v13543_v13 = vld [vmem:[%s22075_s1 + $0x22c] sm:$0xf0]  ;;  %v9170_v19 = vor.u32 %v13511_v11, %v9169_v9  ;;  %6419 = vmatpush.bf16.msra.mxu3 %v9442_v10  ;;  %v8899_v7 = vld [vmem:[%s22076_s0 + $0x80] sm:$0xf0] }
  0x1c   :  { %v9425_v14 = vld [vmem:[%s22075_s1 + $0x320] sm:$0xf]  ;;  %v13575_v15 = vld [vmem:[%s22075_s1 + $0x32c] sm:$0xf0]  ;;  %v9298_v20 = vor.u32 %v13543_v13, %v9297_v12  ;;  %6378 = vmatpush.bf16.msra.mxu0 %v9042_v16  ;;  %v13442_v8 = vld [vmem:[%s22076_s0 + $0xc] sm:$0xf]  ;;  %v14924_v10 = vor.u32 %v13441_v6, %v8899_v7 }
  0x1d   :  { %v9025_v17 = vld [vmem:[%s22075_s1] sm:$0xf]  ;;  %v13475_v18 = vld [vmem:[%s22075_s1 + $0xc] sm:$0xf0]  ;;  %v9426_v24 = vor.u32 %v13575_v15, %v9425_v14  ;;  %6392 = vmatpush.bf16.msra.mxu1 %v9170_v19  ;;  %v8907_v11 = vld [vmem:[%s22076_s0 + $0x88] sm:$0xf0] }
  0x1e   :  { %v9153_v21 = vld [vmem:[%s22075_s1 + $0x100] sm:$0xf]  ;;  %v13507_v22 = vld [vmem:[%s22075_s1 + $0x10c] sm:$0xf0]  ;;  %v9026_v31 = vor.u32 %v13475_v18, %v9025_v17  ;;  %6406 = vmatpush.bf16.msra.mxu2 %v9298_v20  ;;  %v14938_v17 = vor.u32 %v13442_v8, %v8907_v11 }
  0x1f   :  { %v9281_v23 = vld [vmem:[%s22075_s1 + $0x200] sm:$0xf]  ;;  %v13539_v25 = vld [vmem:[%s22075_s1 + $0x20c] sm:$0xf0]  ;;  %v9154_v35 = vor.u32 %v13507_v22, %v9153_v21  ;;  %6420 = vmatpush.bf16.msra.mxu3 %v9426_v24 }
  0x20   :  { %v9409_v26 = vld [vmem:[%s22075_s1 + $0x300] sm:$0xf]  ;;  %v13571_v27 = vld [vmem:[%s22075_s1 + $0x30c] sm:$0xf0]  ;;  %v9282_v36 = vor.u32 %v13539_v25, %v9281_v23  ;;  %6379 = vmatpush.bf16.msra.mxu0 %v9026_v31 }
  0x21   :  { %v9649_v28 = vld [vmem:[%s22075_s1 + $0x4e0] sm:$0xf]  ;;  %v13631_v29 = vld [vmem:[%s22075_s1 + $0x4ec] sm:$0xf0]  ;;  %v9410_v39 = vor.u32 %v13571_v27, %v9409_v26  ;;  %6393 = vmatpush.bf16.msra.mxu1 %v9154_v35 }
  0x22   :  { %v9777_v30 = vld [vmem:[%s22075_s1 + $0x5e0] sm:$0xf]  ;;  %v13663_v32 = vld [vmem:[%s22075_s1 + $0x5ec] sm:$0xf0]  ;;  %v9650_v40 = vor.u32 %v13631_v29, %v9649_v28  ;;  %6407 = vmatpush.bf16.msra.mxu2 %v9282_v36 }
  0x23   :  { %v9905_v33 = vld [vmem:[%s22075_s1 + $0x6e0] sm:$0xf]  ;;  %v13695_v34 = vld [vmem:[%s22075_s1 + $0x6ec] sm:$0xf0]  ;;  %v9778_v43 = vor.u32 %v13663_v32, %v9777_v30  ;;  %6421 = vmatpush.bf16.msra.mxu3 %v9410_v39 }
  0x24   :  { %v10033_v37 = vld [vmem:[%s22075_s1 + $0x7e0] sm:$0xf]  ;;  %v13727_v38 = vld [vmem:[%s22075_s1 + $0x7ec] sm:$0xf0]  ;;  %v9906_v44 = vor.u32 %v13695_v34, %v9905_v33  ;;  %6428 = vmatpush.bf16.msrb.mxu0 %v9650_v40  ;;  %6394 = vmatmul.bf16.vlgmr.msra.gmra.mxu1 %v14924_v10 }
  0x25   :  { %v9633_v41 = vld [vmem:[%s22075_s1 + $0x4c0] sm:$0xf]  ;;  %v13627_v42 = vld [vmem:[%s22075_s1 + $0x4cc] sm:$0xf0]  ;;  %v10034_v48 = vor.u32 %v13727_v38, %v10033_v37  ;;  %6442 = vmatpush.bf16.msrb.mxu1 %v9778_v43  ;;  %6408 = vmatmul.bf16.vlgmr.msra.gmra.mxu2 %v14902_v1 }
  0x26   :  { %v9761_v45 = vld [vmem:[%s22075_s1 + $0x5c0] sm:$0xf]  ;;  %v13659_v46 = vld [vmem:[%s22075_s1 + $0x5cc] sm:$0xf0]  ;;  %v9634_v55 = vor.u32 %v13627_v42, %v9633_v41  ;;  %6456 = vmatpush.bf16.msrb.mxu2 %v9906_v44  ;;  %6422 = vmatmul.bf16.vlgmr.msra.gmra.mxu3 %v14938_v17 }
  0x27   :  { %v9889_v47 = vld [vmem:[%s22075_s1 + $0x6c0] sm:$0xf]  ;;  %v13691_v49 = vld [vmem:[%s22075_s1 + $0x6cc] sm:$0xf0]  ;;  %v9762_v60 = vor.u32 %v13659_v46, %v9761_v45  ;;  %6470 = vmatpush.bf16.msrb.mxu3 %v10034_v48 }
  0x28   :  { %v10017_v50 = vld [vmem:[%s22075_s1 + $0x7c0] sm:$0xf]  ;;  %v13723_v51 = vld [vmem:[%s22075_s1 + $0x7cc] sm:$0xf0]  ;;  %v9890_v61 = vor.u32 %v13691_v49, %v9889_v47  ;;  %6429 = vmatpush.bf16.msrb.mxu0 %v9634_v55 }
  0x29   :  { %v8897_v52 = vld [vmem:[%s22076_s0] sm:$0xf]  ;;  %v13623_v57 = vld [vmem:[%s22075_s1 + $0x4ac] sm:$0xf0]  ;;  %v10018_v2 = vor.u32 %v13723_v51, %v10017_v50  ;;  %6443 = vmatpush.bf16.msrb.mxu1 %v9762_v60 }
  0x2a   :  { %v13457_v53 = vld [vmem:[%s22076_s0 + $0x7c] sm:$0xf0]  ;;  %v13655_v63 = vld [vmem:[%s22075_s1 + $0x5ac] sm:$0xf0]  ;;  %6457 = vmatpush.bf16.msrb.mxu2 %v9890_v61 }
  0x2b   :  { %v9617_v56 = vld [vmem:[%s22075_s1 + $0x4a0] sm:$0xf]  ;;  %v14888_v58 = vor.u32 %v13457_v53, %v8897_v52  ;;  %v13687_v3 = vld [vmem:[%s22075_s1 + $0x6ac] sm:$0xf0]  ;;  %6471 = vmatpush.bf16.msrb.mxu3 %v10018_v2 }
  0x2c   :  { %v9745_v62 = vld [vmem:[%s22075_s1 + $0x5a0] sm:$0xf]  ;;  %v13719_v5 = vld [vmem:[%s22075_s1 + $0x7ac] sm:$0xf0]  ;;  %v9618_v9 = vor.u32 %v13623_v57, %v9617_v56 }
  0x2d   :  { %v9873_v0 = vld [vmem:[%s22075_s1 + $0x6a0] sm:$0xf]  ;;  %6380 = vmatmul.bf16.vlgmr.msra.gmra.mxu0 %v14888_v58  ;;  %v9746_v12 = vor.u32 %v13655_v63, %v9745_v62  ;;  %v13619_v15 = vld [vmem:[%s22075_s1 + $0x48c] sm:$0xf0] }
  0x2e   :  { %v10001_v4 = vld [vmem:[%s22075_s1 + $0x7a0] sm:$0xf]  ;;  %v9874_v13 = vor.u32 %v13687_v3, %v9873_v0  ;;  %v13651_v19 = vld [vmem:[%s22075_s1 + $0x58c] sm:$0xf0]  ;;  %6430 = vmatpush.bf16.msrb.mxu0 %v9618_v9 }
  0x2f   :  { %v9601_v14 = vld [vmem:[%s22075_s1 + $0x480] sm:$0xf]  ;;  %v10002_v18 = vor.u32 %v13719_v5, %v10001_v4  ;;  %v13683_v21 = vld [vmem:[%s22075_s1 + $0x68c] sm:$0xf0]  ;;  %6444 = vmatpush.bf16.msrb.mxu1 %v9746_v12 }
  0x30   :  { %v9729_v16 = vld [vmem:[%s22075_s1 + $0x580] sm:$0xf]  ;;  %v13715_v23 = vld [vmem:[%s22075_s1 + $0x78c] sm:$0xf0]  ;;  %v9602_v24 = vor.u32 %v13619_v15, %v9601_v14  ;;  %6458 = vmatpush.bf16.msrb.mxu2 %v9874_v13 }
  0x31   :  { %v9857_v20 = vld [vmem:[%s22075_s1 + $0x680] sm:$0xf]  ;;  %v9730_v25 = vor.u32 %v13651_v19, %v9729_v16  ;;  %v13615_v28 = vld [vmem:[%s22075_s1 + $0x46c] sm:$0xf0]  ;;  %6472 = vmatpush.bf16.msrb.mxu3 %v10002_v18 }
  0x32   :  { %v9985_v22 = vld [vmem:[%s22075_s1 + $0x780] sm:$0xf]  ;;  %v9858_v26 = vor.u32 %v13683_v21, %v9857_v20  ;;  %v13647_v31 = vld [vmem:[%s22075_s1 + $0x56c] sm:$0xf0]  ;;  %6431 = vmatpush.bf16.msrb.mxu0 %v9602_v24 }
  0x33   :  { %v9585_v27 = vld [vmem:[%s22075_s1 + $0x460] sm:$0xf]  ;;  %v9986_v30 = vor.u32 %v13715_v23, %v9985_v22  ;;  %v13679_v33 = vld [vmem:[%s22075_s1 + $0x66c] sm:$0xf0]  ;;  %6445 = vmatpush.bf16.msrb.mxu1 %v9730_v25  ;;  %v8921_v25 = vld [vmem:[%s22076_s0 + $0x18] sm:$0xf] }
  0x34   :  { %v9713_v29 = vld [vmem:[%s22075_s1 + $0x560] sm:$0xf]  ;;  %v13711_v35 = vld [vmem:[%s22075_s1 + $0x76c] sm:$0xf0]  ;;  %v9586_v36 = vor.u32 %v13615_v28, %v9585_v27  ;;  %6459 = vmatpush.bf16.msrb.mxu2 %v9858_v26  ;;  %v13460_v26 = vld [vmem:[%s22076_s0 + $0x94] sm:$0xf0] }
  0x35   :  { %v9841_v32 = vld [vmem:[%s22075_s1 + $0x660] sm:$0xf]  ;;  %v9714_v37 = vor.u32 %v13647_v31, %v9713_v29  ;;  %v13611_v40 = vld [vmem:[%s22075_s1 + $0x44c] sm:$0xf0]  ;;  %6473 = vmatpush.bf16.msrb.mxu3 %v9986_v30  ;;  %v13443_v27 = vld [vmem:[%s22076_s0 + $0x14] sm:$0xf] }
  0x36   :  { %v9969_v34 = vld [vmem:[%s22075_s1 + $0x760] sm:$0xf]  ;;  %v9842_v38 = vor.u32 %v13679_v33, %v9841_v32  ;;  %v13643_v43 = vld [vmem:[%s22075_s1 + $0x54c] sm:$0xf0]  ;;  %6432 = vmatpush.bf16.msrb.mxu0 %v9586_v36  ;;  %v8915_v30 = vld [vmem:[%s22076_s0 + $0x90] sm:$0xf0] }
  0x37   :  { %v9569_v39 = vld [vmem:[%s22075_s1 + $0x440] sm:$0xf]  ;;  %v9970_v42 = vor.u32 %v13711_v35, %v9969_v34  ;;  %v13675_v45 = vld [vmem:[%s22075_s1 + $0x64c] sm:$0xf0]  ;;  %6446 = vmatpush.bf16.msrb.mxu1 %v9714_v37  ;;  %v13444_v31 = vld [vmem:[%s22076_s0 + $0x1c] sm:$0xf] }
  0x38   :  { %v9697_v41 = vld [vmem:[%s22075_s1 + $0x540] sm:$0xf]  ;;  %v13707_v47 = vld [vmem:[%s22075_s1 + $0x74c] sm:$0xf0]  ;;  %v9570_v48 = vor.u32 %v13611_v40, %v9569_v39  ;;  %6460 = vmatpush.bf16.msrb.mxu2 %v9842_v38  ;;  %v8923_v32 = vld [vmem:[%s22076_s0 + $0x98] sm:$0xf0] }
  0x39   :  { %v9825_v44 = vld [vmem:[%s22075_s1 + $0x640] sm:$0xf]  ;;  %v9698_v50 = vor.u32 %v13643_v43, %v9697_v41  ;;  %v13607_v52 = vld [vmem:[%s22075_s1 + $0x42c] sm:$0xf0]  ;;  %6474 = vmatpush.bf16.msrb.mxu3 %v9970_v42  ;;  %v15121_v43 = vor.u32 %v13460_v26, %v8921_v25 }
  0x3a   :  { %v9953_v46 = vld [vmem:[%s22075_s1 + $0x740] sm:$0xf]  ;;  %v9826_v51 = vor.u32 %v13675_v45, %v9825_v44  ;;  %v13639_v54 = vld [vmem:[%s22075_s1 + $0x52c] sm:$0xf0]  ;;  %6433 = vmatpush.bf16.msrb.mxu0 %v9570_v48  ;;  %v15123_v44 = vor.u32 %v13443_v27, %v8915_v30 }
  0x3b   :  { %v9553_v49 = vld [vmem:[%s22075_s1 + $0x420] sm:$0xf]  ;;  %v9954_v55 = vor.u32 %v13707_v47, %v9953_v46  ;;  %v13671_v57 = vld [vmem:[%s22075_s1 + $0x62c] sm:$0xf0]  ;;  %6447 = vmatpush.bf16.msrb.mxu1 %v9698_v50  ;;  %v15131_v47 = vor.u32 %v13444_v31, %v8923_v32 }
  0x3c   :  { %v9681_v53 = vld [vmem:[%s22075_s1 + $0x520] sm:$0xf]  ;;  %v13703_v60 = vld [vmem:[%s22075_s1 + $0x72c] sm:$0xf0]  ;;  %v9554_v63 = vor.u32 %v13607_v52, %v9553_v49  ;;  %6461 = vmatpush.bf16.msrb.mxu2 %v9826_v51 }
  0x3d   :  { %v9809_v56 = vld [vmem:[%s22075_s1 + $0x620] sm:$0xf]  ;;  %v13603_v62 = vld [vmem:[%s22075_s1 + $0x40c] sm:$0xf0]  ;;  %v9682_v5 = vor.u32 %v13639_v54, %v9681_v53  ;;  %6475 = vmatpush.bf16.msrb.mxu3 %v9954_v55 }
  0x3e   :  { %v9937_v59 = vld [vmem:[%s22075_s1 + $0x720] sm:$0xf]  ;;  %v13635_v2 = vld [vmem:[%s22075_s1 + $0x50c] sm:$0xf0]  ;;  %v9810_v6 = vor.u32 %v13671_v57, %v9809_v56  ;;  %6434 = vmatpush.bf16.msrb.mxu0 %v9554_v63 }
  0x3f   :  { %v9537_v61 = vld [vmem:[%s22075_s1 + $0x400] sm:$0xf]  ;;  %v13667_v4 = vld [vmem:[%s22075_s1 + $0x60c] sm:$0xf0]  ;;  %v9938_v11 = vor.u32 %v13703_v60, %v9937_v59  ;;  %6448 = vmatpush.bf16.msrb.mxu1 %v9682_v5 }
  0x40   :  { %v9665_v0 = vld [vmem:[%s22075_s1 + $0x500] sm:$0xf]  ;;  %v13699_v8 = vld [vmem:[%s22075_s1 + $0x70c] sm:$0xf0]  ;;  %v9538_v19 = vor.u32 %v13603_v62, %v9537_v61  ;;  %6462 = vmatpush.bf16.msrb.mxu2 %v9810_v6 }
  0x41   :  { %v9793_v3 = vld [vmem:[%s22075_s1 + $0x600] sm:$0xf]  ;;  %v13759_v12 = vld [vmem:[%s22075_s1 + $0x8ec] sm:$0xf0]  ;;  %v9666_v23 = vor.u32 %v13635_v2, %v9665_v0  ;;  %6476 = vmatpush.bf16.msrb.mxu3 %v9938_v11 }
  0x42   :  { %v9921_v7 = vld [vmem:[%s22075_s1 + $0x700] sm:$0xf]  ;;  %v13791_v14 = vld [vmem:[%s22075_s1 + $0x9ec] sm:$0xf0]  ;;  %v9794_v24 = vor.u32 %v13667_v4, %v9793_v3  ;;  %6435 = vmatpush.bf16.msrb.mxu0 %v9538_v19 }
  0x43   :  { %v10161_v9 = vld [vmem:[%s22075_s1 + $0x8e0] sm:$0xf]  ;;  %v13823_v16 = vld [vmem:[%s22075_s1 + $0xaec] sm:$0xf0]  ;;  %v9922_v28 = vor.u32 %v13699_v8, %v9921_v7  ;;  %6449 = vmatpush.bf16.msrb.mxu1 %v9666_v23 }
  0x44   :  { %v10289_v13 = vld [vmem:[%s22075_s1 + $0x9e0] sm:$0xf]  ;;  %v13855_v20 = vld [vmem:[%s22075_s1 + $0xbec] sm:$0xf0]  ;;  %v10162_v29 = vor.u32 %v13759_v12, %v10161_v9  ;;  %6463 = vmatpush.bf16.msrb.mxu2 %v9794_v24 }
  0x45   :  { %v10417_v15 = vld [vmem:[%s22075_s1 + $0xae0] sm:$0xf]  ;;  %v8913_v21 = vld [vmem:[%s22076_s0 + $0x10] sm:$0xf]  ;;  %v10290_v33 = vor.u32 %v13791_v14, %v10289_v13  ;;  %6477 = vmatpush.bf16.msrb.mxu3 %v9922_v28 }
  0x46   :  { %v10545_v18 = vld [vmem:[%s22075_s1 + $0xbe0] sm:$0xf]  ;;  %v13459_v22 = vld [vmem:[%s22076_s0 + $0x8c] sm:$0xf0]  ;;  %v10418_v34 = vor.u32 %v13823_v16, %v10417_v15  ;;  %6484 = vmatpush.bf16.msra.mxu0 %v10162_v29  ;;  %6450 = vmatmul.bf16.vlgmr.msrb.gmra.mxu1 %v15123_v44 }
  0x47   :  { %v10145_v35 = vld [vmem:[%s22075_s1 + $0x8c0] sm:$0xf]  ;;  %v13755_v36 = vld [vmem:[%s22075_s1 + $0x8cc] sm:$0xf0]  ;;  %v10546_v38 = vor.u32 %v13855_v20, %v10545_v18  ;;  %v15110_v39 = vor.u32 %v13459_v22, %v8913_v21  ;;  %6498 = vmatpush.bf16.msra.mxu1 %v10290_v33  ;;  %6464 = vmatmul.bf16.vlgmr.msrb.gmra.mxu2 %v15121_v43 }
  0x48   :  { %v10273_v37 = vld [vmem:[%s22075_s1 + $0x9c0] sm:$0xf]  ;;  %v13787_v40 = vld [vmem:[%s22075_s1 + $0x9cc] sm:$0xf0]  ;;  %v10146_v48 = vor.u32 %v13755_v36, %v10145_v35  ;;  %6512 = vmatpush.bf16.msra.mxu2 %v10418_v34  ;;  %6478 = vmatmul.bf16.vlgmr.msrb.gmra.mxu3 %v15131_v47 }
  0x49   :  { %v10401_v41 = vld [vmem:[%s22075_s1 + $0xac0] sm:$0xf]  ;;  %v13819_v42 = vld [vmem:[%s22075_s1 + $0xacc] sm:$0xf0]  ;;  %v10274_v49 = vor.u32 %v13787_v40, %v10273_v37  ;;  %6526 = vmatpush.bf16.msra.mxu3 %v10546_v38  ;;  %6436 = vmatmul.bf16.vlgmr.msrb.gmra.mxu0 %v15110_v39 }
  0x4a   :  { %v10529_v45 = vld [vmem:[%s22075_s1 + $0xbc0] sm:$0xf]  ;;  %v13851_v46 = vld [vmem:[%s22075_s1 + $0xbcc] sm:$0xf0]  ;;  %v10402_v50 = vor.u32 %v13819_v42, %v10401_v41  ;;  %6485 = vmatpush.bf16.msra.mxu0 %v10146_v48 }
  0x4b   :  { %v10129_v51 = vld [vmem:[%s22075_s1 + $0x8a0] sm:$0xf]  ;;  %v13751_v52 = vld [vmem:[%s22075_s1 + $0x8ac] sm:$0xf0]  ;;  %v10530_v54 = vor.u32 %v13851_v46, %v10529_v45  ;;  %6499 = vmatpush.bf16.msra.mxu1 %v10274_v49 }
  0x4c   :  { %v10257_v53 = vld [vmem:[%s22075_s1 + $0x9a0] sm:$0xf]  ;;  %v13783_v55 = vld [vmem:[%s22075_s1 + $0x9ac] sm:$0xf0]  ;;  %v10130_v61 = vor.u32 %v13751_v52, %v10129_v51  ;;  %6513 = vmatpush.bf16.msra.mxu2 %v10402_v50 }
  0x4d   :  { %v10385_v56 = vld [vmem:[%s22075_s1 + $0xaa0] sm:$0xf]  ;;  %v13815_v57 = vld [vmem:[%s22075_s1 + $0xaac] sm:$0xf0]  ;;  %v10258_v62 = vor.u32 %v13783_v55, %v10257_v53  ;;  %6527 = vmatpush.bf16.msra.mxu3 %v10530_v54 }
  0x4e   :  { %v10513_v59 = vld [vmem:[%s22075_s1 + $0xba0] sm:$0xf]  ;;  %v13847_v60 = vld [vmem:[%s22075_s1 + $0xbac] sm:$0xf0]  ;;  %v10386_v63 = vor.u32 %v13815_v57, %v10385_v56  ;;  %6486 = vmatpush.bf16.msra.mxu0 %v10130_v61 }
  0x4f   :  { %v10113_v0 = vld [vmem:[%s22075_s1 + $0x880] sm:$0xf]  ;;  %v13747_v2 = vld [vmem:[%s22075_s1 + $0x88c] sm:$0xf0]  ;;  %v10514_v4 = vor.u32 %v13847_v60, %v10513_v59  ;;  %6500 = vmatpush.bf16.msra.mxu1 %v10258_v62 }
  0x50   :  { %v10241_v3 = vld [vmem:[%s22075_s1 + $0x980] sm:$0xf]  ;;  %v13779_v5 = vld [vmem:[%s22075_s1 + $0x98c] sm:$0xf0]  ;;  %v10114_v11 = vor.u32 %v13747_v2, %v10113_v0  ;;  %6514 = vmatpush.bf16.msra.mxu2 %v10386_v63 }
  0x51   :  { %v10369_v6 = vld [vmem:[%s22075_s1 + $0xa80] sm:$0xf]  ;;  %v13811_v7 = vld [vmem:[%s22075_s1 + $0xa8c] sm:$0xf0]  ;;  %v10242_v12 = vor.u32 %v13779_v5, %v10241_v3  ;;  %6528 = vmatpush.bf16.msra.mxu3 %v10514_v4 }
  0x52   :  { %v10497_v8 = vld [vmem:[%s22075_s1 + $0xb80] sm:$0xf]  ;;  %v13843_v9 = vld [vmem:[%s22075_s1 + $0xb8c] sm:$0xf0]  ;;  %v10370_v13 = vor.u32 %v13811_v7, %v10369_v6  ;;  %6487 = vmatpush.bf16.msra.mxu0 %v10114_v11 }
  0x53   :  { %v10097_v14 = vld [vmem:[%s22075_s1 + $0x860] sm:$0xf]  ;;  %v13743_v15 = vld [vmem:[%s22075_s1 + $0x86c] sm:$0xf0]  ;;  %v10498_v18 = vor.u32 %v13843_v9, %v10497_v8  ;;  %6501 = vmatpush.bf16.msra.mxu1 %v10242_v12 }
  0x54   :  { %v10225_v16 = vld [vmem:[%s22075_s1 + $0x960] sm:$0xf]  ;;  %v13775_v19 = vld [vmem:[%s22075_s1 + $0x96c] sm:$0xf0]  ;;  %v10098_v24 = vor.u32 %v13743_v15, %v10097_v14  ;;  %6515 = vmatpush.bf16.msra.mxu2 %v10370_v13 }
  0x55   :  { %v10353_v20 = vld [vmem:[%s22075_s1 + $0xa60] sm:$0xf]  ;;  %v13807_v21 = vld [vmem:[%s22075_s1 + $0xa6c] sm:$0xf0]  ;;  %v10226_v25 = vor.u32 %v13775_v19, %v10225_v16  ;;  %6529 = vmatpush.bf16.msra.mxu3 %v10498_v18  ;;  %v8937_v16 = vld [vmem:[%s22076_s0 + $0x28] sm:$0xf] }
  0x56   :  { %v10481_v22 = vld [vmem:[%s22075_s1 + $0xb60] sm:$0xf]  ;;  %v13839_v23 = vld [vmem:[%s22075_s1 + $0xb6c] sm:$0xf0]  ;;  %v10354_v26 = vor.u32 %v13807_v21, %v10353_v20  ;;  %6488 = vmatpush.bf16.msra.mxu0 %v10098_v24  ;;  %v13462_v18 = vld [vmem:[%s22076_s0 + $0xa4] sm:$0xf0] }
  0x57   :  { %v10081_v27 = vld [vmem:[%s22075_s1 + $0x840] sm:$0xf]  ;;  %v13739_v28 = vld [vmem:[%s22075_s1 + $0x84c] sm:$0xf0]  ;;  %v10482_v30 = vor.u32 %v13839_v23, %v10481_v22  ;;  %6502 = vmatpush.bf16.msra.mxu1 %v10226_v25  ;;  %v13445_v19 = vld [vmem:[%s22076_s0 + $0x24] sm:$0xf] }
  0x58   :  { %v10209_v29 = vld [vmem:[%s22075_s1 + $0x940] sm:$0xf]  ;;  %v13771_v31 = vld [vmem:[%s22075_s1 + $0x94c] sm:$0xf0]  ;;  %v10082_v36 = vor.u32 %v13739_v28, %v10081_v27  ;;  %6516 = vmatpush.bf16.msra.mxu2 %v10354_v26  ;;  %v8931_v22 = vld [vmem:[%s22076_s0 + $0xa0] sm:$0xf0] }
  0x59   :  { %v10337_v32 = vld [vmem:[%s22075_s1 + $0xa40] sm:$0xf]  ;;  %v13803_v33 = vld [vmem:[%s22075_s1 + $0xa4c] sm:$0xf0]  ;;  %v10210_v38 = vor.u32 %v13771_v31, %v10209_v29  ;;  %6530 = vmatpush.bf16.msra.mxu3 %v10482_v30  ;;  %v13446_v23 = vld [vmem:[%s22076_s0 + $0x2c] sm:$0xf] }
  0x5a   :  { %v10465_v34 = vld [vmem:[%s22075_s1 + $0xb40] sm:$0xf]  ;;  %v13835_v35 = vld [vmem:[%s22075_s1 + $0xb4c] sm:$0xf0]  ;;  %v10338_v40 = vor.u32 %v13803_v33, %v10337_v32  ;;  %6489 = vmatpush.bf16.msra.mxu0 %v10082_v36  ;;  %v8939_v24 = vld [vmem:[%s22076_s0 + $0xa8] sm:$0xf0]  ;;  %v15351_v36 = vor.u32 %v13445_v19, %v8931_v22 }
  0x5b   :  { %v10065_v37 = vld [vmem:[%s22075_s1 + $0x820] sm:$0xf]  ;;  %v13735_v41 = vld [vmem:[%s22075_s1 + $0x82c] sm:$0xf0]  ;;  %v10466_v46 = vor.u32 %v13835_v35, %v10465_v34  ;;  %6503 = vmatpush.bf16.msra.mxu1 %v10210_v38  ;;  %v15349_v35 = vor.u32 %v13462_v18, %v8937_v16 }
  0x5c   :  { %v10193_v42 = vld [vmem:[%s22075_s1 + $0x920] sm:$0xf]  ;;  %v13767_v45 = vld [vmem:[%s22075_s1 + $0x92c] sm:$0xf0]  ;;  %v10066_v54 = vor.u32 %v13735_v41, %v10065_v37  ;;  %6517 = vmatpush.bf16.msra.mxu2 %v10338_v40  ;;  %v15359_v40 = vor.u32 %v13446_v23, %v8939_v24 }
  0x5d   :  { %v10321_v48 = vld [vmem:[%s22075_s1 + $0xa20] sm:$0xf]  ;;  %v13799_v49 = vld [vmem:[%s22075_s1 + $0xa2c] sm:$0xf0]  ;;  %v10194_v60 = vor.u32 %v13767_v45, %v10193_v42  ;;  %6531 = vmatpush.bf16.msra.mxu3 %v10466_v46 }
  0x5e   :  { %v10449_v50 = vld [vmem:[%s22075_s1 + $0xb20] sm:$0xf]  ;;  %v13831_v51 = vld [vmem:[%s22075_s1 + $0xb2c] sm:$0xf0]  ;;  %v10322_v61 = vor.u32 %v13799_v49, %v10321_v48  ;;  %6490 = vmatpush.bf16.msra.mxu0 %v10066_v54 }
  0x5f   :  { %v10049_v52 = vld [vmem:[%s22075_s1 + $0x800] sm:$0xf]  ;;  %v13731_v53 = vld [vmem:[%s22075_s1 + $0x80c] sm:$0xf0]  ;;  %v10450_v2 = vor.u32 %v13831_v51, %v10449_v50  ;;  %6504 = vmatpush.bf16.msra.mxu1 %v10194_v60 }
  0x60   :  { %v10177_v55 = vld [vmem:[%s22075_s1 + $0x900] sm:$0xf]  ;;  %v13763_v56 = vld [vmem:[%s22075_s1 + $0x90c] sm:$0xf0]  ;;  %v10050_v9 = vor.u32 %v13731_v53, %v10049_v52  ;;  %6518 = vmatpush.bf16.msra.mxu2 %v10322_v61 }
  0x61   :  { %v10305_v57 = vld [vmem:[%s22075_s1 + $0xa00] sm:$0xf]  ;;  %v13795_v59 = vld [vmem:[%s22075_s1 + $0xa0c] sm:$0xf0]  ;;  %v10178_v14 = vor.u32 %v13763_v56, %v10177_v55  ;;  %6532 = vmatpush.bf16.msra.mxu3 %v10450_v2 }
  0x62   :  { %v10433_v62 = vld [vmem:[%s22075_s1 + $0xb00] sm:$0xf]  ;;  %v13827_v63 = vld [vmem:[%s22075_s1 + $0xb0c] sm:$0xf0]  ;;  %v10306_v15 = vor.u32 %v13795_v59, %v10305_v57  ;;  %6491 = vmatpush.bf16.msra.mxu0 %v10050_v9 }
  0x63   :  { %v10673_v0 = vld [vmem:[%s22075_s1 + $0xce0] sm:$0xf]  ;;  %v13887_v3 = vld [vmem:[%s22075_s1 + $0xcec] sm:$0xf0]  ;;  %v10434_v20 = vor.u32 %v13827_v63, %v10433_v62  ;;  %6505 = vmatpush.bf16.msra.mxu1 %v10178_v14 }
  0x64   :  { %v10801_v4 = vld [vmem:[%s22075_s1 + $0xde0] sm:$0xf]  ;;  %v13919_v5 = vld [vmem:[%s22075_s1 + $0xdec] sm:$0xf0]  ;;  %v10674_v21 = vor.u32 %v13887_v3, %v10673_v0  ;;  %6519 = vmatpush.bf16.msra.mxu2 %v10306_v15 }
  0x65   :  { %v10929_v6 = vld [vmem:[%s22075_s1 + $0xee0] sm:$0xf]  ;;  %v13951_v7 = vld [vmem:[%s22075_s1 + $0xeec] sm:$0xf0]  ;;  %v10802_v25 = vor.u32 %v13919_v5, %v10801_v4  ;;  %6533 = vmatpush.bf16.msra.mxu3 %v10434_v20 }
  0x66   :  { %v11057_v8 = vld [vmem:[%s22075_s1 + $0xfe0] sm:$0xf]  ;;  %v13983_v11 = vld [vmem:[%s22075_s1 + $0xfec] sm:$0xf0]  ;;  %v10930_v26 = vor.u32 %v13951_v7, %v10929_v6  ;;  %6540 = vmatpush.bf16.msrb.mxu0 %v10674_v21  ;;  %6506 = vmatmul.bf16.vlgmr.msra.gmra.mxu1 %v15351_v36 }
  0x67   :  { %v8929_v12 = vld [vmem:[%s22076_s0 + $0x20] sm:$0xf]  ;;  %v13883_v28 = vld [vmem:[%s22075_s1 + $0xccc] sm:$0xf0]  ;;  %v11058_v30 = vor.u32 %v13983_v11, %v11057_v8  ;;  %6554 = vmatpush.bf16.msrb.mxu1 %v10802_v25  ;;  %6520 = vmatmul.bf16.vlgmr.msra.gmra.mxu2 %v15349_v35 }
  0x68   :  { %v13461_v13 = vld [vmem:[%s22076_s0 + $0x9c] sm:$0xf0]  ;;  %v13915_v32 = vld [vmem:[%s22075_s1 + $0xdcc] sm:$0xf0]  ;;  %6568 = vmatpush.bf16.msrb.mxu2 %v10930_v26  ;;  %6534 = vmatmul.bf16.vlgmr.msra.gmra.mxu3 %v15359_v40 }
  0x69   :  { %v10657_v27 = vld [vmem:[%s22075_s1 + $0xcc0] sm:$0xf]  ;;  %v15338_v31 = vor.u32 %v13461_v13, %v8929_v12  ;;  %v13947_v34 = vld [vmem:[%s22075_s1 + $0xecc] sm:$0xf0]  ;;  %6582 = vmatpush.bf16.msrb.mxu3 %v11058_v30 }
  0x6a   :  { %v10785_v29 = vld [vmem:[%s22075_s1 + $0xdc0] sm:$0xf]  ;;  %v13979_v38 = vld [vmem:[%s22075_s1 + $0xfcc] sm:$0xf0]  ;;  %v10658_v41 = vor.u32 %v13883_v28, %v10657_v27 }
  0x6b   :  { %v10913_v33 = vld [vmem:[%s22075_s1 + $0xec0] sm:$0xf]  ;;  %v10786_v42 = vor.u32 %v13915_v32, %v10785_v29  ;;  %v13879_v48 = vld [vmem:[%s22075_s1 + $0xcac] sm:$0xf0]  ;;  %6492 = vmatmul.bf16.vlgmr.msra.gmra.mxu0 %v15338_v31 }
  0x6c   :  { %v11041_v37 = vld [vmem:[%s22075_s1 + $0xfc0] sm:$0xf]  ;;  %v10914_v45 = vor.u32 %v13947_v34, %v10913_v33  ;;  %v13911_v51 = vld [vmem:[%s22075_s1 + $0xdac] sm:$0xf0]  ;;  %6541 = vmatpush.bf16.msrb.mxu0 %v10658_v41 }
  0x6d   :  { %v10641_v46 = vld [vmem:[%s22075_s1 + $0xca0] sm:$0xf]  ;;  %v11042_v50 = vor.u32 %v13979_v38, %v11041_v37  ;;  %v13943_v53 = vld [vmem:[%s22075_s1 + $0xeac] sm:$0xf0]  ;;  %6555 = vmatpush.bf16.msrb.mxu1 %v10786_v42 }
  0x6e   :  { %v10769_v49 = vld [vmem:[%s22075_s1 + $0xda0] sm:$0xf]  ;;  %v13975_v55 = vld [vmem:[%s22075_s1 + $0xfac] sm:$0xf0]  ;;  %v10642_v56 = vor.u32 %v13879_v48, %v10641_v46  ;;  %6569 = vmatpush.bf16.msrb.mxu2 %v10914_v45 }
  0x6f   :  { %v10897_v52 = vld [vmem:[%s22075_s1 + $0xea0] sm:$0xf]  ;;  %v10770_v57 = vor.u32 %v13911_v51, %v10769_v49  ;;  %v13875_v61 = vld [vmem:[%s22075_s1 + $0xc8c] sm:$0xf0]  ;;  %6583 = vmatpush.bf16.msrb.mxu3 %v11042_v50 }
  0x70   :  { %v11025_v54 = vld [vmem:[%s22075_s1 + $0xfa0] sm:$0xf]  ;;  %v10898_v59 = vor.u32 %v13943_v53, %v10897_v52  ;;  %v13907_v0 = vld [vmem:[%s22075_s1 + $0xd8c] sm:$0xf0]  ;;  %6542 = vmatpush.bf16.msrb.mxu0 %v10642_v56 }
  0x71   :  { %v10625_v60 = vld [vmem:[%s22075_s1 + $0xc80] sm:$0xf]  ;;  %v11026_v63 = vor.u32 %v13975_v55, %v11025_v54  ;;  %v13939_v3 = vld [vmem:[%s22075_s1 + $0xe8c] sm:$0xf0]  ;;  %6556 = vmatpush.bf16.msrb.mxu1 %v10770_v57 }
  0x72   :  { %v10753_v62 = vld [vmem:[%s22075_s1 + $0xd80] sm:$0xf]  ;;  %v13971_v5 = vld [vmem:[%s22075_s1 + $0xf8c] sm:$0xf0]  ;;  %v10626_v6 = vor.u32 %v13875_v61, %v10625_v60  ;;  %6570 = vmatpush.bf16.msrb.mxu2 %v10898_v59 }
  0x73   :  { %v10881_v2 = vld [vmem:[%s22075_s1 + $0xe80] sm:$0xf]  ;;  %v10754_v7 = vor.u32 %v13907_v0, %v10753_v62  ;;  %v13871_v11 = vld [vmem:[%s22075_s1 + $0xc6c] sm:$0xf0]  ;;  %6584 = vmatpush.bf16.msrb.mxu3 %v11026_v63 }
  0x74   :  { %v11009_v4 = vld [vmem:[%s22075_s1 + $0xf80] sm:$0xf]  ;;  %v10882_v8 = vor.u32 %v13939_v3, %v10881_v2  ;;  %v13903_v14 = vld [vmem:[%s22075_s1 + $0xd6c] sm:$0xf0]  ;;  %6543 = vmatpush.bf16.msrb.mxu0 %v10626_v6 }
  0x75   :  { %v10609_v9 = vld [vmem:[%s22075_s1 + $0xc60] sm:$0xf]  ;;  %v11010_v13 = vor.u32 %v13971_v5, %v11009_v4  ;;  %v13935_v16 = vld [vmem:[%s22075_s1 + $0xe6c] sm:$0xf0]  ;;  %6557 = vmatpush.bf16.msrb.mxu1 %v10754_v7 }
  0x76   :  { %v10737_v12 = vld [vmem:[%s22075_s1 + $0xd60] sm:$0xf]  ;;  %v13967_v19 = vld [vmem:[%s22075_s1 + $0xf6c] sm:$0xf0]  ;;  %v10610_v20 = vor.u32 %v13871_v11, %v10609_v9  ;;  %6571 = vmatpush.bf16.msrb.mxu2 %v10882_v8 }
  0x77   :  { %v10865_v15 = vld [vmem:[%s22075_s1 + $0xe60] sm:$0xf]  ;;  %v10738_v21 = vor.u32 %v13903_v14, %v10737_v12  ;;  %v13867_v24 = vld [vmem:[%s22075_s1 + $0xc4c] sm:$0xf0]  ;;  %6585 = vmatpush.bf16.msrb.mxu3 %v11010_v13 }
  0x78   :  { %v10993_v18 = vld [vmem:[%s22075_s1 + $0xf60] sm:$0xf]  ;;  %v10866_v22 = vor.u32 %v13935_v16, %v10865_v15  ;;  %v13899_v27 = vld [vmem:[%s22075_s1 + $0xd4c] sm:$0xf0]  ;;  %6544 = vmatpush.bf16.msrb.mxu0 %v10610_v20  ;;  %v8953_v16 = vld [vmem:[%s22076_s0 + $0x38] sm:$0xf] }
  0x79   :  { %v10593_v23 = vld [vmem:[%s22075_s1 + $0xc40] sm:$0xf]  ;;  %v10994_v26 = vor.u32 %v13967_v19, %v10993_v18  ;;  %v13931_v29 = vld [vmem:[%s22075_s1 + $0xe4c] sm:$0xf0]  ;;  %6558 = vmatpush.bf16.msrb.mxu1 %v10738_v21  ;;  %v13464_v18 = vld [vmem:[%s22076_s0 + $0xb4] sm:$0xf0] }
  0x7a   :  { %v10721_v25 = vld [vmem:[%s22075_s1 + $0xd40] sm:$0xf]  ;;  %v13963_v32 = vld [vmem:[%s22075_s1 + $0xf4c] sm:$0xf0]  ;;  %v10594_v33 = vor.u32 %v13867_v24, %v10593_v23  ;;  %6572 = vmatpush.bf16.msrb.mxu2 %v10866_v22  ;;  %v13447_v19 = vld [vmem:[%s22076_s0 + $0x34] sm:$0xf] }
  0x7b   :  { %v10849_v28 = vld [vmem:[%s22075_s1 + $0xe40] sm:$0xf]  ;;  %v10722_v37 = vor.u32 %v13899_v27, %v10721_v25  ;;  %v13863_v41 = vld [vmem:[%s22075_s1 + $0xc2c] sm:$0xf0]  ;;  %6586 = vmatpush.bf16.msrb.mxu3 %v10994_v26  ;;  %v8947_v22 = vld [vmem:[%s22076_s0 + $0xb0] sm:$0xf0] }
  0x7c   :  { %v10977_v30 = vld [vmem:[%s22075_s1 + $0xf40] sm:$0xf]  ;;  %v10850_v38 = vor.u32 %v13931_v29, %v10849_v28  ;;  %v13895_v45 = vld [vmem:[%s22075_s1 + $0xd2c] sm:$0xf0]  ;;  %6545 = vmatpush.bf16.msrb.mxu0 %v10594_v33  ;;  %v13448_v23 = vld [vmem:[%s22076_s0 + $0x3c] sm:$0xf] }
  0x7d   :  { %v10577_v34 = vld [vmem:[%s22075_s1 + $0xc20] sm:$0xf]  ;;  %v10978_v46 = vor.u32 %v13963_v32, %v10977_v30  ;;  %v13927_v49 = vld [vmem:[%s22075_s1 + $0xe2c] sm:$0xf0]  ;;  %6559 = vmatpush.bf16.msrb.mxu1 %v10722_v37  ;;  %v8955_v24 = vld [vmem:[%s22076_s0 + $0xb8] sm:$0xf0] }
  0x7e   :  { %v10705_v42 = vld [vmem:[%s22075_s1 + $0xd20] sm:$0xf]  ;;  %v13959_v51 = vld [vmem:[%s22075_s1 + $0xf2c] sm:$0xf0]  ;;  %v10578_v54 = vor.u32 %v13863_v41, %v10577_v34  ;;  %6573 = vmatpush.bf16.msrb.mxu2 %v10850_v38  ;;  %v15577_v38 = vor.u32 %v13464_v18, %v8953_v16  ;;  %v15579_v41 = vor.u32 %v13447_v19, %v8947_v22 }
  0x7f   :  { %v10833_v48 = vld [vmem:[%s22075_s1 + $0xe20] sm:$0xf]  ;;  %v13859_v53 = vld [vmem:[%s22075_s1 + $0xc0c] sm:$0xf0]  ;;  %v10706_v60 = vor.u32 %v13895_v45, %v10705_v42  ;;  %6587 = vmatpush.bf16.msrb.mxu3 %v10978_v46  ;;  %v15587_v46 = vor.u32 %v13448_v23, %v8955_v24 }
  0x80   :  { %v10961_v50 = vld [vmem:[%s22075_s1 + $0xf20] sm:$0xf]  ;;  %v13891_v56 = vld [vmem:[%s22075_s1 + $0xd0c] sm:$0xf0]  ;;  %v10834_v61 = vor.u32 %v13927_v49, %v10833_v48  ;;  %6546 = vmatpush.bf16.msrb.mxu0 %v10578_v54 }
  0x81   :  { %v10561_v52 = vld [vmem:[%s22075_s1 + $0xc00] sm:$0xf]  ;;  %v13923_v59 = vld [vmem:[%s22075_s1 + $0xe0c] sm:$0xf0]  ;;  %v10962_v2 = vor.u32 %v13959_v51, %v10961_v50  ;;  %6560 = vmatpush.bf16.msrb.mxu1 %v10706_v60 }
  0x82   :  { %v10689_v55 = vld [vmem:[%s22075_s1 + $0xd00] sm:$0xf]  ;;  %v13955_v63 = vld [vmem:[%s22075_s1 + $0xf0c] sm:$0xf0]  ;;  %v10562_v9 = vor.u32 %v13859_v53, %v10561_v52  ;;  %6574 = vmatpush.bf16.msrb.mxu2 %v10834_v61 }
  0x83   :  { %v10817_v57 = vld [vmem:[%s22075_s1 + $0xe00] sm:$0xf]  ;;  %v14015_v3 = vld [vmem:[%s22075_s1 + $0x10ec] sm:$0xf0]  ;;  %v10690_v14 = vor.u32 %v13891_v56, %v10689_v55  ;;  %6588 = vmatpush.bf16.msrb.mxu3 %v10962_v2 }
  0x84   :  { %v10945_v62 = vld [vmem:[%s22075_s1 + $0xf00] sm:$0xf]  ;;  %v14047_v5 = vld [vmem:[%s22075_s1 + $0x11ec] sm:$0xf0]  ;;  %v10818_v15 = vor.u32 %v13923_v59, %v10817_v57  ;;  %6547 = vmatpush.bf16.msrb.mxu0 %v10562_v9 }
  0x85   :  { %v11185_v0 = vld [vmem:[%s22075_s1 + $0x10e0] sm:$0xf]  ;;  %v14079_v7 = vld [vmem:[%s22075_s1 + $0x12ec] sm:$0xf0]  ;;  %v10946_v20 = vor.u32 %v13955_v63, %v10945_v62  ;;  %6561 = vmatpush.bf16.msrb.mxu1 %v10690_v14 }
  0x86   :  { %v11313_v4 = vld [vmem:[%s22075_s1 + $0x11e0] sm:$0xf]  ;;  %v14111_v11 = vld [vmem:[%s22075_s1 + $0x13ec] sm:$0xf0]  ;;  %v11186_v21 = vor.u32 %v14015_v3, %v11185_v0  ;;  %6575 = vmatpush.bf16.msrb.mxu2 %v10818_v15 }
  0x87   :  { %v11441_v6 = vld [vmem:[%s22075_s1 + $0x12e0] sm:$0xf]  ;;  %v8945_v12 = vld [vmem:[%s22076_s0 + $0x30] sm:$0xf]  ;;  %v11314_v25 = vor.u32 %v14047_v5, %v11313_v4  ;;  %6589 = vmatpush.bf16.msrb.mxu3 %v10946_v20 }
  0x88   :  { %v11569_v8 = vld [vmem:[%s22075_s1 + $0x13e0] sm:$0xf]  ;;  %v13463_v13 = vld [vmem:[%s22076_s0 + $0xac] sm:$0xf0]  ;;  %v11442_v26 = vor.u32 %v14079_v7, %v11441_v6  ;;  %6596 = vmatpush.bf16.msra.mxu0 %v11186_v21  ;;  %6562 = vmatmul.bf16.vlgmr.msrb.gmra.mxu1 %v15579_v41 }
  0x89   :  { %v11169_v27 = vld [vmem:[%s22075_s1 + $0x10c0] sm:$0xf]  ;;  %v14011_v28 = vld [vmem:[%s22075_s1 + $0x10cc] sm:$0xf0]  ;;  %v11570_v30 = vor.u32 %v14111_v11, %v11569_v8  ;;  %v15566_v32 = vor.u32 %v13463_v13, %v8945_v12  ;;  %6610 = vmatpush.bf16.msra.mxu1 %v11314_v25  ;;  %6576 = vmatmul.bf16.vlgmr.msrb.gmra.mxu2 %v15577_v38 }
  0x8a   :  { %v11297_v29 = vld [vmem:[%s22075_s1 + $0x11c0] sm:$0xf]  ;;  %v14043_v33 = vld [vmem:[%s22075_s1 + $0x11cc] sm:$0xf0]  ;;  %v11170_v48 = vor.u32 %v14011_v28, %v11169_v27  ;;  %6624 = vmatpush.bf16.msra.mxu2 %v11442_v26  ;;  %6590 = vmatmul.bf16.vlgmr.msrb.gmra.mxu3 %v15587_v46 }
  0x8b   :  { %v11425_v34 = vld [vmem:[%s22075_s1 + $0x12c0] sm:$0xf]  ;;  %v14075_v37 = vld [vmem:[%s22075_s1 + $0x12cc] sm:$0xf0]  ;;  %v11298_v49 = vor.u32 %v14043_v33, %v11297_v29  ;;  %6638 = vmatpush.bf16.msra.mxu3 %v11570_v30  ;;  %6548 = vmatmul.bf16.vlgmr.msrb.gmra.mxu0 %v15566_v32 }
  0x8c   :  { %v11553_v42 = vld [vmem:[%s22075_s1 + $0x13c0] sm:$0xf]  ;;  %v14107_v45 = vld [vmem:[%s22075_s1 + $0x13cc] sm:$0xf0]  ;;  %v11426_v50 = vor.u32 %v14075_v37, %v11425_v34  ;;  %6597 = vmatpush.bf16.msra.mxu0 %v11170_v48 }
  0x8d   :  { %v11153_v51 = vld [vmem:[%s22075_s1 + $0x10a0] sm:$0xf]  ;;  %v14007_v52 = vld [vmem:[%s22075_s1 + $0x10ac] sm:$0xf0]  ;;  %v11554_v54 = vor.u32 %v14107_v45, %v11553_v42  ;;  %6611 = vmatpush.bf16.msra.mxu1 %v11298_v49 }
  0x8e   :  { %v11281_v53 = vld [vmem:[%s22075_s1 + $0x11a0] sm:$0xf]  ;;  %v14039_v55 = vld [vmem:[%s22075_s1 + $0x11ac] sm:$0xf0]  ;;  %v11154_v61 = vor.u32 %v14007_v52, %v11153_v51  ;;  %6625 = vmatpush.bf16.msra.mxu2 %v11426_v50 }
  0x8f   :  { %v11409_v56 = vld [vmem:[%s22075_s1 + $0x12a0] sm:$0xf]  ;;  %v14071_v57 = vld [vmem:[%s22075_s1 + $0x12ac] sm:$0xf0]  ;;  %v11282_v62 = vor.u32 %v14039_v55, %v11281_v53  ;;  %6639 = vmatpush.bf16.msra.mxu3 %v11554_v54 }
  0x90   :  { %v11537_v59 = vld [vmem:[%s22075_s1 + $0x13a0] sm:$0xf]  ;;  %v14103_v60 = vld [vmem:[%s22075_s1 + $0x13ac] sm:$0xf0]  ;;  %v11410_v63 = vor.u32 %v14071_v57, %v11409_v56  ;;  %6598 = vmatpush.bf16.msra.mxu0 %v11154_v61 }
  0x91   :  { %v11137_v0 = vld [vmem:[%s22075_s1 + $0x1080] sm:$0xf]  ;;  %v14003_v2 = vld [vmem:[%s22075_s1 + $0x108c] sm:$0xf0]  ;;  %v11538_v4 = vor.u32 %v14103_v60, %v11537_v59  ;;  %6612 = vmatpush.bf16.msra.mxu1 %v11282_v62 }
  0x92   :  { %v11265_v3 = vld [vmem:[%s22075_s1 + $0x1180] sm:$0xf]  ;;  %v14035_v5 = vld [vmem:[%s22075_s1 + $0x118c] sm:$0xf0]  ;;  %v11138_v11 = vor.u32 %v14003_v2, %v11137_v0  ;;  %6626 = vmatpush.bf16.msra.mxu2 %v11410_v63 }
  0x93   :  { %v11393_v6 = vld [vmem:[%s22075_s1 + $0x1280] sm:$0xf]  ;;  %v14067_v7 = vld [vmem:[%s22075_s1 + $0x128c] sm:$0xf0]  ;;  %v11266_v12 = vor.u32 %v14035_v5, %v11265_v3  ;;  %6640 = vmatpush.bf16.msra.mxu3 %v11538_v4 }
  0x94   :  { %v11521_v8 = vld [vmem:[%s22075_s1 + $0x1380] sm:$0xf]  ;;  %v14099_v9 = vld [vmem:[%s22075_s1 + $0x138c] sm:$0xf0]  ;;  %v11394_v13 = vor.u32 %v14067_v7, %v11393_v6  ;;  %6599 = vmatpush.bf16.msra.mxu0 %v11138_v11 }
  0x95   :  { %v11121_v14 = vld [vmem:[%s22075_s1 + $0x1060] sm:$0xf]  ;;  %v13999_v15 = vld [vmem:[%s22075_s1 + $0x106c] sm:$0xf0]  ;;  %v11522_v18 = vor.u32 %v14099_v9, %v11521_v8  ;;  %6613 = vmatpush.bf16.msra.mxu1 %v11266_v12 }
  0x96   :  { %v11249_v16 = vld [vmem:[%s22075_s1 + $0x1160] sm:$0xf]  ;;  %v14031_v19 = vld [vmem:[%s22075_s1 + $0x116c] sm:$0xf0]  ;;  %v11122_v24 = vor.u32 %v13999_v15, %v11121_v14  ;;  %6627 = vmatpush.bf16.msra.mxu2 %v11394_v13 }
  0x97   :  { %v11377_v20 = vld [vmem:[%s22075_s1 + $0x1260] sm:$0xf]  ;;  %v14063_v21 = vld [vmem:[%s22075_s1 + $0x126c] sm:$0xf0]  ;;  %v11250_v25 = vor.u32 %v14031_v19, %v11249_v16  ;;  %6641 = vmatpush.bf16.msra.mxu3 %v11522_v18 }
  0x98   :  { %v11505_v22 = vld [vmem:[%s22075_s1 + $0x1360] sm:$0xf]  ;;  %v14095_v23 = vld [vmem:[%s22075_s1 + $0x136c] sm:$0xf0]  ;;  %v11378_v26 = vor.u32 %v14063_v21, %v11377_v20  ;;  %6600 = vmatpush.bf16.msra.mxu0 %v11122_v24 }
  0x99   :  { %v11105_v27 = vld [vmem:[%s22075_s1 + $0x1040] sm:$0xf]  ;;  %v13995_v28 = vld [vmem:[%s22075_s1 + $0x104c] sm:$0xf0]  ;;  %v11506_v30 = vor.u32 %v14095_v23, %v11505_v22  ;;  %6614 = vmatpush.bf16.msra.mxu1 %v11250_v25  ;;  %v8969_v25 = vld [vmem:[%s22076_s0 + $0x48] sm:$0xf] }
  0x9a   :  { %v11233_v29 = vld [vmem:[%s22075_s1 + $0x1140] sm:$0xf]  ;;  %v14027_v33 = vld [vmem:[%s22075_s1 + $0x114c] sm:$0xf0]  ;;  %v11106_v48 = vor.u32 %v13995_v28, %v11105_v27  ;;  %6628 = vmatpush.bf16.msra.mxu2 %v11378_v26  ;;  %v13466_v26 = vld [vmem:[%s22076_s0 + $0xc4] sm:$0xf0] }
  0x9b   :  { %v11361_v34 = vld [vmem:[%s22075_s1 + $0x1240] sm:$0xf]  ;;  %v14059_v37 = vld [vmem:[%s22075_s1 + $0x124c] sm:$0xf0]  ;;  %v11234_v50 = vor.u32 %v14027_v33, %v11233_v29  ;;  %6642 = vmatpush.bf16.msra.mxu3 %v11506_v30  ;;  %v13449_v27 = vld [vmem:[%s22076_s0 + $0x44] sm:$0xf] }
  0x9c   :  { %v11489_v42 = vld [vmem:[%s22075_s1 + $0x1340] sm:$0xf]  ;;  %v14091_v45 = vld [vmem:[%s22075_s1 + $0x134c] sm:$0xf0]  ;;  %v11362_v51 = vor.u32 %v14059_v37, %v11361_v34  ;;  %6601 = vmatpush.bf16.msra.mxu0 %v11106_v48  ;;  %v8963_v30 = vld [vmem:[%s22076_s0 + $0xc0] sm:$0xf0] }
  0x9d   :  { %v11089_v49 = vld [vmem:[%s22075_s1 + $0x1020] sm:$0xf]  ;;  %v13991_v52 = vld [vmem:[%s22075_s1 + $0x102c] sm:$0xf0]  ;;  %v11490_v55 = vor.u32 %v14091_v45, %v11489_v42  ;;  %6615 = vmatpush.bf16.msra.mxu1 %v11234_v50  ;;  %v13450_v33 = vld [vmem:[%s22076_s0 + $0x4c] sm:$0xf] }
  0x9e   :  { %v11217_v53 = vld [vmem:[%s22075_s1 + $0x1120] sm:$0xf]  ;;  %v14023_v54 = vld [vmem:[%s22075_s1 + $0x112c] sm:$0xf0]  ;;  %v11090_v63 = vor.u32 %v13991_v52, %v11089_v49  ;;  %6629 = vmatpush.bf16.msra.mxu2 %v11362_v51  ;;  %v8971_v34 = vld [vmem:[%s22076_s0 + $0xc8] sm:$0xf0] }
  0x9f   :  { %v11345_v56 = vld [vmem:[%s22075_s1 + $0x1220] sm:$0xf]  ;;  %v14055_v57 = vld [vmem:[%s22075_s1 + $0x122c] sm:$0xf0]  ;;  %v11218_v5 = vor.u32 %v14023_v54, %v11217_v53  ;;  %6643 = vmatpush.bf16.msra.mxu3 %v11490_v55  ;;  %v15805_v55 = vor.u32 %v13466_v26, %v8969_v25 }
  0xa0   :  { %v11473_v59 = vld [vmem:[%s22075_s1 + $0x1320] sm:$0xf]  ;;  %v14087_v60 = vld [vmem:[%s22075_s1 + $0x132c] sm:$0xf0]  ;;  %v11346_v6 = vor.u32 %v14055_v57, %v11345_v56  ;;  %6602 = vmatpush.bf16.msra.mxu0 %v11090_v63  ;;  %v15807_v56 = vor.u32 %v13449_v27, %v8963_v30 }
  0xa1   :  { %v11073_v61 = vld [vmem:[%s22075_s1 + $0x1000] sm:$0xf]  ;;  %v13987_v62 = vld [vmem:[%s22075_s1 + $0x100c] sm:$0xf0]  ;;  %v11474_v11 = vor.u32 %v14087_v60, %v11473_v59  ;;  %6616 = vmatpush.bf16.msra.mxu1 %v11218_v5  ;;  %v15815_v60 = vor.u32 %v13450_v33, %v8971_v34 }
  0xa2   :  { %v11201_v0 = vld [vmem:[%s22075_s1 + $0x1100] sm:$0xf]  ;;  %v14019_v2 = vld [vmem:[%s22075_s1 + $0x110c] sm:$0xf0]  ;;  %v11074_v19 = vor.u32 %v13987_v62, %v11073_v61  ;;  %6630 = vmatpush.bf16.msra.mxu2 %v11346_v6 }
  0xa3   :  { %v11329_v3 = vld [vmem:[%s22075_s1 + $0x1200] sm:$0xf]  ;;  %v14051_v4 = vld [vmem:[%s22075_s1 + $0x120c] sm:$0xf0]  ;;  %v11202_v23 = vor.u32 %v14019_v2, %v11201_v0  ;;  %6644 = vmatpush.bf16.msra.mxu3 %v11474_v11 }
  0xa4   :  { %v11457_v7 = vld [vmem:[%s22075_s1 + $0x1300] sm:$0xf]  ;;  %v14083_v8 = vld [vmem:[%s22075_s1 + $0x130c] sm:$0xf0]  ;;  %v11330_v24 = vor.u32 %v14051_v4, %v11329_v3  ;;  %6603 = vmatpush.bf16.msra.mxu0 %v11074_v19 }
  0xa5   :  { %v11697_v9 = vld [vmem:[%s22075_s1 + $0x14e0] sm:$0xf]  ;;  %v14143_v12 = vld [vmem:[%s22075_s1 + $0x14ec] sm:$0xf0]  ;;  %v11458_v28 = vor.u32 %v14083_v8, %v11457_v7  ;;  %6617 = vmatpush.bf16.msra.mxu1 %v11202_v23 }
  0xa6   :  { %v11825_v13 = vld [vmem:[%s22075_s1 + $0x15e0] sm:$0xf]  ;;  %v14175_v14 = vld [vmem:[%s22075_s1 + $0x15ec] sm:$0xf0]  ;;  %v11698_v29 = vor.u32 %v14143_v12, %v11697_v9  ;;  %6631 = vmatpush.bf16.msra.mxu2 %v11330_v24 }
  0xa7   :  { %v11953_v15 = vld [vmem:[%s22075_s1 + $0x16e0] sm:$0xf]  ;;  %v14207_v16 = vld [vmem:[%s22075_s1 + $0x16ec] sm:$0xf0]  ;;  %v11826_v37 = vor.u32 %v14175_v14, %v11825_v13  ;;  %6645 = vmatpush.bf16.msra.mxu3 %v11458_v28 }
  0xa8   :  { %v12081_v18 = vld [vmem:[%s22075_s1 + $0x17e0] sm:$0xf]  ;;  %v14239_v20 = vld [vmem:[%s22075_s1 + $0x17ec] sm:$0xf0]  ;;  %v11954_v42 = vor.u32 %v14207_v16, %v11953_v15  ;;  %6652 = vmatpush.bf16.msrb.mxu0 %v11698_v29  ;;  %6618 = vmatmul.bf16.vlgmr.msra.gmra.mxu1 %v15807_v56 }
  0xa9   :  { %v8961_v21 = vld [vmem:[%s22076_s0 + $0x40] sm:$0xf]  ;;  %v14139_v48 = vld [vmem:[%s22075_s1 + $0x14cc] sm:$0xf0]  ;;  %v12082_v50 = vor.u32 %v14239_v20, %v12081_v18  ;;  %6666 = vmatpush.bf16.msrb.mxu1 %v11826_v37  ;;  %6632 = vmatmul.bf16.vlgmr.msra.gmra.mxu2 %v15805_v55 }
  0xaa   :  { %v13465_v22 = vld [vmem:[%s22076_s0 + $0xbc] sm:$0xf0]  ;;  %v14171_v52 = vld [vmem:[%s22075_s1 + $0x15cc] sm:$0xf0]  ;;  %6680 = vmatpush.bf16.msrb.mxu2 %v11954_v42  ;;  %6646 = vmatmul.bf16.vlgmr.msra.gmra.mxu3 %v15815_v60  ;;  %v6381_v26 = vpop.f32.mrf.mxu0 }
  0xab   :  { %v11681_v45 = vld [vmem:[%s22075_s1 + $0x14c0] sm:$0xf]  ;;  %v15794_v51 = vor.u32 %v13465_v22, %v8961_v21  ;;  %v14203_v54 = vld [vmem:[%s22075_s1 + $0x16cc] sm:$0xf0]  ;;  %6694 = vmatpush.bf16.msrb.mxu3 %v12082_v50 }
  0xac   :  { %v11809_v49 = vld [vmem:[%s22075_s1 + $0x15c0] sm:$0xf]  ;;  %v14235_v59 = vld [vmem:[%s22075_s1 + $0x17cc] sm:$0xf0]  ;;  %v11682_v61 = vor.u32 %v14139_v48, %v11681_v45 }
  0xad   :  { %v11937_v53 = vld [vmem:[%s22075_s1 + $0x16c0] sm:$0xf]  ;;  %v11810_v63 = vor.u32 %v14171_v52, %v11809_v49  ;;  %v14135_v2 = vld [vmem:[%s22075_s1 + $0x14ac] sm:$0xf0]  ;;  %6604 = vmatmul.bf16.vlgmr.msra.gmra.mxu0 %v15794_v51 }
  0xae   :  { %v12065_v57 = vld [vmem:[%s22075_s1 + $0x17c0] sm:$0xf]  ;;  %v11938_v0 = vor.u32 %v14203_v54, %v11937_v53  ;;  %v14167_v6 = vld [vmem:[%s22075_s1 + $0x15ac] sm:$0xf0]  ;;  %6653 = vmatpush.bf16.msrb.mxu0 %v11682_v61  ;;  %v6395_v53 = vpop.f32.mrf.mxu1 }
  0xaf   :  { %v11665_v62 = vld [vmem:[%s22075_s1 + $0x14a0] sm:$0xf]  ;;  %v12066_v5 = vor.u32 %v14235_v59, %v12065_v57  ;;  %v14199_v8 = vld [vmem:[%s22075_s1 + $0x16ac] sm:$0xf0]  ;;  %6667 = vmatpush.bf16.msrb.mxu1 %v11810_v63 }
  0xb0   :  { %v11793_v3 = vld [vmem:[%s22075_s1 + $0x15a0] sm:$0xf]  ;;  %v14231_v11 = vld [vmem:[%s22075_s1 + $0x17ac] sm:$0xf0]  ;;  %v11666_v12 = vor.u32 %v14135_v2, %v11665_v62  ;;  %6681 = vmatpush.bf16.msrb.mxu2 %v11938_v0 }
  0xb1   :  { %v15829_v4 = vld [vmem:[%s22077_s2] sm:$0xf]  ;;  %v11794_v14 = vor.u32 %v14167_v6, %v11793_v3  ;;  %v14131_v18 = vld [vmem:[%s22075_s1 + $0x148c] sm:$0xf0]  ;;  %6695 = vmatpush.bf16.msrb.mxu3 %v12066_v5 }
  0xb2   :  { %v11921_v7 = vld [vmem:[%s22075_s1 + $0x16a0] sm:$0xf]  ;;  %v22083_v13 = vperm.slane %v15829_v4, 0  ;;  %v14163_v21 = vld [vmem:[%s22075_s1 + $0x158c] sm:$0xf0]  ;;  %6654 = vmatpush.bf16.msrb.mxu0 %v11666_v12 }
  0xb3   :  { %v12049_v9 = vld [vmem:[%s22075_s1 + $0x17a0] sm:$0xf]  ;;  %v11922_v15 = vor.u32 %v14199_v8, %v11921_v7  ;;  %v14195_v23 = vld [vmem:[%s22075_s1 + $0x168c] sm:$0xf0]  ;;  %6668 = vmatpush.bf16.msrb.mxu1 %v11794_v14  ;;  %v6409_v7 = vpop.f32.mrf.mxu2 }
  0xb4   :  { %v11649_v16 = vld [vmem:[%s22075_s1 + $0x1480] sm:$0xf]  ;;  %v12050_v20 = vor.u32 %v14231_v11, %v12049_v9  ;;  %v14227_v25 = vld [vmem:[%s22075_s1 + $0x178c] sm:$0xf0]  ;;  %v6382_v28 = vadd.f32 %v6381_v26, %v22083_v13 }
  0xb5   :  { %v11777_v19 = vld [vmem:[%s22075_s1 + $0x1580] sm:$0xf]  ;;  %v11650_v27 = vor.u32 %v14131_v18, %v11649_v16  ;;  %6682 = vmatpush.bf16.msrb.mxu2 %v11922_v15  ;;  %v14127_v34 = vld [vmem:[%s22075_s1 + $0x146c] sm:$0xf0] }
  0xb6   :  { %v11905_v22 = vld [vmem:[%s22075_s1 + $0x1680] sm:$0xf]  ;;  %v11778_v29 = vor.u32 %v14163_v21, %v11777_v19  ;;  %6696 = vmatpush.bf16.msrb.mxu3 %v12050_v20  ;;  %v14159_v45 = vld [vmem:[%s22075_s1 + $0x156c] sm:$0xf0]  ;;  %v6396_v57 = vadd.f32 %v6395_v53, %v6382_v28 }
  0xb7   :  { %v12033_v24 = vld [vmem:[%s22075_s1 + $0x1780] sm:$0xf]  ;;  %v11906_v30 = vor.u32 %v14195_v23, %v11905_v22  ;;  %v14191_v49 = vld [vmem:[%s22075_s1 + $0x166c] sm:$0xf0]  ;;  %6655 = vmatpush.bf16.msrb.mxu0 %v11650_v27 }
  0xb8   :  { %v11633_v33 = vld [vmem:[%s22075_s1 + $0x1460] sm:$0xf]  ;;  %v12034_v42 = vor.u32 %v14227_v25, %v12033_v24  ;;  %v14223_v52 = vld [vmem:[%s22075_s1 + $0x176c] sm:$0xf0]  ;;  %6669 = vmatpush.bf16.msrb.mxu1 %v11778_v29  ;;  %v6410_v11 = vadd.f32 %v6409_v7, %v6396_v57  ;;  %v6423_v25 = vpop.f32.mrf.mxu3 }
  0xb9   :  { %v11761_v37 = vld [vmem:[%s22075_s1 + $0x1560] sm:$0xf]  ;;  %v11634_v54 = vor.u32 %v14127_v34, %v11633_v33  ;;  %6683 = vmatpush.bf16.msrb.mxu2 %v11906_v30  ;;  %v14123_v63 = vld [vmem:[%s22075_s1 + $0x144c] sm:$0xf0] }
  0xba   :  { %v11889_v48 = vld [vmem:[%s22075_s1 + $0x1660] sm:$0xf]  ;;  %v11762_v59 = vor.u32 %v14159_v45, %v11761_v37  ;;  %6697 = vmatpush.bf16.msrb.mxu3 %v12034_v42  ;;  %v14155_v3 = vld [vmem:[%s22075_s1 + $0x154c] sm:$0xf0]  ;;  %v15955_v29 = vadd.f32 %v6423_v25, %v6410_v11  ;;  %v13451_v11 = vld [vmem:[%s22076_s0 + $0x54] sm:$0xf] }
  0xbb   :  { %v12017_v50 = vld [vmem:[%s22075_s1 + $0x1760] sm:$0xf]  ;;  %v11890_v61 = vor.u32 %v14191_v49, %v11889_v48  ;;  %v14187_v6 = vld [vmem:[%s22075_s1 + $0x164c] sm:$0xf0]  ;;  %6656 = vmatpush.bf16.msrb.mxu0 %v11634_v54 }
  0xbc   :  { %v11617_v62 = vld [vmem:[%s22075_s1 + $0x1440] sm:$0xf]  ;;  %v12018_v2 = vor.u32 %v14223_v52, %v12017_v50  ;;  %v14219_v9 = vld [vmem:[%s22075_s1 + $0x174c] sm:$0xf0]  ;;  %6670 = vmatpush.bf16.msrb.mxu1 %v11762_v59 }
  0xbd   :  { %v11745_v0 = vld [vmem:[%s22075_s1 + $0x1540] sm:$0xf]  ;;  %v11618_v12 = vor.u32 %v14123_v63, %v11617_v62  ;;  %6684 = vmatpush.bf16.msrb.mxu2 %v11890_v61  ;;  %v14119_v18 = vld [vmem:[%s22075_s1 + $0x142c] sm:$0xf0] }
  0xbe   :  { %v11873_v5 = vld [vmem:[%s22075_s1 + $0x1640] sm:$0xf]  ;;  %v11746_v15 = vor.u32 %v14155_v3, %v11745_v0  ;;  %v14151_v20 = vld [vmem:[%s22075_s1 + $0x152c] sm:$0xf0]  ;;  %6698 = vmatpush.bf16.msrb.mxu3 %v12018_v2 }
  0xbf   :  { %v12001_v8 = vld [vmem:[%s22075_s1 + $0x1740] sm:$0xf]  ;;  %v11874_v16 = vor.u32 %v14187_v6, %v11873_v5  ;;  %v14183_v23 = vld [vmem:[%s22075_s1 + $0x162c] sm:$0xf0]  ;;  %6657 = vmatpush.bf16.msrb.mxu0 %v11618_v12 }
  0xc0   :  { %v11601_v14 = vld [vmem:[%s22075_s1 + $0x1420] sm:$0xf]  ;;  %v12002_v21 = vor.u32 %v14219_v9, %v12001_v8  ;;  %v14215_v26 = vld [vmem:[%s22075_s1 + $0x172c] sm:$0xf0]  ;;  %6671 = vmatpush.bf16.msrb.mxu1 %v11746_v15  ;;  %v8985_v8 = vld [vmem:[%s22076_s0 + $0x58] sm:$0xf] }
  0xc1   :  { %v11729_v19 = vld [vmem:[%s22075_s1 + $0x1520] sm:$0xf]  ;;  %v14115_v28 = vld [vmem:[%s22075_s1 + $0x140c] sm:$0xf0]  ;;  %v11602_v30 = vor.u32 %v14119_v18, %v11601_v14  ;;  %6685 = vmatpush.bf16.msrb.mxu2 %v11874_v16  ;;  %v13468_v9 = vld [vmem:[%s22076_s0 + $0xd4] sm:$0xf0] }
  0xc2   :  { %v11857_v22 = vld [vmem:[%s22075_s1 + $0x1620] sm:$0xf]  ;;  %v14147_v34 = vld [vmem:[%s22075_s1 + $0x150c] sm:$0xf0]  ;;  %v11730_v45 = vor.u32 %v14151_v20, %v11729_v19  ;;  %6699 = vmatpush.bf16.msrb.mxu3 %v12002_v21  ;;  %v8979_v15 = vld [vmem:[%s22076_s0 + $0xd0] sm:$0xf0]  ;;  %v16023_v21 = vpop.f32.mrf.mxu0 }
  0xc3   :  { %v11985_v24 = vld [vmem:[%s22075_s1 + $0x1720] sm:$0xf]  ;;  %v14179_v42 = vld [vmem:[%s22075_s1 + $0x160c] sm:$0xf0]  ;;  %v11858_v48 = vor.u32 %v14183_v23, %v11857_v22  ;;  %6658 = vmatpush.bf16.msrb.mxu0 %v11602_v30  ;;  %v13452_v16 = vld [vmem:[%s22076_s0 + $0x5c] sm:$0xf] }
  0xc4   :  { %v11585_v27 = vld [vmem:[%s22075_s1 + $0x1400] sm:$0xf]  ;;  %v14211_v50 = vld [vmem:[%s22075_s1 + $0x170c] sm:$0xf0]  ;;  %v11986_v53 = vor.u32 %v14215_v26, %v11985_v24  ;;  %6672 = vmatpush.bf16.msrb.mxu1 %v11730_v45  ;;  %v8987_v18 = vld [vmem:[%s22076_s0 + $0xd8] sm:$0xf0]  ;;  %v16055_v45 = vpop.f32.mrf.mxu1 }
  0xc5   :  { %v11713_v33 = vld [vmem:[%s22075_s1 + $0x1500] sm:$0xf]  ;;  %v14271_v54 = vld [vmem:[%s22075_s1 + $0x18ec] sm:$0xf0]  ;;  %v11586_v0 = vor.u32 %v14115_v28, %v11585_v27  ;;  %6686 = vmatpush.bf16.msrb.mxu2 %v11858_v48  ;;  %22093 = vst [vmem:[#allocation2_spill] sm:$0xff] %v16055_v45  ;;  %v16057_v48 = vor.u32 %v13452_v16, %v8987_v18 }
  0xc6   :  { %v11841_v37 = vld [vmem:[%s22075_s1 + $0x1600] sm:$0xf]  ;;  %v14303_v59 = vld [vmem:[%s22075_s1 + $0x19ec] sm:$0xf0]  ;;  %v11714_v6 = vor.u32 %v14147_v34, %v11713_v33  ;;  %6700 = vmatpush.bf16.msrb.mxu3 %v11986_v53  ;;  %v16045_v33 = vor.u32 %v13468_v9, %v8985_v8  ;;  %v16047_v34 = vor.u32 %v13451_v11, %v8979_v15 }
  0xc7   :  { %v11969_v49 = vld [vmem:[%s22075_s1 + $0x1700] sm:$0xf]  ;;  %v14335_v62 = vld [vmem:[%s22075_s1 + $0x1aec] sm:$0xf0]  ;;  %v11842_v7 = vor.u32 %v14179_v42, %v11841_v37  ;;  %6659 = vmatpush.bf16.msrb.mxu0 %v11586_v0 }
  0xc8   :  { %v12209_v52 = vld [vmem:[%s22075_s1 + $0x18e0] sm:$0xf]  ;;  %v14367_v2 = vld [vmem:[%s22075_s1 + $0x1bec] sm:$0xf0]  ;;  %v11970_v12 = vor.u32 %v14211_v50, %v11969_v49  ;;  %6673 = vmatpush.bf16.msrb.mxu1 %v11714_v6 }
  0xc9   :  { %v12337_v57 = vld [vmem:[%s22075_s1 + $0x19e0] sm:$0xf]  ;;  %v8977_v3 = vld [vmem:[%s22076_s0 + $0x50] sm:$0xf]  ;;  %v12210_v14 = vor.u32 %v14271_v54, %v12209_v52  ;;  %6687 = vmatpush.bf16.msrb.mxu2 %v11842_v7 }
  0xca   :  { %v12465_v61 = vld [vmem:[%s22075_s1 + $0x1ae0] sm:$0xf]  ;;  %v13467_v5 = vld [vmem:[%s22076_s0 + $0xcc] sm:$0xf0]  ;;  %v12338_v19 = vor.u32 %v14303_v59, %v12337_v57  ;;  %6701 = vmatpush.bf16.msrb.mxu3 %v11970_v12 }
  0xcb   :  { %v12593_v63 = vld [vmem:[%s22075_s1 + $0x1be0] sm:$0xf]  ;;  %v12466_v20 = vor.u32 %v14335_v62, %v12465_v61  ;;  %v14267_v23 = vld [vmem:[%s22075_s1 + $0x18cc] sm:$0xf0]  ;;  %v16034_v26 = vor.u32 %v13467_v5, %v8977_v3  ;;  %6708 = vmatpush.bf16.msra.mxu0 %v12210_v14  ;;  %6674 = vmatmul.bf16.vlgmr.msrb.gmra.mxu1 %v16047_v34  ;;  %v16087_v5 = vpop.f32.mrf.mxu2  ;;  %v16098_v14 = vpop.f32.mrf.mxu3 }
  0xcc   :  { %v12193_v22 = vld [vmem:[%s22075_s1 + $0x18c0] sm:$0xf]  ;;  %v12594_v25 = vor.u32 %v14367_v2, %v12593_v63  ;;  %v14299_v27 = vld [vmem:[%s22075_s1 + $0x19cc] sm:$0xf0]  ;;  %6722 = vmatpush.bf16.msra.mxu1 %v12338_v19  ;;  %6688 = vmatmul.bf16.vlgmr.msrb.gmra.mxu2 %v16045_v33  ;;  %22094 = vst [vmem:[#allocation3_spill] sm:$0xff] %v16087_v5  ;;  %v6437_v19 = vpop.f32.mrf.mxu0 }
  0xcd   :  { %v12321_v24 = vld [vmem:[%s22075_s1 + $0x19c0] sm:$0xf]  ;;  %v14331_v30 = vld [vmem:[%s22075_s1 + $0x1acc] sm:$0xf0]  ;;  %v12194_v49 = vor.u32 %v14267_v23, %v12193_v22  ;;  %6736 = vmatpush.bf16.msra.mxu2 %v12466_v20  ;;  %6660 = vmatmul.bf16.vlgmr.msrb.gmra.mxu0 %v16034_v26  ;;  %22095 = vst [vmem:[#allocation4_spill] sm:$0xff] %v16098_v14  ;;  %v6438_v23 = vadd.f32 %v6437_v19, %v15955_v29 }
  0xce   :  { %v12449_v28 = vld [vmem:[%s22075_s1 + $0x1ac0] sm:$0xf]  ;;  %v14363_v42 = vld [vmem:[%s22075_s1 + $0x1bcc] sm:$0xf0]  ;;  %v12322_v50 = vor.u32 %v14299_v27, %v12321_v24  ;;  %6750 = vmatpush.bf16.msra.mxu3 %v12594_v25 }
  0xcf   :  { %v12577_v37 = vld [vmem:[%s22075_s1 + $0x1bc0] sm:$0xf]  ;;  %v12450_v52 = vor.u32 %v14331_v30, %v12449_v28  ;;  %v14263_v54 = vld [vmem:[%s22075_s1 + $0x18ac] sm:$0xf0]  ;;  %6702 = vmatmul.bf16.vlgmr.msrb.gmra.mxu3 %v16057_v48  ;;  %6709 = vmatpush.bf16.msra.mxu0 %v12194_v49  ;;  %v6451_v28 = vpop.f32.mrf.mxu1 }
  0xd0   :  { %v12177_v53 = vld [vmem:[%s22075_s1 + $0x18a0] sm:$0xf]  ;;  %v12578_v59 = vor.u32 %v14363_v42, %v12577_v37  ;;  %v14295_v61 = vld [vmem:[%s22075_s1 + $0x19ac] sm:$0xf0]  ;;  %6723 = vmatpush.bf16.msra.mxu1 %v12322_v50  ;;  %v6452_v49 = vadd.f32 %v6451_v28, %v6438_v23 }
  0xd1   :  { %v12305_v57 = vld [vmem:[%s22075_s1 + $0x19a0] sm:$0xf]  ;;  %v14327_v63 = vld [vmem:[%s22075_s1 + $0x1aac] sm:$0xf0]  ;;  %v12178_v3 = vor.u32 %v14263_v54, %v12177_v53  ;;  %6737 = vmatpush.bf16.msra.mxu2 %v12450_v52 }
  0xd2   :  { %v12433_v62 = vld [vmem:[%s22075_s1 + $0x1aa0] sm:$0xf]  ;;  %v14359_v2 = vld [vmem:[%s22075_s1 + $0x1bac] sm:$0xf0]  ;;  %v12306_v6 = vor.u32 %v14295_v61, %v12305_v57  ;;  %6751 = vmatpush.bf16.msra.mxu3 %v12578_v59 }
  0xd3   :  { %v12561_v0 = vld [vmem:[%s22075_s1 + $0x1ba0] sm:$0xf]  ;;  %v12434_v7 = vor.u32 %v14327_v63, %v12433_v62  ;;  %v14259_v9 = vld [vmem:[%s22075_s1 + $0x188c] sm:$0xf0]  ;;  %6710 = vmatpush.bf16.msra.mxu0 %v12178_v3 }
  0xd4   :  { %v12161_v8 = vld [vmem:[%s22075_s1 + $0x1880] sm:$0xf]  ;;  %v12562_v12 = vor.u32 %v14359_v2, %v12561_v0  ;;  %v14291_v15 = vld [vmem:[%s22075_s1 + $0x198c] sm:$0xf0]  ;;  %6724 = vmatpush.bf16.msra.mxu1 %v12306_v6  ;;  %v6465_v6 = vpop.f32.mrf.mxu2 }
  0xd5   :  { %v12289_v11 = vld [vmem:[%s22075_s1 + $0x1980] sm:$0xf]  ;;  %v14323_v18 = vld [vmem:[%s22075_s1 + $0x1a8c] sm:$0xf0]  ;;  %v12162_v24 = vor.u32 %v14259_v9, %v12161_v8  ;;  %6738 = vmatpush.bf16.msra.mxu2 %v12434_v7 }
  0xd6   :  { %v12417_v16 = vld [vmem:[%s22075_s1 + $0x1a80] sm:$0xf]  ;;  %v14355_v22 = vld [vmem:[%s22075_s1 + $0x1b8c] sm:$0xf0]  ;;  %v12290_v25 = vor.u32 %v14291_v15, %v12289_v11  ;;  %6752 = vmatpush.bf16.msra.mxu3 %v12562_v12  ;;  %v6466_v11 = vadd.f32 %v6465_v6, %v6452_v49 }
  0xd7   :  { %v12545_v20 = vld [vmem:[%s22075_s1 + $0x1b80] sm:$0xf]  ;;  %v12418_v27 = vor.u32 %v14323_v18, %v12417_v16  ;;  %v14255_v37 = vld [vmem:[%s22075_s1 + $0x186c] sm:$0xf0]  ;;  %6711 = vmatpush.bf16.msra.mxu0 %v12162_v24  ;;  %v6479_v16 = vpop.f32.mrf.mxu3 }
  0xd8   :  { %v12145_v30 = vld [vmem:[%s22075_s1 + $0x1860] sm:$0xf]  ;;  %v12546_v29 = vor.u32 %v14355_v22, %v12545_v20  ;;  %v14287_v50 = vld [vmem:[%s22075_s1 + $0x196c] sm:$0xf0]  ;;  %6725 = vmatpush.bf16.msra.mxu1 %v12290_v25  ;;  %v16167_v20 = vadd.f32 %v6479_v16, %v6466_v11 }
  0xd9   :  { %v12273_v42 = vld [vmem:[%s22075_s1 + $0x1960] sm:$0xf]  ;;  %v14319_v53 = vld [vmem:[%s22075_s1 + $0x1a6c] sm:$0xf0]  ;;  %v12146_v59 = vor.u32 %v14255_v37, %v12145_v30  ;;  %6739 = vmatpush.bf16.msra.mxu2 %v12418_v27 }
  0xda   :  { %v12401_v52 = vld [vmem:[%s22075_s1 + $0x1a60] sm:$0xf]  ;;  %v14351_v57 = vld [vmem:[%s22075_s1 + $0x1b6c] sm:$0xf0]  ;;  %v12274_v61 = vor.u32 %v14287_v50, %v12273_v42  ;;  %6753 = vmatpush.bf16.msra.mxu3 %v12546_v29 }
  0xdb   :  { %v12529_v54 = vld [vmem:[%s22075_s1 + $0x1b60] sm:$0xf]  ;;  %v12402_v62 = vor.u32 %v14319_v53, %v12401_v52  ;;  %v14251_v0 = vld [vmem:[%s22075_s1 + $0x184c] sm:$0xf0]  ;;  %6712 = vmatpush.bf16.msra.mxu0 %v12146_v59 }
  0xdc   :  { %v12129_v63 = vld [vmem:[%s22075_s1 + $0x1840] sm:$0xf]  ;;  %v12530_v3 = vor.u32 %v14351_v57, %v12529_v54  ;;  %v14283_v7 = vld [vmem:[%s22075_s1 + $0x194c] sm:$0xf0]  ;;  %6726 = vmatpush.bf16.msra.mxu1 %v12274_v61 }
  0xdd   :  { %v12257_v2 = vld [vmem:[%s22075_s1 + $0x1940] sm:$0xf]  ;;  %v14315_v9 = vld [vmem:[%s22075_s1 + $0x1a4c] sm:$0xf0]  ;;  %v12130_v18 = vor.u32 %v14251_v0, %v12129_v63  ;;  %6740 = vmatpush.bf16.msra.mxu2 %v12402_v62 }
  0xde   :  { %v12385_v8 = vld [vmem:[%s22075_s1 + $0x1a40] sm:$0xf]  ;;  %v14347_v15 = vld [vmem:[%s22075_s1 + $0x1b4c] sm:$0xf0]  ;;  %v12258_v22 = vor.u32 %v14283_v7, %v12257_v2  ;;  %6754 = vmatpush.bf16.msra.mxu3 %v12530_v3 }
  0xdf   :  { %v12513_v12 = vld [vmem:[%s22075_s1 + $0x1b40] sm:$0xf]  ;;  %v12386_v23 = vor.u32 %v14315_v9, %v12385_v8  ;;  %v14247_v24 = vld [vmem:[%s22075_s1 + $0x182c] sm:$0xf0]  ;;  %6713 = vmatpush.bf16.msra.mxu0 %v12130_v18 }
  0xe0   :  { %v12113_v19 = vld [vmem:[%s22075_s1 + $0x1820] sm:$0xf]  ;;  %v14279_v27 = vld [vmem:[%s22075_s1 + $0x192c] sm:$0xf0]  ;;  %v12514_v28 = vor.u32 %v14347_v15, %v12513_v12  ;;  %6727 = vmatpush.bf16.msra.mxu1 %v12258_v22 }
  0xe1   :  { %v12241_v25 = vld [vmem:[%s22075_s1 + $0x1920] sm:$0xf]  ;;  %v14311_v37 = vld [vmem:[%s22075_s1 + $0x1a2c] sm:$0xf0]  ;;  %v12114_v52 = vor.u32 %v14247_v24, %v12113_v19  ;;  %6741 = vmatpush.bf16.msra.mxu2 %v12386_v23  ;;  %v9001_v24 = vld [vmem:[%s22076_s0 + $0x68] sm:$0xf] }
  0xe2   :  { %v12369_v30 = vld [vmem:[%s22075_s1 + $0x1a20] sm:$0xf]  ;;  %v14343_v29 = vld [vmem:[%s22075_s1 + $0x1b2c] sm:$0xf0]  ;;  %v12242_v61 = vor.u32 %v14279_v27, %v12241_v25  ;;  %6755 = vmatpush.bf16.msra.mxu3 %v12514_v28  ;;  %v13470_v25 = vld [vmem:[%s22076_s0 + $0xe4] sm:$0xf0] }
  0xe3   :  { %v12497_v42 = vld [vmem:[%s22075_s1 + $0x1b20] sm:$0xf]  ;;  %v14243_v50 = vld [vmem:[%s22075_s1 + $0x180c] sm:$0xf0]  ;;  %v12370_v62 = vor.u32 %v14311_v37, %v12369_v30  ;;  %6714 = vmatpush.bf16.msra.mxu0 %v12114_v52  ;;  %v13453_v27 = vld [vmem:[%s22076_s0 + $0x64] sm:$0xf] }
  0xe4   :  { %v12097_v49 = vld [vmem:[%s22075_s1 + $0x1800] sm:$0xf]  ;;  %v14275_v54 = vld [vmem:[%s22075_s1 + $0x190c] sm:$0xf0]  ;;  %v12498_v3 = vor.u32 %v14343_v29, %v12497_v42  ;;  %6728 = vmatpush.bf16.msra.mxu1 %v12242_v61  ;;  %v8995_v37 = vld [vmem:[%s22076_s0 + $0xe0] sm:$0xf0] }
  0xe5   :  { %v12225_v53 = vld [vmem:[%s22075_s1 + $0x1900] sm:$0xf]  ;;  %v14307_v59 = vld [vmem:[%s22075_s1 + $0x1a0c] sm:$0xf0]  ;;  %v12098_v15 = vor.u32 %v14243_v50, %v12097_v49  ;;  %6742 = vmatpush.bf16.msra.mxu2 %v12370_v62  ;;  %v13454_v42 = vld [vmem:[%s22076_s0 + $0x6c] sm:$0xf] }
  0xe6   :  { %v12353_v57 = vld [vmem:[%s22075_s1 + $0x1a00] sm:$0xf]  ;;  %v14339_v0 = vld [vmem:[%s22075_s1 + $0x1b0c] sm:$0xf0]  ;;  %v12226_v22 = vor.u32 %v14275_v54, %v12225_v53  ;;  %6756 = vmatpush.bf16.msra.mxu3 %v12498_v3  ;;  %v9003_v29 = vld [vmem:[%s22076_s0 + $0xe8] sm:$0xf0]  ;;  %v16286_v3 = vor.u32 %v13453_v27, %v8995_v37 }
  0xe7   :  { %v12481_v63 = vld [vmem:[%s22075_s1 + $0x1b00] sm:$0xf]  ;;  %v14399_v6 = vld [vmem:[%s22075_s1 + $0x1cec] sm:$0xf0]  ;;  %v12354_v23 = vor.u32 %v14307_v59, %v12353_v57  ;;  %6715 = vmatpush.bf16.msra.mxu0 %v12098_v15 }
  0xe8   :  { %v12721_v2 = vld [vmem:[%s22075_s1 + $0x1ce0] sm:$0xf]  ;;  %v14431_v8 = vld [vmem:[%s22075_s1 + $0x1dec] sm:$0xf0]  ;;  %v12482_v28 = vor.u32 %v14339_v0, %v12481_v63  ;;  %v16282_v0 = vpop.f32.mrf.mxu0  ;;  %6729 = vmatpush.bf16.msra.mxu1 %v12226_v22  ;;  %22099 = vst [vmem:[#allocation8_spill] sm:$0xff] %v16286_v3 }
  0xe9   :  { %v12849_v7 = vld [vmem:[%s22075_s1 + $0x1de0] sm:$0xf]  ;;  %v14463_v11 = vld [vmem:[%s22075_s1 + $0x1eec] sm:$0xf0]  ;;  %v12722_v30 = vor.u32 %v14399_v6, %v12721_v2  ;;  %22097 = vst [vmem:[#allocation6_spill] sm:$0xff] %v16282_v0  ;;  %6743 = vmatpush.bf16.msra.mxu2 %v12354_v23  ;;  %v16284_v2 = vor.u32 %v13470_v25, %v9001_v24 }
  0xea   :  { %v12977_v9 = vld [vmem:[%s22075_s1 + $0x1ee0] sm:$0xf]  ;;  %v14495_v16 = vld [vmem:[%s22075_s1 + $0x1fec] sm:$0xf0]  ;;  %v12850_v49 = vor.u32 %v14431_v8, %v12849_v7  ;;  %v16294_v8 = vpop.f32.mrf.mxu1  ;;  %6757 = vmatpush.bf16.msra.mxu3 %v12482_v28 }
  0xeb   :  { %v13105_v12 = vld [vmem:[%s22075_s1 + $0x1fe0] sm:$0xf]  ;;  %v12978_v50 = vor.u32 %v14463_v11, %v12977_v9  ;;  %v14395_v53 = vld [vmem:[%s22075_s1 + $0x1ccc] sm:$0xf0]  ;;  %22098 = vst [vmem:[#allocation7_spill] sm:$0xff] %v16284_v2  ;;  %6764 = vmatpush.bf16.msrb.mxu0 %v12722_v30  ;;  %v16296_v9 = vor.u32 %v13454_v42, %v9003_v29  ;;  %6730 = vmatmul.bf16.vlgmr.msra.gmra.mxu1 %v16286_v3 }
  0xec   :  { %v8993_v18 = vld [vmem:[%s22076_s0 + $0x60] sm:$0xf]  ;;  %v13106_v57 = vor.u32 %v14495_v16, %v13105_v12  ;;  %v14427_v61 = vld [vmem:[%s22075_s1 + $0x1dcc] sm:$0xf0]  ;;  %22100 = vst [vmem:[#allocation9_spill] sm:$0xff] %v16294_v8  ;;  %6778 = vmatpush.bf16.msrb.mxu1 %v12850_v49  ;;  %6744 = vmatmul.bf16.vlgmr.msra.gmra.mxu2 %v16284_v2 }
  0xed   :  { %v13469_v19 = vld [vmem:[%s22076_s0 + $0xdc] sm:$0xf0]  ;;  %v14459_v63 = vld [vmem:[%s22075_s1 + $0x1ecc] sm:$0xf0]  ;;  %22101 = vst [vmem:[#allocation10_spill] sm:$0xff] %v16296_v9  ;;  %6792 = vmatpush.bf16.msrb.mxu2 %v12978_v50  ;;  %6758 = vmatmul.bf16.vlgmr.msra.gmra.mxu3 %v16296_v9 }
  0xee   :  { %v12705_v52 = vld [vmem:[%s22075_s1 + $0x1cc0] sm:$0xf]  ;;  %v16271_v59 = vor.u32 %v13469_v19, %v8993_v18  ;;  %v14491_v7 = vld [vmem:[%s22075_s1 + $0x1fcc] sm:$0xf0]  ;;  %6806 = vmatpush.bf16.msrb.mxu3 %v13106_v57 }
  0xef   :  { %v12833_v54 = vld [vmem:[%s22075_s1 + $0x1dc0] sm:$0xf]  ;;  %v12706_v11 = vor.u32 %v14395_v53, %v12705_v52  ;;  %v14391_v18 = vld [vmem:[%s22075_s1 + $0x1cac] sm:$0xf0]  ;;  %v16335_v52 = vpop.f32.mrf.mxu2 }
  0xf0   :  { %22096 = vst [vmem:[#allocation5_spill] sm:$0xff] %v16271_v59  ;;  %v12961_v62 = vld [vmem:[%s22075_s1 + $0x1ec0] sm:$0xf]  ;;  %v12834_v12 = vor.u32 %v14427_v61, %v12833_v54  ;;  %6716 = vmatmul.bf16.vlgmr.msra.gmra.mxu0 %v16271_v59  ;;  %v14423_v23 = vld [vmem:[%s22075_s1 + $0x1dac] sm:$0xf0] }
  0xf1   :  { %v13089_v6 = vld [vmem:[%s22075_s1 + $0x1fc0] sm:$0xf]  ;;  %v12962_v15 = vor.u32 %v14459_v63, %v12961_v62  ;;  %v14455_v25 = vld [vmem:[%s22075_s1 + $0x1eac] sm:$0xf0]  ;;  %6765 = vmatpush.bf16.msrb.mxu0 %v12706_v11  ;;  %22102 = vst [vmem:[#allocation11_spill] sm:$0xff] %v16335_v52  ;;  %v16346_v62 = vpop.f32.mrf.mxu3  ;;  %v6493_v63 = vpop.f32.mrf.mxu0 }
  0xf2   :  { %v12689_v16 = vld [vmem:[%s22075_s1 + $0x1ca0] sm:$0xf]  ;;  %v13090_v22 = vor.u32 %v14491_v7, %v13089_v6  ;;  %v14487_v28 = vld [vmem:[%s22075_s1 + $0x1fac] sm:$0xf0]  ;;  %6779 = vmatpush.bf16.msrb.mxu1 %v12834_v12  ;;  %22103 = vst [vmem:[#allocation12_spill] sm:$0xff] %v16346_v62  ;;  %v6494_v11 = vadd.f32 %v6493_v63, %v16167_v20 }
  0xf3   :  { %v12817_v19 = vld [vmem:[%s22075_s1 + $0x1da0] sm:$0xf]  ;;  %v12690_v30 = vor.u32 %v14391_v18, %v12689_v16  ;;  %6793 = vmatpush.bf16.msrb.mxu2 %v12962_v15  ;;  %v14387_v49 = vld [vmem:[%s22075_s1 + $0x1c8c] sm:$0xf0]  ;;  %v6507_v15 = vpop.f32.mrf.mxu1 }
  0xf4   :  { %v12945_v24 = vld [vmem:[%s22075_s1 + $0x1ea0] sm:$0xf]  ;;  %v12818_v37 = vor.u32 %v14423_v23, %v12817_v19  ;;  %6807 = vmatpush.bf16.msrb.mxu3 %v13090_v22  ;;  %v14419_v54 = vld [vmem:[%s22075_s1 + $0x1d8c] sm:$0xf0] }
  0xf5   :  { %v13073_v27 = vld [vmem:[%s22075_s1 + $0x1fa0] sm:$0xf]  ;;  %v12946_v42 = vor.u32 %v14455_v25, %v12945_v24  ;;  %v14451_v61 = vld [vmem:[%s22075_s1 + $0x1e8c] sm:$0xf0]  ;;  %6766 = vmatpush.bf16.msrb.mxu0 %v12690_v30  ;;  %v6508_v24 = vadd.f32 %v6507_v15, %v6494_v11 }
  0xf6   :  { %v12673_v29 = vld [vmem:[%s22075_s1 + $0x1c80] sm:$0xf]  ;;  %v13074_v53 = vor.u32 %v14487_v28, %v13073_v27  ;;  %v14483_v7 = vld [vmem:[%s22075_s1 + $0x1f8c] sm:$0xf0]  ;;  %6780 = vmatpush.bf16.msrb.mxu1 %v12818_v37 }
  0xf7   :  { %v12801_v50 = vld [vmem:[%s22075_s1 + $0x1d80] sm:$0xf]  ;;  %v12674_v12 = vor.u32 %v14387_v49, %v12673_v29  ;;  %6794 = vmatpush.bf16.msrb.mxu2 %v12946_v42  ;;  %v14383_v22 = vld [vmem:[%s22075_s1 + $0x1c6c] sm:$0xf0] }
  0xf8   :  { %v12929_v57 = vld [vmem:[%s22075_s1 + $0x1e80] sm:$0xf]  ;;  %v12802_v16 = vor.u32 %v14419_v54, %v12801_v50  ;;  %6808 = vmatpush.bf16.msrb.mxu3 %v13074_v53  ;;  %v14415_v25 = vld [vmem:[%s22075_s1 + $0x1d6c] sm:$0xf0] }
  0xf9   :  { %v13057_v6 = vld [vmem:[%s22075_s1 + $0x1f80] sm:$0xf]  ;;  %v12930_v18 = vor.u32 %v14451_v61, %v12929_v57  ;;  %v14447_v28 = vld [vmem:[%s22075_s1 + $0x1e6c] sm:$0xf0]  ;;  %6767 = vmatpush.bf16.msrb.mxu0 %v12674_v12  ;;  %v6521_v61 = vpop.f32.mrf.mxu2  ;;  %v6535_v12 = vpop.f32.mrf.mxu3 }
  0xfa   :  { %v12657_v19 = vld [vmem:[%s22075_s1 + $0x1c60] sm:$0xf]  ;;  %v13058_v20 = vor.u32 %v14483_v7, %v13057_v6  ;;  %v14479_v37 = vld [vmem:[%s22075_s1 + $0x1f6c] sm:$0xf0]  ;;  %6781 = vmatpush.bf16.msrb.mxu1 %v12802_v16  ;;  %v6522_v11 = vadd.f32 %v6521_v61, %v6508_v24 }
  0xfb   :  { %v12785_v23 = vld [vmem:[%s22075_s1 + $0x1d60] sm:$0xf]  ;;  %v12658_v42 = vor.u32 %v14383_v22, %v12657_v19  ;;  %6795 = vmatpush.bf16.msrb.mxu2 %v12930_v18  ;;  %v14379_v53 = vld [vmem:[%s22075_s1 + $0x1c4c] sm:$0xf0] }
  0xfc   :  { %v12913_v27 = vld [vmem:[%s22075_s1 + $0x1e60] sm:$0xf]  ;;  %v12786_v29 = vor.u32 %v14415_v25, %v12785_v23  ;;  %6809 = vmatpush.bf16.msrb.mxu3 %v13058_v20  ;;  %v14411_v63 = vld [vmem:[%s22075_s1 + $0x1d4c] sm:$0xf0]  ;;  %v16406_v22 = vadd.f32 %v6535_v12, %v6522_v11 }
  0xfd   :  { %v13041_v30 = vld [vmem:[%s22075_s1 + $0x1f60] sm:$0xf]  ;;  %v12914_v49 = vor.u32 %v14447_v28, %v12913_v27  ;;  %v14443_v7 = vld [vmem:[%s22075_s1 + $0x1e4c] sm:$0xf0]  ;;  %6768 = vmatpush.bf16.msrb.mxu0 %v12658_v42 }
  0xfe   :  { %v12641_v50 = vld [vmem:[%s22075_s1 + $0x1c40] sm:$0xf]  ;;  %v13042_v57 = vor.u32 %v14479_v37, %v13041_v30  ;;  %v14475_v16 = vld [vmem:[%s22075_s1 + $0x1f4c] sm:$0xf0]  ;;  %6782 = vmatpush.bf16.msrb.mxu1 %v12786_v29 }
  0xff   :  { %v12769_v54 = vld [vmem:[%s22075_s1 + $0x1d40] sm:$0xf]  ;;  %v12642_v18 = vor.u32 %v14379_v53, %v12641_v50  ;;  %6796 = vmatpush.bf16.msrb.mxu2 %v12914_v49  ;;  %v14375_v24 = vld [vmem:[%s22075_s1 + $0x1c2c] sm:$0xf0] }
 0x100   :  { %v12897_v6 = vld [vmem:[%s22075_s1 + $0x1e40] sm:$0xf]  ;;  %v12770_v23 = vor.u32 %v14411_v63, %v12769_v54  ;;  %v14407_v27 = vld [vmem:[%s22075_s1 + $0x1d2c] sm:$0xf0]  ;;  %6810 = vmatpush.bf16.msrb.mxu3 %v13042_v57 }
 0x101   :  { %v13025_v15 = vld [vmem:[%s22075_s1 + $0x1f40] sm:$0xf]  ;;  %v12898_v20 = vor.u32 %v14443_v7, %v12897_v6  ;;  %v14439_v37 = vld [vmem:[%s22075_s1 + $0x1e2c] sm:$0xf0]  ;;  %6769 = vmatpush.bf16.msrb.mxu0 %v12642_v18  ;;  %v9139_v18 = vld [vmem:[%s22075_s1 + $0xf0] sm:$0xf0] }
 0x102   :  { %v12625_v19 = vld [vmem:[%s22075_s1 + $0x1c20] sm:$0xf]  ;;  %v13026_v28 = vor.u32 %v14475_v16, %v13025_v15  ;;  %v14471_v29 = vld [vmem:[%s22075_s1 + $0x1f2c] sm:$0xf0]  ;;  %6783 = vmatpush.bf16.msrb.mxu1 %v12770_v23  ;;  %v13501_v15 = vld [vmem:[%s22075_s1 + $0xe4] sm:$0xf] }
 0x103   :  { %v12753_v25 = vld [vmem:[%s22075_s1 + $0x1d20] sm:$0xf]  ;;  %v14371_v50 = vld [vmem:[%s22075_s1 + $0x1c0c] sm:$0xf0]  ;;  %v12626_v53 = vor.u32 %v14375_v24, %v12625_v19  ;;  %6797 = vmatpush.bf16.msrb.mxu2 %v12898_v20  ;;  %v13533_v19 = vld [vmem:[%s22075_s1 + $0x1e4] sm:$0xf]  ;;  %v9142_v62 = vor.u32 %v13501_v15, %v9139_v18 }
 0x104   :  { %v12881_v30 = vld [vmem:[%s22075_s1 + $0x1e20] sm:$0xf]  ;;  %v14403_v57 = vld [vmem:[%s22075_s1 + $0x1d0c] sm:$0xf0]  ;;  %v12754_v6 = vor.u32 %v14407_v27, %v12753_v25  ;;  %6811 = vmatpush.bf16.msrb.mxu3 %v13026_v28  ;;  %v9267_v23 = vld [vmem:[%s22075_s1 + $0x1f0] sm:$0xf0] }
 0x105   :  { %v13009_v42 = vld [vmem:[%s22075_s1 + $0x1f20] sm:$0xf]  ;;  %v14435_v63 = vld [vmem:[%s22075_s1 + $0x1e0c] sm:$0xf0]  ;;  %v12882_v7 = vor.u32 %v14439_v37, %v12881_v30  ;;  %v13565_v20 = vld [vmem:[%s22075_s1 + $0x2e4] sm:$0xf]  ;;  %6770 = vmatpush.bf16.msrb.mxu0 %v12626_v53 }
 0x106   :  { %v12609_v49 = vld [vmem:[%s22075_s1 + $0x1c00] sm:$0xf]  ;;  %v14467_v12 = vld [vmem:[%s22075_s1 + $0x1f0c] sm:$0xf0]  ;;  %v13010_v16 = vor.u32 %v14471_v29, %v13009_v42  ;;  %v9395_v24 = vld [vmem:[%s22075_s1 + $0x2f0] sm:$0xf0]  ;;  %6784 = vmatpush.bf16.msrb.mxu1 %v12754_v6 }
 0x107   :  { %v12737_v54 = vld [vmem:[%s22075_s1 + $0x1d00] sm:$0xf]  ;;  %v13597_v25 = vld [vmem:[%s22075_s1 + $0x3e4] sm:$0xf]  ;;  %v12610_v27 = vor.u32 %v14371_v50, %v12609_v49  ;;  %v9523_v28 = vld [vmem:[%s22075_s1 + $0x3f0] sm:$0xf0]  ;;  %6798 = vmatpush.bf16.msrb.mxu2 %v12882_v7  ;;  %v9398_v6 = vor.u32 %v13565_v20, %v9395_v24  ;;  %v16521_v20 = vpop.f32.mrf.mxu0 }
 0x108   :  { %v12865_v61 = vld [vmem:[%s22075_s1 + $0x1e00] sm:$0xf]  ;;  %v9009_v30 = vld [vmem:[%s22076_s0 + $0x70] sm:$0xf]  ;;  %v12738_v42 = vor.u32 %v14403_v57, %v12737_v54  ;;  %v9017_v49 = vld [vmem:[%s22076_s0 + $0x78] sm:$0xf]  ;;  %6812 = vmatpush.bf16.msrb.mxu3 %v13010_v16  ;;  %v9526_v15 = vor.u32 %v13597_v25, %v9523_v28 }
 0x109   :  { %v12993_v11 = vld [vmem:[%s22075_s1 + $0x1f00] sm:$0xf]  ;;  %v13471_v37 = vld [vmem:[%s22076_s0 + $0xec] sm:$0xf0]  ;;  %v12866_v29 = vor.u32 %v14435_v63, %v12865_v61  ;;  %v13472_v50 = vld [vmem:[%s22076_s0 + $0xf4] sm:$0xf0]  ;;  %v9270_v63 = vor.u32 %v13533_v19, %v9267_v23  ;;  %6771 = vmatpush.bf16.msrb.mxu0 %v12610_v27 }
 0x10a   :  { %v13455_v53 = vld [vmem:[%s22076_s0 + $0x74] sm:$0xf]  ;;  %v12994_v13 = vor.u32 %v14467_v12, %v12993_v11  ;;  %v13456_v57 = vld [vmem:[%s22076_s0 + $0x7c] sm:$0xf]  ;;  %v13497_v7 = vld [vmem:[%s22075_s1 + $0xc4] sm:$0xf]  ;;  %v16510_v16 = vor.u32 %v13471_v37, %v9009_v30  ;;  %6785 = vmatpush.bf16.msrb.mxu1 %v12738_v42  ;;  %v16523_v24 = vor.u32 %v13472_v50, %v9017_v49  ;;  %v16533_v30 = vpop.f32.mrf.mxu1 }
 0x10b   :  { %v9011_v54 = vld [vmem:[%s22076_s0 + $0xf0] sm:$0xf0]  ;;  %v9019_v61 = vld [vmem:[%s22076_s0 + $0xf8] sm:$0xf0]  ;;  %v13529_v12 = vld [vmem:[%s22075_s1 + $0x1c4] sm:$0xf]  ;;  %6799 = vmatpush.bf16.msrb.mxu2 %v12866_v29 }
 0x10c   :  { %v9123_v11 = vld [vmem:[%s22075_s1 + $0xd0] sm:$0xf0]  ;;  %22104 = vst [vmem:[#allocation13_spill] sm:$0xff] %v16510_v16  ;;  %v13561_v19 = vld [vmem:[%s22075_s1 + $0x2c4] sm:$0xf]  ;;  %v16525_v25 = vor.u32 %v13455_v53, %v9011_v54  ;;  %6813 = vmatpush.bf16.msrb.mxu3 %v12994_v13  ;;  %v16535_v37 = vor.u32 %v13456_v57, %v9019_v61  ;;  %6772 = vmatmul.bf16.vlgmr.msrb.gmra.mxu0 %v16510_v16 }
 0x10d   :  { %v9251_v18 = vld [vmem:[%s22075_s1 + $0x1d0] sm:$0xf0]  ;;  %22105 = vst [vmem:[#allocation14_spill] sm:$0xff] %v16521_v20  ;;  %v13593_v27 = vld [vmem:[%s22075_s1 + $0x3c4] sm:$0xf]  ;;  %6820 = vmatpush.bf16.msra.mxu0 %v9142_v62  ;;  %v9126_v42 = vor.u32 %v13497_v7, %v9123_v11 }
 0x10e   :  { %v9379_v23 = vld [vmem:[%s22075_s1 + $0x2d0] sm:$0xf0]  ;;  %22106 = vst [vmem:[#allocation15_spill] sm:$0xff] %v16523_v24  ;;  %6834 = vmatpush.bf16.msra.mxu1 %v9270_v63  ;;  %v9254_v29 = vor.u32 %v13529_v12, %v9251_v18  ;;  %v13493_v50 = vld [vmem:[%s22075_s1 + $0xa4] sm:$0xf]  ;;  %6800 = vmatmul.bf16.vlgmr.msrb.gmra.mxu2 %v16523_v24 }
 0x10f   :  { %22107 = vst [vmem:[#allocation16_spill] sm:$0xff] %v16525_v25  ;;  %v9507_v28 = vld [vmem:[%s22075_s1 + $0x3d0] sm:$0xf0]  ;;  %6848 = vmatpush.bf16.msra.mxu2 %v9398_v6  ;;  %v9382_v49 = vor.u32 %v13561_v19, %v9379_v23  ;;  %v13525_v13 = vld [vmem:[%s22075_s1 + $0x1a4] sm:$0xf]  ;;  %6786 = vmatmul.bf16.vlgmr.msrb.gmra.mxu1 %v16525_v25  ;;  %v16574_v23 = vpop.f32.mrf.mxu2 }
 0x110   :  { %22108 = vst [vmem:[#allocation17_spill] sm:$0xff] %v16533_v30  ;;  %v9107_v53 = vld [vmem:[%s22075_s1 + $0xb0] sm:$0xf0]  ;;  %6862 = vmatpush.bf16.msra.mxu3 %v9526_v15  ;;  %v9510_v62 = vor.u32 %v13593_v27, %v9507_v28  ;;  %v13557_v57 = vld [vmem:[%s22075_s1 + $0x2a4] sm:$0xf] }
 0x111   :  { %22109 = vst [vmem:[#allocation18_spill] sm:$0xff] %v16535_v37  ;;  %v9235_v54 = vld [vmem:[%s22075_s1 + $0x1b0] sm:$0xf0]  ;;  %v13589_v63 = vld [vmem:[%s22075_s1 + $0x3a4] sm:$0xf]  ;;  %6814 = vmatmul.bf16.vlgmr.msrb.gmra.mxu3 %v16535_v37  ;;  %6821 = vmatpush.bf16.msra.mxu0 %v9126_v42  ;;  %v9110_v7 = vor.u32 %v13493_v50, %v9107_v53  ;;  %v6549_v50 = vpop.f32.mrf.mxu0 }
 0x112   :  { %v9363_v61 = vld [vmem:[%s22075_s1 + $0x2b0] sm:$0xf0]  ;;  %6835 = vmatpush.bf16.msra.mxu1 %v9254_v29  ;;  %v9238_v11 = vor.u32 %v13525_v13, %v9235_v54  ;;  %v13489_v15 = vld [vmem:[%s22075_s1 + $0x84] sm:$0xf]  ;;  %22110 = vst [vmem:[#allocation19_spill] sm:$0xff] %v16574_v23 }
 0x113   :  { %v9491_v6 = vld [vmem:[%s22075_s1 + $0x3b0] sm:$0xf0]  ;;  %6849 = vmatpush.bf16.msra.mxu2 %v9382_v49  ;;  %v9366_v12 = vor.u32 %v13557_v57, %v9363_v61  ;;  %v13521_v19 = vld [vmem:[%s22075_s1 + $0x184] sm:$0xf]  ;;  %v16585_v49 = vpop.f32.mrf.mxu3  ;;  %v6563_v57 = vpop.f32.mrf.mxu1 }
 0x114   :  { %v9091_v18 = vld [vmem:[%s22075_s1 + $0x90] sm:$0xf0]  ;;  %6863 = vmatpush.bf16.msra.mxu3 %v9510_v62  ;;  %v9494_v27 = vor.u32 %v13589_v63, %v9491_v6  ;;  %v13553_v42 = vld [vmem:[%s22075_s1 + $0x284] sm:$0xf]  ;;  %22111 = vst [vmem:[#allocation20_spill] sm:$0xff] %v16585_v49  ;;  %v6550_v62 = vadd.f32 %v6549_v50, %v16406_v22 }
 0x115   :  { %v9219_v28 = vld [vmem:[%s22075_s1 + $0x190] sm:$0xf0]  ;;  %v13585_v53 = vld [vmem:[%s22075_s1 + $0x384] sm:$0xf]  ;;  %6822 = vmatpush.bf16.msra.mxu0 %v9110_v7  ;;  %v9094_v54 = vor.u32 %v13489_v15, %v9091_v18 }
 0x116   :  { %v9347_v29 = vld [vmem:[%s22075_s1 + $0x290] sm:$0xf0]  ;;  %6836 = vmatpush.bf16.msra.mxu1 %v9238_v11  ;;  %v9222_v61 = vor.u32 %v13521_v19, %v9219_v28  ;;  %v13485_v6 = vld [vmem:[%s22075_s1 + $0x64] sm:$0xf]  ;;  %v6564_v15 = vadd.f32 %v6563_v57, %v6550_v62 }
 0x117   :  { %v9475_v13 = vld [vmem:[%s22075_s1 + $0x390] sm:$0xf0]  ;;  %6850 = vmatpush.bf16.msra.mxu2 %v9366_v12  ;;  %v9350_v63 = vor.u32 %v13553_v42, %v9347_v29  ;;  %v13517_v7 = vld [vmem:[%s22075_s1 + $0x164] sm:$0xf] }
 0x118   :  { %v9075_v49 = vld [vmem:[%s22075_s1 + $0x70] sm:$0xf0]  ;;  %6864 = vmatpush.bf16.msra.mxu3 %v9494_v27  ;;  %v9478_v22 = vor.u32 %v13585_v53, %v9475_v13  ;;  %v13549_v12 = vld [vmem:[%s22075_s1 + $0x264] sm:$0xf] }
 0x119   :  { %v9203_v11 = vld [vmem:[%s22075_s1 + $0x170] sm:$0xf0]  ;;  %v13581_v19 = vld [vmem:[%s22075_s1 + $0x364] sm:$0xf]  ;;  %6823 = vmatpush.bf16.msra.mxu0 %v9094_v54  ;;  %v9078_v28 = vor.u32 %v13485_v6, %v9075_v49  ;;  %v6577_v54 = vpop.f32.mrf.mxu2 }
 0x11a   :  { %v9331_v18 = vld [vmem:[%s22075_s1 + $0x270] sm:$0xf0]  ;;  %6837 = vmatpush.bf16.msra.mxu1 %v9222_v61  ;;  %v9206_v42 = vor.u32 %v13517_v7, %v9203_v11  ;;  %v13481_v50 = vld [vmem:[%s22075_s1 + $0x44] sm:$0xf] }
 0x11b   :  { %v9459_v27 = vld [vmem:[%s22075_s1 + $0x370] sm:$0xf0]  ;;  %6851 = vmatpush.bf16.msra.mxu2 %v9350_v63  ;;  %v9334_v29 = vor.u32 %v13549_v12, %v9331_v18  ;;  %v13513_v13 = vld [vmem:[%s22075_s1 + $0x144] sm:$0xf]  ;;  %v6578_v63 = vadd.f32 %v6577_v54, %v6564_v15  ;;  %v6591_v6 = vpop.f32.mrf.mxu3 }
 0x11c   :  { %v9059_v53 = vld [vmem:[%s22075_s1 + $0x50] sm:$0xf0]  ;;  %6865 = vmatpush.bf16.msra.mxu3 %v9478_v22  ;;  %v9462_v62 = vor.u32 %v13581_v19, %v9459_v27  ;;  %v13545_v57 = vld [vmem:[%s22075_s1 + $0x244] sm:$0xf] }
 0x11d   :  { %v9187_v49 = vld [vmem:[%s22075_s1 + $0x150] sm:$0xf0]  ;;  %v13577_v7 = vld [vmem:[%s22075_s1 + $0x344] sm:$0xf]  ;;  %6824 = vmatpush.bf16.msra.mxu0 %v9078_v28  ;;  %v9062_v11 = vor.u32 %v13481_v50, %v9059_v53  ;;  %v16642_v12 = vadd.f32 %v6591_v6, %v6578_v63 }
 0x11e   :  { %v9315_v61 = vld [vmem:[%s22075_s1 + $0x250] sm:$0xf0]  ;;  %6838 = vmatpush.bf16.msra.mxu1 %v9206_v42  ;;  %v9190_v18 = vor.u32 %v13513_v13, %v9187_v49  ;;  %v13477_v15 = vld [vmem:[%s22075_s1 + $0x24] sm:$0xf] }
 0x11f   :  { %v9443_v22 = vld [vmem:[%s22075_s1 + $0x350] sm:$0xf0]  ;;  %6852 = vmatpush.bf16.msra.mxu2 %v9334_v29  ;;  %v9318_v19 = vor.u32 %v13545_v57, %v9315_v61  ;;  %v13509_v54 = vld [vmem:[%s22075_s1 + $0x124] sm:$0xf] }
 0x120   :  { %v9043_v27 = vld [vmem:[%s22075_s1 + $0x30] sm:$0xf0]  ;;  %6866 = vmatpush.bf16.msra.mxu3 %v9462_v62  ;;  %v9446_v28 = vor.u32 %v13577_v7, %v9443_v22  ;;  %v13541_v29 = vld [vmem:[%s22075_s1 + $0x224] sm:$0xf] }
 0x121   :  { %v9171_v42 = vld [vmem:[%s22075_s1 + $0x130] sm:$0xf0]  ;;  %v13573_v53 = vld [vmem:[%s22075_s1 + $0x324] sm:$0xf]  ;;  %6825 = vmatpush.bf16.msra.mxu0 %v9062_v11  ;;  %v9046_v62 = vor.u32 %v13477_v15, %v9043_v27 }
 0x122   :  { %v9299_v50 = vld [vmem:[%s22075_s1 + $0x230] sm:$0xf0]  ;;  %v13473_v49 = vld [vmem:[%s22075_s1 + $0x4] sm:$0xf]  ;;  %6839 = vmatpush.bf16.msra.mxu1 %v9190_v18  ;;  %v9174_v61 = vor.u32 %v13509_v54, %v9171_v42 }
 0x123   :  { %v9427_v13 = vld [vmem:[%s22075_s1 + $0x330] sm:$0xf0]  ;;  %6853 = vmatpush.bf16.msra.mxu2 %v9318_v19  ;;  %v9302_v63 = vor.u32 %v13541_v29, %v9299_v50  ;;  %v13505_v6 = vld [vmem:[%s22075_s1 + $0x104] sm:$0xf] }
 0x124   :  { %v9027_v57 = vld [vmem:[%s22075_s1 + $0x10] sm:$0xf0]  ;;  %v13537_v22 = vld [vmem:[%s22075_s1 + $0x204] sm:$0xf]  ;;  %6867 = vmatpush.bf16.msra.mxu3 %v9446_v28  ;;  %v9430_v11 = vor.u32 %v13573_v53, %v9427_v13 }
 0x125   :  { %v9155_v7 = vld [vmem:[%s22075_s1 + $0x110] sm:$0xf0]  ;;  %v13569_v19 = vld [vmem:[%s22075_s1 + $0x304] sm:$0xf]  ;;  %6826 = vmatpush.bf16.msra.mxu0 %v9046_v62  ;;  %v9030_v42 = vor.u32 %v13473_v49, %v9027_v57 }
 0x126   :  { %v9283_v18 = vld [vmem:[%s22075_s1 + $0x210] sm:$0xf0]  ;;  %v13629_v27 = vld [vmem:[%s22075_s1 + $0x4e4] sm:$0xf]  ;;  %6840 = vmatpush.bf16.msra.mxu1 %v9174_v61  ;;  %v9158_v13 = vor.u32 %v13505_v6, %v9155_v7 }
 0x127   :  { %v9411_v15 = vld [vmem:[%s22075_s1 + $0x310] sm:$0xf0]  ;;  %v13661_v28 = vld [vmem:[%s22075_s1 + $0x5e4] sm:$0xf]  ;;  %6854 = vmatpush.bf16.msra.mxu2 %v9302_v63  ;;  %v9286_v23 = vor.u32 %v13537_v22, %v9283_v18 }
 0x128   :  { %v9651_v54 = vld [vmem:[%s22075_s1 + $0x4f0] sm:$0xf0]  ;;  %v13693_v50 = vld [vmem:[%s22075_s1 + $0x6e4] sm:$0xf]  ;;  %6868 = vmatpush.bf16.msra.mxu3 %v9430_v11  ;;  %v9414_v57 = vor.u32 %v13569_v19, %v9411_v15  ;;  %v16734_v19 = vpop.f32.mrf.mxu0 }
 0x129   :  { %v9779_v29 = vld [vmem:[%s22075_s1 + $0x5f0] sm:$0xf0]  ;;  %v13725_v62 = vld [vmem:[%s22075_s1 + $0x7e4] sm:$0xf]  ;;  %v9654_v30 = vor.u32 %v13629_v27, %v9651_v54  ;;  %6827 = vmatpush.bf16.msra.mxu0 %v9030_v42  ;;  %22112 = vst [vmem:[#allocation21_spill] sm:$0xff] %v16734_v19  ;;  %v16742_v54 = vpop.f32.mrf.mxu1 }
 0x12a   :  { %v9907_v53 = vld [vmem:[%s22075_s1 + $0x6f0] sm:$0xf0]  ;;  %v9782_v20 = vor.u32 %v13661_v28, %v9779_v29  ;;  %v13625_v61 = vld [vmem:[%s22075_s1 + $0x4c4] sm:$0xf]  ;;  %6841 = vmatpush.bf16.msra.mxu1 %v9158_v13  ;;  %22113 = vst [vmem:[#allocation22_spill] sm:$0xff] %v16742_v54 }
 0x12b   :  { %v10035_v49 = vld [vmem:[%s22075_s1 + $0x7f0] sm:$0xf0]  ;;  %v9910_v52 = vor.u32 %v13693_v50, %v9907_v53  ;;  %v13657_v6 = vld [vmem:[%s22075_s1 + $0x5c4] sm:$0xf]  ;;  %6855 = vmatpush.bf16.msra.mxu2 %v9286_v23 }
 0x12c   :  { %v9635_v63 = vld [vmem:[%s22075_s1 + $0x4d0] sm:$0xf0]  ;;  %v10038_v7 = vor.u32 %v13725_v62, %v10035_v49  ;;  %v13689_v11 = vld [vmem:[%s22075_s1 + $0x6c4] sm:$0xf]  ;;  %6869 = vmatpush.bf16.msra.mxu3 %v9414_v57  ;;  %6828 = vmatmul.bf16.vlgmr.msra.gmra.mxu0 %v14888_v58 }
 0x12d   :  { %v9763_v22 = vld [vmem:[%s22075_s1 + $0x5d0] sm:$0xf0]  ;;  %v13721_v15 = vld [vmem:[%s22075_s1 + $0x7c4] sm:$0xf]  ;;  %6876 = vmatpush.bf16.msrb.mxu0 %v9654_v30  ;;  %v9638_v28 = vor.u32 %v13625_v61, %v9635_v63  ;;  %6842 = vmatmul.bf16.vlgmr.msra.gmra.mxu1 %v14924_v10 }
 0x12e   :  { %v9891_v18 = vld [vmem:[%s22075_s1 + $0x6d0] sm:$0xf0]  ;;  %6890 = vmatpush.bf16.msrb.mxu1 %v9782_v20  ;;  %v9766_v42 = vor.u32 %v13657_v6, %v9763_v22  ;;  %v13621_v23 = vld [vmem:[%s22075_s1 + $0x4a4] sm:$0xf]  ;;  %6856 = vmatmul.bf16.vlgmr.msra.gmra.mxu2 %v14902_v1 }
 0x12f   :  { %v10019_v27 = vld [vmem:[%s22075_s1 + $0x7d0] sm:$0xf0]  ;;  %6904 = vmatpush.bf16.msrb.mxu2 %v9910_v52  ;;  %v9894_v29 = vor.u32 %v13689_v11, %v9891_v18  ;;  %v13653_v53 = vld [vmem:[%s22075_s1 + $0x5a4] sm:$0xf]  ;;  %6870 = vmatmul.bf16.vlgmr.msra.gmra.mxu3 %v14938_v17  ;;  %v16781_v11 = vpop.f32.mrf.mxu2 }
 0x130   :  { %v9619_v50 = vld [vmem:[%s22075_s1 + $0x4b0] sm:$0xf0]  ;;  %6918 = vmatpush.bf16.msrb.mxu3 %v10038_v7  ;;  %v10022_v13 = vor.u32 %v13721_v15, %v10019_v27  ;;  %v13685_v20 = vld [vmem:[%s22075_s1 + $0x6a4] sm:$0xf]  ;;  %22114 = vst [vmem:[#allocation23_spill] sm:$0xff] %v16781_v11 }
 0x131   :  { %v9747_v52 = vld [vmem:[%s22075_s1 + $0x5b0] sm:$0xf0]  ;;  %v13717_v62 = vld [vmem:[%s22075_s1 + $0x7a4] sm:$0xf]  ;;  %6877 = vmatpush.bf16.msrb.mxu0 %v9638_v28  ;;  %v9622_v57 = vor.u32 %v13621_v23, %v9619_v50 }
 0x132   :  { %v9875_v30 = vld [vmem:[%s22075_s1 + $0x6b0] sm:$0xf0]  ;;  %6891 = vmatpush.bf16.msrb.mxu1 %v9766_v42  ;;  %v9750_v61 = vor.u32 %v13653_v53, %v9747_v52  ;;  %v13617_v6 = vld [vmem:[%s22075_s1 + $0x484] sm:$0xf]  ;;  %v16792_v42 = vpop.f32.mrf.mxu3  ;;  %v6619_v52 = vpop.f32.mrf.mxu1 }
 0x133   :  { %v10003_v49 = vld [vmem:[%s22075_s1 + $0x7b0] sm:$0xf0]  ;;  %6905 = vmatpush.bf16.msrb.mxu2 %v9894_v29  ;;  %v9878_v63 = vor.u32 %v13685_v20, %v9875_v30  ;;  %v13649_v22 = vld [vmem:[%s22075_s1 + $0x584] sm:$0xf]  ;;  %22115 = vst [vmem:[#allocation24_spill] sm:$0xff] %v16792_v42  ;;  %v6605_v29 = vpop.f32.mrf.mxu0 }
 0x134   :  { %v9603_v7 = vld [vmem:[%s22075_s1 + $0x490] sm:$0xf0]  ;;  %6919 = vmatpush.bf16.msrb.mxu3 %v10022_v13  ;;  %v10006_v18 = vor.u32 %v13717_v62, %v10003_v49  ;;  %v13681_v27 = vld [vmem:[%s22075_s1 + $0x684] sm:$0xf]  ;;  %v6606_v53 = vadd.f32 %v6605_v29, %v16642_v12 }
 0x135   :  { %v9731_v15 = vld [vmem:[%s22075_s1 + $0x590] sm:$0xf0]  ;;  %v13713_v23 = vld [vmem:[%s22075_s1 + $0x784] sm:$0xf]  ;;  %6878 = vmatpush.bf16.msrb.mxu0 %v9622_v57  ;;  %v9606_v13 = vor.u32 %v13617_v6, %v9603_v7 }
 0x136   :  { %v9859_v28 = vld [vmem:[%s22075_s1 + $0x690] sm:$0xf0]  ;;  %6892 = vmatpush.bf16.msrb.mxu1 %v9750_v61  ;;  %v9734_v20 = vor.u32 %v13649_v22, %v9731_v15  ;;  %v13613_v62 = vld [vmem:[%s22075_s1 + $0x464] sm:$0xf]  ;;  %v6620_v6 = vadd.f32 %v6619_v52, %v6606_v53 }
 0x137   :  { %v9987_v50 = vld [vmem:[%s22075_s1 + $0x790] sm:$0xf0]  ;;  %6906 = vmatpush.bf16.msrb.mxu2 %v9878_v63  ;;  %v9862_v30 = vor.u32 %v13681_v27, %v9859_v28  ;;  %v13645_v57 = vld [vmem:[%s22075_s1 + $0x564] sm:$0xf] }
 0x138   :  { %v9587_v49 = vld [vmem:[%s22075_s1 + $0x470] sm:$0xf0]  ;;  %6920 = vmatpush.bf16.msrb.mxu3 %v10006_v18  ;;  %v9990_v12 = vor.u32 %v13713_v23, %v9987_v50  ;;  %v13677_v63 = vld [vmem:[%s22075_s1 + $0x664] sm:$0xf] }
 0x139   :  { %v9715_v61 = vld [vmem:[%s22075_s1 + $0x570] sm:$0xf0]  ;;  %v13709_v22 = vld [vmem:[%s22075_s1 + $0x764] sm:$0xf]  ;;  %6879 = vmatpush.bf16.msrb.mxu0 %v9606_v13  ;;  %v9590_v15 = vor.u32 %v13613_v62, %v9587_v49  ;;  %v6633_v13 = vpop.f32.mrf.mxu2 }
 0x13a   :  { %v9843_v7 = vld [vmem:[%s22075_s1 + $0x670] sm:$0xf0]  ;;  %6893 = vmatpush.bf16.msrb.mxu1 %v9734_v20  ;;  %v9718_v27 = vor.u32 %v13645_v57, %v9715_v61  ;;  %v13609_v29 = vld [vmem:[%s22075_s1 + $0x444] sm:$0xf]  ;;  %v6634_v62 = vadd.f32 %v6633_v13, %v6620_v6  ;;  %v6647_v49 = vpop.f32.mrf.mxu3 }
 0x13b   :  { %v9971_v18 = vld [vmem:[%s22075_s1 + $0x770] sm:$0xf0]  ;;  %6907 = vmatpush.bf16.msrb.mxu2 %v9862_v30  ;;  %v9846_v28 = vor.u32 %v13677_v63, %v9843_v7  ;;  %v13641_v50 = vld [vmem:[%s22075_s1 + $0x544] sm:$0xf] }
 0x13c   :  { %v9571_v23 = vld [vmem:[%s22075_s1 + $0x450] sm:$0xf0]  ;;  %6921 = vmatpush.bf16.msrb.mxu3 %v9990_v12  ;;  %v9974_v53 = vor.u32 %v13709_v22, %v9971_v18  ;;  %v13673_v20 = vld [vmem:[%s22075_s1 + $0x644] sm:$0xf]  ;;  %v16849_v63 = vadd.f32 %v6647_v49, %v6634_v62 }
 0x13d   :  { %v9699_v52 = vld [vmem:[%s22075_s1 + $0x550] sm:$0xf0]  ;;  %v13705_v57 = vld [vmem:[%s22075_s1 + $0x744] sm:$0xf]  ;;  %6880 = vmatpush.bf16.msrb.mxu0 %v9590_v15  ;;  %v9574_v61 = vor.u32 %v13609_v29, %v9571_v23 }
 0x13e   :  { %v9827_v30 = vld [vmem:[%s22075_s1 + $0x650] sm:$0xf0]  ;;  %6894 = vmatpush.bf16.msrb.mxu1 %v9718_v27  ;;  %v9702_v7 = vor.u32 %v13641_v50, %v9699_v52  ;;  %v13605_v6 = vld [vmem:[%s22075_s1 + $0x424] sm:$0xf] }
 0x13f   :  { %v9955_v12 = vld [vmem:[%s22075_s1 + $0x750] sm:$0xf0]  ;;  %6908 = vmatpush.bf16.msrb.mxu2 %v9846_v28  ;;  %v9830_v22 = vor.u32 %v13673_v20, %v9827_v30  ;;  %v13637_v13 = vld [vmem:[%s22075_s1 + $0x524] sm:$0xf] }
 0x140   :  { %v9555_v18 = vld [vmem:[%s22075_s1 + $0x430] sm:$0xf0]  ;;  %6922 = vmatpush.bf16.msrb.mxu3 %v9974_v53  ;;  %v9958_v15 = vor.u32 %v13705_v57, %v9955_v12  ;;  %v13669_v28 = vld [vmem:[%s22075_s1 + $0x624] sm:$0xf] }
 0x141   :  { %v9683_v27 = vld [vmem:[%s22075_s1 + $0x530] sm:$0xf0]  ;;  %v13701_v23 = vld [vmem:[%s22075_s1 + $0x724] sm:$0xf]  ;;  %6881 = vmatpush.bf16.msrb.mxu0 %v9574_v61  ;;  %v9558_v53 = vor.u32 %v13605_v6, %v9555_v18 }
 0x142   :  { %v9811_v29 = vld [vmem:[%s22075_s1 + $0x630] sm:$0xf0]  ;;  %v13601_v52 = vld [vmem:[%s22075_s1 + $0x404] sm:$0xf]  ;;  %6895 = vmatpush.bf16.msrb.mxu1 %v9702_v7  ;;  %v9686_v30 = vor.u32 %v13637_v13, %v9683_v27 }
 0x143   :  { %v9939_v50 = vld [vmem:[%s22075_s1 + $0x730] sm:$0xf0]  ;;  %6909 = vmatpush.bf16.msrb.mxu2 %v9830_v22  ;;  %v9814_v62 = vor.u32 %v13669_v28, %v9811_v29  ;;  %v13633_v49 = vld [vmem:[%s22075_s1 + $0x504] sm:$0xf] }
 0x144   :  { %v9539_v20 = vld [vmem:[%s22075_s1 + $0x410] sm:$0xf0]  ;;  %v13665_v12 = vld [vmem:[%s22075_s1 + $0x604] sm:$0xf]  ;;  %6923 = vmatpush.bf16.msrb.mxu3 %v9958_v15  ;;  %v9942_v61 = vor.u32 %v13701_v23, %v9939_v50 }
 0x145   :  { %v9667_v57 = vld [vmem:[%s22075_s1 + $0x510] sm:$0xf0]  ;;  %v13697_v22 = vld [vmem:[%s22075_s1 + $0x704] sm:$0xf]  ;;  %6882 = vmatpush.bf16.msrb.mxu0 %v9558_v53  ;;  %v9542_v27 = vor.u32 %v13601_v52, %v9539_v20 }
 0x146   :  { %v9795_v7 = vld [vmem:[%s22075_s1 + $0x610] sm:$0xf0]  ;;  %v13757_v18 = vld [vmem:[%s22075_s1 + $0x8e4] sm:$0xf]  ;;  %6896 = vmatpush.bf16.msrb.mxu1 %v9686_v30  ;;  %v9670_v50 = vor.u32 %v13633_v49, %v9667_v57 }
 0x147   :  { %v9923_v6 = vld [vmem:[%s22075_s1 + $0x710] sm:$0xf0]  ;;  %v13789_v15 = vld [vmem:[%s22075_s1 + $0x9e4] sm:$0xf]  ;;  %6910 = vmatpush.bf16.msrb.mxu2 %v9814_v62  ;;  %v9798_v42 = vor.u32 %v13665_v12, %v9795_v7 }
 0x148   :  { %v10163_v13 = vld [vmem:[%s22075_s1 + $0x8f0] sm:$0xf0]  ;;  %v13821_v29 = vld [vmem:[%s22075_s1 + $0xae4] sm:$0xf]  ;;  %6924 = vmatpush.bf16.msrb.mxu3 %v9942_v61  ;;  %v9926_v20 = vor.u32 %v13697_v22, %v9923_v6  ;;  %v16941_v22 = vpop.f32.mrf.mxu0 }
 0x149   :  { %v10291_v28 = vld [vmem:[%s22075_s1 + $0x9f0] sm:$0xf0]  ;;  %v13853_v53 = vld [vmem:[%s22075_s1 + $0xbe4] sm:$0xf]  ;;  %v10166_v11 = vor.u32 %v13757_v18, %v10163_v13  ;;  %6883 = vmatpush.bf16.msrb.mxu0 %v9542_v27  ;;  %22116 = vst [vmem:[#allocation25_spill] sm:$0xff] %v16941_v22  ;;  %v16949_v13 = vpop.f32.mrf.mxu1 }
 0x14a   :  { %v10419_v23 = vld [vmem:[%s22075_s1 + $0xaf0] sm:$0xf0]  ;;  %v10294_v54 = vor.u32 %v13789_v15, %v10291_v28  ;;  %v13753_v30 = vld [vmem:[%s22075_s1 + $0x8c4] sm:$0xf]  ;;  %6897 = vmatpush.bf16.msrb.mxu1 %v9670_v50  ;;  %22117 = vst [vmem:[#allocation26_spill] sm:$0xff] %v16949_v13 }
 0x14b   :  { %v10547_v52 = vld [vmem:[%s22075_s1 + $0xbf0] sm:$0xf0]  ;;  %v10422_v19 = vor.u32 %v13821_v29, %v10419_v23  ;;  %v13785_v49 = vld [vmem:[%s22075_s1 + $0x9c4] sm:$0xf]  ;;  %6911 = vmatpush.bf16.msrb.mxu2 %v9798_v42 }
 0x14c   :  { %v10147_v62 = vld [vmem:[%s22075_s1 + $0x8d0] sm:$0xf0]  ;;  %v10550_v57 = vor.u32 %v13853_v53, %v10547_v52  ;;  %v13817_v61 = vld [vmem:[%s22075_s1 + $0xac4] sm:$0xf]  ;;  %6925 = vmatpush.bf16.msrb.mxu3 %v9926_v20  ;;  %6884 = vmatmul.bf16.vlgmr.msrb.gmra.mxu0 %v15110_v39 }
 0x14d   :  { %v10275_v12 = vld [vmem:[%s22075_s1 + $0x9d0] sm:$0xf0]  ;;  %v13849_v6 = vld [vmem:[%s22075_s1 + $0xbc4] sm:$0xf]  ;;  %6932 = vmatpush.bf16.msra.mxu0 %v10166_v11  ;;  %v10150_v15 = vor.u32 %v13753_v30, %v10147_v62  ;;  %6898 = vmatmul.bf16.vlgmr.msrb.gmra.mxu1 %v15123_v44 }
 0x14e   :  { %v10403_v7 = vld [vmem:[%s22075_s1 + $0xad0] sm:$0xf0]  ;;  %6946 = vmatpush.bf16.msra.mxu1 %v10294_v54  ;;  %v10278_v27 = vor.u32 %v13785_v49, %v10275_v12  ;;  %v13749_v42 = vld [vmem:[%s22075_s1 + $0x8a4] sm:$0xf]  ;;  %6912 = vmatmul.bf16.vlgmr.msrb.gmra.mxu2 %v15121_v43 }
 0x14f   :  { %v10531_v18 = vld [vmem:[%s22075_s1 + $0xbd0] sm:$0xf0]  ;;  %6960 = vmatpush.bf16.msra.mxu2 %v10422_v19  ;;  %v10406_v28 = vor.u32 %v13817_v61, %v10403_v7  ;;  %v13781_v23 = vld [vmem:[%s22075_s1 + $0x9a4] sm:$0xf]  ;;  %6926 = vmatmul.bf16.vlgmr.msrb.gmra.mxu3 %v15131_v47  ;;  %v16988_v61 = vpop.f32.mrf.mxu2 }
 0x150   :  { %v10131_v29 = vld [vmem:[%s22075_s1 + $0x8b0] sm:$0xf0]  ;;  %6974 = vmatpush.bf16.msra.mxu3 %v10550_v57  ;;  %v10534_v11 = vor.u32 %v13849_v6, %v10531_v18  ;;  %v13813_v54 = vld [vmem:[%s22075_s1 + $0xaa4] sm:$0xf]  ;;  %22118 = vst [vmem:[#allocation27_spill] sm:$0xff] %v16988_v61 }
 0x151   :  { %v10259_v19 = vld [vmem:[%s22075_s1 + $0x9b0] sm:$0xf0]  ;;  %v13845_v53 = vld [vmem:[%s22075_s1 + $0xba4] sm:$0xf]  ;;  %6933 = vmatpush.bf16.msra.mxu0 %v10150_v15  ;;  %v10134_v20 = vor.u32 %v13749_v42, %v10131_v29 }
 0x152   :  { %v10387_v50 = vld [vmem:[%s22075_s1 + $0xab0] sm:$0xf0]  ;;  %6947 = vmatpush.bf16.msra.mxu1 %v10278_v27  ;;  %v10262_v30 = vor.u32 %v13781_v23, %v10259_v19  ;;  %v13745_v49 = vld [vmem:[%s22075_s1 + $0x884] sm:$0xf]  ;;  %v16999_v27 = vpop.f32.mrf.mxu3  ;;  %v6675_v19 = vpop.f32.mrf.mxu1 }
 0x153   :  { %v10515_v52 = vld [vmem:[%s22075_s1 + $0xbb0] sm:$0xf0]  ;;  %6961 = vmatpush.bf16.msra.mxu2 %v10406_v28  ;;  %v10390_v62 = vor.u32 %v13813_v54, %v10387_v50  ;;  %v13777_v12 = vld [vmem:[%s22075_s1 + $0x984] sm:$0xf]  ;;  %22119 = vst [vmem:[#allocation28_spill] sm:$0xff] %v16999_v27  ;;  %v6661_v28 = vpop.f32.mrf.mxu0 }
 0x154   :  { %v10115_v57 = vld [vmem:[%s22075_s1 + $0x890] sm:$0xf0]  ;;  %6975 = vmatpush.bf16.msra.mxu3 %v10534_v11  ;;  %v10518_v7 = vor.u32 %v13845_v53, %v10515_v52  ;;  %v13809_v18 = vld [vmem:[%s22075_s1 + $0xa84] sm:$0xf]  ;;  %v6662_v23 = vadd.f32 %v6661_v28, %v16849_v63 }
 0x155   :  { %v10243_v6 = vld [vmem:[%s22075_s1 + $0x990] sm:$0xf0]  ;;  %v13841_v42 = vld [vmem:[%s22075_s1 + $0xb84] sm:$0xf]  ;;  %6934 = vmatpush.bf16.msra.mxu0 %v10134_v20  ;;  %v10118_v11 = vor.u32 %v13745_v49, %v10115_v57 }
 0x156   :  { %v10371_v15 = vld [vmem:[%s22075_s1 + $0xa90] sm:$0xf0]  ;;  %6948 = vmatpush.bf16.msra.mxu1 %v10262_v30  ;;  %v10246_v54 = vor.u32 %v13777_v12, %v10243_v6  ;;  %v13741_v53 = vld [vmem:[%s22075_s1 + $0x864] sm:$0xf]  ;;  %v6676_v49 = vadd.f32 %v6675_v19, %v6662_v23 }
 0x157   :  { %v10499_v29 = vld [vmem:[%s22075_s1 + $0xb90] sm:$0xf0]  ;;  %6962 = vmatpush.bf16.msra.mxu2 %v10390_v62  ;;  %v10374_v50 = vor.u32 %v13809_v18, %v10371_v15  ;;  %v13773_v20 = vld [vmem:[%s22075_s1 + $0x964] sm:$0xf] }
 0x158   :  { %v10099_v52 = vld [vmem:[%s22075_s1 + $0x870] sm:$0xf0]  ;;  %6976 = vmatpush.bf16.msra.mxu3 %v10518_v7  ;;  %v10502_v63 = vor.u32 %v13841_v42, %v10499_v29  ;;  %v13805_v62 = vld [vmem:[%s22075_s1 + $0xa64] sm:$0xf] }
 0x159   :  { %v10227_v30 = vld [vmem:[%s22075_s1 + $0x970] sm:$0xf0]  ;;  %v13837_v12 = vld [vmem:[%s22075_s1 + $0xb64] sm:$0xf]  ;;  %6935 = vmatpush.bf16.msra.mxu0 %v10118_v11  ;;  %v10102_v6 = vor.u32 %v13741_v53, %v10099_v52  ;;  %v6689_v11 = vpop.f32.mrf.mxu2 }
 0x15a   :  { %v10355_v57 = vld [vmem:[%s22075_s1 + $0xa70] sm:$0xf0]  ;;  %6949 = vmatpush.bf16.msra.mxu1 %v10246_v54  ;;  %v10230_v18 = vor.u32 %v13773_v20, %v10227_v30  ;;  %v13737_v28 = vld [vmem:[%s22075_s1 + $0x844] sm:$0xf]  ;;  %v6690_v53 = vadd.f32 %v6689_v11, %v6676_v49  ;;  %v6703_v52 = vpop.f32.mrf.mxu3 }
 0x15b   :  { %v10483_v7 = vld [vmem:[%s22075_s1 + $0xb70] sm:$0xf0]  ;;  %6963 = vmatpush.bf16.msra.mxu2 %v10374_v50  ;;  %v10358_v15 = vor.u32 %v13805_v62, %v10355_v57  ;;  %v13769_v29 = vld [vmem:[%s22075_s1 + $0x944] sm:$0xf] }
 0x15c   :  { %v10083_v42 = vld [vmem:[%s22075_s1 + $0x850] sm:$0xf0]  ;;  %6977 = vmatpush.bf16.msra.mxu3 %v10502_v63  ;;  %v10486_v23 = vor.u32 %v13837_v12, %v10483_v7  ;;  %v13801_v54 = vld [vmem:[%s22075_s1 + $0xa44] sm:$0xf]  ;;  %v17056_v62 = vadd.f32 %v6703_v52, %v6690_v53 }
 0x15d   :  { %v10211_v19 = vld [vmem:[%s22075_s1 + $0x950] sm:$0xf0]  ;;  %v13833_v20 = vld [vmem:[%s22075_s1 + $0xb44] sm:$0xf]  ;;  %6936 = vmatpush.bf16.msra.mxu0 %v10102_v6  ;;  %v10086_v30 = vor.u32 %v13737_v28, %v10083_v42 }
 0x15e   :  { %v10339_v50 = vld [vmem:[%s22075_s1 + $0xa50] sm:$0xf0]  ;;  %6950 = vmatpush.bf16.msra.mxu1 %v10230_v18  ;;  %v10214_v57 = vor.u32 %v13769_v29, %v10211_v19  ;;  %v13733_v49 = vld [vmem:[%s22075_s1 + $0x824] sm:$0xf] }
 0x15f   :  { %v10467_v63 = vld [vmem:[%s22075_s1 + $0xb50] sm:$0xf0]  ;;  %6964 = vmatpush.bf16.msra.mxu2 %v10358_v15  ;;  %v10342_v12 = vor.u32 %v13801_v54, %v10339_v50  ;;  %v13765_v11 = vld [vmem:[%s22075_s1 + $0x924] sm:$0xf] }
 0x160   :  { %v10067_v7 = vld [vmem:[%s22075_s1 + $0x830] sm:$0xf0]  ;;  %6978 = vmatpush.bf16.msra.mxu3 %v10486_v23  ;;  %v10470_v6 = vor.u32 %v13833_v20, %v10467_v63  ;;  %v13797_v15 = vld [vmem:[%s22075_s1 + $0xa24] sm:$0xf] }
 0x161   :  { %v10195_v18 = vld [vmem:[%s22075_s1 + $0x930] sm:$0xf0]  ;;  %v13829_v42 = vld [vmem:[%s22075_s1 + $0xb24] sm:$0xf]  ;;  %6937 = vmatpush.bf16.msra.mxu0 %v10086_v30  ;;  %v10070_v23 = vor.u32 %v13733_v49, %v10067_v7 }
 0x162   :  { %v10323_v28 = vld [vmem:[%s22075_s1 + $0xa30] sm:$0xf0]  ;;  %v13729_v19 = vld [vmem:[%s22075_s1 + $0x804] sm:$0xf]  ;;  %6951 = vmatpush.bf16.msra.mxu1 %v10214_v57  ;;  %v10198_v50 = vor.u32 %v13765_v11, %v10195_v18 }
 0x163   :  { %v10451_v29 = vld [vmem:[%s22075_s1 + $0xb30] sm:$0xf0]  ;;  %6965 = vmatpush.bf16.msra.mxu2 %v10342_v12  ;;  %v10326_v53 = vor.u32 %v13797_v15, %v10323_v28  ;;  %v13761_v52 = vld [vmem:[%s22075_s1 + $0x904] sm:$0xf] }
 0x164   :  { %v10051_v54 = vld [vmem:[%s22075_s1 + $0x810] sm:$0xf0]  ;;  %v13793_v63 = vld [vmem:[%s22075_s1 + $0xa04] sm:$0xf]  ;;  %6979 = vmatpush.bf16.msra.mxu3 %v10470_v6  ;;  %v10454_v30 = vor.u32 %v13829_v42, %v10451_v29 }
 0x165   :  { %v10179_v20 = vld [vmem:[%s22075_s1 + $0x910] sm:$0xf0]  ;;  %v13825_v12 = vld [vmem:[%s22075_s1 + $0xb04] sm:$0xf]  ;;  %6938 = vmatpush.bf16.msra.mxu0 %v10070_v23  ;;  %v10054_v18 = vor.u32 %v13729_v19, %v10051_v54 }
 0x166   :  { %v10307_v57 = vld [vmem:[%s22075_s1 + $0xa10] sm:$0xf0]  ;;  %v13885_v7 = vld [vmem:[%s22075_s1 + $0xce4] sm:$0xf]  ;;  %6952 = vmatpush.bf16.msra.mxu1 %v10198_v50  ;;  %v10182_v29 = vor.u32 %v13761_v52, %v10179_v20 }
 0x167   :  { %v10435_v49 = vld [vmem:[%s22075_s1 + $0xb10] sm:$0xf0]  ;;  %v13917_v6 = vld [vmem:[%s22075_s1 + $0xde4] sm:$0xf]  ;;  %6966 = vmatpush.bf16.msra.mxu2 %v10326_v53  ;;  %v10310_v27 = vor.u32 %v13793_v63, %v10307_v57 }
 0x168   :  { %v10675_v11 = vld [vmem:[%s22075_s1 + $0xcf0] sm:$0xf0]  ;;  %v13949_v28 = vld [vmem:[%s22075_s1 + $0xee4] sm:$0xf]  ;;  %6980 = vmatpush.bf16.msra.mxu3 %v10454_v30  ;;  %v10438_v54 = vor.u32 %v13825_v12, %v10435_v49  ;;  %v17148_v12 = vpop.f32.mrf.mxu0 }
 0x169   :  { %v10803_v15 = vld [vmem:[%s22075_s1 + $0xdf0] sm:$0xf0]  ;;  %v13981_v23 = vld [vmem:[%s22075_s1 + $0xfe4] sm:$0xf]  ;;  %v10678_v61 = vor.u32 %v13885_v7, %v10675_v11  ;;  %6939 = vmatpush.bf16.msra.mxu0 %v10054_v18  ;;  %22120 = vst [vmem:[#allocation29_spill] sm:$0xff] %v17148_v12  ;;  %v17156_v11 = vpop.f32.mrf.mxu1 }
 0x16a   :  { %v10931_v42 = vld [vmem:[%s22075_s1 + $0xef0] sm:$0xf0]  ;;  %v10806_v13 = vor.u32 %v13917_v6, %v10803_v15  ;;  %v13881_v50 = vld [vmem:[%s22075_s1 + $0xcc4] sm:$0xf]  ;;  %6953 = vmatpush.bf16.msra.mxu1 %v10182_v29  ;;  %22121 = vst [vmem:[#allocation30_spill] sm:$0xff] %v17156_v11 }
 0x16b   :  { %v11059_v19 = vld [vmem:[%s22075_s1 + $0xff0] sm:$0xf0]  ;;  %v10934_v22 = vor.u32 %v13949_v28, %v10931_v42  ;;  %v13913_v52 = vld [vmem:[%s22075_s1 + $0xdc4] sm:$0xf]  ;;  %6967 = vmatpush.bf16.msra.mxu2 %v10310_v27 }
 0x16c   :  { %v10659_v53 = vld [vmem:[%s22075_s1 + $0xcd0] sm:$0xf0]  ;;  %v11062_v20 = vor.u32 %v13981_v23, %v11059_v19  ;;  %v13945_v30 = vld [vmem:[%s22075_s1 + $0xec4] sm:$0xf]  ;;  %6981 = vmatpush.bf16.msra.mxu3 %v10438_v54  ;;  %6940 = vmatmul.bf16.vlgmr.msra.gmra.mxu0 %v15338_v31 }
 0x16d   :  { %v10787_v63 = vld [vmem:[%s22075_s1 + $0xdd0] sm:$0xf0]  ;;  %v13977_v49 = vld [vmem:[%s22075_s1 + $0xfc4] sm:$0xf]  ;;  %6988 = vmatpush.bf16.msrb.mxu0 %v10678_v61  ;;  %v10662_v6 = vor.u32 %v13881_v50, %v10659_v53  ;;  %6954 = vmatmul.bf16.vlgmr.msra.gmra.mxu1 %v15351_v36 }
 0x16e   :  { %v10915_v57 = vld [vmem:[%s22075_s1 + $0xed0] sm:$0xf0]  ;;  %7002 = vmatpush.bf16.msrb.mxu1 %v10806_v13  ;;  %v10790_v18 = vor.u32 %v13913_v52, %v10787_v63  ;;  %v13877_v27 = vld [vmem:[%s22075_s1 + $0xca4] sm:$0xf]  ;;  %6968 = vmatmul.bf16.vlgmr.msra.gmra.mxu2 %v15349_v35 }
 0x16f   :  { %v11043_v7 = vld [vmem:[%s22075_s1 + $0xfd0] sm:$0xf0]  ;;  %7016 = vmatpush.bf16.msrb.mxu2 %v10934_v22  ;;  %v10918_v15 = vor.u32 %v13945_v30, %v10915_v57  ;;  %v13909_v42 = vld [vmem:[%s22075_s1 + $0xda4] sm:$0xf]  ;;  %6982 = vmatmul.bf16.vlgmr.msra.gmra.mxu3 %v15359_v40  ;;  %v17195_v30 = vpop.f32.mrf.mxu2 }
 0x170   :  { %v10643_v28 = vld [vmem:[%s22075_s1 + $0xcb0] sm:$0xf0]  ;;  %7030 = vmatpush.bf16.msrb.mxu3 %v11062_v20  ;;  %v11046_v61 = vor.u32 %v13977_v49, %v11043_v7  ;;  %v13941_v13 = vld [vmem:[%s22075_s1 + $0xea4] sm:$0xf]  ;;  %22122 = vst [vmem:[#allocation31_spill] sm:$0xff] %v17195_v30 }
 0x171   :  { %v10771_v22 = vld [vmem:[%s22075_s1 + $0xdb0] sm:$0xf0]  ;;  %v13973_v23 = vld [vmem:[%s22075_s1 + $0xfa4] sm:$0xf]  ;;  %6989 = vmatpush.bf16.msrb.mxu0 %v10662_v6  ;;  %v10646_v54 = vor.u32 %v13877_v27, %v10643_v28 }
 0x172   :  { %v10899_v29 = vld [vmem:[%s22075_s1 + $0xeb0] sm:$0xf0]  ;;  %7003 = vmatpush.bf16.msrb.mxu1 %v10790_v18  ;;  %v10774_v50 = vor.u32 %v13909_v42, %v10771_v22  ;;  %v13873_v52 = vld [vmem:[%s22075_s1 + $0xc84] sm:$0xf]  ;;  %v17206_v18 = vpop.f32.mrf.mxu3  ;;  %v6731_v22 = vpop.f32.mrf.mxu1 }
 0x173   :  { %v11027_v19 = vld [vmem:[%s22075_s1 + $0xfb0] sm:$0xf0]  ;;  %7017 = vmatpush.bf16.msrb.mxu2 %v10918_v15  ;;  %v10902_v53 = vor.u32 %v13941_v13, %v10899_v29  ;;  %v13905_v63 = vld [vmem:[%s22075_s1 + $0xd84] sm:$0xf]  ;;  %22123 = vst [vmem:[#allocation32_spill] sm:$0xff] %v17206_v18  ;;  %v6717_v15 = vpop.f32.mrf.mxu0 }
 0x174   :  { %v10627_v20 = vld [vmem:[%s22075_s1 + $0xc90] sm:$0xf0]  ;;  %7031 = vmatpush.bf16.msrb.mxu3 %v11046_v61  ;;  %v11030_v57 = vor.u32 %v13973_v23, %v11027_v19  ;;  %v13937_v7 = vld [vmem:[%s22075_s1 + $0xe84] sm:$0xf]  ;;  %v6718_v42 = vadd.f32 %v6717_v15, %v17056_v62 }
 0x175   :  { %v10755_v49 = vld [vmem:[%s22075_s1 + $0xd90] sm:$0xf0]  ;;  %v13969_v27 = vld [vmem:[%s22075_s1 + $0xf84] sm:$0xf]  ;;  %6990 = vmatpush.bf16.msrb.mxu0 %v10646_v54  ;;  %v10630_v61 = vor.u32 %v13873_v52, %v10627_v20 }
 0x176   :  { %v10883_v6 = vld [vmem:[%s22075_s1 + $0xe90] sm:$0xf0]  ;;  %7004 = vmatpush.bf16.msrb.mxu1 %v10774_v50  ;;  %v10758_v13 = vor.u32 %v13905_v63, %v10755_v49  ;;  %v13869_v23 = vld [vmem:[%s22075_s1 + $0xc64] sm:$0xf]  ;;  %v6732_v52 = vadd.f32 %v6731_v22, %v6718_v42 }
 0x177   :  { %v11011_v28 = vld [vmem:[%s22075_s1 + $0xf90] sm:$0xf0]  ;;  %7018 = vmatpush.bf16.msrb.mxu2 %v10902_v53  ;;  %v10886_v29 = vor.u32 %v13937_v7, %v10883_v6  ;;  %v13901_v54 = vld [vmem:[%s22075_s1 + $0xd64] sm:$0xf] }
 0x178   :  { %v10611_v19 = vld [vmem:[%s22075_s1 + $0xc70] sm:$0xf0]  ;;  %7032 = vmatpush.bf16.msrb.mxu3 %v11030_v57  ;;  %v11014_v62 = vor.u32 %v13969_v27, %v11011_v28  ;;  %v13933_v53 = vld [vmem:[%s22075_s1 + $0xe64] sm:$0xf] }
 0x179   :  { %v10739_v50 = vld [vmem:[%s22075_s1 + $0xd70] sm:$0xf0]  ;;  %v13965_v63 = vld [vmem:[%s22075_s1 + $0xf64] sm:$0xf]  ;;  %6991 = vmatpush.bf16.msrb.mxu0 %v10630_v61  ;;  %v10614_v49 = vor.u32 %v13869_v23, %v10611_v19  ;;  %v6745_v61 = vpop.f32.mrf.mxu2 }
 0x17a   :  { %v10867_v20 = vld [vmem:[%s22075_s1 + $0xe70] sm:$0xf0]  ;;  %7005 = vmatpush.bf16.msrb.mxu1 %v10758_v13  ;;  %v10742_v7 = vor.u32 %v13901_v54, %v10739_v50  ;;  %v13865_v15 = vld [vmem:[%s22075_s1 + $0xc44] sm:$0xf]  ;;  %v6746_v23 = vadd.f32 %v6745_v61, %v6732_v52  ;;  %v6759_v19 = vpop.f32.mrf.mxu3 }
 0x17b   :  { %v10995_v57 = vld [vmem:[%s22075_s1 + $0xf70] sm:$0xf0]  ;;  %7019 = vmatpush.bf16.msrb.mxu2 %v10886_v29  ;;  %v10870_v6 = vor.u32 %v13933_v53, %v10867_v20  ;;  %v13897_v28 = vld [vmem:[%s22075_s1 + $0xd44] sm:$0xf] }
 0x17c   :  { %v10595_v27 = vld [vmem:[%s22075_s1 + $0xc50] sm:$0xf0]  ;;  %7033 = vmatpush.bf16.msrb.mxu3 %v11014_v62  ;;  %v10998_v42 = vor.u32 %v13965_v63, %v10995_v57  ;;  %v13929_v13 = vld [vmem:[%s22075_s1 + $0xe44] sm:$0xf]  ;;  %v17263_v53 = vadd.f32 %v6759_v19, %v6746_v23 }
 0x17d   :  { %v10723_v22 = vld [vmem:[%s22075_s1 + $0xd50] sm:$0xf0]  ;;  %v13961_v54 = vld [vmem:[%s22075_s1 + $0xf44] sm:$0xf]  ;;  %6992 = vmatpush.bf16.msrb.mxu0 %v10614_v49  ;;  %v10598_v50 = vor.u32 %v13865_v15, %v10595_v27 }
 0x17e   :  { %v10851_v29 = vld [vmem:[%s22075_s1 + $0xe50] sm:$0xf0]  ;;  %7006 = vmatpush.bf16.msrb.mxu1 %v10742_v7  ;;  %v10726_v20 = vor.u32 %v13897_v28, %v10723_v22  ;;  %v13861_v52 = vld [vmem:[%s22075_s1 + $0xc24] sm:$0xf] }
 0x17f   :  { %v10979_v62 = vld [vmem:[%s22075_s1 + $0xf50] sm:$0xf0]  ;;  %7020 = vmatpush.bf16.msrb.mxu2 %v10870_v6  ;;  %v10854_v63 = vor.u32 %v13929_v13, %v10851_v29  ;;  %v13893_v61 = vld [vmem:[%s22075_s1 + $0xd24] sm:$0xf] }
 0x180   :  { %v10579_v57 = vld [vmem:[%s22075_s1 + $0xc30] sm:$0xf0]  ;;  %7034 = vmatpush.bf16.msrb.mxu3 %v10998_v42  ;;  %v10982_v49 = vor.u32 %v13961_v54, %v10979_v62  ;;  %v13925_v6 = vld [vmem:[%s22075_s1 + $0xe24] sm:$0xf] }
 0x181   :  { %v10707_v7 = vld [vmem:[%s22075_s1 + $0xd30] sm:$0xf0]  ;;  %v13957_v27 = vld [vmem:[%s22075_s1 + $0xf24] sm:$0xf]  ;;  %6993 = vmatpush.bf16.msrb.mxu0 %v10598_v50  ;;  %v10582_v42 = vor.u32 %v13861_v52, %v10579_v57 }
 0x182   :  { %v10835_v15 = vld [vmem:[%s22075_s1 + $0xe30] sm:$0xf0]  ;;  %v13857_v22 = vld [vmem:[%s22075_s1 + $0xc04] sm:$0xf]  ;;  %7007 = vmatpush.bf16.msrb.mxu1 %v10726_v20  ;;  %v10710_v29 = vor.u32 %v13893_v61, %v10707_v7 }
 0x183   :  { %v10963_v28 = vld [vmem:[%s22075_s1 + $0xf30] sm:$0xf0]  ;;  %7021 = vmatpush.bf16.msrb.mxu2 %v10854_v63  ;;  %v10838_v23 = vor.u32 %v13925_v6, %v10835_v15  ;;  %v13889_v19 = vld [vmem:[%s22075_s1 + $0xd04] sm:$0xf] }
 0x184   :  { %v10563_v13 = vld [vmem:[%s22075_s1 + $0xc10] sm:$0xf0]  ;;  %v13921_v62 = vld [vmem:[%s22075_s1 + $0xe04] sm:$0xf]  ;;  %7035 = vmatpush.bf16.msrb.mxu3 %v10982_v49  ;;  %v10966_v50 = vor.u32 %v13957_v27, %v10963_v28 }
 0x185   :  { %v10691_v54 = vld [vmem:[%s22075_s1 + $0xd10] sm:$0xf0]  ;;  %v13953_v63 = vld [vmem:[%s22075_s1 + $0xf04] sm:$0xf]  ;;  %6994 = vmatpush.bf16.msrb.mxu0 %v10582_v42  ;;  %v10566_v7 = vor.u32 %v13857_v22, %v10563_v13 }
 0x186   :  { %v10819_v20 = vld [vmem:[%s22075_s1 + $0xe10] sm:$0xf0]  ;;  %v14013_v57 = vld [vmem:[%s22075_s1 + $0x10e4] sm:$0xf]  ;;  %7008 = vmatpush.bf16.msrb.mxu1 %v10710_v29  ;;  %v10694_v28 = vor.u32 %v13889_v19, %v10691_v54 }
 0x187   :  { %v10947_v52 = vld [vmem:[%s22075_s1 + $0xf10] sm:$0xf0]  ;;  %v14045_v49 = vld [vmem:[%s22075_s1 + $0x11e4] sm:$0xf]  ;;  %7022 = vmatpush.bf16.msrb.mxu2 %v10838_v23  ;;  %v10822_v18 = vor.u32 %v13921_v62, %v10819_v20 }
 0x188   :  { %v11187_v61 = vld [vmem:[%s22075_s1 + $0x10f0] sm:$0xf0]  ;;  %v14077_v15 = vld [vmem:[%s22075_s1 + $0x12e4] sm:$0xf]  ;;  %7036 = vmatpush.bf16.msrb.mxu3 %v10966_v50  ;;  %v10950_v13 = vor.u32 %v13953_v63, %v10947_v52  ;;  %v17355_v63 = vpop.f32.mrf.mxu0 }
 0x189   :  { %v11315_v6 = vld [vmem:[%s22075_s1 + $0x11f0] sm:$0xf0]  ;;  %v14109_v42 = vld [vmem:[%s22075_s1 + $0x13e4] sm:$0xf]  ;;  %v11190_v30 = vor.u32 %v14013_v57, %v11187_v61  ;;  %6995 = vmatpush.bf16.msrb.mxu0 %v10566_v7  ;;  %22124 = vst [vmem:[#allocation33_spill] sm:$0xff] %v17355_v63  ;;  %v17363_v61 = vpop.f32.mrf.mxu1 }
 0x18a   :  { %v11443_v27 = vld [vmem:[%s22075_s1 + $0x12f0] sm:$0xf0]  ;;  %v11318_v11 = vor.u32 %v14045_v49, %v11315_v6  ;;  %v14009_v29 = vld [vmem:[%s22075_s1 + $0x10c4] sm:$0xf]  ;;  %7009 = vmatpush.bf16.msrb.mxu1 %v10694_v28  ;;  %22125 = vst [vmem:[#allocation34_spill] sm:$0xff] %v17363_v61 }
 0x18b   :  { %v11571_v22 = vld [vmem:[%s22075_s1 + $0x13f0] sm:$0xf0]  ;;  %v11446_v12 = vor.u32 %v14077_v15, %v11443_v27  ;;  %v14041_v19 = vld [vmem:[%s22075_s1 + $0x11c4] sm:$0xf]  ;;  %7023 = vmatpush.bf16.msrb.mxu2 %v10822_v18 }
 0x18c   :  { %v11171_v23 = vld [vmem:[%s22075_s1 + $0x10d0] sm:$0xf0]  ;;  %v11574_v54 = vor.u32 %v14109_v42, %v11571_v22  ;;  %v14073_v50 = vld [vmem:[%s22075_s1 + $0x12c4] sm:$0xf]  ;;  %7037 = vmatpush.bf16.msrb.mxu3 %v10950_v13  ;;  %6996 = vmatmul.bf16.vlgmr.msrb.gmra.mxu0 %v15566_v32 }
 0x18d   :  { %v11299_v62 = vld [vmem:[%s22075_s1 + $0x11d0] sm:$0xf0]  ;;  %v14105_v52 = vld [vmem:[%s22075_s1 + $0x13c4] sm:$0xf]  ;;  %7044 = vmatpush.bf16.msra.mxu0 %v11190_v30  ;;  %v11174_v49 = vor.u32 %v14009_v29, %v11171_v23  ;;  %7010 = vmatmul.bf16.vlgmr.msrb.gmra.mxu1 %v15579_v41 }
 0x18e   :  { %v11427_v20 = vld [vmem:[%s22075_s1 + $0x12d0] sm:$0xf0]  ;;  %7058 = vmatpush.bf16.msra.mxu1 %v11318_v11  ;;  %v11302_v7 = vor.u32 %v14041_v19, %v11299_v62  ;;  %v14005_v18 = vld [vmem:[%s22075_s1 + $0x10a4] sm:$0xf]  ;;  %7024 = vmatmul.bf16.vlgmr.msrb.gmra.mxu2 %v15577_v38 }
 0x18f   :  { %v11555_v57 = vld [vmem:[%s22075_s1 + $0x13d0] sm:$0xf0]  ;;  %7072 = vmatpush.bf16.msra.mxu2 %v11446_v12  ;;  %v11430_v6 = vor.u32 %v14073_v50, %v11427_v20  ;;  %v14037_v27 = vld [vmem:[%s22075_s1 + $0x11a4] sm:$0xf]  ;;  %7038 = vmatmul.bf16.vlgmr.msrb.gmra.mxu3 %v15587_v46  ;;  %v17402_v50 = vpop.f32.mrf.mxu2 }
 0x190   :  { %v11155_v15 = vld [vmem:[%s22075_s1 + $0x10b0] sm:$0xf0]  ;;  %7086 = vmatpush.bf16.msra.mxu3 %v11574_v54  ;;  %v11558_v30 = vor.u32 %v14105_v52, %v11555_v57  ;;  %v14069_v11 = vld [vmem:[%s22075_s1 + $0x12a4] sm:$0xf]  ;;  %22126 = vst [vmem:[#allocation35_spill] sm:$0xff] %v17402_v50 }
 0x191   :  { %v11283_v12 = vld [vmem:[%s22075_s1 + $0x11b0] sm:$0xf0]  ;;  %v14101_v42 = vld [vmem:[%s22075_s1 + $0x13a4] sm:$0xf]  ;;  %7045 = vmatpush.bf16.msra.mxu0 %v11174_v49  ;;  %v11158_v13 = vor.u32 %v14005_v18, %v11155_v15 }
 0x192   :  { %v11411_v28 = vld [vmem:[%s22075_s1 + $0x12b0] sm:$0xf0]  ;;  %7059 = vmatpush.bf16.msra.mxu1 %v11302_v7  ;;  %v11286_v29 = vor.u32 %v14037_v27, %v11283_v12  ;;  %v14001_v19 = vld [vmem:[%s22075_s1 + $0x1084] sm:$0xf]  ;;  %v17413_v7 = vpop.f32.mrf.mxu3  ;;  %v6787_v12 = vpop.f32.mrf.mxu1 }
 0x193   :  { %v11539_v22 = vld [vmem:[%s22075_s1 + $0x13b0] sm:$0xf0]  ;;  %7073 = vmatpush.bf16.msra.mxu2 %v11430_v6  ;;  %v11414_v23 = vor.u32 %v14069_v11, %v11411_v28  ;;  %v14033_v62 = vld [vmem:[%s22075_s1 + $0x1184] sm:$0xf]  ;;  %22127 = vst [vmem:[#allocation36_spill] sm:$0xff] %v17413_v7  ;;  %v6773_v6 = vpop.f32.mrf.mxu0 }
 0x194   :  { %v11139_v54 = vld [vmem:[%s22075_s1 + $0x1090] sm:$0xf0]  ;;  %7087 = vmatpush.bf16.msra.mxu3 %v11558_v30  ;;  %v11542_v20 = vor.u32 %v14101_v42, %v11539_v22  ;;  %v14065_v57 = vld [vmem:[%s22075_s1 + $0x1284] sm:$0xf]  ;;  %v6774_v27 = vadd.f32 %v6773_v6, %v17263_v53 }
 0x195   :  { %v11267_v52 = vld [vmem:[%s22075_s1 + $0x1190] sm:$0xf0]  ;;  %v14097_v18 = vld [vmem:[%s22075_s1 + $0x1384] sm:$0xf]  ;;  %7046 = vmatpush.bf16.msra.mxu0 %v11158_v13  ;;  %v11142_v30 = vor.u32 %v14001_v19, %v11139_v54 }
 0x196   :  { %v11395_v49 = vld [vmem:[%s22075_s1 + $0x1290] sm:$0xf0]  ;;  %7060 = vmatpush.bf16.msra.mxu1 %v11286_v29  ;;  %v11270_v11 = vor.u32 %v14033_v62, %v11267_v52  ;;  %v13997_v42 = vld [vmem:[%s22075_s1 + $0x1064] sm:$0xf]  ;;  %v6788_v19 = vadd.f32 %v6787_v12, %v6774_v27 }
 0x197   :  { %v11523_v15 = vld [vmem:[%s22075_s1 + $0x1390] sm:$0xf0]  ;;  %7074 = vmatpush.bf16.msra.mxu2 %v11414_v23  ;;  %v11398_v28 = vor.u32 %v14065_v57, %v11395_v49  ;;  %v14029_v13 = vld [vmem:[%s22075_s1 + $0x1164] sm:$0xf] }
 0x198   :  { %v11123_v22 = vld [vmem:[%s22075_s1 + $0x1070] sm:$0xf0]  ;;  %7088 = vmatpush.bf16.msra.mxu3 %v11542_v20  ;;  %v11526_v53 = vor.u32 %v14097_v18, %v11523_v15  ;;  %v14061_v23 = vld [vmem:[%s22075_s1 + $0x1264] sm:$0xf] }
 0x199   :  { %v11251_v29 = vld [vmem:[%s22075_s1 + $0x1170] sm:$0xf0]  ;;  %v14093_v62 = vld [vmem:[%s22075_s1 + $0x1364] sm:$0xf]  ;;  %7047 = vmatpush.bf16.msra.mxu0 %v11142_v30  ;;  %v11126_v52 = vor.u32 %v13997_v42, %v11123_v22  ;;  %v6801_v30 = vpop.f32.mrf.mxu2 }
 0x19a   :  { %v11379_v54 = vld [vmem:[%s22075_s1 + $0x1270] sm:$0xf0]  ;;  %7061 = vmatpush.bf16.msra.mxu1 %v11270_v11  ;;  %v11254_v57 = vor.u32 %v14029_v13, %v11251_v29  ;;  %v13993_v6 = vld [vmem:[%s22075_s1 + $0x1044] sm:$0xf]  ;;  %v6802_v42 = vadd.f32 %v6801_v30, %v6788_v19  ;;  %v6815_v22 = vpop.f32.mrf.mxu3 }
 0x19b   :  { %v11507_v20 = vld [vmem:[%s22075_s1 + $0x1370] sm:$0xf0]  ;;  %7075 = vmatpush.bf16.msra.mxu2 %v11398_v28  ;;  %v11382_v49 = vor.u32 %v14061_v23, %v11379_v54  ;;  %v14025_v15 = vld [vmem:[%s22075_s1 + $0x1144] sm:$0xf] }
 0x19c   :  { %v11107_v18 = vld [vmem:[%s22075_s1 + $0x1050] sm:$0xf0]  ;;  %7089 = vmatpush.bf16.msra.mxu3 %v11526_v53  ;;  %v11510_v27 = vor.u32 %v14093_v62, %v11507_v20  ;;  %v14057_v11 = vld [vmem:[%s22075_s1 + $0x1244] sm:$0xf]  ;;  %v17470_v23 = vadd.f32 %v6815_v22, %v6802_v42 }
 0x19d   :  { %v11235_v12 = vld [vmem:[%s22075_s1 + $0x1150] sm:$0xf0]  ;;  %v14089_v13 = vld [vmem:[%s22075_s1 + $0x1344] sm:$0xf]  ;;  %7048 = vmatpush.bf16.msra.mxu0 %v11126_v52  ;;  %v11110_v29 = vor.u32 %v13993_v6, %v11107_v18 }
 0x19e   :  { %v11363_v28 = vld [vmem:[%s22075_s1 + $0x1250] sm:$0xf0]  ;;  %7062 = vmatpush.bf16.msra.mxu1 %v11254_v57  ;;  %22128 = vst [vmem:[#allocation37_spill] sm:$0xff] %v17470_v23  ;;  %v11238_v54 = vor.u32 %v14025_v15, %v11235_v12  ;;  %v13989_v19 = vld [vmem:[%s22075_s1 + $0x1024] sm:$0xf] }
 0x19f   :  { %v11491_v53 = vld [vmem:[%s22075_s1 + $0x1350] sm:$0xf0]  ;;  %7076 = vmatpush.bf16.msra.mxu2 %v11382_v49  ;;  %v11366_v62 = vor.u32 %v14057_v11, %v11363_v28  ;;  %v14021_v30 = vld [vmem:[%s22075_s1 + $0x1124] sm:$0xf] }
 0x1a0   :  { %v11091_v20 = vld [vmem:[%s22075_s1 + $0x1030] sm:$0xf0]  ;;  %7090 = vmatpush.bf16.msra.mxu3 %v11510_v27  ;;  %v11494_v52 = vor.u32 %v14089_v13, %v11491_v53  ;;  %v14053_v49 = vld [vmem:[%s22075_s1 + $0x1224] sm:$0xf] }
 0x1a1   :  { %v11219_v57 = vld [vmem:[%s22075_s1 + $0x1130] sm:$0xf0]  ;;  %v14085_v18 = vld [vmem:[%s22075_s1 + $0x1324] sm:$0xf]  ;;  %7049 = vmatpush.bf16.msra.mxu0 %v11110_v29  ;;  %v11094_v27 = vor.u32 %v13989_v19, %v11091_v20 }
 0x1a2   :  { %v11347_v6 = vld [vmem:[%s22075_s1 + $0x1230] sm:$0xf0]  ;;  %v13985_v12 = vld [vmem:[%s22075_s1 + $0x1004] sm:$0xf]  ;;  %7063 = vmatpush.bf16.msra.mxu1 %v11238_v54  ;;  %v11222_v28 = vor.u32 %v14021_v30, %v11219_v57 }
 0x1a3   :  { %v11475_v15 = vld [vmem:[%s22075_s1 + $0x1330] sm:$0xf0]  ;;  %7077 = vmatpush.bf16.msra.mxu2 %v11366_v62  ;;  %v11350_v42 = vor.u32 %v14053_v49, %v11347_v6  ;;  %v14017_v22 = vld [vmem:[%s22075_s1 + $0x1104] sm:$0xf] }
 0x1a4   :  { %v11075_v11 = vld [vmem:[%s22075_s1 + $0x1010] sm:$0xf0]  ;;  %v14049_v53 = vld [vmem:[%s22075_s1 + $0x1204] sm:$0xf]  ;;  %7091 = vmatpush.bf16.msra.mxu3 %v11494_v52  ;;  %v11478_v29 = vor.u32 %v14085_v18, %v11475_v15 }
 0x1a5   :  { %v11203_v13 = vld [vmem:[%s22075_s1 + $0x1110] sm:$0xf0]  ;;  %v14081_v62 = vld [vmem:[%s22075_s1 + $0x1304] sm:$0xf]  ;;  %7050 = vmatpush.bf16.msra.mxu0 %v11094_v27  ;;  %v11078_v57 = vor.u32 %v13985_v12, %v11075_v11 }
 0x1a6   :  { %v11331_v54 = vld [vmem:[%s22075_s1 + $0x1210] sm:$0xf0]  ;;  %v14141_v20 = vld [vmem:[%s22075_s1 + $0x14e4] sm:$0xf]  ;;  %7064 = vmatpush.bf16.msra.mxu1 %v11222_v28  ;;  %v11206_v15 = vor.u32 %v14017_v22, %v11203_v13 }
 0x1a7   :  { %v11459_v19 = vld [vmem:[%s22075_s1 + $0x1310] sm:$0xf0]  ;;  %v14173_v52 = vld [vmem:[%s22075_s1 + $0x15e4] sm:$0xf]  ;;  %7078 = vmatpush.bf16.msra.mxu2 %v11350_v42  ;;  %v11334_v23 = vor.u32 %v14049_v53, %v11331_v54 }
 0x1a8   :  { %v11699_v30 = vld [vmem:[%s22075_s1 + $0x14f0] sm:$0xf0]  ;;  %v14205_v6 = vld [vmem:[%s22075_s1 + $0x16e4] sm:$0xf]  ;;  %7092 = vmatpush.bf16.msra.mxu3 %v11478_v29  ;;  %v11462_v11 = vor.u32 %v14081_v62, %v11459_v19  ;;  %v17562_v62 = vpop.f32.mrf.mxu0 }
 0x1a9   :  { %v11827_v49 = vld [vmem:[%s22075_s1 + $0x15f0] sm:$0xf0]  ;;  %v14237_v27 = vld [vmem:[%s22075_s1 + $0x17e4] sm:$0xf]  ;;  %v11702_v7 = vor.u32 %v14141_v20, %v11699_v30  ;;  %7051 = vmatpush.bf16.msra.mxu0 %v11078_v57  ;;  %22129 = vst [vmem:[#allocation38_spill] sm:$0xff] %v17562_v62 }
 0x1aa   :  { %v11955_v18 = vld [vmem:[%s22075_s1 + $0x16f0] sm:$0xf0]  ;;  %v11830_v50 = vor.u32 %v14173_v52, %v11827_v49  ;;  %v14137_v28 = vld [vmem:[%s22075_s1 + $0x14c4] sm:$0xf]  ;;  %7065 = vmatpush.bf16.msra.mxu1 %v11206_v15  ;;  %v17570_v52 = vpop.f32.mrf.mxu1 }
 0x1ab   :  { %v12083_v12 = vld [vmem:[%s22075_s1 + $0x17f0] sm:$0xf0]  ;;  %v11958_v61 = vor.u32 %v14205_v6, %v11955_v18  ;;  %v14169_v22 = vld [vmem:[%s22075_s1 + $0x15c4] sm:$0xf]  ;;  %7079 = vmatpush.bf16.msra.mxu2 %v11334_v23  ;;  %22130 = vst [vmem:[#allocation39_spill] sm:$0xff] %v17570_v52 }
 0x1ac   :  { %v11683_v42 = vld [vmem:[%s22075_s1 + $0x14d0] sm:$0xf0]  ;;  %v12086_v13 = vor.u32 %v14237_v27, %v12083_v12  ;;  %v14201_v29 = vld [vmem:[%s22075_s1 + $0x16c4] sm:$0xf]  ;;  %7093 = vmatpush.bf16.msra.mxu3 %v11462_v11  ;;  %7052 = vmatmul.bf16.vlgmr.msra.gmra.mxu0 %v15794_v51 }
 0x1ad   :  { %v11811_v53 = vld [vmem:[%s22075_s1 + $0x15d0] sm:$0xf0]  ;;  %v14233_v19 = vld [vmem:[%s22075_s1 + $0x17c4] sm:$0xf]  ;;  %7100 = vmatpush.bf16.msrb.mxu0 %v11702_v7  ;;  %v11686_v30 = vor.u32 %v14137_v28, %v11683_v42  ;;  %7066 = vmatmul.bf16.vlgmr.msra.gmra.mxu1 %v15807_v56  ;;  %v17603_v28 = vld [vmem:[%s22077_s2] sm:$0xf] }
 0x1ae   :  { %v11939_v54 = vld [vmem:[%s22075_s1 + $0x16d0] sm:$0xf0]  ;;  %7114 = vmatpush.bf16.msrb.mxu1 %v11830_v50  ;;  %v11814_v57 = vor.u32 %v14169_v22, %v11811_v53  ;;  %v14133_v23 = vld [vmem:[%s22075_s1 + $0x14a4] sm:$0xf]  ;;  %7080 = vmatmul.bf16.vlgmr.msra.gmra.mxu2 %v15805_v55  ;;  %v22084_v42 = vperm.slane %v17603_v28, 1 }
 0x1af   :  { %v12067_v20 = vld [vmem:[%s22075_s1 + $0x17d0] sm:$0xf0]  ;;  %7128 = vmatpush.bf16.msrb.mxu2 %v11958_v61  ;;  %v11942_v49 = vor.u32 %v14201_v29, %v11939_v54  ;;  %v14165_v18 = vld [vmem:[%s22075_s1 + $0x15a4] sm:$0xf]  ;;  %7094 = vmatmul.bf16.vlgmr.msra.gmra.mxu3 %v15815_v60 }
 0x1b0   :  { %v11667_v6 = vld [vmem:[%s22075_s1 + $0x14b0] sm:$0xf0]  ;;  %7142 = vmatpush.bf16.msrb.mxu3 %v12086_v13  ;;  %v12070_v7 = vor.u32 %v14233_v19, %v12067_v20  ;;  %v14197_v50 = vld [vmem:[%s22075_s1 + $0x16a4] sm:$0xf]  ;;  %v17615_v19 = vpop.f32.mrf.mxu2 }
 0x1b1   :  { %v11795_v61 = vld [vmem:[%s22075_s1 + $0x15b0] sm:$0xf0]  ;;  %v14229_v27 = vld [vmem:[%s22075_s1 + $0x17a4] sm:$0xf]  ;;  %7101 = vmatpush.bf16.msrb.mxu0 %v11686_v30  ;;  %v11670_v11 = vor.u32 %v14133_v23, %v11667_v6  ;;  %22131 = vst [vmem:[#allocation40_spill] sm:$0xff] %v17615_v19 }
 0x1b2   :  { %v11923_v15 = vld [vmem:[%s22075_s1 + $0x16b0] sm:$0xf0]  ;;  %7115 = vmatpush.bf16.msrb.mxu1 %v11814_v57  ;;  %v11798_v22 = vor.u32 %v14165_v18, %v11795_v61  ;;  %v14129_v53 = vld [vmem:[%s22075_s1 + $0x1484] sm:$0xf]  ;;  %v6829_v18 = vpop.f32.mrf.mxu0 }
 0x1b3   :  { %v12051_v12 = vld [vmem:[%s22075_s1 + $0x17b0] sm:$0xf0]  ;;  %7129 = vmatpush.bf16.msrb.mxu2 %v11942_v49  ;;  %v11926_v13 = vor.u32 %v14197_v50, %v11923_v15  ;;  %v14161_v54 = vld [vmem:[%s22075_s1 + $0x1584] sm:$0xf]  ;;  %v6830_v50 = vadd.f32 %v6829_v18, %v22084_v42 }
 0x1b4   :  { %v11651_v29 = vld [vmem:[%s22075_s1 + $0x1490] sm:$0xf0]  ;;  %7143 = vmatpush.bf16.msrb.mxu3 %v12070_v7  ;;  %v12054_v20 = vor.u32 %v14229_v27, %v12051_v12  ;;  %v14193_v57 = vld [vmem:[%s22075_s1 + $0x1684] sm:$0xf]  ;;  %v17632_v7 = vpop.f32.mrf.mxu3 }
 0x1b5   :  { %v11779_v30 = vld [vmem:[%s22075_s1 + $0x1590] sm:$0xf0]  ;;  %v14225_v23 = vld [vmem:[%s22075_s1 + $0x1784] sm:$0xf]  ;;  %22132 = vst [vmem:[#allocation41_spill] sm:$0xff] %v17632_v7  ;;  %7102 = vmatpush.bf16.msrb.mxu0 %v11670_v11  ;;  %v11654_v61 = vor.u32 %v14129_v53, %v11651_v29  ;;  %v6843_v53 = vpop.f32.mrf.mxu1 }
 0x1b6   :  { %v11907_v49 = vld [vmem:[%s22075_s1 + $0x1690] sm:$0xf0]  ;;  %7116 = vmatpush.bf16.msrb.mxu1 %v11798_v22  ;;  %v11782_v15 = vor.u32 %v14161_v54, %v11779_v30  ;;  %v14125_v12 = vld [vmem:[%s22075_s1 + $0x1464] sm:$0xf]  ;;  %v6844_v30 = vadd.f32 %v6843_v53, %v6830_v50 }
 0x1b7   :  { %v12035_v6 = vld [vmem:[%s22075_s1 + $0x1790] sm:$0xf0]  ;;  %7130 = vmatpush.bf16.msrb.mxu2 %v11926_v13  ;;  %v11910_v27 = vor.u32 %v14193_v57, %v11907_v49  ;;  %v14157_v11 = vld [vmem:[%s22075_s1 + $0x1564] sm:$0xf] }
 0x1b8   :  { %v11635_v19 = vld [vmem:[%s22075_s1 + $0x1470] sm:$0xf0]  ;;  %7144 = vmatpush.bf16.msrb.mxu3 %v12054_v20  ;;  %v12038_v29 = vor.u32 %v14225_v23, %v12035_v6  ;;  %v14189_v13 = vld [vmem:[%s22075_s1 + $0x1664] sm:$0xf] }
 0x1b9   :  { %v11763_v22 = vld [vmem:[%s22075_s1 + $0x1570] sm:$0xf0]  ;;  %v14221_v57 = vld [vmem:[%s22075_s1 + $0x1764] sm:$0xf]  ;;  %7103 = vmatpush.bf16.msrb.mxu0 %v11654_v61  ;;  %v11638_v49 = vor.u32 %v14125_v12, %v11635_v19 }
 0x1ba   :  { %v11891_v54 = vld [vmem:[%s22075_s1 + $0x1670] sm:$0xf0]  ;;  %7117 = vmatpush.bf16.msrb.mxu1 %v11782_v15  ;;  %v11766_v23 = vor.u32 %v14157_v11, %v11763_v22  ;;  %v14121_v18 = vld [vmem:[%s22075_s1 + $0x1444] sm:$0xf]  ;;  %v17758_v0 = vpop.f32.mrf.mxu0 }
 0x1bb   :  { %v12019_v20 = vld [vmem:[%s22075_s1 + $0x1770] sm:$0xf0]  ;;  %7131 = vmatpush.bf16.msrb.mxu2 %v11910_v27  ;;  %v11894_v6 = vor.u32 %v14189_v13, %v11891_v54  ;;  %v14153_v53 = vld [vmem:[%s22075_s1 + $0x1544] sm:$0xf]  ;;  %v6857_v27 = vpop.f32.mrf.mxu2 }
 0x1bc   :  { %v11619_v50 = vld [vmem:[%s22075_s1 + $0x1450] sm:$0xf0]  ;;  %7145 = vmatpush.bf16.msrb.mxu3 %v12038_v29  ;;  %v12022_v42 = vor.u32 %v14221_v57, %v12019_v20  ;;  %v14185_v61 = vld [vmem:[%s22075_s1 + $0x1644] sm:$0xf]  ;;  %v6858_v29 = vadd.f32 %v6857_v27, %v6844_v30  ;;  %v6871_v13 = vpop.f32.mrf.mxu3 }
 0x1bd   :  { %v11747_v19 = vld [vmem:[%s22075_s1 + $0x1550] sm:$0xf0]  ;;  %v14217_v12 = vld [vmem:[%s22075_s1 + $0x1744] sm:$0xf]  ;;  %7104 = vmatpush.bf16.msrb.mxu0 %v11638_v49  ;;  %v11622_v22 = vor.u32 %v14121_v18, %v11619_v50 }
 0x1be   :  { %v11875_v15 = vld [vmem:[%s22075_s1 + $0x1650] sm:$0xf0]  ;;  %7118 = vmatpush.bf16.msrb.mxu1 %v11766_v23  ;;  %v11750_v54 = vor.u32 %v14153_v53, %v11747_v19  ;;  %v14117_v20 = vld [vmem:[%s22075_s1 + $0x1424] sm:$0xf]  ;;  %v17693_v30 = vadd.f32 %v6871_v13, %v6858_v29 }
 0x1bf   :  { %v12003_v11 = vld [vmem:[%s22075_s1 + $0x1750] sm:$0xf0]  ;;  %7132 = vmatpush.bf16.msrb.mxu2 %v11894_v6  ;;  %v11878_v57 = vor.u32 %v14185_v61, %v11875_v15  ;;  %v14149_v52 = vld [vmem:[%s22075_s1 + $0x1524] sm:$0xf] }
 0x1c0   :  { %v11603_v7 = vld [vmem:[%s22075_s1 + $0x1430] sm:$0xf0]  ;;  %7146 = vmatpush.bf16.msrb.mxu3 %v12022_v42  ;;  %v12006_v49 = vor.u32 %v14217_v12, %v12003_v11  ;;  %v14181_v6 = vld [vmem:[%s22075_s1 + $0x1624] sm:$0xf] }
 0x1c1   :  { %v11731_v23 = vld [vmem:[%s22075_s1 + $0x1530] sm:$0xf0]  ;;  %v14213_v50 = vld [vmem:[%s22075_s1 + $0x1724] sm:$0xf]  ;;  %7105 = vmatpush.bf16.msrb.mxu0 %v11622_v22  ;;  %v11606_v53 = vor.u32 %v14117_v20, %v11603_v7 }
 0x1c2   :  { %v11859_v18 = vld [vmem:[%s22075_s1 + $0x1630] sm:$0xf0]  ;;  %v14113_v19 = vld [vmem:[%s22075_s1 + $0x1404] sm:$0xf]  ;;  %7119 = vmatpush.bf16.msrb.mxu1 %v11750_v54  ;;  %v11734_v15 = vor.u32 %v14149_v52, %v11731_v23 }
 0x1c3   :  { %v11987_v42 = vld [vmem:[%s22075_s1 + $0x1730] sm:$0xf0]  ;;  %7133 = vmatpush.bf16.msrb.mxu2 %v11878_v57  ;;  %v11862_v27 = vor.u32 %v14181_v6, %v11859_v18  ;;  %v14145_v12 = vld [vmem:[%s22075_s1 + $0x1504] sm:$0xf] }
 0x1c4   :  { %v11587_v61 = vld [vmem:[%s22075_s1 + $0x1410] sm:$0xf0]  ;;  %v14177_v11 = vld [vmem:[%s22075_s1 + $0x1604] sm:$0xf]  ;;  %7147 = vmatpush.bf16.msrb.mxu3 %v12006_v49  ;;  %v11990_v29 = vor.u32 %v14213_v50, %v11987_v42 }
 0x1c5   :  { %v11715_v7 = vld [vmem:[%s22075_s1 + $0x1510] sm:$0xf0]  ;;  %v14209_v52 = vld [vmem:[%s22075_s1 + $0x1704] sm:$0xf]  ;;  %7106 = vmatpush.bf16.msrb.mxu0 %v11606_v53  ;;  %v11590_v49 = vor.u32 %v14113_v19, %v11587_v61 }
 0x1c6   :  { %v11843_v22 = vld [vmem:[%s22075_s1 + $0x1610] sm:$0xf0]  ;;  %v14269_v54 = vld [vmem:[%s22075_s1 + $0x18e4] sm:$0xf]  ;;  %7120 = vmatpush.bf16.msrb.mxu1 %v11734_v15  ;;  %v11718_v50 = vor.u32 %v14145_v12, %v11715_v7 }
 0x1c7   :  { %v11971_v13 = vld [vmem:[%s22075_s1 + $0x1710] sm:$0xf0]  ;;  %v14301_v20 = vld [vmem:[%s22075_s1 + $0x19e4] sm:$0xf]  ;;  %7134 = vmatpush.bf16.msrb.mxu2 %v11862_v27  ;;  %v11846_v42 = vor.u32 %v14177_v11, %v11843_v22 }
 0x1c8   :  { %v12211_v57 = vld [vmem:[%s22075_s1 + $0x18f0] sm:$0xf0]  ;;  %v14333_v6 = vld [vmem:[%s22075_s1 + $0x1ae4] sm:$0xf]  ;;  %7148 = vmatpush.bf16.msrb.mxu3 %v11990_v29  ;;  %v11974_v61 = vor.u32 %v14209_v52, %v11971_v13 }
 0x1c9   :  { %v12339_v23 = vld [vmem:[%s22075_s1 + $0x19f0] sm:$0xf0]  ;;  %v14365_v53 = vld [vmem:[%s22075_s1 + $0x1be4] sm:$0xf]  ;;  %v12214_v62 = vor.u32 %v14269_v54, %v12211_v57  ;;  %7107 = vmatpush.bf16.msrb.mxu0 %v11590_v49  ;;  %v17784_v54 = vpop.f32.mrf.mxu1 }
 0x1ca   :  { %v12467_v18 = vld [vmem:[%s22075_s1 + $0x1af0] sm:$0xf0]  ;;  %v12342_v63 = vor.u32 %v14301_v20, %v12339_v23  ;;  %v14265_v15 = vld [vmem:[%s22075_s1 + $0x18c4] sm:$0xf]  ;;  %7121 = vmatpush.bf16.msrb.mxu1 %v11718_v50  ;;  %22133 = vst [vmem:[#allocation42_spill] sm:$0xff] %v17784_v54 }
 0x1cb   :  { %v12595_v19 = vld [vmem:[%s22075_s1 + $0x1bf0] sm:$0xf0]  ;;  %v12470_v8 = vor.u32 %v14333_v6, %v12467_v18  ;;  %v14297_v12 = vld [vmem:[%s22075_s1 + $0x19c4] sm:$0xf]  ;;  %7135 = vmatpush.bf16.msrb.mxu2 %v11846_v42 }
 0x1cc   :  { %v12195_v27 = vld [vmem:[%s22075_s1 + $0x18d0] sm:$0xf0]  ;;  %v12598_v7 = vor.u32 %v14365_v53, %v12595_v19  ;;  %v14329_v29 = vld [vmem:[%s22075_s1 + $0x1ac4] sm:$0xf]  ;;  %7149 = vmatpush.bf16.msrb.mxu3 %v11974_v61  ;;  %7108 = vmatmul.bf16.vlgmr.msrb.gmra.mxu0 %v16034_v26  ;;  %v17814_v61 = vpop.f32.mrf.mxu2 }
 0x1cd   :  { %v12323_v11 = vld [vmem:[%s22075_s1 + $0x19d0] sm:$0xf0]  ;;  %v14361_v52 = vld [vmem:[%s22075_s1 + $0x1bc4] sm:$0xf]  ;;  %7156 = vmatpush.bf16.msra.mxu0 %v12214_v62  ;;  %v12198_v57 = vor.u32 %v14265_v15, %v12195_v27  ;;  %7122 = vmatmul.bf16.vlgmr.msrb.gmra.mxu1 %v16047_v34  ;;  %22134 = vst [vmem:[#allocation43_spill] sm:$0xff] %v17814_v61 }
 0x1ce   :  { %v12451_v22 = vld [vmem:[%s22075_s1 + $0x1ad0] sm:$0xf0]  ;;  %7170 = vmatpush.bf16.msra.mxu1 %v12342_v63  ;;  %v12326_v20 = vor.u32 %v14297_v12, %v12323_v11  ;;  %v14261_v23 = vld [vmem:[%s22075_s1 + $0x18a4] sm:$0xf]  ;;  %7136 = vmatmul.bf16.vlgmr.msrb.gmra.mxu2 %v16045_v33 }
 0x1cf   :  { %v12579_v13 = vld [vmem:[%s22075_s1 + $0x1bd0] sm:$0xf0]  ;;  %7184 = vmatpush.bf16.msra.mxu2 %v12470_v8  ;;  %v12454_v49 = vor.u32 %v14329_v29, %v12451_v22  ;;  %v14293_v18 = vld [vmem:[%s22075_s1 + $0x19a4] sm:$0xf]  ;;  %7150 = vmatmul.bf16.vlgmr.msrb.gmra.mxu3 %v16057_v48  ;;  %v17825_v22 = vpop.f32.mrf.mxu3 }
 0x1d0   :  { %v12179_v6 = vld [vmem:[%s22075_s1 + $0x18b0] sm:$0xf0]  ;;  %7198 = vmatpush.bf16.msra.mxu3 %v12598_v7  ;;  %v12582_v62 = vor.u32 %v14361_v52, %v12579_v13  ;;  %v14325_v63 = vld [vmem:[%s22075_s1 + $0x1aa4] sm:$0xf]  ;;  %22135 = vst [vmem:[#allocation44_spill] sm:$0xff] %v17825_v22 }
 0x1d1   :  { %v12307_v8 = vld [vmem:[%s22075_s1 + $0x19b0] sm:$0xf0]  ;;  %v14357_v42 = vld [vmem:[%s22075_s1 + $0x1ba4] sm:$0xf]  ;;  %7157 = vmatpush.bf16.msra.mxu0 %v12198_v57  ;;  %v12182_v19 = vor.u32 %v14261_v23, %v12179_v6 }
 0x1d2   :  { %v12435_v50 = vld [vmem:[%s22075_s1 + $0x1ab0] sm:$0xf0]  ;;  %7171 = vmatpush.bf16.msra.mxu1 %v12326_v20  ;;  %v12310_v15 = vor.u32 %v14293_v18, %v12307_v8  ;;  %v14257_v12 = vld [vmem:[%s22075_s1 + $0x1884] sm:$0xf]  ;;  %v6885_v20 = vpop.f32.mrf.mxu0 }
 0x1d3   :  { %v12563_v53 = vld [vmem:[%s22075_s1 + $0x1bb0] sm:$0xf0]  ;;  %7185 = vmatpush.bf16.msra.mxu2 %v12454_v49  ;;  %v12438_v27 = vor.u32 %v14325_v63, %v12435_v50  ;;  %v14289_v11 = vld [vmem:[%s22075_s1 + $0x1984] sm:$0xf]  ;;  %v6886_v6 = vadd.f32 %v6885_v20, %v17693_v30  ;;  %v6899_v63 = vpop.f32.mrf.mxu1 }
 0x1d4   :  { %v12163_v7 = vld [vmem:[%s22075_s1 + $0x1890] sm:$0xf0]  ;;  %7199 = vmatpush.bf16.msra.mxu3 %v12582_v62  ;;  %v12566_v29 = vor.u32 %v14357_v42, %v12563_v53  ;;  %v14321_v13 = vld [vmem:[%s22075_s1 + $0x1a84] sm:$0xf] }
 0x1d5   :  { %v12291_v52 = vld [vmem:[%s22075_s1 + $0x1990] sm:$0xf0]  ;;  %v14353_v49 = vld [vmem:[%s22075_s1 + $0x1b84] sm:$0xf]  ;;  %7158 = vmatpush.bf16.msra.mxu0 %v12182_v19  ;;  %v12166_v18 = vor.u32 %v14257_v12, %v12163_v7  ;;  %v6900_v19 = vadd.f32 %v6899_v63, %v6886_v6  ;;  %v6913_v6 = vpop.f32.mrf.mxu2 }
 0x1d6   :  { %v12419_v57 = vld [vmem:[%s22075_s1 + $0x1a90] sm:$0xf0]  ;;  %7172 = vmatpush.bf16.msra.mxu1 %v12310_v15  ;;  %v12294_v62 = vor.u32 %v14289_v11, %v12291_v52  ;;  %v14253_v50 = vld [vmem:[%s22075_s1 + $0x1864] sm:$0xf] }
 0x1d7   :  { %v12547_v23 = vld [vmem:[%s22075_s1 + $0x1b90] sm:$0xf0]  ;;  %7186 = vmatpush.bf16.msra.mxu2 %v12438_v27  ;;  %v12422_v8 = vor.u32 %v14321_v13, %v12419_v57  ;;  %v14285_v53 = vld [vmem:[%s22075_s1 + $0x1964] sm:$0xf]  ;;  %v6914_v63 = vadd.f32 %v6913_v6, %v6900_v19 }
 0x1d8   :  { %v12147_v42 = vld [vmem:[%s22075_s1 + $0x1870] sm:$0xf0]  ;;  %7200 = vmatpush.bf16.msra.mxu3 %v12566_v29  ;;  %v12550_v30 = vor.u32 %v14353_v49, %v12547_v23  ;;  %v14317_v27 = vld [vmem:[%s22075_s1 + $0x1a64] sm:$0xf] }
 0x1d9   :  { %v12275_v15 = vld [vmem:[%s22075_s1 + $0x1970] sm:$0xf0]  ;;  %v14349_v7 = vld [vmem:[%s22075_s1 + $0x1b64] sm:$0xf]  ;;  %7159 = vmatpush.bf16.msra.mxu0 %v12166_v18  ;;  %v12150_v29 = vor.u32 %v14253_v50, %v12147_v42 }
 0x1da   :  { %v12403_v12 = vld [vmem:[%s22075_s1 + $0x1a70] sm:$0xf0]  ;;  %7173 = vmatpush.bf16.msra.mxu1 %v12294_v62  ;;  %v12278_v52 = vor.u32 %v14285_v53, %v12275_v15  ;;  %v14249_v57 = vld [vmem:[%s22075_s1 + $0x1844] sm:$0xf]  ;;  %v6927_v53 = vpop.f32.mrf.mxu3 }
 0x1db   :  { %v12531_v11 = vld [vmem:[%s22075_s1 + $0x1b70] sm:$0xf0]  ;;  %7187 = vmatpush.bf16.msra.mxu2 %v12422_v8  ;;  %v12406_v13 = vor.u32 %v14317_v27, %v12403_v12  ;;  %v14281_v49 = vld [vmem:[%s22075_s1 + $0x1944] sm:$0xf]  ;;  %v17891_v15 = vadd.f32 %v6927_v53, %v6914_v63 }
 0x1dc   :  { %v12131_v20 = vld [vmem:[%s22075_s1 + $0x1850] sm:$0xf0]  ;;  %7201 = vmatpush.bf16.msra.mxu3 %v12550_v30  ;;  %v12534_v23 = vor.u32 %v14349_v7, %v12531_v11  ;;  %v14313_v62 = vld [vmem:[%s22075_s1 + $0x1a44] sm:$0xf] }
 0x1dd   :  { %v12259_v18 = vld [vmem:[%s22075_s1 + $0x1950] sm:$0xf0]  ;;  %v14345_v50 = vld [vmem:[%s22075_s1 + $0x1b44] sm:$0xf]  ;;  %7160 = vmatpush.bf16.msra.mxu0 %v12150_v29  ;;  %v12134_v30 = vor.u32 %v14249_v57, %v12131_v20 }
 0x1de   :  { %v12387_v8 = vld [vmem:[%s22075_s1 + $0x1a50] sm:$0xf0]  ;;  %7174 = vmatpush.bf16.msra.mxu1 %v12278_v52  ;;  %v12262_v27 = vor.u32 %v14281_v49, %v12259_v18  ;;  %v14245_v19 = vld [vmem:[%s22075_s1 + $0x1824] sm:$0xf] }
 0x1df   :  { %v12515_v42 = vld [vmem:[%s22075_s1 + $0x1b50] sm:$0xf0]  ;;  %7188 = vmatpush.bf16.msra.mxu2 %v12406_v13  ;;  %v12390_v12 = vor.u32 %v14313_v62, %v12387_v8  ;;  %v14277_v11 = vld [vmem:[%s22075_s1 + $0x1924] sm:$0xf] }
 0x1e0   :  { %v12115_v7 = vld [vmem:[%s22075_s1 + $0x1830] sm:$0xf0]  ;;  %7202 = vmatpush.bf16.msra.mxu3 %v12534_v23  ;;  %v12518_v29 = vor.u32 %v14345_v50, %v12515_v42  ;;  %v14309_v13 = vld [vmem:[%s22075_s1 + $0x1a24] sm:$0xf] }
 0x1e1   :  { %v12243_v52 = vld [vmem:[%s22075_s1 + $0x1930] sm:$0xf0]  ;;  %v14341_v20 = vld [vmem:[%s22075_s1 + $0x1b24] sm:$0xf]  ;;  %7161 = vmatpush.bf16.msra.mxu0 %v12134_v30  ;;  %v12118_v23 = vor.u32 %v14245_v19, %v12115_v7 }
 0x1e2   :  { %v12371_v57 = vld [vmem:[%s22075_s1 + $0x1a30] sm:$0xf0]  ;;  %v14241_v6 = vld [vmem:[%s22075_s1 + $0x1804] sm:$0xf]  ;;  %7175 = vmatpush.bf16.msra.mxu1 %v12262_v27  ;;  %v12246_v62 = vor.u32 %v14277_v11, %v12243_v52 }
 0x1e3   :  { %v12499_v49 = vld [vmem:[%s22075_s1 + $0x1b30] sm:$0xf0]  ;;  %7189 = vmatpush.bf16.msra.mxu2 %v12390_v12  ;;  %v12374_v8 = vor.u32 %v14309_v13, %v12371_v57  ;;  %v14273_v63 = vld [vmem:[%s22075_s1 + $0x1904] sm:$0xf] }
 0x1e4   :  { %v12099_v18 = vld [vmem:[%s22075_s1 + $0x1810] sm:$0xf0]  ;;  %v14305_v42 = vld [vmem:[%s22075_s1 + $0x1a04] sm:$0xf]  ;;  %7203 = vmatpush.bf16.msra.mxu3 %v12518_v29  ;;  %v12502_v53 = vor.u32 %v14341_v20, %v12499_v49 }
 0x1e5   :  { %v12227_v50 = vld [vmem:[%s22075_s1 + $0x1910] sm:$0xf0]  ;;  %v14337_v27 = vld [vmem:[%s22075_s1 + $0x1b04] sm:$0xf]  ;;  %7162 = vmatpush.bf16.msra.mxu0 %v12118_v23  ;;  %v12102_v29 = vor.u32 %v14241_v6, %v12099_v18 }
 0x1e6   :  { %v12355_v30 = vld [vmem:[%s22075_s1 + $0x1a10] sm:$0xf0]  ;;  %v14397_v19 = vld [vmem:[%s22075_s1 + $0x1ce4] sm:$0xf]  ;;  %7176 = vmatpush.bf16.msra.mxu1 %v12246_v62  ;;  %v12230_v20 = vor.u32 %v14273_v63, %v12227_v50 }
 0x1e7   :  { %v12483_v12 = vld [vmem:[%s22075_s1 + $0x1b10] sm:$0xf0]  ;;  %v14429_v11 = vld [vmem:[%s22075_s1 + $0x1de4] sm:$0xf]  ;;  %7190 = vmatpush.bf16.msra.mxu2 %v12374_v8  ;;  %v12358_v49 = vor.u32 %v14305_v42, %v12355_v30 }
 0x1e8   :  { %v12723_v7 = vld [vmem:[%s22075_s1 + $0x1cf0] sm:$0xf0]  ;;  %v14461_v13 = vld [vmem:[%s22075_s1 + $0x1ee4] sm:$0xf]  ;;  %7204 = vmatpush.bf16.msra.mxu3 %v12502_v53  ;;  %v12486_v18 = vor.u32 %v14337_v27, %v12483_v12  ;;  %v17983_v27 = vpop.f32.mrf.mxu0 }
 0x1e9   :  { %v12851_v52 = vld [vmem:[%s22075_s1 + $0x1df0] sm:$0xf0]  ;;  %v14493_v23 = vld [vmem:[%s22075_s1 + $0x1fe4] sm:$0xf]  ;;  %v12726_v22 = vor.u32 %v14397_v19, %v12723_v7  ;;  %7163 = vmatpush.bf16.msra.mxu0 %v12102_v29  ;;  %22136 = vst [vmem:[#allocation45_spill] sm:$0xff] %v17983_v27  ;;  %v17991_v7 = vpop.f32.mrf.mxu1 }
 0x1ea   :  { %v12979_v57 = vld [vmem:[%s22075_s1 + $0x1ef0] sm:$0xf0]  ;;  %v12854_v14 = vor.u32 %v14429_v11, %v12851_v52  ;;  %v14393_v62 = vld [vmem:[%s22075_s1 + $0x1cc4] sm:$0xf]  ;;  %7177 = vmatpush.bf16.msra.mxu1 %v12230_v20  ;;  %22137 = vst [vmem:[#allocation46_spill] sm:$0xff] %v17991_v7 }
 0x1eb   :  { %v13107_v6 = vld [vmem:[%s22075_s1 + $0x1ff0] sm:$0xf0]  ;;  %v12982_v61 = vor.u32 %v14461_v13, %v12979_v57  ;;  %v14425_v63 = vld [vmem:[%s22075_s1 + $0x1dc4] sm:$0xf]  ;;  %7191 = vmatpush.bf16.msra.mxu2 %v12358_v49 }
 0x1ec   :  { %v12707_v8 = vld [vmem:[%s22075_s1 + $0x1cd0] sm:$0xf0]  ;;  %v13110_v50 = vor.u32 %v14493_v23, %v13107_v6  ;;  %v14457_v53 = vld [vmem:[%s22075_s1 + $0x1ec4] sm:$0xf]  ;;  %7205 = vmatpush.bf16.msra.mxu3 %v12486_v18  ;;  %7164 = vmatmul.bf16.vlgmr.msra.gmra.mxu0 %v16271_v59 }
 0x1ed   :  { %v12835_v42 = vld [vmem:[%s22075_s1 + $0x1dd0] sm:$0xf0]  ;;  %v14489_v12 = vld [vmem:[%s22075_s1 + $0x1fc4] sm:$0xf]  ;;  %7212 = vmatpush.bf16.msrb.mxu0 %v12726_v22  ;;  %v12710_v11 = vor.u32 %v14393_v62, %v12707_v8  ;;  %7178 = vmatmul.bf16.vlgmr.msra.gmra.mxu1 %v16286_v3 }
 0x1ee   :  { %v12963_v30 = vld [vmem:[%s22075_s1 + $0x1ed0] sm:$0xf0]  ;;  %7226 = vmatpush.bf16.msrb.mxu1 %v12854_v14  ;;  %v12838_v29 = vor.u32 %v14425_v63, %v12835_v42  ;;  %v14389_v13 = vld [vmem:[%s22075_s1 + $0x1ca4] sm:$0xf]  ;;  %7192 = vmatmul.bf16.vlgmr.msra.gmra.mxu2 %v16284_v2 }
 0x1ef   :  { %v13091_v19 = vld [vmem:[%s22075_s1 + $0x1fd0] sm:$0xf0]  ;;  %7240 = vmatpush.bf16.msrb.mxu2 %v12982_v61  ;;  %v12966_v52 = vor.u32 %v14457_v53, %v12963_v30  ;;  %v14421_v20 = vld [vmem:[%s22075_s1 + $0x1da4] sm:$0xf]  ;;  %7206 = vmatmul.bf16.vlgmr.msra.gmra.mxu3 %v16296_v9  ;;  %v18030_v53 = vpop.f32.mrf.mxu2 }
 0x1f0   :  { %v12691_v57 = vld [vmem:[%s22075_s1 + $0x1cb0] sm:$0xf0]  ;;  %7254 = vmatpush.bf16.msrb.mxu3 %v13110_v50  ;;  %v13094_v22 = vor.u32 %v14489_v12, %v13091_v19  ;;  %v14453_v61 = vld [vmem:[%s22075_s1 + $0x1ea4] sm:$0xf]  ;;  %22138 = vst [vmem:[#allocation47_spill] sm:$0xff] %v18030_v53 }
 0x1f1   :  { %v12819_v14 = vld [vmem:[%s22075_s1 + $0x1db0] sm:$0xf0]  ;;  %v14485_v23 = vld [vmem:[%s22075_s1 + $0x1fa4] sm:$0xf]  ;;  %7213 = vmatpush.bf16.msrb.mxu0 %v12710_v11  ;;  %v12694_v18 = vor.u32 %v14389_v13, %v12691_v57 }
 0x1f2   :  { %v12947_v49 = vld [vmem:[%s22075_s1 + $0x1eb0] sm:$0xf0]  ;;  %7227 = vmatpush.bf16.msrb.mxu1 %v12838_v29  ;;  %v12822_v62 = vor.u32 %v14421_v20, %v12819_v14  ;;  %v14385_v63 = vld [vmem:[%s22075_s1 + $0x1c84] sm:$0xf]  ;;  %v18041_v29 = vpop.f32.mrf.mxu3  ;;  %v6955_v14 = vpop.f32.mrf.mxu1 }
 0x1f3   :  { %v13075_v6 = vld [vmem:[%s22075_s1 + $0x1fb0] sm:$0xf0]  ;;  %7241 = vmatpush.bf16.msrb.mxu2 %v12966_v52  ;;  %v12950_v8 = vor.u32 %v14453_v61, %v12947_v49  ;;  %v14417_v42 = vld [vmem:[%s22075_s1 + $0x1d84] sm:$0xf]  ;;  %22139 = vst [vmem:[#allocation48_spill] sm:$0xff] %v18041_v29  ;;  %v6941_v52 = vpop.f32.mrf.mxu0 }
 0x1f4   :  { %v12675_v50 = vld [vmem:[%s22075_s1 + $0x1c90] sm:$0xf0]  ;;  %7255 = vmatpush.bf16.msrb.mxu3 %v13094_v22  ;;  %v13078_v30 = vor.u32 %v14485_v23, %v13075_v6  ;;  %v14449_v19 = vld [vmem:[%s22075_s1 + $0x1e84] sm:$0xf]  ;;  %v6942_v20 = vadd.f32 %v6941_v52, %v17891_v15 }
 0x1f5   :  { %v12803_v12 = vld [vmem:[%s22075_s1 + $0x1d90] sm:$0xf0]  ;;  %v14481_v13 = vld [vmem:[%s22075_s1 + $0x1f84] sm:$0xf]  ;;  %7214 = vmatpush.bf16.msrb.mxu0 %v12694_v18  ;;  %v12678_v22 = vor.u32 %v14385_v63, %v12675_v50 }
 0x1f6   :  { %v12931_v11 = vld [vmem:[%s22075_s1 + $0x1e90] sm:$0xf0]  ;;  %7228 = vmatpush.bf16.msrb.mxu1 %v12822_v62  ;;  %v12806_v61 = vor.u32 %v14417_v42, %v12803_v12  ;;  %v14381_v23 = vld [vmem:[%s22075_s1 + $0x1c64] sm:$0xf]  ;;  %v6956_v63 = vadd.f32 %v6955_v14, %v6942_v20 }
 0x1f7   :  { %v13059_v57 = vld [vmem:[%s22075_s1 + $0x1f90] sm:$0xf0]  ;;  %7242 = vmatpush.bf16.msrb.mxu2 %v12950_v8  ;;  %v12934_v49 = vor.u32 %v14449_v19, %v12931_v11  ;;  %v14413_v18 = vld [vmem:[%s22075_s1 + $0x1d64] sm:$0xf] }
 0x1f8   :  { %v12659_v6 = vld [vmem:[%s22075_s1 + $0x1c70] sm:$0xf0]  ;;  %7256 = vmatpush.bf16.msrb.mxu3 %v13078_v30  ;;  %v13062_v15 = vor.u32 %v14481_v13, %v13059_v57  ;;  %v14445_v8 = vld [vmem:[%s22075_s1 + $0x1e64] sm:$0xf] }
 0x1f9   :  { %v12787_v62 = vld [vmem:[%s22075_s1 + $0x1d70] sm:$0xf0]  ;;  %v14477_v42 = vld [vmem:[%s22075_s1 + $0x1f64] sm:$0xf]  ;;  %7215 = vmatpush.bf16.msrb.mxu0 %v12678_v22  ;;  %v12662_v12 = vor.u32 %v14381_v23, %v12659_v6  ;;  %v6969_v22 = vpop.f32.mrf.mxu2 }
 0x1fa   :  { %v12915_v50 = vld [vmem:[%s22075_s1 + $0x1e70] sm:$0xf0]  ;;  %7229 = vmatpush.bf16.msrb.mxu1 %v12806_v61  ;;  %v12790_v19 = vor.u32 %v14413_v18, %v12787_v62  ;;  %v14377_v52 = vld [vmem:[%s22075_s1 + $0x1c44] sm:$0xf]  ;;  %v6970_v23 = vadd.f32 %v6969_v22, %v6956_v63  ;;  %v6983_v6 = vpop.f32.mrf.mxu3 }
 0x1fb   :  { %v13043_v30 = vld [vmem:[%s22075_s1 + $0x1f70] sm:$0xf0]  ;;  %7243 = vmatpush.bf16.msrb.mxu2 %v12934_v49  ;;  %v12918_v11 = vor.u32 %v14445_v8, %v12915_v50  ;;  %v14409_v57 = vld [vmem:[%s22075_s1 + $0x1d44] sm:$0xf] }
 0x1fc   :  { %v12643_v13 = vld [vmem:[%s22075_s1 + $0x1c50] sm:$0xf0]  ;;  %7257 = vmatpush.bf16.msrb.mxu3 %v13062_v15  ;;  %v13046_v20 = vor.u32 %v14477_v42, %v13043_v30  ;;  %v14441_v61 = vld [vmem:[%s22075_s1 + $0x1e44] sm:$0xf]  ;;  %v18098_v8 = vadd.f32 %v6983_v6, %v6970_v23 }
 0x1fd   :  { %v12771_v14 = vld [vmem:[%s22075_s1 + $0x1d50] sm:$0xf0]  ;;  %v14473_v18 = vld [vmem:[%s22075_s1 + $0x1f44] sm:$0xf]  ;;  %7216 = vmatpush.bf16.msrb.mxu0 %v12662_v12  ;;  %v12646_v62 = vor.u32 %v14377_v52, %v12643_v13 }
 0x1fe   :  { %v12899_v49 = vld [vmem:[%s22075_s1 + $0x1e50] sm:$0xf0]  ;;  %7230 = vmatpush.bf16.msrb.mxu1 %v12790_v19  ;;  %v12774_v50 = vor.u32 %v14409_v57, %v12771_v14  ;;  %v14373_v63 = vld [vmem:[%s22075_s1 + $0x1c24] sm:$0xf] }
 0x1ff   :  { %v13027_v15 = vld [vmem:[%s22075_s1 + $0x1f50] sm:$0xf0]  ;;  %7244 = vmatpush.bf16.msrb.mxu2 %v12918_v11  ;;  %v12902_v42 = vor.u32 %v14441_v61, %v12899_v49  ;;  %v14405_v22 = vld [vmem:[%s22075_s1 + $0x1d24] sm:$0xf] }
 0x200   :  { %v12627_v30 = vld [vmem:[%s22075_s1 + $0x1c30] sm:$0xf0]  ;;  %7258 = vmatpush.bf16.msrb.mxu3 %v13046_v20  ;;  %v13030_v12 = vor.u32 %v14473_v18, %v13027_v15  ;;  %v14437_v11 = vld [vmem:[%s22075_s1 + $0x1e24] sm:$0xf] }
 0x201   :  { %v12755_v19 = vld [vmem:[%s22075_s1 + $0x1d30] sm:$0xf0]  ;;  %v14469_v13 = vld [vmem:[%s22075_s1 + $0x1f24] sm:$0xf]  ;;  %7217 = vmatpush.bf16.msrb.mxu0 %v12646_v62  ;;  %v12630_v20 = vor.u32 %v14373_v63, %v12627_v30  ;;  %v9145_v30 = vld [vmem:[%s22075_s1 + $0xe8] sm:$0xf] }
 0x202   :  { %v12883_v52 = vld [vmem:[%s22075_s1 + $0x1e30] sm:$0xf0]  ;;  %v14369_v14 = vld [vmem:[%s22075_s1 + $0x1c04] sm:$0xf]  ;;  %7231 = vmatpush.bf16.msrb.mxu1 %v12774_v50  ;;  %v12758_v49 = vor.u32 %v14405_v22, %v12755_v19  ;;  %v13504_v22 = vld [vmem:[%s22075_s1 + $0xf4] sm:$0xf0] }
 0x203   :  { %v13011_v57 = vld [vmem:[%s22075_s1 + $0x1f30] sm:$0xf0]  ;;  %7245 = vmatpush.bf16.msrb.mxu2 %v12902_v42  ;;  %v12886_v23 = vor.u32 %v14437_v11, %v12883_v52  ;;  %v14401_v6 = vld [vmem:[%s22075_s1 + $0x1d04] sm:$0xf]  ;;  %v13536_v11 = vld [vmem:[%s22075_s1 + $0x1f4] sm:$0xf0]  ;;  %v9146_v53 = vor.u32 %v13504_v22, %v9145_v30  ;;  %v18198_v22 = vpop.f32.mrf.mxu1 }
 0x204   :  { %v12611_v61 = vld [vmem:[%s22075_s1 + $0x1c10] sm:$0xf0]  ;;  %v14433_v15 = vld [vmem:[%s22075_s1 + $0x1e04] sm:$0xf]  ;;  %7259 = vmatpush.bf16.msrb.mxu3 %v13030_v12  ;;  %v13014_v62 = vor.u32 %v14469_v13, %v13011_v57  ;;  %v9273_v12 = vld [vmem:[%s22075_s1 + $0x1e8] sm:$0xf] }
 0x205   :  { %v12739_v18 = vld [vmem:[%s22075_s1 + $0x1d10] sm:$0xf0]  ;;  %v14465_v42 = vld [vmem:[%s22075_s1 + $0x1f04] sm:$0xf]  ;;  %7218 = vmatpush.bf16.msrb.mxu0 %v12630_v20  ;;  %v12614_v19 = vor.u32 %v14369_v14, %v12611_v61  ;;  %v9401_v52 = vld [vmem:[%s22075_s1 + $0x2e8] sm:$0xf]  ;;  %v9274_v7 = vor.u32 %v13536_v11, %v9273_v12 }
 0x206   :  { %v12867_v50 = vld [vmem:[%s22075_s1 + $0x1e10] sm:$0xf0]  ;;  %v13568_v13 = vld [vmem:[%s22075_s1 + $0x2f4] sm:$0xf0]  ;;  %7232 = vmatpush.bf16.msrb.mxu1 %v12758_v49  ;;  %v12742_v57 = vor.u32 %v14401_v6, %v12739_v18  ;;  %v9529_v20 = vld [vmem:[%s22075_s1 + $0x3e8] sm:$0xf] }
 0x207   :  { %v12995_v63 = vld [vmem:[%s22075_s1 + $0x1f10] sm:$0xf0]  ;;  %7246 = vmatpush.bf16.msrb.mxu2 %v12886_v23  ;;  %v12870_v29 = vor.u32 %v14433_v15, %v12867_v50  ;;  %v13600_v14 = vld [vmem:[%s22075_s1 + $0x3f4] sm:$0xf0]  ;;  %v9402_v27 = vor.u32 %v13568_v13, %v9401_v52  ;;  %v9129_v49 = vld [vmem:[%s22075_s1 + $0xc8] sm:$0xf] }
 0x208   :  { %7260 = vmatpush.bf16.msrb.mxu3 %v13014_v62  ;;  %v12998_v61 = vor.u32 %v14465_v42, %v12995_v63  ;;  %v13500_v23 = vld [vmem:[%s22075_s1 + $0xd4] sm:$0xf0]  ;;  %v9257_v6 = vld [vmem:[%s22075_s1 + $0x1c8] sm:$0xf]  ;;  %v9530_v18 = vor.u32 %v13600_v14, %v9529_v20  ;;  %v18190_v42 = vpop.f32.mrf.mxu0  ;;  %22141 = vst [vmem:[#allocation50_spill] sm:$0xff] %v18198_v22 }
 0x209   :  { %7219 = vmatpush.bf16.msrb.mxu0 %v12614_v19  ;;  %v13532_v15 = vld [vmem:[%s22075_s1 + $0x1d4] sm:$0xf0]  ;;  %v9385_v62 = vld [vmem:[%s22075_s1 + $0x2c8] sm:$0xf]  ;;  %22140 = vst [vmem:[#allocation49_spill] sm:$0xff] %v18190_v42  ;;  %v9130_v12 = vor.u32 %v13500_v23, %v9129_v49 }
 0x20a   :  { %v13564_v50 = vld [vmem:[%s22075_s1 + $0x2d4] sm:$0xf0]  ;;  %7233 = vmatpush.bf16.msrb.mxu1 %v12742_v57  ;;  %v9513_v63 = vld [vmem:[%s22075_s1 + $0x3c8] sm:$0xf]  ;;  %v9258_v19 = vor.u32 %v13532_v15, %v9257_v6 }
 0x20b   :  { %7247 = vmatpush.bf16.msrb.mxu2 %v12870_v29  ;;  %v13596_v30 = vld [vmem:[%s22075_s1 + $0x3d4] sm:$0xf0]  ;;  %v9386_v11 = vor.u32 %v13564_v50, %v9385_v62  ;;  %v9113_v29 = vld [vmem:[%s22075_s1 + $0xa8] sm:$0xf]  ;;  %v18237_v62 = vpop.f32.mrf.mxu2 }
 0x20c   :  { %7261 = vmatpush.bf16.msrb.mxu3 %v12998_v61  ;;  %v13496_v52 = vld [vmem:[%s22075_s1 + $0xb4] sm:$0xf0]  ;;  %v9241_v13 = vld [vmem:[%s22075_s1 + $0x1a8] sm:$0xf]  ;;  %7220 = vmatmul.bf16.vlgmr.msrb.gmra.mxu0 %v16510_v16  ;;  %22142 = vst [vmem:[#allocation51_spill] sm:$0xff] %v18237_v62 }
 0x20d   :  { %7268 = vmatpush.bf16.msra.mxu0 %v9146_v53  ;;  %v9514_v53 = vor.u32 %v13596_v30, %v9513_v63  ;;  %v13560_v57 = vld [vmem:[%s22075_s1 + $0x2b4] sm:$0xf0]  ;;  %7234 = vmatmul.bf16.vlgmr.msrb.gmra.mxu1 %v16525_v25  ;;  %v9497_v20 = vld [vmem:[%s22075_s1 + $0x3a8] sm:$0xf]  ;;  %v9114_v61 = vor.u32 %v13496_v52, %v9113_v29 }
 0x20e   :  { %7282 = vmatpush.bf16.msra.mxu1 %v9274_v7  ;;  %v9369_v7 = vld [vmem:[%s22075_s1 + $0x2a8] sm:$0xf]  ;;  %7248 = vmatmul.bf16.vlgmr.msrb.gmra.mxu2 %v16523_v24  ;;  %v13592_v14 = vld [vmem:[%s22075_s1 + $0x3b4] sm:$0xf0] }
 0x20f   :  { %7296 = vmatpush.bf16.msra.mxu2 %v9402_v27  ;;  %v13528_v27 = vld [vmem:[%s22075_s1 + $0x1b4] sm:$0xf0]  ;;  %7262 = vmatmul.bf16.vlgmr.msrb.gmra.mxu3 %v16535_v37  ;;  %v9370_v23 = vor.u32 %v13560_v57, %v9369_v7  ;;  %v9097_v6 = vld [vmem:[%s22075_s1 + $0x88] sm:$0xf]  ;;  %v9498_v50 = vor.u32 %v13592_v14, %v9497_v20 }
 0x210   :  { %7310 = vmatpush.bf16.msra.mxu3 %v9530_v18  ;;  %v9242_v49 = vor.u32 %v13528_v27, %v9241_v13  ;;  %v13492_v18 = vld [vmem:[%s22075_s1 + $0x94] sm:$0xf0]  ;;  %v9225_v15 = vld [vmem:[%s22075_s1 + $0x188] sm:$0xf]  ;;  %v7011_v27 = vpop.f32.mrf.mxu1 }
 0x211   :  { %7269 = vmatpush.bf16.msra.mxu0 %v9130_v12  ;;  %v13524_v63 = vld [vmem:[%s22075_s1 + $0x194] sm:$0xf0]  ;;  %v9353_v30 = vld [vmem:[%s22075_s1 + $0x288] sm:$0xf] }
 0x212   :  { %7283 = vmatpush.bf16.msra.mxu1 %v9258_v19  ;;  %v13556_v12 = vld [vmem:[%s22075_s1 + $0x294] sm:$0xf0]  ;;  %v18248_v19 = vpop.f32.mrf.mxu3  ;;  %v9481_v29 = vld [vmem:[%s22075_s1 + $0x388] sm:$0xf]  ;;  %v9226_v7 = vor.u32 %v13524_v63, %v9225_v15 }
 0x213   :  { %7297 = vmatpush.bf16.msra.mxu2 %v9386_v11  ;;  %22143 = vst [vmem:[#allocation52_spill] sm:$0xff] %v18248_v19  ;;  %v6997_v11 = vpop.f32.mrf.mxu0  ;;  %v13588_v52 = vld [vmem:[%s22075_s1 + $0x394] sm:$0xf0]  ;;  %v9354_v57 = vor.u32 %v13556_v12, %v9353_v30  ;;  %v9081_v20 = vld [vmem:[%s22075_s1 + $0x68] sm:$0xf] }
 0x214   :  { %7311 = vmatpush.bf16.msra.mxu3 %v9514_v53  ;;  %v6998_v13 = vadd.f32 %v6997_v11, %v18098_v8  ;;  %v9098_v53 = vor.u32 %v13492_v18, %v9097_v6  ;;  %v13488_v14 = vld [vmem:[%s22075_s1 + $0x74] sm:$0xf0]  ;;  %v9482_v8 = vor.u32 %v13588_v52, %v9481_v29  ;;  %v9465_v15 = vld [vmem:[%s22075_s1 + $0x368] sm:$0xf] }
 0x215   :  { %7270 = vmatpush.bf16.msra.mxu0 %v9114_v61  ;;  %v9209_v61 = vld [vmem:[%s22075_s1 + $0x168] sm:$0xf]  ;;  %v13552_v18 = vld [vmem:[%s22075_s1 + $0x274] sm:$0xf0]  ;;  %v9082_v63 = vor.u32 %v13488_v14, %v9081_v20 }
 0x216   :  { %7284 = vmatpush.bf16.msra.mxu1 %v9242_v49  ;;  %v7012_v6 = vadd.f32 %v7011_v27, %v6998_v13  ;;  %v13520_v49 = vld [vmem:[%s22075_s1 + $0x174] sm:$0xf0]  ;;  %v9065_v11 = vld [vmem:[%s22075_s1 + $0x48] sm:$0xf] }
 0x217   :  { %7298 = vmatpush.bf16.msra.mxu2 %v9370_v23  ;;  %v9337_v23 = vld [vmem:[%s22075_s1 + $0x268] sm:$0xf]  ;;  %v9210_v30 = vor.u32 %v13520_v49, %v9209_v61  ;;  %v13484_v29 = vld [vmem:[%s22075_s1 + $0x54] sm:$0xf0] }
 0x218   :  { %7312 = vmatpush.bf16.msra.mxu3 %v9498_v50  ;;  %v13584_v50 = vld [vmem:[%s22075_s1 + $0x374] sm:$0xf0]  ;;  %v9338_v12 = vor.u32 %v13552_v18, %v9337_v23  ;;  %v9193_v52 = vld [vmem:[%s22075_s1 + $0x148] sm:$0xf]  ;;  %v9066_v49 = vor.u32 %v13484_v29, %v9065_v11 }
 0x219   :  { %7271 = vmatpush.bf16.msra.mxu0 %v9098_v53  ;;  %v9466_v13 = vor.u32 %v13584_v50, %v9465_v15  ;;  %v7025_v53 = vpop.f32.mrf.mxu2  ;;  %v13516_v27 = vld [vmem:[%s22075_s1 + $0x154] sm:$0xf0]  ;;  %v9449_v61 = vld [vmem:[%s22075_s1 + $0x348] sm:$0xf] }
 0x21a   :  { %7285 = vmatpush.bf16.msra.mxu1 %v9226_v7  ;;  %v9321_v7 = vld [vmem:[%s22075_s1 + $0x248] sm:$0xf]  ;;  %v7026_v20 = vadd.f32 %v7025_v53, %v7012_v6  ;;  %v7039_v14 = vpop.f32.mrf.mxu3  ;;  %v9194_v18 = vor.u32 %v13516_v27, %v9193_v52  ;;  %v13480_v50 = vld [vmem:[%s22075_s1 + $0x34] sm:$0xf0] }
 0x21b   :  { %7299 = vmatpush.bf16.msra.mxu2 %v9354_v57  ;;  %v13548_v57 = vld [vmem:[%s22075_s1 + $0x254] sm:$0xf0]  ;;  %v9049_v6 = vld [vmem:[%s22075_s1 + $0x28] sm:$0xf] }
 0x21c   :  { %7313 = vmatpush.bf16.msra.mxu3 %v9482_v8  ;;  %v13580_v8 = vld [vmem:[%s22075_s1 + $0x354] sm:$0xf0]  ;;  %v18305_v23 = vadd.f32 %v7039_v14, %v7026_v20  ;;  %v9322_v15 = vor.u32 %v13548_v57, %v9321_v7  ;;  %v9177_v53 = vld [vmem:[%s22075_s1 + $0x128] sm:$0xf] }
 0x21d   :  { %7272 = vmatpush.bf16.msra.mxu0 %v9082_v63  ;;  %v9450_v63 = vor.u32 %v13580_v8, %v9449_v61  ;;  %v13544_v11 = vld [vmem:[%s22075_s1 + $0x234] sm:$0xf0]  ;;  %v9433_v29 = vld [vmem:[%s22075_s1 + $0x328] sm:$0xf] }
 0x21e   :  { %7286 = vmatpush.bf16.msra.mxu1 %v9210_v30  ;;  %v13512_v30 = vld [vmem:[%s22075_s1 + $0x134] sm:$0xf0]  ;;  %v9033_v27 = vld [vmem:[%s22075_s1 + $0x8] sm:$0xf] }
 0x21f   :  { %7300 = vmatpush.bf16.msra.mxu2 %v9338_v12  ;;  %v9305_v12 = vld [vmem:[%s22075_s1 + $0x228] sm:$0xf]  ;;  %v13576_v52 = vld [vmem:[%s22075_s1 + $0x334] sm:$0xf0]  ;;  %v9178_v57 = vor.u32 %v13512_v30, %v9177_v53 }
 0x220   :  { %7314 = vmatpush.bf16.msra.mxu3 %v9466_v13  ;;  %v9050_v13 = vor.u32 %v13480_v50, %v9049_v6  ;;  %v13476_v7 = vld [vmem:[%s22075_s1 + $0x14] sm:$0xf0]  ;;  %v9306_v20 = vor.u32 %v13544_v11, %v9305_v12  ;;  %v9161_v14 = vld [vmem:[%s22075_s1 + $0x108] sm:$0xf] }
 0x221   :  { %7273 = vmatpush.bf16.msra.mxu0 %v9066_v49  ;;  %v13508_v61 = vld [vmem:[%s22075_s1 + $0x114] sm:$0xf0]  ;;  %v9289_v8 = vld [vmem:[%s22075_s1 + $0x208] sm:$0xf]  ;;  %v9434_v49 = vor.u32 %v13576_v52, %v9433_v29  ;;  %v9034_v30 = vor.u32 %v13476_v7, %v9033_v27 }
 0x222   :  { %7287 = vmatpush.bf16.msra.mxu1 %v9194_v18  ;;  %v13540_v18 = vld [vmem:[%s22075_s1 + $0x214] sm:$0xf0]  ;;  %v9657_v50 = vld [vmem:[%s22075_s1 + $0x4e8] sm:$0xf]  ;;  %v9162_v52 = vor.u32 %v13508_v61, %v9161_v14 }
 0x223   :  { %7301 = vmatpush.bf16.msra.mxu2 %v9322_v15  ;;  %v9417_v15 = vld [vmem:[%s22075_s1 + $0x308] sm:$0xf]  ;;  %v13572_v6 = vld [vmem:[%s22075_s1 + $0x314] sm:$0xf0]  ;;  %v9290_v19 = vor.u32 %v13540_v18, %v9289_v8 }
 0x224   :  { %7315 = vmatpush.bf16.msra.mxu3 %v9450_v63  ;;  %v13632_v53 = vld [vmem:[%s22075_s1 + $0x4f4] sm:$0xf0]  ;;  %v9785_v63 = vld [vmem:[%s22075_s1 + $0x5e8] sm:$0xf]  ;;  %v9418_v7 = vor.u32 %v13572_v6, %v9417_v15  ;;  %v18397_v15 = vpop.f32.mrf.mxu0 }
 0x225   :  { %7274 = vmatpush.bf16.msra.mxu0 %v9050_v13  ;;  %v13664_v12 = vld [vmem:[%s22075_s1 + $0x5f4] sm:$0xf0]  ;;  %v9913_v11 = vld [vmem:[%s22075_s1 + $0x6e8] sm:$0xf]  ;;  %v9658_v62 = vor.u32 %v13632_v53, %v9657_v50  ;;  %22144 = vst [vmem:[#allocation53_spill] sm:$0xff] %v18397_v15  ;;  %v18405_v53 = vpop.f32.mrf.mxu1 }
 0x226   :  { %v13696_v29 = vld [vmem:[%s22075_s1 + $0x6f4] sm:$0xf0]  ;;  %7288 = vmatpush.bf16.msra.mxu1 %v9178_v57  ;;  %v10041_v13 = vld [vmem:[%s22075_s1 + $0x7e8] sm:$0xf]  ;;  %v9786_v22 = vor.u32 %v13664_v12, %v9785_v63  ;;  %22145 = vst [vmem:[#allocation54_spill] sm:$0xff] %v18405_v53 }
 0x227   :  { %7302 = vmatpush.bf16.msra.mxu2 %v9306_v20  ;;  %v13728_v27 = vld [vmem:[%s22075_s1 + $0x7f4] sm:$0xf0]  ;;  %v9914_v42 = vor.u32 %v13696_v29, %v9913_v11  ;;  %v9641_v57 = vld [vmem:[%s22075_s1 + $0x4c8] sm:$0xf] }
 0x228   :  { %7316 = vmatpush.bf16.msra.mxu3 %v9434_v49  ;;  %v13628_v20 = vld [vmem:[%s22075_s1 + $0x4d4] sm:$0xf0]  ;;  %v9769_v14 = vld [vmem:[%s22075_s1 + $0x5c8] sm:$0xf]  ;;  %v10042_v61 = vor.u32 %v13728_v27, %v10041_v13 }
 0x229   :  { %7275 = vmatpush.bf16.msra.mxu0 %v9034_v30  ;;  %v13660_v8 = vld [vmem:[%s22075_s1 + $0x5d4] sm:$0xf0]  ;;  %v9897_v49 = vld [vmem:[%s22075_s1 + $0x6c8] sm:$0xf]  ;;  %v9642_v63 = vor.u32 %v13628_v20, %v9641_v57 }
 0x22a   :  { %v13692_v18 = vld [vmem:[%s22075_s1 + $0x6d4] sm:$0xf0]  ;;  %7289 = vmatpush.bf16.msra.mxu1 %v9162_v52  ;;  %v10025_v6 = vld [vmem:[%s22075_s1 + $0x7c8] sm:$0xf]  ;;  %v9770_v30 = vor.u32 %v13660_v8, %v9769_v14 }
 0x22b   :  { %7303 = vmatpush.bf16.msra.mxu2 %v9290_v19  ;;  %v13724_v50 = vld [vmem:[%s22075_s1 + $0x7d4] sm:$0xf0]  ;;  %v9898_v12 = vor.u32 %v13692_v18, %v9897_v49  ;;  %v9625_v19 = vld [vmem:[%s22075_s1 + $0x4a8] sm:$0xf]  ;;  %v18444_v49 = vpop.f32.mrf.mxu2 }
 0x22c   :  { %7317 = vmatpush.bf16.msra.mxu3 %v9418_v7  ;;  %v13624_v11 = vld [vmem:[%s22075_s1 + $0x4b4] sm:$0xf0]  ;;  %v9753_v29 = vld [vmem:[%s22075_s1 + $0x5a8] sm:$0xf]  ;;  %v10026_v52 = vor.u32 %v13724_v50, %v10025_v6  ;;  %7276 = vmatmul.bf16.vlgmr.msra.gmra.mxu0 %v14888_v58  ;;  %22146 = vst [vmem:[#allocation55_spill] sm:$0xff] %v18444_v49 }
 0x22d   :  { %7324 = vmatpush.bf16.msrb.mxu0 %v9658_v62  ;;  %v13688_v62 = vld [vmem:[%s22075_s1 + $0x6b4] sm:$0xf0]  ;;  %v10009_v13 = vld [vmem:[%s22075_s1 + $0x7a8] sm:$0xf]  ;;  %7290 = vmatmul.bf16.vlgmr.msra.gmra.mxu1 %v14924_v10  ;;  %v9626_v7 = vor.u32 %v13624_v11, %v9625_v19 }
 0x22e   :  { %7338 = vmatpush.bf16.msrb.mxu1 %v9786_v22  ;;  %v9881_v22 = vld [vmem:[%s22075_s1 + $0x6a8] sm:$0xf]  ;;  %v13720_v27 = vld [vmem:[%s22075_s1 + $0x7b4] sm:$0xf0]  ;;  %7304 = vmatmul.bf16.vlgmr.msra.gmra.mxu2 %v14902_v1 }
 0x22f   :  { %7352 = vmatpush.bf16.msrb.mxu2 %v9914_v42  ;;  %v13656_v42 = vld [vmem:[%s22075_s1 + $0x5b4] sm:$0xf0]  ;;  %7318 = vmatmul.bf16.vlgmr.msra.gmra.mxu3 %v14938_v17  ;;  %v9882_v20 = vor.u32 %v13688_v62, %v9881_v22  ;;  %v9609_v14 = vld [vmem:[%s22075_s1 + $0x488] sm:$0xf]  ;;  %v10010_v18 = vor.u32 %v13720_v27, %v10009_v13 }
 0x230   :  { %7366 = vmatpush.bf16.msrb.mxu3 %v10042_v61  ;;  %v9754_v57 = vor.u32 %v13656_v42, %v9753_v29  ;;  %v13620_v61 = vld [vmem:[%s22075_s1 + $0x494] sm:$0xf0]  ;;  %v9737_v8 = vld [vmem:[%s22075_s1 + $0x588] sm:$0xf]  ;;  %v7067_v42 = vpop.f32.mrf.mxu1 }
 0x231   :  { %7325 = vmatpush.bf16.msrb.mxu0 %v9642_v63  ;;  %v13652_v6 = vld [vmem:[%s22075_s1 + $0x594] sm:$0xf0]  ;;  %v9865_v50 = vld [vmem:[%s22075_s1 + $0x688] sm:$0xf] }
 0x232   :  { %7339 = vmatpush.bf16.msrb.mxu1 %v9770_v30  ;;  %v13684_v63 = vld [vmem:[%s22075_s1 + $0x694] sm:$0xf0]  ;;  %v18455_v30 = vpop.f32.mrf.mxu3  ;;  %v9993_v19 = vld [vmem:[%s22075_s1 + $0x788] sm:$0xf]  ;;  %v9738_v22 = vor.u32 %v13652_v6, %v9737_v8 }
 0x233   :  { %7353 = vmatpush.bf16.msrb.mxu2 %v9898_v12  ;;  %22147 = vst [vmem:[#allocation56_spill] sm:$0xff] %v18455_v30  ;;  %v7053_v12 = vpop.f32.mrf.mxu0  ;;  %v13716_v11 = vld [vmem:[%s22075_s1 + $0x794] sm:$0xf0]  ;;  %v9866_v62 = vor.u32 %v13684_v63, %v9865_v50  ;;  %v9593_v13 = vld [vmem:[%s22075_s1 + $0x468] sm:$0xf] }
 0x234   :  { %7367 = vmatpush.bf16.msrb.mxu3 %v10026_v52  ;;  %v7054_v29 = vadd.f32 %v7053_v12, %v18305_v23  ;;  %v9610_v52 = vor.u32 %v13620_v61, %v9609_v14  ;;  %v13616_v27 = vld [vmem:[%s22075_s1 + $0x474] sm:$0xf0]  ;;  %v9994_v23 = vor.u32 %v13716_v11, %v9993_v19  ;;  %v9977_v8 = vld [vmem:[%s22075_s1 + $0x768] sm:$0xf] }
 0x235   :  { %7326 = vmatpush.bf16.msrb.mxu0 %v9626_v7  ;;  %v9721_v7 = vld [vmem:[%s22075_s1 + $0x568] sm:$0xf]  ;;  %v13680_v61 = vld [vmem:[%s22075_s1 + $0x674] sm:$0xf0]  ;;  %v9594_v6 = vor.u32 %v13616_v27, %v9593_v13 }
 0x236   :  { %7340 = vmatpush.bf16.msrb.mxu1 %v9754_v57  ;;  %v7068_v14 = vadd.f32 %v7067_v42, %v7054_v29  ;;  %v13648_v57 = vld [vmem:[%s22075_s1 + $0x574] sm:$0xf0]  ;;  %v9577_v12 = vld [vmem:[%s22075_s1 + $0x448] sm:$0xf] }
 0x237   :  { %7354 = vmatpush.bf16.msrb.mxu2 %v9882_v20  ;;  %v9849_v20 = vld [vmem:[%s22075_s1 + $0x668] sm:$0xf]  ;;  %v9722_v50 = vor.u32 %v13648_v57, %v9721_v7  ;;  %v13612_v19 = vld [vmem:[%s22075_s1 + $0x454] sm:$0xf0] }
 0x238   :  { %7368 = vmatpush.bf16.msrb.mxu3 %v10010_v18  ;;  %v13712_v18 = vld [vmem:[%s22075_s1 + $0x774] sm:$0xf0]  ;;  %v9850_v63 = vor.u32 %v13680_v61, %v9849_v20  ;;  %v9705_v11 = vld [vmem:[%s22075_s1 + $0x548] sm:$0xf]  ;;  %v9578_v57 = vor.u32 %v13612_v19, %v9577_v12 }
 0x239   :  { %7327 = vmatpush.bf16.msrb.mxu0 %v9610_v52  ;;  %v9978_v29 = vor.u32 %v13712_v18, %v9977_v8  ;;  %v7081_v52 = vpop.f32.mrf.mxu2  ;;  %v13644_v42 = vld [vmem:[%s22075_s1 + $0x554] sm:$0xf0]  ;;  %v9961_v7 = vld [vmem:[%s22075_s1 + $0x748] sm:$0xf] }
 0x23a   :  { %7341 = vmatpush.bf16.msrb.mxu1 %v9738_v22  ;;  %v9833_v22 = vld [vmem:[%s22075_s1 + $0x648] sm:$0xf]  ;;  %v7082_v13 = vadd.f32 %v7081_v52, %v7068_v14  ;;  %v7095_v27 = vpop.f32.mrf.mxu3  ;;  %v9706_v61 = vor.u32 %v13644_v42, %v9705_v11  ;;  %v13608_v18 = vld [vmem:[%s22075_s1 + $0x434] sm:$0xf0] }
 0x23b   :  { %7355 = vmatpush.bf16.msrb.mxu2 %v9866_v62  ;;  %v13676_v62 = vld [vmem:[%s22075_s1 + $0x654] sm:$0xf0]  ;;  %v9561_v14 = vld [vmem:[%s22075_s1 + $0x428] sm:$0xf] }
 0x23c   :  { %7369 = vmatpush.bf16.msrb.mxu3 %v9994_v23  ;;  %v13708_v23 = vld [vmem:[%s22075_s1 + $0x754] sm:$0xf0]  ;;  %v18512_v20 = vadd.f32 %v7095_v27, %v7082_v13  ;;  %v9834_v8 = vor.u32 %v13676_v62, %v9833_v22  ;;  %v9689_v52 = vld [vmem:[%s22075_s1 + $0x528] sm:$0xf] }
 0x23d   :  { %7328 = vmatpush.bf16.msrb.mxu0 %v9594_v6  ;;  %v9962_v6 = vor.u32 %v13708_v23, %v9961_v7  ;;  %v13672_v12 = vld [vmem:[%s22075_s1 + $0x634] sm:$0xf0]  ;;  %v9945_v19 = vld [vmem:[%s22075_s1 + $0x728] sm:$0xf] }
 0x23e   :  { %7342 = vmatpush.bf16.msrb.mxu1 %v9722_v50  ;;  %v13640_v50 = vld [vmem:[%s22075_s1 + $0x534] sm:$0xf0]  ;;  %v9545_v42 = vld [vmem:[%s22075_s1 + $0x408] sm:$0xf] }
 0x23f   :  { %7356 = vmatpush.bf16.msrb.mxu2 %v9850_v63  ;;  %v9817_v63 = vld [vmem:[%s22075_s1 + $0x628] sm:$0xf]  ;;  %v13704_v11 = vld [vmem:[%s22075_s1 + $0x734] sm:$0xf0]  ;;  %v9690_v62 = vor.u32 %v13640_v50, %v9689_v52 }
 0x240   :  { %7370 = vmatpush.bf16.msrb.mxu3 %v9978_v29  ;;  %v9562_v29 = vor.u32 %v13608_v18, %v9561_v14  ;;  %v13604_v22 = vld [vmem:[%s22075_s1 + $0x414] sm:$0xf0]  ;;  %v9818_v13 = vor.u32 %v13672_v12, %v9817_v63  ;;  %v9673_v27 = vld [vmem:[%s22075_s1 + $0x508] sm:$0xf] }
 0x241   :  { %7329 = vmatpush.bf16.msrb.mxu0 %v9578_v57  ;;  %v13636_v7 = vld [vmem:[%s22075_s1 + $0x514] sm:$0xf0]  ;;  %v9801_v23 = vld [vmem:[%s22075_s1 + $0x608] sm:$0xf]  ;;  %v9946_v57 = vor.u32 %v13704_v11, %v9945_v19  ;;  %v9546_v50 = vor.u32 %v13604_v22, %v9545_v42 }
 0x242   :  { %7343 = vmatpush.bf16.msrb.mxu1 %v9706_v61  ;;  %v13668_v61 = vld [vmem:[%s22075_s1 + $0x614] sm:$0xf0]  ;;  %v10169_v18 = vld [vmem:[%s22075_s1 + $0x8e8] sm:$0xf]  ;;  %v9674_v11 = vor.u32 %v13636_v7, %v9673_v27 }
 0x243   :  { %7357 = vmatpush.bf16.msrb.mxu2 %v9834_v8  ;;  %v9929_v8 = vld [vmem:[%s22075_s1 + $0x708] sm:$0xf]  ;;  %v13700_v14 = vld [vmem:[%s22075_s1 + $0x714] sm:$0xf0]  ;;  %v9802_v30 = vor.u32 %v13668_v61, %v9801_v23 }
 0x244   :  { %7371 = vmatpush.bf16.msrb.mxu3 %v9962_v6  ;;  %v13760_v52 = vld [vmem:[%s22075_s1 + $0x8f4] sm:$0xf0]  ;;  %v10297_v6 = vld [vmem:[%s22075_s1 + $0x9e8] sm:$0xf]  ;;  %v9930_v22 = vor.u32 %v13700_v14, %v9929_v8  ;;  %v18604_v8 = vpop.f32.mrf.mxu0 }
 0x245   :  { %7330 = vmatpush.bf16.msrb.mxu0 %v9562_v29  ;;  %v13792_v63 = vld [vmem:[%s22075_s1 + $0x9f4] sm:$0xf0]  ;;  %v10425_v12 = vld [vmem:[%s22075_s1 + $0xae8] sm:$0xf]  ;;  %v10170_v49 = vor.u32 %v13760_v52, %v10169_v18  ;;  %22148 = vst [vmem:[#allocation57_spill] sm:$0xff] %v18604_v8  ;;  %v18612_v52 = vpop.f32.mrf.mxu1 }
 0x246   :  { %v13824_v19 = vld [vmem:[%s22075_s1 + $0xaf4] sm:$0xf0]  ;;  %7344 = vmatpush.bf16.msrb.mxu1 %v9690_v62  ;;  %v10553_v29 = vld [vmem:[%s22075_s1 + $0xbe8] sm:$0xf]  ;;  %v10298_v53 = vor.u32 %v13792_v63, %v10297_v6  ;;  %22149 = vst [vmem:[#allocation58_spill] sm:$0xff] %v18612_v52 }
 0x247   :  { %7358 = vmatpush.bf16.msrb.mxu2 %v9818_v13  ;;  %v13856_v42 = vld [vmem:[%s22075_s1 + $0xbf4] sm:$0xf0]  ;;  %v10426_v15 = vor.u32 %v13824_v19, %v10425_v12  ;;  %v10153_v62 = vld [vmem:[%s22075_s1 + $0x8c8] sm:$0xf] }
 0x248   :  { %7372 = vmatpush.bf16.msrb.mxu3 %v9946_v57  ;;  %v13756_v13 = vld [vmem:[%s22075_s1 + $0x8d4] sm:$0xf0]  ;;  %v10281_v27 = vld [vmem:[%s22075_s1 + $0x9c8] sm:$0xf]  ;;  %v10554_v7 = vor.u32 %v13856_v42, %v10553_v29 }
 0x249   :  { %7331 = vmatpush.bf16.msrb.mxu0 %v9546_v50  ;;  %v13788_v23 = vld [vmem:[%s22075_s1 + $0x9d4] sm:$0xf0]  ;;  %v10409_v57 = vld [vmem:[%s22075_s1 + $0xac8] sm:$0xf]  ;;  %v10154_v6 = vor.u32 %v13756_v13, %v10153_v62 }
 0x24a   :  { %v13820_v61 = vld [vmem:[%s22075_s1 + $0xad4] sm:$0xf0]  ;;  %7345 = vmatpush.bf16.msrb.mxu1 %v9674_v11  ;;  %v10537_v14 = vld [vmem:[%s22075_s1 + $0xbc8] sm:$0xf]  ;;  %v10282_v50 = vor.u32 %v13788_v23, %v10281_v27 }
 0x24b   :  { %7359 = vmatpush.bf16.msrb.mxu2 %v9802_v30  ;;  %v13852_v18 = vld [vmem:[%s22075_s1 + $0xbd4] sm:$0xf0]  ;;  %v10410_v63 = vor.u32 %v13820_v61, %v10409_v57  ;;  %v10137_v30 = vld [vmem:[%s22075_s1 + $0x8a8] sm:$0xf]  ;;  %v18651_v57 = vpop.f32.mrf.mxu2 }
 0x24c   :  { %7373 = vmatpush.bf16.msrb.mxu3 %v9930_v22  ;;  %v13752_v12 = vld [vmem:[%s22075_s1 + $0x8b4] sm:$0xf0]  ;;  %v10265_v19 = vld [vmem:[%s22075_s1 + $0x9a8] sm:$0xf]  ;;  %7332 = vmatmul.bf16.vlgmr.msrb.gmra.mxu0 %v15110_v39  ;;  %22150 = vst [vmem:[#allocation59_spill] sm:$0xff] %v18651_v57 }
 0x24d   :  { %7380 = vmatpush.bf16.msra.mxu0 %v10170_v49  ;;  %v10538_v49 = vor.u32 %v13852_v18, %v10537_v14  ;;  %v13816_v11 = vld [vmem:[%s22075_s1 + $0xab4] sm:$0xf0]  ;;  %7346 = vmatmul.bf16.vlgmr.msrb.gmra.mxu1 %v15123_v44  ;;  %v10521_v29 = vld [vmem:[%s22075_s1 + $0xba8] sm:$0xf]  ;;  %v10138_v22 = vor.u32 %v13752_v12, %v10137_v30 }
 0x24e   :  { %7394 = vmatpush.bf16.msra.mxu1 %v10298_v53  ;;  %v10393_v53 = vld [vmem:[%s22075_s1 + $0xaa8] sm:$0xf]  ;;  %7360 = vmatmul.bf16.vlgmr.msrb.gmra.mxu2 %v15121_v43  ;;  %v13848_v42 = vld [vmem:[%s22075_s1 + $0xbb4] sm:$0xf0] }
 0x24f   :  { %7408 = vmatpush.bf16.msra.mxu2 %v10426_v15  ;;  %v13784_v15 = vld [vmem:[%s22075_s1 + $0x9b4] sm:$0xf0]  ;;  %7374 = vmatmul.bf16.vlgmr.msrb.gmra.mxu3 %v15131_v47  ;;  %v10394_v13 = vor.u32 %v13816_v11, %v10393_v53  ;;  %v10121_v27 = vld [vmem:[%s22075_s1 + $0x888] sm:$0xf]  ;;  %v10522_v61 = vor.u32 %v13848_v42, %v10521_v29 }
 0x250   :  { %7422 = vmatpush.bf16.msra.mxu3 %v10554_v7  ;;  %v10266_v62 = vor.u32 %v13784_v15, %v10265_v19  ;;  %v13748_v7 = vld [vmem:[%s22075_s1 + $0x894] sm:$0xf0]  ;;  %v10249_v23 = vld [vmem:[%s22075_s1 + $0x988] sm:$0xf]  ;;  %v7123_v15 = vpop.f32.mrf.mxu1 }
 0x251   :  { %7381 = vmatpush.bf16.msra.mxu0 %v10154_v6  ;;  %v13780_v14 = vld [vmem:[%s22075_s1 + $0x994] sm:$0xf0]  ;;  %v10377_v18 = vld [vmem:[%s22075_s1 + $0xa88] sm:$0xf] }
 0x252   :  { %7395 = vmatpush.bf16.msra.mxu1 %v10282_v50  ;;  %v13812_v6 = vld [vmem:[%s22075_s1 + $0xa94] sm:$0xf0]  ;;  %v18662_v50 = vpop.f32.mrf.mxu3  ;;  %v10505_v30 = vld [vmem:[%s22075_s1 + $0xb88] sm:$0xf]  ;;  %v10250_v53 = vor.u32 %v13780_v14, %v10249_v23 }
 0x253   :  { %7409 = vmatpush.bf16.msra.mxu2 %v10410_v63  ;;  %22151 = vst [vmem:[#allocation60_spill] sm:$0xff] %v18662_v50  ;;  %v7109_v63 = vpop.f32.mrf.mxu0  ;;  %v13844_v12 = vld [vmem:[%s22075_s1 + $0xb94] sm:$0xf0]  ;;  %v10378_v11 = vor.u32 %v13812_v6, %v10377_v18  ;;  %v10105_v29 = vld [vmem:[%s22075_s1 + $0x868] sm:$0xf] }
 0x254   :  { %7423 = vmatpush.bf16.msra.mxu3 %v10538_v49  ;;  %v7110_v19 = vadd.f32 %v7109_v63, %v18512_v20  ;;  %v10122_v49 = vor.u32 %v13748_v7, %v10121_v27  ;;  %v13744_v42 = vld [vmem:[%s22075_s1 + $0x874] sm:$0xf0]  ;;  %v10506_v20 = vor.u32 %v13844_v12, %v10505_v30  ;;  %v10489_v23 = vld [vmem:[%s22075_s1 + $0xb68] sm:$0xf] }
 0x255   :  { %7382 = vmatpush.bf16.msra.mxu0 %v10138_v22  ;;  %v10233_v22 = vld [vmem:[%s22075_s1 + $0x968] sm:$0xf]  ;;  %v13808_v7 = vld [vmem:[%s22075_s1 + $0xa74] sm:$0xf0]  ;;  %v10106_v14 = vor.u32 %v13744_v42, %v10105_v29 }
 0x256   :  { %7396 = vmatpush.bf16.msra.mxu1 %v10266_v62  ;;  %v7124_v27 = vadd.f32 %v7123_v15, %v7110_v19  ;;  %v13776_v62 = vld [vmem:[%s22075_s1 + $0x974] sm:$0xf0]  ;;  %v10089_v63 = vld [vmem:[%s22075_s1 + $0x848] sm:$0xf] }
 0x257   :  { %7410 = vmatpush.bf16.msra.mxu2 %v10394_v13  ;;  %v10361_v13 = vld [vmem:[%s22075_s1 + $0xa68] sm:$0xf]  ;;  %v10234_v18 = vor.u32 %v13776_v62, %v10233_v22  ;;  %v13740_v30 = vld [vmem:[%s22075_s1 + $0x854] sm:$0xf0] }
 0x258   :  { %7424 = vmatpush.bf16.msra.mxu3 %v10522_v61  ;;  %v13840_v61 = vld [vmem:[%s22075_s1 + $0xb74] sm:$0xf0]  ;;  %v10362_v6 = vor.u32 %v13808_v7, %v10361_v13  ;;  %v10217_v12 = vld [vmem:[%s22075_s1 + $0x948] sm:$0xf]  ;;  %v10090_v62 = vor.u32 %v13740_v30, %v10089_v63 }
 0x259   :  { %7383 = vmatpush.bf16.msra.mxu0 %v10122_v49  ;;  %v10490_v19 = vor.u32 %v13840_v61, %v10489_v23  ;;  %v7137_v49 = vpop.f32.mrf.mxu2  ;;  %v13772_v15 = vld [vmem:[%s22075_s1 + $0x954] sm:$0xf0]  ;;  %v10473_v22 = vld [vmem:[%s22075_s1 + $0xb48] sm:$0xf] }
 0x25a   :  { %7397 = vmatpush.bf16.msra.mxu1 %v10250_v53  ;;  %v10345_v53 = vld [vmem:[%s22075_s1 + $0xa48] sm:$0xf]  ;;  %v7138_v29 = vadd.f32 %v7137_v49, %v7124_v27  ;;  %v7151_v42 = vpop.f32.mrf.mxu3  ;;  %v10218_v7 = vor.u32 %v13772_v15, %v10217_v12  ;;  %v13736_v61 = vld [vmem:[%s22075_s1 + $0x834] sm:$0xf0] }
 0x25b   :  { %7411 = vmatpush.bf16.msra.mxu2 %v10378_v11  ;;  %v13804_v11 = vld [vmem:[%s22075_s1 + $0xa54] sm:$0xf0]  ;;  %v10073_v27 = vld [vmem:[%s22075_s1 + $0x828] sm:$0xf] }
 0x25c   :  { %7425 = vmatpush.bf16.msra.mxu3 %v10506_v20  ;;  %v13836_v20 = vld [vmem:[%s22075_s1 + $0xb54] sm:$0xf0]  ;;  %v18719_v13 = vadd.f32 %v7151_v42, %v7138_v29  ;;  %v10346_v23 = vor.u32 %v13804_v11, %v10345_v53  ;;  %v10201_v49 = vld [vmem:[%s22075_s1 + $0x928] sm:$0xf] }
 0x25d   :  { %7384 = vmatpush.bf16.msra.mxu0 %v10106_v14  ;;  %v10474_v14 = vor.u32 %v13836_v20, %v10473_v22  ;;  %v13800_v63 = vld [vmem:[%s22075_s1 + $0xa34] sm:$0xf0]  ;;  %v10457_v30 = vld [vmem:[%s22075_s1 + $0xb28] sm:$0xf] }
 0x25e   :  { %7398 = vmatpush.bf16.msra.mxu1 %v10234_v18  ;;  %v13768_v18 = vld [vmem:[%s22075_s1 + $0x934] sm:$0xf0]  ;;  %v10057_v15 = vld [vmem:[%s22075_s1 + $0x808] sm:$0xf] }
 0x25f   :  { %7412 = vmatpush.bf16.msra.mxu2 %v10362_v6  ;;  %v10329_v6 = vld [vmem:[%s22075_s1 + $0xa28] sm:$0xf]  ;;  %v13832_v12 = vld [vmem:[%s22075_s1 + $0xb34] sm:$0xf0]  ;;  %v10202_v11 = vor.u32 %v13768_v18, %v10201_v49 }
 0x260   :  { %7426 = vmatpush.bf16.msra.mxu3 %v10490_v19  ;;  %v10074_v19 = vor.u32 %v13736_v61, %v10073_v27  ;;  %v13732_v53 = vld [vmem:[%s22075_s1 + $0x814] sm:$0xf0]  ;;  %v10330_v29 = vor.u32 %v13800_v63, %v10329_v6  ;;  %v10185_v42 = vld [vmem:[%s22075_s1 + $0x908] sm:$0xf] }
 0x261   :  { %7385 = vmatpush.bf16.msra.mxu0 %v10090_v62  ;;  %v13764_v22 = vld [vmem:[%s22075_s1 + $0x914] sm:$0xf0]  ;;  %v10313_v20 = vld [vmem:[%s22075_s1 + $0xa08] sm:$0xf]  ;;  %v10458_v62 = vor.u32 %v13832_v12, %v10457_v30  ;;  %v10058_v18 = vor.u32 %v13732_v53, %v10057_v15 }
 0x262   :  { %7399 = vmatpush.bf16.msra.mxu1 %v10218_v7  ;;  %v13796_v7 = vld [vmem:[%s22075_s1 + $0xa14] sm:$0xf0]  ;;  %v10681_v61 = vld [vmem:[%s22075_s1 + $0xce8] sm:$0xf]  ;;  %v10186_v12 = vor.u32 %v13764_v22, %v10185_v42 }
 0x263   :  { %7413 = vmatpush.bf16.msra.mxu2 %v10346_v23  ;;  %v10441_v23 = vld [vmem:[%s22075_s1 + $0xb08] sm:$0xf]  ;;  %v13828_v27 = vld [vmem:[%s22075_s1 + $0xb14] sm:$0xf0]  ;;  %v10314_v50 = vor.u32 %v13796_v7, %v10313_v20 }
 0x264   :  { %7427 = vmatpush.bf16.msra.mxu3 %v10474_v14  ;;  %v13888_v49 = vld [vmem:[%s22075_s1 + $0xcf4] sm:$0xf0]  ;;  %v10809_v14 = vld [vmem:[%s22075_s1 + $0xde8] sm:$0xf]  ;;  %v10442_v53 = vor.u32 %v13828_v27, %v10441_v23  ;;  %v18811_v23 = vpop.f32.mrf.mxu0 }
 0x265   :  { %7386 = vmatpush.bf16.msra.mxu0 %v10074_v19  ;;  %v13920_v6 = vld [vmem:[%s22075_s1 + $0xdf4] sm:$0xf0]  ;;  %v10937_v63 = vld [vmem:[%s22075_s1 + $0xee8] sm:$0xf]  ;;  %v10682_v57 = vor.u32 %v13888_v49, %v10681_v61  ;;  %22152 = vst [vmem:[#allocation61_spill] sm:$0xff] %v18811_v23  ;;  %v18819_v49 = vpop.f32.mrf.mxu1 }
 0x266   :  { %v13952_v30 = vld [vmem:[%s22075_s1 + $0xef4] sm:$0xf0]  ;;  %7400 = vmatpush.bf16.msra.mxu1 %v10202_v11  ;;  %v11065_v19 = vld [vmem:[%s22075_s1 + $0xfe8] sm:$0xf]  ;;  %v10810_v52 = vor.u32 %v13920_v6, %v10809_v14  ;;  %22153 = vst [vmem:[#allocation62_spill] sm:$0xff] %v18819_v49 }
 0x267   :  { %7414 = vmatpush.bf16.msra.mxu2 %v10330_v29  ;;  %v13984_v15 = vld [vmem:[%s22075_s1 + $0xff4] sm:$0xf0]  ;;  %v10938_v8 = vor.u32 %v13952_v30, %v10937_v63  ;;  %v10665_v11 = vld [vmem:[%s22075_s1 + $0xcc8] sm:$0xf] }
 0x268   :  { %7428 = vmatpush.bf16.msra.mxu3 %v10458_v62  ;;  %v13884_v29 = vld [vmem:[%s22075_s1 + $0xcd4] sm:$0xf0]  ;;  %v10793_v42 = vld [vmem:[%s22075_s1 + $0xdc8] sm:$0xf]  ;;  %v11066_v22 = vor.u32 %v13984_v15, %v11065_v19 }
 0x269   :  { %7387 = vmatpush.bf16.msra.mxu0 %v10058_v18  ;;  %v13916_v20 = vld [vmem:[%s22075_s1 + $0xdd4] sm:$0xf0]  ;;  %v10921_v62 = vld [vmem:[%s22075_s1 + $0xec8] sm:$0xf]  ;;  %v10666_v14 = vor.u32 %v13884_v29, %v10665_v11 }
 0x26a   :  { %v13948_v7 = vld [vmem:[%s22075_s1 + $0xed4] sm:$0xf0]  ;;  %7401 = vmatpush.bf16.msra.mxu1 %v10186_v12  ;;  %v11049_v27 = vld [vmem:[%s22075_s1 + $0xfc8] sm:$0xf]  ;;  %v10794_v18 = vor.u32 %v13916_v20, %v10793_v42 }
 0x26b   :  { %7415 = vmatpush.bf16.msra.mxu2 %v10314_v50  ;;  %v13980_v61 = vld [vmem:[%s22075_s1 + $0xfd4] sm:$0xf0]  ;;  %v10922_v6 = vor.u32 %v13948_v7, %v10921_v62  ;;  %v10649_v50 = vld [vmem:[%s22075_s1 + $0xca8] sm:$0xf]  ;;  %v18858_v62 = vpop.f32.mrf.mxu2 }
 0x26c   :  { %7429 = vmatpush.bf16.msra.mxu3 %v10442_v53  ;;  %v13880_v63 = vld [vmem:[%s22075_s1 + $0xcb4] sm:$0xf0]  ;;  %v10777_v30 = vld [vmem:[%s22075_s1 + $0xda8] sm:$0xf]  ;;  %7388 = vmatmul.bf16.vlgmr.msra.gmra.mxu0 %v15338_v31  ;;  %22154 = vst [vmem:[#allocation63_spill] sm:$0xff] %v18858_v62 }
 0x26d   :  { %7436 = vmatpush.bf16.msrb.mxu0 %v10682_v57  ;;  %v11050_v57 = vor.u32 %v13980_v61, %v11049_v27  ;;  %v13944_v12 = vld [vmem:[%s22075_s1 + $0xeb4] sm:$0xf0]  ;;  %7402 = vmatmul.bf16.vlgmr.msra.gmra.mxu1 %v15351_v36  ;;  %v11033_v19 = vld [vmem:[%s22075_s1 + $0xfa8] sm:$0xf]  ;;  %v10650_v53 = vor.u32 %v13880_v63, %v10649_v50 }
 0x26e   :  { %7450 = vmatpush.bf16.msrb.mxu1 %v10810_v52  ;;  %v10905_v52 = vld [vmem:[%s22075_s1 + $0xea8] sm:$0xf]  ;;  %7416 = vmatmul.bf16.vlgmr.msra.gmra.mxu2 %v15349_v35  ;;  %v13976_v15 = vld [vmem:[%s22075_s1 + $0xfb4] sm:$0xf0] }
 0x26f   :  { %7464 = vmatpush.bf16.msrb.mxu2 %v10938_v8  ;;  %v13912_v8 = vld [vmem:[%s22075_s1 + $0xdb4] sm:$0xf0]  ;;  %7430 = vmatmul.bf16.vlgmr.msra.gmra.mxu3 %v15359_v40  ;;  %v10906_v29 = vor.u32 %v13944_v12, %v10905_v52  ;;  %v10633_v42 = vld [vmem:[%s22075_s1 + $0xc88] sm:$0xf]  ;;  %v11034_v7 = vor.u32 %v13976_v15, %v11033_v19 }
 0x270   :  { %7478 = vmatpush.bf16.msrb.mxu3 %v11066_v22  ;;  %v10778_v11 = vor.u32 %v13912_v8, %v10777_v30  ;;  %v13876_v22 = vld [vmem:[%s22075_s1 + $0xc94] sm:$0xf0]  ;;  %v10761_v20 = vld [vmem:[%s22075_s1 + $0xd88] sm:$0xf]  ;;  %v7179_v8 = vpop.f32.mrf.mxu1 }
 0x271   :  { %7437 = vmatpush.bf16.msrb.mxu0 %v10666_v14  ;;  %v13908_v27 = vld [vmem:[%s22075_s1 + $0xd94] sm:$0xf0]  ;;  %v10889_v61 = vld [vmem:[%s22075_s1 + $0xe88] sm:$0xf] }
 0x272   :  { %7451 = vmatpush.bf16.msrb.mxu1 %v10794_v18  ;;  %v13940_v14 = vld [vmem:[%s22075_s1 + $0xe94] sm:$0xf0]  ;;  %v18869_v18 = vpop.f32.mrf.mxu3  ;;  %v11017_v50 = vld [vmem:[%s22075_s1 + $0xf88] sm:$0xf]  ;;  %v10762_v52 = vor.u32 %v13908_v27, %v10761_v20 }
 0x273   :  { %7465 = vmatpush.bf16.msrb.mxu2 %v10922_v6  ;;  %22155 = vst [vmem:[#allocation64_spill] sm:$0xff] %v18869_v18  ;;  %v7165_v6 = vpop.f32.mrf.mxu0  ;;  %v13972_v63 = vld [vmem:[%s22075_s1 + $0xf94] sm:$0xf0]  ;;  %v10890_v12 = vor.u32 %v13940_v14, %v10889_v61  ;;  %v10617_v19 = vld [vmem:[%s22075_s1 + $0xc68] sm:$0xf] }
 0x274   :  { %7479 = vmatpush.bf16.msrb.mxu3 %v11050_v57  ;;  %v7166_v30 = vadd.f32 %v7165_v6, %v18719_v13  ;;  %v10634_v57 = vor.u32 %v13876_v22, %v10633_v42  ;;  %v13872_v15 = vld [vmem:[%s22075_s1 + $0xc74] sm:$0xf0]  ;;  %v11018_v13 = vor.u32 %v13972_v63, %v11017_v50  ;;  %v11001_v20 = vld [vmem:[%s22075_s1 + $0xf68] sm:$0xf] }
 0x275   :  { %7438 = vmatpush.bf16.msrb.mxu0 %v10650_v53  ;;  %v10745_v53 = vld [vmem:[%s22075_s1 + $0xd68] sm:$0xf]  ;;  %v13936_v22 = vld [vmem:[%s22075_s1 + $0xe74] sm:$0xf0]  ;;  %v10618_v27 = vor.u32 %v13872_v15, %v10617_v19 }
 0x276   :  { %7452 = vmatpush.bf16.msrb.mxu1 %v10778_v11  ;;  %v7180_v42 = vadd.f32 %v7179_v8, %v7166_v30  ;;  %v13904_v11 = vld [vmem:[%s22075_s1 + $0xd74] sm:$0xf0]  ;;  %v10601_v6 = vld [vmem:[%s22075_s1 + $0xc48] sm:$0xf] }
 0x277   :  { %7466 = vmatpush.bf16.msrb.mxu2 %v10906_v29  ;;  %v10873_v29 = vld [vmem:[%s22075_s1 + $0xe68] sm:$0xf]  ;;  %v10746_v61 = vor.u32 %v13904_v11, %v10745_v53  ;;  %v13868_v50 = vld [vmem:[%s22075_s1 + $0xc54] sm:$0xf0] }
 0x278   :  { %7480 = vmatpush.bf16.msrb.mxu3 %v11034_v7  ;;  %v13968_v7 = vld [vmem:[%s22075_s1 + $0xf74] sm:$0xf0]  ;;  %v10874_v14 = vor.u32 %v13936_v22, %v10873_v29  ;;  %v10729_v63 = vld [vmem:[%s22075_s1 + $0xd48] sm:$0xf]  ;;  %v10602_v11 = vor.u32 %v13868_v50, %v10601_v6 }
 0x279   :  { %7439 = vmatpush.bf16.msrb.mxu0 %v10634_v57  ;;  %v11002_v30 = vor.u32 %v13968_v7, %v11001_v20  ;;  %v7193_v57 = vpop.f32.mrf.mxu2  ;;  %v13900_v8 = vld [vmem:[%s22075_s1 + $0xd54] sm:$0xf0]  ;;  %v10985_v53 = vld [vmem:[%s22075_s1 + $0xf48] sm:$0xf] }
 0x27a   :  { %7453 = vmatpush.bf16.msrb.mxu1 %v10762_v52  ;;  %v10857_v52 = vld [vmem:[%s22075_s1 + $0xe48] sm:$0xf]  ;;  %v7194_v19 = vadd.f32 %v7193_v57, %v7180_v42  ;;  %v7207_v15 = vpop.f32.mrf.mxu3  ;;  %v10730_v22 = vor.u32 %v13900_v8, %v10729_v63  ;;  %v13864_v7 = vld [vmem:[%s22075_s1 + $0xc34] sm:$0xf0] }
 0x27b   :  { %7467 = vmatpush.bf16.msrb.mxu2 %v10890_v12  ;;  %v13932_v12 = vld [vmem:[%s22075_s1 + $0xe54] sm:$0xf0]  ;;  %v10585_v42 = vld [vmem:[%s22075_s1 + $0xc28] sm:$0xf] }
 0x27c   :  { %7481 = vmatpush.bf16.msrb.mxu3 %v11018_v13  ;;  %v13964_v13 = vld [vmem:[%s22075_s1 + $0xf54] sm:$0xf0]  ;;  %v18926_v29 = vadd.f32 %v7207_v15, %v7194_v19  ;;  %v10858_v20 = vor.u32 %v13932_v12, %v10857_v52  ;;  %v10713_v57 = vld [vmem:[%s22075_s1 + $0xd28] sm:$0xf] }
 0x27d   :  { %7440 = vmatpush.bf16.msrb.mxu0 %v10618_v27  ;;  %v10986_v27 = vor.u32 %v13964_v13, %v10985_v53  ;;  %v13928_v6 = vld [vmem:[%s22075_s1 + $0xe34] sm:$0xf0]  ;;  %v10969_v50 = vld [vmem:[%s22075_s1 + $0xf28] sm:$0xf] }
 0x27e   :  { %7454 = vmatpush.bf16.msrb.mxu1 %v10746_v61  ;;  %v13896_v61 = vld [vmem:[%s22075_s1 + $0xd34] sm:$0xf0]  ;;  %v10569_v8 = vld [vmem:[%s22075_s1 + $0xc08] sm:$0xf] }
 0x27f   :  { %7468 = vmatpush.bf16.msrb.mxu2 %v10874_v14  ;;  %v10841_v14 = vld [vmem:[%s22075_s1 + $0xe28] sm:$0xf]  ;;  %v13960_v63 = vld [vmem:[%s22075_s1 + $0xf34] sm:$0xf0]  ;;  %v10714_v12 = vor.u32 %v13896_v61, %v10713_v57 }
 0x280   :  { %7482 = vmatpush.bf16.msrb.mxu3 %v11002_v30  ;;  %v10586_v30 = vor.u32 %v13864_v7, %v10585_v42  ;;  %v13860_v52 = vld [vmem:[%s22075_s1 + $0xc14] sm:$0xf0]  ;;  %v10842_v19 = vor.u32 %v13928_v6, %v10841_v14  ;;  %v10697_v15 = vld [vmem:[%s22075_s1 + $0xd08] sm:$0xf] }
 0x281   :  { %7441 = vmatpush.bf16.msrb.mxu0 %v10602_v11  ;;  %v13892_v53 = vld [vmem:[%s22075_s1 + $0xd14] sm:$0xf0]  ;;  %v10825_v13 = vld [vmem:[%s22075_s1 + $0xe08] sm:$0xf]  ;;  %v10970_v11 = vor.u32 %v13960_v63, %v10969_v50  ;;  %v10570_v61 = vor.u32 %v13860_v52, %v10569_v8 }
 0x282   :  { %7455 = vmatpush.bf16.msrb.mxu1 %v10730_v22  ;;  %v13924_v22 = vld [vmem:[%s22075_s1 + $0xe14] sm:$0xf0]  ;;  %v11193_v7 = vld [vmem:[%s22075_s1 + $0x10e8] sm:$0xf]  ;;  %v10698_v63 = vor.u32 %v13892_v53, %v10697_v15 }
 0x283   :  { %7469 = vmatpush.bf16.msrb.mxu2 %v10858_v20  ;;  %v10953_v20 = vld [vmem:[%s22075_s1 + $0xf08] sm:$0xf]  ;;  %v13956_v42 = vld [vmem:[%s22075_s1 + $0xf14] sm:$0xf0]  ;;  %v10826_v18 = vor.u32 %v13924_v22, %v10825_v13 }
 0x284   :  { %7483 = vmatpush.bf16.msrb.mxu3 %v10986_v27  ;;  %v14016_v57 = vld [vmem:[%s22075_s1 + $0x10f4] sm:$0xf0]  ;;  %v11321_v27 = vld [vmem:[%s22075_s1 + $0x11e8] sm:$0xf]  ;;  %v10954_v52 = vor.u32 %v13956_v42, %v10953_v20  ;;  %v19018_v20 = vpop.f32.mrf.mxu0 }
 0x285   :  { %7442 = vmatpush.bf16.msrb.mxu0 %v10586_v30  ;;  %v14048_v14 = vld [vmem:[%s22075_s1 + $0x11f4] sm:$0xf0]  ;;  %v11449_v6 = vld [vmem:[%s22075_s1 + $0x12e8] sm:$0xf]  ;;  %v11194_v62 = vor.u32 %v14016_v57, %v11193_v7  ;;  %22156 = vst [vmem:[#allocation65_spill] sm:$0xff] %v19018_v20  ;;  %v19026_v57 = vpop.f32.mrf.mxu1 }
 0x286   :  { %v14080_v50 = vld [vmem:[%s22075_s1 + $0x12f4] sm:$0xf0]  ;;  %7456 = vmatpush.bf16.msrb.mxu1 %v10714_v12  ;;  %v11577_v30 = vld [vmem:[%s22075_s1 + $0x13e8] sm:$0xf]  ;;  %v11322_v49 = vor.u32 %v14048_v14, %v11321_v27  ;;  %22157 = vst [vmem:[#allocation66_spill] sm:$0xff] %v19026_v57 }
 0x287   :  { %7470 = vmatpush.bf16.msrb.mxu2 %v10842_v19  ;;  %v14112_v8 = vld [vmem:[%s22075_s1 + $0x13f4] sm:$0xf0]  ;;  %v11450_v23 = vor.u32 %v14080_v50, %v11449_v6  ;;  %v11177_v12 = vld [vmem:[%s22075_s1 + $0x10c8] sm:$0xf] }
 0x288   :  { %7484 = vmatpush.bf16.msrb.mxu3 %v10970_v11  ;;  %v14012_v19 = vld [vmem:[%s22075_s1 + $0x10d4] sm:$0xf0]  ;;  %v11305_v15 = vld [vmem:[%s22075_s1 + $0x11c8] sm:$0xf]  ;;  %v11578_v53 = vor.u32 %v14112_v8, %v11577_v30 }
 0x289   :  { %7443 = vmatpush.bf16.msrb.mxu0 %v10570_v61  ;;  %v14044_v13 = vld [vmem:[%s22075_s1 + $0x11d4] sm:$0xf0]  ;;  %v11433_v11 = vld [vmem:[%s22075_s1 + $0x12c8] sm:$0xf]  ;;  %v11178_v27 = vor.u32 %v14012_v19, %v11177_v12 }
 0x28a   :  { %v14076_v22 = vld [vmem:[%s22075_s1 + $0x12d4] sm:$0xf0]  ;;  %7457 = vmatpush.bf16.msrb.mxu1 %v10698_v63  ;;  %v11561_v42 = vld [vmem:[%s22075_s1 + $0x13c8] sm:$0xf]  ;;  %v11306_v61 = vor.u32 %v14044_v13, %v11305_v15 }
 0x28b   :  { %7471 = vmatpush.bf16.msrb.mxu2 %v10826_v18  ;;  %v14108_v7 = vld [vmem:[%s22075_s1 + $0x13d4] sm:$0xf0]  ;;  %v11434_v14 = vor.u32 %v14076_v22, %v11433_v11  ;;  %v11161_v18 = vld [vmem:[%s22075_s1 + $0x10a8] sm:$0xf]  ;;  %v19065_v11 = vpop.f32.mrf.mxu2 }
 0x28c   :  { %7485 = vmatpush.bf16.msrb.mxu3 %v10954_v52  ;;  %v14008_v6 = vld [vmem:[%s22075_s1 + $0x10b4] sm:$0xf0]  ;;  %v11289_v50 = vld [vmem:[%s22075_s1 + $0x11a8] sm:$0xf]  ;;  %7444 = vmatmul.bf16.vlgmr.msrb.gmra.mxu0 %v15566_v32  ;;  %22158 = vst [vmem:[#allocation67_spill] sm:$0xff] %v19065_v11 }
 0x28d   :  { %7492 = vmatpush.bf16.msra.mxu0 %v11194_v62  ;;  %v11562_v62 = vor.u32 %v14108_v7, %v11561_v42  ;;  %v14072_v63 = vld [vmem:[%s22075_s1 + $0x12b4] sm:$0xf0]  ;;  %7458 = vmatmul.bf16.vlgmr.msrb.gmra.mxu1 %v15579_v41  ;;  %v11545_v30 = vld [vmem:[%s22075_s1 + $0x13a8] sm:$0xf]  ;;  %v11162_v52 = vor.u32 %v14008_v6, %v11161_v18 }
 0x28e   :  { %7506 = vmatpush.bf16.msra.mxu1 %v11322_v49  ;;  %v11417_v49 = vld [vmem:[%s22075_s1 + $0x12a8] sm:$0xf]  ;;  %7472 = vmatmul.bf16.vlgmr.msrb.gmra.mxu2 %v15577_v38  ;;  %v14104_v8 = vld [vmem:[%s22075_s1 + $0x13b4] sm:$0xf0] }
 0x28f   :  { %7520 = vmatpush.bf16.msra.mxu2 %v11450_v23  ;;  %v14040_v23 = vld [vmem:[%s22075_s1 + $0x11b4] sm:$0xf0]  ;;  %7486 = vmatmul.bf16.vlgmr.msrb.gmra.mxu3 %v15587_v46  ;;  %v11418_v19 = vor.u32 %v14072_v63, %v11417_v49  ;;  %v11145_v15 = vld [vmem:[%s22075_s1 + $0x1088] sm:$0xf]  ;;  %v11546_v22 = vor.u32 %v14104_v8, %v11545_v30 }
 0x290   :  { %7534 = vmatpush.bf16.msra.mxu3 %v11578_v53  ;;  %v11290_v12 = vor.u32 %v14040_v23, %v11289_v50  ;;  %v14004_v53 = vld [vmem:[%s22075_s1 + $0x1094] sm:$0xf0]  ;;  %v11273_v13 = vld [vmem:[%s22075_s1 + $0x1188] sm:$0xf]  ;;  %v7235_v23 = vpop.f32.mrf.mxu1 }
 0x291   :  { %7493 = vmatpush.bf16.msra.mxu0 %v11178_v27  ;;  %v14036_v42 = vld [vmem:[%s22075_s1 + $0x1194] sm:$0xf0]  ;;  %v11401_v7 = vld [vmem:[%s22075_s1 + $0x1288] sm:$0xf] }
 0x292   :  { %7507 = vmatpush.bf16.msra.mxu1 %v11306_v61  ;;  %v14068_v27 = vld [vmem:[%s22075_s1 + $0x1294] sm:$0xf0]  ;;  %v19076_v61 = vpop.f32.mrf.mxu3  ;;  %v11529_v18 = vld [vmem:[%s22075_s1 + $0x1388] sm:$0xf]  ;;  %v11274_v49 = vor.u32 %v14036_v42, %v11273_v13 }
 0x293   :  { %7521 = vmatpush.bf16.msra.mxu2 %v11434_v14  ;;  %22159 = vst [vmem:[#allocation68_spill] sm:$0xff] %v19076_v61  ;;  %v7221_v14 = vpop.f32.mrf.mxu0  ;;  %v14100_v6 = vld [vmem:[%s22075_s1 + $0x1394] sm:$0xf0]  ;;  %v11402_v63 = vor.u32 %v14068_v27, %v11401_v7  ;;  %v11129_v30 = vld [vmem:[%s22075_s1 + $0x1068] sm:$0xf] }
 0x294   :  { %7535 = vmatpush.bf16.msra.mxu3 %v11562_v62  ;;  %v7222_v50 = vadd.f32 %v7221_v14, %v18926_v29  ;;  %v11146_v62 = vor.u32 %v14004_v53, %v11145_v15  ;;  %v14000_v8 = vld [vmem:[%s22075_s1 + $0x1074] sm:$0xf0]  ;;  %v11530_v29 = vor.u32 %v14100_v6, %v11529_v18  ;;  %v11513_v13 = vld [vmem:[%s22075_s1 + $0x1368] sm:$0xf] }
 0x295   :  { %7494 = vmatpush.bf16.msra.mxu0 %v11162_v52  ;;  %v11257_v52 = vld [vmem:[%s22075_s1 + $0x1168] sm:$0xf]  ;;  %v14064_v53 = vld [vmem:[%s22075_s1 + $0x1274] sm:$0xf0]  ;;  %v11130_v42 = vor.u32 %v14000_v8, %v11129_v30 }
 0x296   :  { %7508 = vmatpush.bf16.msra.mxu1 %v11290_v12  ;;  %v7236_v15 = vadd.f32 %v7235_v23, %v7222_v50  ;;  %v14032_v12 = vld [vmem:[%s22075_s1 + $0x1174] sm:$0xf0]  ;;  %v11113_v14 = vld [vmem:[%s22075_s1 + $0x1048] sm:$0xf] }
 0x297   :  { %7522 = vmatpush.bf16.msra.mxu2 %v11418_v19  ;;  %v11385_v19 = vld [vmem:[%s22075_s1 + $0x1268] sm:$0xf]  ;;  %v11258_v7 = vor.u32 %v14032_v12, %v11257_v52  ;;  %v13996_v18 = vld [vmem:[%s22075_s1 + $0x1054] sm:$0xf0] }
 0x298   :  { %7536 = vmatpush.bf16.msra.mxu3 %v11546_v22  ;;  %v14096_v22 = vld [vmem:[%s22075_s1 + $0x1374] sm:$0xf0]  ;;  %v11386_v27 = vor.u32 %v14064_v53, %v11385_v19  ;;  %v11241_v6 = vld [vmem:[%s22075_s1 + $0x1148] sm:$0xf]  ;;  %v11114_v12 = vor.u32 %v13996_v18, %v11113_v14 }
 0x299   :  { %7495 = vmatpush.bf16.msra.mxu0 %v11146_v62  ;;  %v11514_v50 = vor.u32 %v14096_v22, %v11513_v13  ;;  %v7249_v62 = vpop.f32.mrf.mxu2  ;;  %v14028_v23 = vld [vmem:[%s22075_s1 + $0x1154] sm:$0xf0]  ;;  %v11497_v52 = vld [vmem:[%s22075_s1 + $0x1348] sm:$0xf] }
 0x29a   :  { %7509 = vmatpush.bf16.msra.mxu1 %v11274_v49  ;;  %v11369_v49 = vld [vmem:[%s22075_s1 + $0x1248] sm:$0xf]  ;;  %v7250_v30 = vadd.f32 %v7249_v62, %v7236_v15  ;;  %v7263_v8 = vpop.f32.mrf.mxu3  ;;  %v11242_v53 = vor.u32 %v14028_v23, %v11241_v6  ;;  %v13992_v22 = vld [vmem:[%s22075_s1 + $0x1034] sm:$0xf0] }
 0x29b   :  { %7523 = vmatpush.bf16.msra.mxu2 %v11402_v63  ;;  %v14060_v63 = vld [vmem:[%s22075_s1 + $0x1254] sm:$0xf0]  ;;  %v11097_v15 = vld [vmem:[%s22075_s1 + $0x1028] sm:$0xf] }
 0x29c   :  { %7537 = vmatpush.bf16.msra.mxu3 %v11530_v29  ;;  %v14092_v29 = vld [vmem:[%s22075_s1 + $0x1354] sm:$0xf0]  ;;  %v19133_v19 = vadd.f32 %v7263_v8, %v7250_v30  ;;  %v11370_v13 = vor.u32 %v14060_v63, %v11369_v49  ;;  %v11225_v62 = vld [vmem:[%s22075_s1 + $0x1128] sm:$0xf] }
 0x29d   :  { %7496 = vmatpush.bf16.msra.mxu0 %v11130_v42  ;;  %v11498_v42 = vor.u32 %v14092_v29, %v11497_v52  ;;  %v14056_v14 = vld [vmem:[%s22075_s1 + $0x1234] sm:$0xf0]  ;;  %v11481_v18 = vld [vmem:[%s22075_s1 + $0x1328] sm:$0xf] }
 0x29e   :  { %7510 = vmatpush.bf16.msra.mxu1 %v11258_v7  ;;  %22160 = vst [vmem:[#allocation69_spill] sm:$0xff] %v19133_v19  ;;  %v14024_v7 = vld [vmem:[%s22075_s1 + $0x1134] sm:$0xf0]  ;;  %v11081_v23 = vld [vmem:[%s22075_s1 + $0x1008] sm:$0xf] }
 0x29f   :  { %7524 = vmatpush.bf16.msra.mxu2 %v11386_v27  ;;  %v11353_v27 = vld [vmem:[%s22075_s1 + $0x1228] sm:$0xf]  ;;  %v14088_v6 = vld [vmem:[%s22075_s1 + $0x1334] sm:$0xf0]  ;;  %v11226_v63 = vor.u32 %v14024_v7, %v11225_v62 }
 0x2a0   :  { %7538 = vmatpush.bf16.msra.mxu3 %v11514_v50  ;;  %v11098_v50 = vor.u32 %v13992_v22, %v11097_v15  ;;  %v13988_v49 = vld [vmem:[%s22075_s1 + $0x1014] sm:$0xf0]  ;;  %v11354_v30 = vor.u32 %v14056_v14, %v11353_v27  ;;  %v11209_v8 = vld [vmem:[%s22075_s1 + $0x1108] sm:$0xf] }
 0x2a1   :  { %7497 = vmatpush.bf16.msra.mxu0 %v11114_v12  ;;  %v14020_v52 = vld [vmem:[%s22075_s1 + $0x1114] sm:$0xf0]  ;;  %v11337_v29 = vld [vmem:[%s22075_s1 + $0x1208] sm:$0xf]  ;;  %v11482_v12 = vor.u32 %v14088_v6, %v11481_v18  ;;  %v11082_v7 = vor.u32 %v13988_v49, %v11081_v23 }
 0x2a2   :  { %7511 = vmatpush.bf16.msra.mxu1 %v11242_v53  ;;  %v14052_v53 = vld [vmem:[%s22075_s1 + $0x1214] sm:$0xf0]  ;;  %v11705_v22 = vld [vmem:[%s22075_s1 + $0x14e8] sm:$0xf]  ;;  %v11210_v6 = vor.u32 %v14020_v52, %v11209_v8 }
 0x2a3   :  { %7525 = vmatpush.bf16.msra.mxu2 %v11370_v13  ;;  %v11465_v13 = vld [vmem:[%s22075_s1 + $0x1308] sm:$0xf]  ;;  %v14084_v15 = vld [vmem:[%s22075_s1 + $0x1314] sm:$0xf0]  ;;  %v11338_v19 = vor.u32 %v14052_v53, %v11337_v29 }
 0x2a4   :  { %7539 = vmatpush.bf16.msra.mxu3 %v11498_v42  ;;  %v14144_v62 = vld [vmem:[%s22075_s1 + $0x14f4] sm:$0xf0]  ;;  %v11833_v42 = vld [vmem:[%s22075_s1 + $0x15e8] sm:$0xf]  ;;  %v11466_v49 = vor.u32 %v14084_v15, %v11465_v13  ;;  %v19225_v13 = vpop.f32.mrf.mxu0 }
 0x2a5   :  { %7498 = vmatpush.bf16.msra.mxu0 %v11098_v50  ;;  %v14176_v27 = vld [vmem:[%s22075_s1 + $0x15f4] sm:$0xf0]  ;;  %v11961_v14 = vld [vmem:[%s22075_s1 + $0x16e8] sm:$0xf]  ;;  %v11706_v61 = vor.u32 %v14144_v62, %v11705_v22  ;;  %22161 = vst [vmem:[#allocation70_spill] sm:$0xff] %v19225_v13  ;;  %v19233_v62 = vpop.f32.mrf.mxu1 }
 0x2a6   :  { %v14208_v18 = vld [vmem:[%s22075_s1 + $0x16f4] sm:$0xf0]  ;;  %7512 = vmatpush.bf16.msra.mxu1 %v11226_v63  ;;  %v12089_v50 = vld [vmem:[%s22075_s1 + $0x17e8] sm:$0xf]  ;;  %v11834_v11 = vor.u32 %v14176_v27, %v11833_v42  ;;  %22162 = vst [vmem:[#allocation71_spill] sm:$0xff] %v19233_v62 }
 0x2a7   :  { %7526 = vmatpush.bf16.msra.mxu2 %v11354_v30  ;;  %v14240_v23 = vld [vmem:[%s22075_s1 + $0x17f4] sm:$0xf0]  ;;  %v11962_v57 = vor.u32 %v14208_v18, %v11961_v14  ;;  %v11689_v63 = vld [vmem:[%s22075_s1 + $0x14c8] sm:$0xf] }
 0x2a8   :  { %7540 = vmatpush.bf16.msra.mxu3 %v11482_v12  ;;  %v14140_v30 = vld [vmem:[%s22075_s1 + $0x14d4] sm:$0xf0]  ;;  %v11817_v8 = vld [vmem:[%s22075_s1 + $0x15c8] sm:$0xf]  ;;  %v12090_v52 = vor.u32 %v14240_v23, %v12089_v50 }
 0x2a9   :  { %7499 = vmatpush.bf16.msra.mxu0 %v11082_v7  ;;  %v14172_v29 = vld [vmem:[%s22075_s1 + $0x15d4] sm:$0xf0]  ;;  %v11945_v12 = vld [vmem:[%s22075_s1 + $0x16c8] sm:$0xf]  ;;  %v11690_v42 = vor.u32 %v14140_v30, %v11689_v63  ;;  %v14591_v63 = vld [vmem:[%s22077_s2] sm:$0xf] }
 0x2aa   :  { %v14204_v53 = vld [vmem:[%s22075_s1 + $0x16d4] sm:$0xf0]  ;;  %7513 = vmatpush.bf16.msra.mxu1 %v11210_v6  ;;  %v12073_v15 = vld [vmem:[%s22075_s1 + $0x17c8] sm:$0xf]  ;;  %v11818_v7 = vor.u32 %v14172_v29, %v11817_v8  ;;  %v1086_v30 = vperm.slane %v14591_v63, 2 }
 0x2ab   :  { %7527 = vmatpush.bf16.msra.mxu2 %v11338_v19  ;;  %v14236_v22 = vld [vmem:[%s22075_s1 + $0x17d4] sm:$0xf0]  ;;  %v11946_v27 = vor.u32 %v14204_v53, %v11945_v12  ;;  %v11673_v19 = vld [vmem:[%s22075_s1 + $0x14a8] sm:$0xf] }
 0x2ac   :  { %7541 = vmatpush.bf16.msra.mxu3 %v11466_v49  ;;  %v14136_v14 = vld [vmem:[%s22075_s1 + $0x14b4] sm:$0xf0]  ;;  %v11801_v18 = vld [vmem:[%s22075_s1 + $0x15a8] sm:$0xf]  ;;  %7500 = vmatmul.bf16.vlgmr.msra.gmra.mxu0 %v15794_v51 }
 0x2ad   :  { %7548 = vmatpush.bf16.msrb.mxu0 %v11706_v61  ;;  %v12074_v61 = vor.u32 %v14236_v22, %v12073_v15  ;;  %v14200_v6 = vld [vmem:[%s22075_s1 + $0x16b4] sm:$0xf0]  ;;  %7514 = vmatmul.bf16.vlgmr.msra.gmra.mxu1 %v15807_v56  ;;  %v12057_v50 = vld [vmem:[%s22075_s1 + $0x17a8] sm:$0xf]  ;;  %v11674_v49 = vor.u32 %v14136_v14, %v11673_v19  ;;  %v19275_v15 = vpop.f32.mrf.mxu2  ;;  %v19286_v19 = vpop.f32.mrf.mxu3 }
 0x2ae   :  { %7562 = vmatpush.bf16.msrb.mxu1 %v11834_v11  ;;  %v11929_v11 = vld [vmem:[%s22075_s1 + $0x16a8] sm:$0xf]  ;;  %7528 = vmatmul.bf16.vlgmr.msra.gmra.mxu2 %v15805_v55  ;;  %v14232_v23 = vld [vmem:[%s22075_s1 + $0x17b4] sm:$0xf0]  ;;  %22163 = vst [vmem:[#allocation72_spill] sm:$0xff] %v19275_v15 }
 0x2af   :  { %7576 = vmatpush.bf16.msrb.mxu2 %v11962_v57  ;;  %v14168_v57 = vld [vmem:[%s22075_s1 + $0x15b4] sm:$0xf0]  ;;  %7542 = vmatmul.bf16.vlgmr.msra.gmra.mxu3 %v15815_v60  ;;  %v11657_v29 = vld [vmem:[%s22075_s1 + $0x1488] sm:$0xf]  ;;  %v12058_v22 = vor.u32 %v14232_v23, %v12057_v50  ;;  %22164 = vst [vmem:[#allocation73_spill] sm:$0xff] %v19286_v19 }
 0x2b0   :  { %7590 = vmatpush.bf16.msrb.mxu3 %v12090_v52  ;;  %v11802_v8 = vor.u32 %v14168_v57, %v11801_v18  ;;  %v11930_v52 = vor.u32 %v14200_v6, %v11929_v11  ;;  %v14132_v12 = vld [vmem:[%s22075_s1 + $0x1494] sm:$0xf0]  ;;  %v11785_v53 = vld [vmem:[%s22075_s1 + $0x1588] sm:$0xf]  ;;  %v7291_v6 = vpop.f32.mrf.mxu1 }
 0x2b1   :  { %7549 = vmatpush.bf16.msrb.mxu0 %v11690_v42  ;;  %v14164_v42 = vld [vmem:[%s22075_s1 + $0x1594] sm:$0xf0]  ;;  %v12041_v14 = vld [vmem:[%s22075_s1 + $0x1788] sm:$0xf]  ;;  %v11658_v57 = vor.u32 %v14132_v12, %v11657_v29 }
 0x2b2   :  { %7563 = vmatpush.bf16.msrb.mxu1 %v11818_v7  ;;  %v11913_v7 = vld [vmem:[%s22075_s1 + $0x1688] sm:$0xf]  ;;  %v14228_v18 = vld [vmem:[%s22075_s1 + $0x1794] sm:$0xf0]  ;;  %v11786_v50 = vor.u32 %v14164_v42, %v11785_v53 }
 0x2b3   :  { %7577 = vmatpush.bf16.msrb.mxu2 %v11946_v27  ;;  %v14196_v27 = vld [vmem:[%s22075_s1 + $0x1694] sm:$0xf0]  ;;  %v11641_v63 = vld [vmem:[%s22075_s1 + $0x1468] sm:$0xf] }
 0x2b4   :  { %7591 = vmatpush.bf16.msrb.mxu3 %v12074_v61  ;;  %v7277_v61 = vpop.f32.mrf.mxu0  ;;  %v11914_v23 = vor.u32 %v14196_v27, %v11913_v7  ;;  %v14128_v19 = vld [vmem:[%s22075_s1 + $0x1474] sm:$0xf0]  ;;  %v11769_v15 = vld [vmem:[%s22075_s1 + $0x1568] sm:$0xf] }
 0x2b5   :  { %7550 = vmatpush.bf16.msrb.mxu0 %v11674_v49  ;;  %v7278_v11 = vadd.f32 %v7277_v61, %v1086_v30  ;;  %v12042_v49 = vor.u32 %v14228_v18, %v12041_v14  ;;  %v14192_v29 = vld [vmem:[%s22075_s1 + $0x1674] sm:$0xf0]  ;;  %v12025_v53 = vld [vmem:[%s22075_s1 + $0x1768] sm:$0xf]  ;;  %v11642_v42 = vor.u32 %v14128_v19, %v11641_v63 }
 0x2b6   :  { %7564 = vmatpush.bf16.msrb.mxu1 %v11802_v8  ;;  %v14160_v8 = vld [vmem:[%s22075_s1 + $0x1574] sm:$0xf0]  ;;  %v11625_v14 = vld [vmem:[%s22075_s1 + $0x1448] sm:$0xf] }
 0x2b7   :  { %7578 = vmatpush.bf16.msrb.mxu2 %v11930_v52  ;;  %v11897_v52 = vld [vmem:[%s22075_s1 + $0x1668] sm:$0xf]  ;;  %v7292_v12 = vadd.f32 %v7291_v6, %v7278_v11  ;;  %v11770_v7 = vor.u32 %v14160_v8, %v11769_v15  ;;  %v14124_v18 = vld [vmem:[%s22075_s1 + $0x1454] sm:$0xf0]  ;;  %v7305_v6 = vpop.f32.mrf.mxu2  ;;  %v7319_v8 = vpop.f32.mrf.mxu3 }
 0x2b8   :  { %7592 = vmatpush.bf16.msrb.mxu3 %v12058_v22  ;;  %v14224_v22 = vld [vmem:[%s22075_s1 + $0x1774] sm:$0xf0]  ;;  %v11898_v27 = vor.u32 %v14192_v29, %v11897_v52  ;;  %v11753_v61 = vld [vmem:[%s22075_s1 + $0x1548] sm:$0xf]  ;;  %v11626_v52 = vor.u32 %v14124_v18, %v11625_v14 }
 0x2b9   :  { %7551 = vmatpush.bf16.msrb.mxu0 %v11658_v57  ;;  %v12026_v11 = vor.u32 %v14224_v22, %v12025_v53  ;;  %v14156_v19 = vld [vmem:[%s22075_s1 + $0x1554] sm:$0xf0]  ;;  %v11881_v15 = vld [vmem:[%s22075_s1 + $0x1648] sm:$0xf]  ;;  %v7306_v63 = vadd.f32 %v7305_v6, %v7292_v12 }
 0x2ba   :  { %7565 = vmatpush.bf16.msrb.mxu1 %v11786_v50  ;;  %v14188_v57 = vld [vmem:[%s22075_s1 + $0x1654] sm:$0xf0]  ;;  %v12009_v50 = vld [vmem:[%s22075_s1 + $0x1748] sm:$0xf]  ;;  %v11754_v53 = vor.u32 %v14156_v19, %v11753_v61 }
 0x2bb   :  { %7579 = vmatpush.bf16.msrb.mxu2 %v11914_v23  ;;  %v14220_v23 = vld [vmem:[%s22075_s1 + $0x1754] sm:$0xf0]  ;;  %v11882_v22 = vor.u32 %v14188_v57, %v11881_v15  ;;  %v11609_v62 = vld [vmem:[%s22075_s1 + $0x1428] sm:$0xf]  ;;  %v19351_v6 = vadd.f32 %v7319_v8, %v7306_v63 }
 0x2bc   :  { %7593 = vmatpush.bf16.msrb.mxu3 %v12042_v49  ;;  %v7279_v49 = vpop.f32.mrf.mxu0  ;;  %v14120_v13 = vld [vmem:[%s22075_s1 + $0x1434] sm:$0xf0]  ;;  %v11737_v12 = vld [vmem:[%s22075_s1 + $0x1528] sm:$0xf] }
 0x2bd   :  { %7552 = vmatpush.bf16.msrb.mxu0 %v11642_v42  ;;  %v7280_v29 = vadd.f32 %v7279_v49, %v1086_v30  ;;  %v7293_v42 = vpop.f32.mrf.mxu1  ;;  %v12010_v30 = vor.u32 %v14220_v23, %v12009_v50  ;;  %v14184_v14 = vld [vmem:[%s22075_s1 + $0x1634] sm:$0xf0]  ;;  %v11993_v61 = vld [vmem:[%s22075_s1 + $0x1728] sm:$0xf]  ;;  %v11610_v19 = vor.u32 %v14120_v13, %v11609_v62 }
 0x2be   :  { %7566 = vmatpush.bf16.msrb.mxu1 %v11770_v7  ;;  %v14152_v7 = vld [vmem:[%s22075_s1 + $0x1534] sm:$0xf0]  ;;  %v11593_v15 = vld [vmem:[%s22075_s1 + $0x1408] sm:$0xf] }
 0x2bf   :  { %7580 = vmatpush.bf16.msrb.mxu2 %v11898_v27  ;;  %v11865_v27 = vld [vmem:[%s22075_s1 + $0x1628] sm:$0xf]  ;;  %v7294_v18 = vadd.f32 %v7293_v42, %v7280_v29  ;;  %v14116_v57 = vld [vmem:[%s22075_s1 + $0x1414] sm:$0xf0]  ;;  %v11738_v50 = vor.u32 %v14152_v7, %v11737_v12 }
 0x2c0   :  { %7594 = vmatpush.bf16.msrb.mxu3 %v12026_v11  ;;  %v14216_v11 = vld [vmem:[%s22075_s1 + $0x1734] sm:$0xf0]  ;;  %v11866_v23 = vor.u32 %v14184_v14, %v11865_v27  ;;  %v11721_v63 = vld [vmem:[%s22075_s1 + $0x1508] sm:$0xf]  ;;  %v11594_v7 = vor.u32 %v14116_v57, %v11593_v15 }
 0x2c1   :  { %7553 = vmatpush.bf16.msrb.mxu0 %v11626_v52  ;;  %v14148_v13 = vld [vmem:[%s22075_s1 + $0x1514] sm:$0xf0]  ;;  %v11849_v62 = vld [vmem:[%s22075_s1 + $0x1608] sm:$0xf]  ;;  %v11994_v49 = vor.u32 %v14216_v11, %v11993_v61  ;;  %v7321_v11 = vpop.f32.mrf.mxu3 }
 0x2c2   :  { %7567 = vmatpush.bf16.msrb.mxu1 %v11754_v53  ;;  %v14180_v8 = vld [vmem:[%s22075_s1 + $0x1614] sm:$0xf0]  ;;  %v11977_v52 = vld [vmem:[%s22075_s1 + $0x1708] sm:$0xf]  ;;  %v7307_v53 = vpop.f32.mrf.mxu2  ;;  %v11722_v20 = vor.u32 %v14148_v13, %v11721_v63 }
 0x2c3   :  { %7581 = vmatpush.bf16.msrb.mxu2 %v11882_v22  ;;  %v14212_v29 = vld [vmem:[%s22075_s1 + $0x1714] sm:$0xf0]  ;;  %v12217_v22 = vld [vmem:[%s22075_s1 + $0x18e8] sm:$0xf]  ;;  %v11850_v5 = vor.u32 %v14180_v8, %v11849_v62 }
 0x2c4   :  { %7595 = vmatpush.bf16.msrb.mxu3 %v12010_v30  ;;  %v14272_v12 = vld [vmem:[%s22075_s1 + $0x18f4] sm:$0xf0]  ;;  %v12345_v42 = vld [vmem:[%s22075_s1 + $0x19e8] sm:$0xf]  ;;  %v7308_v30 = vadd.f32 %v7307_v53, %v7294_v18  ;;  %v11978_v57 = vor.u32 %v14212_v29, %v11977_v52 }
 0x2c5   :  { %7554 = vmatpush.bf16.msrb.mxu0 %v11610_v19  ;;  %v14304_v27 = vld [vmem:[%s22075_s1 + $0x19f4] sm:$0xf0]  ;;  %v12473_v14 = vld [vmem:[%s22075_s1 + $0x1ae8] sm:$0xf]  ;;  %v12218_v53 = vor.u32 %v14272_v12, %v12217_v22 }
 0x2c6   :  { %v14336_v61 = vld [vmem:[%s22075_s1 + $0x1af4] sm:$0xf0]  ;;  %7568 = vmatpush.bf16.msrb.mxu1 %v11738_v50  ;;  %v12601_v18 = vld [vmem:[%s22075_s1 + $0x1be8] sm:$0xf]  ;;  %v19416_v15 = vadd.f32 %v7321_v11, %v7308_v30  ;;  %v12346_v54 = vor.u32 %v14304_v27, %v12345_v42 }
 0x2c7   :  { %7582 = vmatpush.bf16.msrb.mxu2 %v11866_v23  ;;  %v14368_v19 = vld [vmem:[%s22075_s1 + $0x1bf4] sm:$0xf0]  ;;  %v12474_v45 = vor.u32 %v14336_v61, %v12473_v14  ;;  %v12201_v50 = vld [vmem:[%s22075_s1 + $0x18c8] sm:$0xf] }
 0x2c8   :  { %7596 = vmatpush.bf16.msrb.mxu3 %v11994_v49  ;;  %v14268_v23 = vld [vmem:[%s22075_s1 + $0x18d4] sm:$0xf0]  ;;  %v12329_v63 = vld [vmem:[%s22075_s1 + $0x19c8] sm:$0xf]  ;;  %v12602_v13 = vor.u32 %v14368_v19, %v12601_v18 }
 0x2c9   :  { %7555 = vmatpush.bf16.msrb.mxu0 %v11594_v7  ;;  %v14300_v62 = vld [vmem:[%s22075_s1 + $0x19d4] sm:$0xf0]  ;;  %v12457_v49 = vld [vmem:[%s22075_s1 + $0x1ac8] sm:$0xf]  ;;  %v12202_v22 = vor.u32 %v14268_v23, %v12201_v50 }
 0x2ca   :  { %v14332_v8 = vld [vmem:[%s22075_s1 + $0x1ad4] sm:$0xf0]  ;;  %7569 = vmatpush.bf16.msrb.mxu1 %v11722_v20  ;;  %v12585_v52 = vld [vmem:[%s22075_s1 + $0x1bc8] sm:$0xf]  ;;  %v12330_v12 = vor.u32 %v14300_v62, %v12329_v63 }
 0x2cb   :  { %7583 = vmatpush.bf16.msrb.mxu2 %v11850_v5  ;;  %v14364_v29 = vld [vmem:[%s22075_s1 + $0x1bd4] sm:$0xf0]  ;;  %v12458_v42 = vor.u32 %v14332_v8, %v12457_v49  ;;  %v12185_v20 = vld [vmem:[%s22075_s1 + $0x18a8] sm:$0xf]  ;;  %v7333_v49 = vpop.f32.mrf.mxu0 }
 0x2cc   :  { %7597 = vmatpush.bf16.msrb.mxu3 %v11978_v57  ;;  %v14264_v5 = vld [vmem:[%s22075_s1 + $0x18b4] sm:$0xf0]  ;;  %v12313_v30 = vld [vmem:[%s22075_s1 + $0x19a8] sm:$0xf]  ;;  %7556 = vmatmul.bf16.vlgmr.msrb.gmra.mxu0 %v16034_v26  ;;  %v12586_v7 = vor.u32 %v14364_v29, %v12585_v52  ;;  %v7334_v29 = vadd.f32 %v7333_v49, %v19351_v6 }
 0x2cd   :  { %7604 = vmatpush.bf16.msra.mxu0 %v12218_v53  ;;  %v14328_v27 = vld [vmem:[%s22075_s1 + $0x1ab4] sm:$0xf0]  ;;  %7570 = vmatmul.bf16.vlgmr.msrb.gmra.mxu1 %v16047_v34  ;;  %v12569_v14 = vld [vmem:[%s22075_s1 + $0x1ba8] sm:$0xf]  ;;  %v12186_v11 = vor.u32 %v14264_v5, %v12185_v20  ;;  %v7347_v20 = vpop.f32.mrf.mxu1 }
 0x2ce   :  { %7618 = vmatpush.bf16.msra.mxu1 %v12346_v54  ;;  %v12441_v54 = vld [vmem:[%s22075_s1 + $0x1aa8] sm:$0xf]  ;;  %7584 = vmatmul.bf16.vlgmr.msrb.gmra.mxu2 %v16045_v33  ;;  %v14360_v61 = vld [vmem:[%s22075_s1 + $0x1bb4] sm:$0xf0] }
 0x2cf   :  { %7632 = vmatpush.bf16.msra.mxu2 %v12474_v45  ;;  %v14296_v45 = vld [vmem:[%s22075_s1 + $0x19b4] sm:$0xf0]  ;;  %7598 = vmatmul.bf16.vlgmr.msrb.gmra.mxu3 %v16057_v48  ;;  %v12442_v19 = vor.u32 %v14328_v27, %v12441_v54  ;;  %v12169_v57 = vld [vmem:[%s22075_s1 + $0x1888] sm:$0xf]  ;;  %v12570_v23 = vor.u32 %v14360_v61, %v12569_v14 }
 0x2d0   :  { %7646 = vmatpush.bf16.msra.mxu3 %v12602_v13  ;;  %v12314_v18 = vor.u32 %v14296_v45, %v12313_v30  ;;  %v14260_v53 = vld [vmem:[%s22075_s1 + $0x1894] sm:$0xf0]  ;;  %v12297_v50 = vld [vmem:[%s22075_s1 + $0x1988] sm:$0xf]  ;;  %v7348_v45 = vadd.f32 %v7347_v20, %v7334_v29 }
 0x2d1   :  { %7605 = vmatpush.bf16.msra.mxu0 %v12202_v22  ;;  %v14292_v63 = vld [vmem:[%s22075_s1 + $0x1994] sm:$0xf0]  ;;  %v12425_v13 = vld [vmem:[%s22075_s1 + $0x1a88] sm:$0xf]  ;;  %v12170_v22 = vor.u32 %v14260_v53, %v12169_v57 }
 0x2d2   :  { %7619 = vmatpush.bf16.msra.mxu1 %v12330_v12  ;;  %v14324_v62 = vld [vmem:[%s22075_s1 + $0x1a94] sm:$0xf0]  ;;  %v12553_v8 = vld [vmem:[%s22075_s1 + $0x1b88] sm:$0xf]  ;;  %v12298_v12 = vor.u32 %v14292_v63, %v12297_v50 }
 0x2d3   :  { %7633 = vmatpush.bf16.msra.mxu2 %v12458_v42  ;;  %v14356_v52 = vld [vmem:[%s22075_s1 + $0x1b94] sm:$0xf0]  ;;  %v12426_v42 = vor.u32 %v14324_v62, %v12425_v13  ;;  %v12153_v5 = vld [vmem:[%s22075_s1 + $0x1868] sm:$0xf]  ;;  %v7361_v13 = vpop.f32.mrf.mxu2 }
 0x2d4   :  { %7647 = vmatpush.bf16.msra.mxu3 %v12586_v7  ;;  %v14256_v30 = vld [vmem:[%s22075_s1 + $0x1874] sm:$0xf0]  ;;  %v12281_v7 = vld [vmem:[%s22075_s1 + $0x1968] sm:$0xf]  ;;  %v12554_v6 = vor.u32 %v14356_v52, %v12553_v8  ;;  %v7362_v52 = vadd.f32 %v7361_v13, %v7348_v45 }
 0x2d5   :  { %7606 = vmatpush.bf16.msra.mxu0 %v12186_v11  ;;  %v14288_v54 = vld [vmem:[%s22075_s1 + $0x1974] sm:$0xf0]  ;;  %v12409_v27 = vld [vmem:[%s22075_s1 + $0x1a68] sm:$0xf] }
 0x2d6   :  { %7620 = vmatpush.bf16.msra.mxu1 %v12314_v18  ;;  %v14320_v14 = vld [vmem:[%s22075_s1 + $0x1a74] sm:$0xf0]  ;;  %v12537_v61 = vld [vmem:[%s22075_s1 + $0x1b68] sm:$0xf]  ;;  %v12154_v18 = vor.u32 %v14256_v30, %v12153_v5 }
 0x2d7   :  { %7634 = vmatpush.bf16.msra.mxu2 %v12442_v19  ;;  %v14352_v11 = vld [vmem:[%s22075_s1 + $0x1b74] sm:$0xf0]  ;;  %v12282_v19 = vor.u32 %v14288_v54, %v12281_v7  ;;  %v12410_v57 = vor.u32 %v14320_v14, %v12409_v27  ;;  %v12137_v53 = vld [vmem:[%s22075_s1 + $0x1848] sm:$0xf] }
 0x2d8   :  { %7648 = vmatpush.bf16.msra.mxu3 %v12570_v23  ;;  %v14252_v50 = vld [vmem:[%s22075_s1 + $0x1854] sm:$0xf0]  ;;  %v12265_v23 = vld [vmem:[%s22075_s1 + $0x1948] sm:$0xf]  ;;  %v12538_v63 = vor.u32 %v14352_v11, %v12537_v61 }
 0x2d9   :  { %7607 = vmatpush.bf16.msra.mxu0 %v12170_v22  ;;  %v14284_v62 = vld [vmem:[%s22075_s1 + $0x1954] sm:$0xf0]  ;;  %v12393_v49 = vld [vmem:[%s22075_s1 + $0x1a48] sm:$0xf] }
 0x2da   :  { %7621 = vmatpush.bf16.msra.mxu1 %v12298_v12  ;;  %v14316_v8 = vld [vmem:[%s22075_s1 + $0x1a54] sm:$0xf0]  ;;  %v12521_v29 = vld [vmem:[%s22075_s1 + $0x1b48] sm:$0xf]  ;;  %v7375_v12 = vpop.f32.mrf.mxu3  ;;  %v12266_v5 = vor.u32 %v14284_v62, %v12265_v23 }
 0x2db   :  { %7635 = vmatpush.bf16.msra.mxu2 %v12426_v42  ;;  %v14348_v22 = vld [vmem:[%s22075_s1 + $0x1b54] sm:$0xf0]  ;;  %v12138_v42 = vor.u32 %v14252_v50, %v12137_v53  ;;  %v19543_v20 = vadd.f32 %v7375_v12, %v7362_v52  ;;  %v12394_v30 = vor.u32 %v14316_v8, %v12393_v49  ;;  %v12121_v7 = vld [vmem:[%s22075_s1 + $0x1828] sm:$0xf] }
 0x2dc   :  { %7649 = vmatpush.bf16.msra.mxu3 %v12554_v6  ;;  %v14248_v6 = vld [vmem:[%s22075_s1 + $0x1834] sm:$0xf0]  ;;  %v12249_v45 = vld [vmem:[%s22075_s1 + $0x1928] sm:$0xf]  ;;  %v12522_v54 = vor.u32 %v14348_v22, %v12521_v29 }
 0x2dd   :  { %7608 = vmatpush.bf16.msra.mxu0 %v12154_v18  ;;  %v14280_v27 = vld [vmem:[%s22075_s1 + $0x1934] sm:$0xf0]  ;;  %v12377_v14 = vld [vmem:[%s22075_s1 + $0x1a28] sm:$0xf] }
 0x2de   :  { %7622 = vmatpush.bf16.msra.mxu1 %v12282_v19  ;;  %v14312_v61 = vld [vmem:[%s22075_s1 + $0x1a34] sm:$0xf0]  ;;  %v12505_v11 = vld [vmem:[%s22075_s1 + $0x1b28] sm:$0xf]  ;;  %v12122_v19 = vor.u32 %v14248_v6, %v12121_v7  ;;  %v12250_v50 = vor.u32 %v14280_v27, %v12249_v45 }
 0x2df   :  { %7636 = vmatpush.bf16.msra.mxu2 %v12410_v57  ;;  %v14344_v18 = vld [vmem:[%s22075_s1 + $0x1b34] sm:$0xf0]  ;;  %v12105_v57 = vld [vmem:[%s22075_s1 + $0x1808] sm:$0xf]  ;;  %v12378_v23 = vor.u32 %v14312_v61, %v12377_v14 }
 0x2e0   :  { %7650 = vmatpush.bf16.msra.mxu3 %v12538_v63  ;;  %v14244_v53 = vld [vmem:[%s22075_s1 + $0x1814] sm:$0xf0]  ;;  %v12233_v63 = vld [vmem:[%s22075_s1 + $0x1908] sm:$0xf]  ;;  %v12506_v49 = vor.u32 %v14344_v18, %v12505_v11 }
 0x2e1   :  { %7609 = vmatpush.bf16.msra.mxu0 %v12138_v42  ;;  %v14276_v13 = vld [vmem:[%s22075_s1 + $0x1914] sm:$0xf0]  ;;  %v12361_v62 = vld [vmem:[%s22075_s1 + $0x1a08] sm:$0xf] }
 0x2e2   :  { %7623 = vmatpush.bf16.msra.mxu1 %v12266_v5  ;;  %v14308_v8 = vld [vmem:[%s22075_s1 + $0x1a14] sm:$0xf0]  ;;  %v12489_v52 = vld [vmem:[%s22075_s1 + $0x1b08] sm:$0xf]  ;;  %v12106_v5 = vor.u32 %v14244_v53, %v12105_v57  ;;  %v12234_v45 = vor.u32 %v14276_v13, %v12233_v63 }
 0x2e3   :  { %7637 = vmatpush.bf16.msra.mxu2 %v12394_v30  ;;  %v14340_v29 = vld [vmem:[%s22075_s1 + $0x1b14] sm:$0xf0]  ;;  %v12729_v22 = vld [vmem:[%s22075_s1 + $0x1ce8] sm:$0xf] }
 0x2e4   :  { %7651 = vmatpush.bf16.msra.mxu3 %v12522_v54  ;;  %v14400_v12 = vld [vmem:[%s22075_s1 + $0x1cf4] sm:$0xf0]  ;;  %v12857_v42 = vld [vmem:[%s22075_s1 + $0x1de8] sm:$0xf]  ;;  %v12362_v54 = vor.u32 %v14308_v8, %v12361_v62  ;;  %v12490_v61 = vor.u32 %v14340_v29, %v12489_v52 }
 0x2e5   :  { %7610 = vmatpush.bf16.msra.mxu0 %v12122_v19  ;;  %v14432_v30 = vld [vmem:[%s22075_s1 + $0x1df4] sm:$0xf0]  ;;  %v12985_v7 = vld [vmem:[%s22075_s1 + $0x1ee8] sm:$0xf]  ;;  %v12730_v11 = vor.u32 %v14400_v12, %v12729_v22 }
 0x2e6   :  { %v14464_v6 = vld [vmem:[%s22075_s1 + $0x1ef4] sm:$0xf0]  ;;  %7624 = vmatpush.bf16.msra.mxu1 %v12250_v50  ;;  %v13113_v27 = vld [vmem:[%s22075_s1 + $0x1fe8] sm:$0xf]  ;;  %v12858_v18 = vor.u32 %v14432_v30, %v12857_v42 }
 0x2e7   :  { %7638 = vmatpush.bf16.msra.mxu2 %v12378_v23  ;;  %v14496_v14 = vld [vmem:[%s22075_s1 + $0x1ff4] sm:$0xf0]  ;;  %v12986_v19 = vor.u32 %v14464_v6, %v12985_v7  ;;  %v12713_v57 = vld [vmem:[%s22075_s1 + $0x1cc8] sm:$0xf] }
 0x2e8   :  { %7652 = vmatpush.bf16.msra.mxu3 %v12506_v49  ;;  %v14396_v53 = vld [vmem:[%s22075_s1 + $0x1cd4] sm:$0xf0]  ;;  %v12841_v50 = vld [vmem:[%s22075_s1 + $0x1dc8] sm:$0xf]  ;;  %v13114_v23 = vor.u32 %v14496_v14, %v13113_v27 }
 0x2e9   :  { %7611 = vmatpush.bf16.msra.mxu0 %v12106_v5  ;;  %v14428_v63 = vld [vmem:[%s22075_s1 + $0x1dd4] sm:$0xf0]  ;;  %v12969_v13 = vld [vmem:[%s22075_s1 + $0x1ec8] sm:$0xf]  ;;  %v12714_v52 = vor.u32 %v14396_v53, %v12713_v57 }
 0x2ea   :  { %v14460_v62 = vld [vmem:[%s22075_s1 + $0x1ed4] sm:$0xf0]  ;;  %7625 = vmatpush.bf16.msra.mxu1 %v12234_v45  ;;  %v13097_v49 = vld [vmem:[%s22075_s1 + $0x1fc8] sm:$0xf]  ;;  %v12842_v29 = vor.u32 %v14428_v63, %v12841_v50 }
 0x2eb   :  { %7639 = vmatpush.bf16.msra.mxu2 %v12362_v54  ;;  %v14492_v8 = vld [vmem:[%s22075_s1 + $0x1fd4] sm:$0xf0]  ;;  %v12970_v22 = vor.u32 %v14460_v62, %v12969_v13  ;;  %v12697_v12 = vld [vmem:[%s22075_s1 + $0x1ca8] sm:$0xf] }
 0x2ec   :  { %7653 = vmatpush.bf16.msra.mxu3 %v12490_v61  ;;  %v14392_v42 = vld [vmem:[%s22075_s1 + $0x1cb4] sm:$0xf0]  ;;  %v12825_v5 = vld [vmem:[%s22075_s1 + $0x1da8] sm:$0xf]  ;;  %7612 = vmatmul.bf16.vlgmr.msra.gmra.mxu0 %v16271_v59  ;;  %v13098_v30 = vor.u32 %v14492_v8, %v13097_v49 }
 0x2ed   :  { %7660 = vmatpush.bf16.msrb.mxu0 %v12730_v11  ;;  %v14424_v7 = vld [vmem:[%s22075_s1 + $0x1db4] sm:$0xf0]  ;;  %v12953_v6 = vld [vmem:[%s22075_s1 + $0x1ea8] sm:$0xf]  ;;  %7626 = vmatmul.bf16.vlgmr.msra.gmra.mxu1 %v16286_v3  ;;  %v12698_v14 = vor.u32 %v14392_v42, %v12697_v12 }
 0x2ee   :  { %7674 = vmatpush.bf16.msrb.mxu1 %v12858_v18  ;;  %v14456_v45 = vld [vmem:[%s22075_s1 + $0x1eb4] sm:$0xf0]  ;;  %7640 = vmatmul.bf16.vlgmr.msra.gmra.mxu2 %v16284_v2  ;;  %v13081_v54 = vld [vmem:[%s22075_s1 + $0x1fa8] sm:$0xf]  ;;  %v12826_v61 = vor.u32 %v14424_v7, %v12825_v5 }
 0x2ef   :  { %7688 = vmatpush.bf16.msrb.mxu2 %v12986_v19  ;;  %v14488_v27 = vld [vmem:[%s22075_s1 + $0x1fb4] sm:$0xf0]  ;;  %7654 = vmatmul.bf16.vlgmr.msra.gmra.mxu3 %v16296_v9  ;;  %v12954_v11 = vor.u32 %v14456_v45, %v12953_v6  ;;  %v12681_v18 = vld [vmem:[%s22075_s1 + $0x1c88] sm:$0xf] }
 0x2f0   :  { %7702 = vmatpush.bf16.msrb.mxu3 %v13114_v23  ;;  %v14388_v19 = vld [vmem:[%s22075_s1 + $0x1c94] sm:$0xf0]  ;;  %v12809_v57 = vld [vmem:[%s22075_s1 + $0x1d88] sm:$0xf]  ;;  %v13082_v53 = vor.u32 %v14488_v27, %v13081_v54 }
 0x2f1   :  { %7661 = vmatpush.bf16.msrb.mxu0 %v12714_v52  ;;  %v14420_v50 = vld [vmem:[%s22075_s1 + $0x1d94] sm:$0xf0]  ;;  %v12937_v23 = vld [vmem:[%s22075_s1 + $0x1e88] sm:$0xf]  ;;  %v12682_v49 = vor.u32 %v14388_v19, %v12681_v18 }
 0x2f2   :  { %7675 = vmatpush.bf16.msrb.mxu1 %v12842_v29  ;;  %v14452_v63 = vld [vmem:[%s22075_s1 + $0x1e94] sm:$0xf0]  ;;  %v13065_v13 = vld [vmem:[%s22075_s1 + $0x1f88] sm:$0xf]  ;;  %v12810_v8 = vor.u32 %v14420_v50, %v12809_v57 }
 0x2f3   :  { %7689 = vmatpush.bf16.msrb.mxu2 %v12970_v22  ;;  %v14484_v62 = vld [vmem:[%s22075_s1 + $0x1f94] sm:$0xf0]  ;;  %v12938_v52 = vor.u32 %v14452_v63, %v12937_v23  ;;  %v12665_v29 = vld [vmem:[%s22075_s1 + $0x1c68] sm:$0xf] }
 0x2f4   :  { %7703 = vmatpush.bf16.msrb.mxu3 %v13098_v30  ;;  %v14384_v22 = vld [vmem:[%s22075_s1 + $0x1c74] sm:$0xf0]  ;;  %v12793_v12 = vld [vmem:[%s22075_s1 + $0x1d68] sm:$0xf]  ;;  %v13066_v42 = vor.u32 %v14484_v62, %v13065_v13 }
 0x2f5   :  { %7662 = vmatpush.bf16.msrb.mxu0 %v12698_v14  ;;  %v14416_v5 = vld [vmem:[%s22075_s1 + $0x1d74] sm:$0xf0]  ;;  %v12921_v30 = vld [vmem:[%s22075_s1 + $0x1e68] sm:$0xf]  ;;  %v12666_v54 = vor.u32 %v14384_v22, %v12665_v29 }
 0x2f6   :  { %7676 = vmatpush.bf16.msrb.mxu1 %v12826_v61  ;;  %v14448_v7 = vld [vmem:[%s22075_s1 + $0x1e74] sm:$0xf0]  ;;  %v13049_v6 = vld [vmem:[%s22075_s1 + $0x1f68] sm:$0xf]  ;;  %v12794_v27 = vor.u32 %v14416_v5, %v12793_v12 }
 0x2f7   :  { %7690 = vmatpush.bf16.msrb.mxu2 %v12954_v11  ;;  %v14480_v45 = vld [vmem:[%s22075_s1 + $0x1f74] sm:$0xf0]  ;;  %v12922_v14 = vor.u32 %v14448_v7, %v12921_v30  ;;  %v12649_v61 = vld [vmem:[%s22075_s1 + $0x1c48] sm:$0xf] }
 0x2f8   :  { %7704 = vmatpush.bf16.msrb.mxu3 %v13082_v53  ;;  %v14380_v11 = vld [vmem:[%s22075_s1 + $0x1c54] sm:$0xf0]  ;;  %v12777_v18 = vld [vmem:[%s22075_s1 + $0x1d48] sm:$0xf]  ;;  %v13050_v19 = vor.u32 %v14480_v45, %v13049_v6 }
 0x2f9   :  { %7663 = vmatpush.bf16.msrb.mxu0 %v12682_v49  ;;  %v14412_v57 = vld [vmem:[%s22075_s1 + $0x1d54] sm:$0xf0]  ;;  %v12905_v53 = vld [vmem:[%s22075_s1 + $0x1e48] sm:$0xf]  ;;  %v12650_v13 = vor.u32 %v14380_v11, %v12649_v61 }
 0x2fa   :  { %7677 = vmatpush.bf16.msrb.mxu1 %v12810_v8  ;;  %v14444_v50 = vld [vmem:[%s22075_s1 + $0x1e54] sm:$0xf0]  ;;  %v13033_v23 = vld [vmem:[%s22075_s1 + $0x1f48] sm:$0xf]  ;;  %v12778_v62 = vor.u32 %v14412_v57, %v12777_v18 }
 0x2fb   :  { %7691 = vmatpush.bf16.msrb.mxu2 %v12938_v52  ;;  %v14476_v63 = vld [vmem:[%s22075_s1 + $0x1f54] sm:$0xf0]  ;;  %v12906_v49 = vor.u32 %v14444_v50, %v12905_v53  ;;  %v12633_v8 = vld [vmem:[%s22075_s1 + $0x1c28] sm:$0xf] }
 0x2fc   :  { %7705 = vmatpush.bf16.msrb.mxu3 %v13066_v42  ;;  %v14376_v52 = vld [vmem:[%s22075_s1 + $0x1c34] sm:$0xf0]  ;;  %v12761_v29 = vld [vmem:[%s22075_s1 + $0x1d28] sm:$0xf]  ;;  %v13034_v22 = vor.u32 %v14476_v63, %v13033_v23  ;;  %v13502_v23 = vld [vmem:[%s22075_s1 + $0xec] sm:$0xf] }
 0x2fd   :  { %7664 = vmatpush.bf16.msrb.mxu0 %v12666_v54  ;;  %v14408_v12 = vld [vmem:[%s22075_s1 + $0x1d34] sm:$0xf0]  ;;  %v12889_v42 = vld [vmem:[%s22075_s1 + $0x1e28] sm:$0xf]  ;;  %v12634_v6 = vor.u32 %v14376_v52, %v12633_v8  ;;  %v9147_v63 = vld [vmem:[%s22075_s1 + $0xf8] sm:$0xf0] }
 0x2fe   :  { %7678 = vmatpush.bf16.msrb.mxu1 %v12794_v27  ;;  %v14440_v5 = vld [vmem:[%s22075_s1 + $0x1e34] sm:$0xf0]  ;;  %v13017_v30 = vld [vmem:[%s22075_s1 + $0x1f28] sm:$0xf]  ;;  %v12762_v27 = vor.u32 %v14408_v12, %v12761_v29  ;;  %v13566_v8 = vld [vmem:[%s22075_s1 + $0x2ec] sm:$0xf] }
 0x2ff   :  { %7692 = vmatpush.bf16.msrb.mxu2 %v12922_v14  ;;  %v14472_v7 = vld [vmem:[%s22075_s1 + $0x1f34] sm:$0xf0]  ;;  %v12617_v45 = vld [vmem:[%s22075_s1 + $0x1c08] sm:$0xf]  ;;  %v12890_v14 = vor.u32 %v14440_v5, %v12889_v42  ;;  %v9403_v52 = vld [vmem:[%s22075_s1 + $0x2f8] sm:$0xf0] }
 0x300   :  { %7706 = vmatpush.bf16.msrb.mxu3 %v13050_v19  ;;  %v14372_v54 = vld [vmem:[%s22075_s1 + $0x1c14] sm:$0xf0]  ;;  %v12745_v61 = vld [vmem:[%s22075_s1 + $0x1d08] sm:$0xf]  ;;  %v13018_v19 = vor.u32 %v14472_v7, %v13017_v30  ;;  %v13598_v12 = vld [vmem:[%s22075_s1 + $0x3ec] sm:$0xf]  ;;  %v9150_v30 = vor.u32 %v13502_v23, %v9147_v63 }
 0x301   :  { %7665 = vmatpush.bf16.msrb.mxu0 %v12650_v13  ;;  %v14404_v11 = vld [vmem:[%s22075_s1 + $0x1d14] sm:$0xf0]  ;;  %v12873_v18 = vld [vmem:[%s22075_s1 + $0x1e08] sm:$0xf]  ;;  %v13534_v13 = vld [vmem:[%s22075_s1 + $0x1ec] sm:$0xf] }
 0x302   :  { %7679 = vmatpush.bf16.msrb.mxu1 %v12778_v62  ;;  %v14436_v57 = vld [vmem:[%s22075_s1 + $0x1e14] sm:$0xf0]  ;;  %v13001_v53 = vld [vmem:[%s22075_s1 + $0x1f08] sm:$0xf]  ;;  %v12618_v62 = vor.u32 %v14372_v54, %v12617_v45  ;;  %v12746_v29 = vor.u32 %v14404_v11, %v12745_v61  ;;  %v9531_v42 = vld [vmem:[%s22075_s1 + $0x3f8] sm:$0xf0] }
 0x303   :  { %7693 = vmatpush.bf16.msrb.mxu2 %v12906_v49  ;;  %v14468_v50 = vld [vmem:[%s22075_s1 + $0x1f14] sm:$0xf0]  ;;  %v9275_v49 = vld [vmem:[%s22075_s1 + $0x1f8] sm:$0xf0]  ;;  %v13498_v45 = vld [vmem:[%s22075_s1 + $0xcc] sm:$0xf] }
 0x304   :  { %7707 = vmatpush.bf16.msrb.mxu3 %v13034_v22  ;;  %v12874_v22 = vor.u32 %v14436_v57, %v12873_v18  ;;  %v13002_v5 = vor.u32 %v14468_v50, %v13001_v53  ;;  %v9278_v7 = vor.u32 %v13534_v13, %v9275_v49  ;;  %v9131_v54 = vld [vmem:[%s22075_s1 + $0xd8] sm:$0xf0]  ;;  %v13562_v11 = vld [vmem:[%s22075_s1 + $0x2cc] sm:$0xf] }
 0x305   :  { %7666 = vmatpush.bf16.msrb.mxu0 %v12634_v6  ;;  %v9406_v6 = vor.u32 %v13566_v8, %v9403_v52  ;;  %v9259_v61 = vld [vmem:[%s22075_s1 + $0x1d8] sm:$0xf0]  ;;  %v9134_v53 = vor.u32 %v13498_v45, %v9131_v54  ;;  %v13494_v63 = vld [vmem:[%s22075_s1 + $0xac] sm:$0xf] }
 0x306   :  { %7680 = vmatpush.bf16.msrb.mxu1 %v12762_v27  ;;  %v13530_v27 = vld [vmem:[%s22075_s1 + $0x1cc] sm:$0xf]  ;;  %v9387_v18 = vld [vmem:[%s22075_s1 + $0x2d8] sm:$0xf0] }
 0x307   :  { %7694 = vmatpush.bf16.msrb.mxu2 %v12890_v14  ;;  %v9534_v14 = vor.u32 %v13598_v12, %v9531_v42  ;;  %v9515_v57 = vld [vmem:[%s22075_s1 + $0x3d8] sm:$0xf0]  ;;  %v9262_v50 = vor.u32 %v13530_v27, %v9259_v61  ;;  %v9390_v23 = vor.u32 %v13562_v11, %v9387_v18  ;;  %v13558_v52 = vld [vmem:[%s22075_s1 + $0x2ac] sm:$0xf] }
 0x308   :  { %7708 = vmatpush.bf16.msrb.mxu3 %v13018_v19  ;;  %v13594_v19 = vld [vmem:[%s22075_s1 + $0x3cc] sm:$0xf]  ;;  %v9115_v13 = vld [vmem:[%s22075_s1 + $0xb8] sm:$0xf0] }
 0x309   :  { %7667 = vmatpush.bf16.msrb.mxu0 %v12618_v62  ;;  %v13526_v62 = vld [vmem:[%s22075_s1 + $0x1ac] sm:$0xf]  ;;  %v9518_v49 = vor.u32 %v13594_v19, %v9515_v57  ;;  %v9243_v8 = vld [vmem:[%s22075_s1 + $0x1b8] sm:$0xf0]  ;;  %v9118_v42 = vor.u32 %v13494_v63, %v9115_v13 }
 0x30a   :  { %7681 = vmatpush.bf16.msrb.mxu1 %v12746_v29  ;;  %v9371_v29 = vld [vmem:[%s22075_s1 + $0x2b8] sm:$0xf0]  ;;  %v13522_v45 = vld [vmem:[%s22075_s1 + $0x18c] sm:$0xf] }
 0x30b   :  { %7695 = vmatpush.bf16.msrb.mxu2 %v12874_v22  ;;  %v13590_v22 = vld [vmem:[%s22075_s1 + $0x3ac] sm:$0xf]  ;;  %v9499_v12 = vld [vmem:[%s22075_s1 + $0x3b8] sm:$0xf0] }
 0x30c   :  { %7709 = vmatpush.bf16.msrb.mxu3 %v13002_v5  ;;  %7668 = vmatmul.bf16.vlgmr.msrb.gmra.mxu0 %v16510_v16  ;;  %v9246_v5 = vor.u32 %v13526_v62, %v9243_v8  ;;  %v9502_v54 = vor.u32 %v13590_v22, %v9499_v12  ;;  %v9227_v27 = vld [vmem:[%s22075_s1 + $0x198] sm:$0xf0]  ;;  %v13586_v11 = vld [vmem:[%s22075_s1 + $0x38c] sm:$0xf] }
 0x30d   :  { %7716 = vmatpush.bf16.msra.mxu0 %v9150_v30  ;;  %7682 = vmatmul.bf16.vlgmr.msrb.gmra.mxu1 %v16525_v25  ;;  %v9374_v30 = vor.u32 %v13558_v52, %v9371_v29  ;;  %v9355_v61 = vld [vmem:[%s22075_s1 + $0x298] sm:$0xf0]  ;;  %v9230_v57 = vor.u32 %v13522_v45, %v9227_v27  ;;  %v13518_v63 = vld [vmem:[%s22075_s1 + $0x16c] sm:$0xf] }
 0x30e   :  { %7730 = vmatpush.bf16.msra.mxu1 %v9278_v7  ;;  %7696 = vmatmul.bf16.vlgmr.msrb.gmra.mxu2 %v16523_v24  ;;  %v13490_v7 = vld [vmem:[%s22075_s1 + $0x8c] sm:$0xf]  ;;  %v9483_v18 = vld [vmem:[%s22075_s1 + $0x398] sm:$0xf0] }
 0x30f   :  { %7744 = vmatpush.bf16.msra.mxu2 %v9406_v6  ;;  %7710 = vmatmul.bf16.vlgmr.msrb.gmra.mxu3 %v16535_v37  ;;  %v9099_v6 = vld [vmem:[%s22075_s1 + $0x98] sm:$0xf0]  ;;  %v9486_v13 = vor.u32 %v13586_v11, %v9483_v18  ;;  %v13582_v52 = vld [vmem:[%s22075_s1 + $0x36c] sm:$0xf] }
 0x310   :  { %7758 = vmatpush.bf16.msra.mxu3 %v9534_v14  ;;  %v13554_v14 = vld [vmem:[%s22075_s1 + $0x28c] sm:$0xf]  ;;  %v9102_v19 = vor.u32 %v13490_v7, %v9099_v6  ;;  %v9211_v62 = vld [vmem:[%s22075_s1 + $0x178] sm:$0xf0] }
 0x311   :  { %7717 = vmatpush.bf16.msra.mxu0 %v9134_v53  ;;  %v9358_v53 = vor.u32 %v13554_v14, %v9355_v61  ;;  %v9339_v8 = vld [vmem:[%s22075_s1 + $0x278] sm:$0xf0]  ;;  %v9214_v12 = vor.u32 %v13518_v63, %v9211_v62  ;;  %v13514_v7 = vld [vmem:[%s22075_s1 + $0x14c] sm:$0xf] }
 0x312   :  { %7731 = vmatpush.bf16.msra.mxu1 %v9262_v50  ;;  %v13486_v50 = vld [vmem:[%s22075_s1 + $0x6c] sm:$0xf]  ;;  %v9467_v29 = vld [vmem:[%s22075_s1 + $0x378] sm:$0xf0] }
 0x313   :  { %7745 = vmatpush.bf16.msra.mxu2 %v9390_v23  ;;  %v9083_v23 = vld [vmem:[%s22075_s1 + $0x78] sm:$0xf0]  ;;  %v9470_v6 = vor.u32 %v13582_v52, %v9467_v29  ;;  %v13578_v14 = vld [vmem:[%s22075_s1 + $0x34c] sm:$0xf] }
 0x314   :  { %7759 = vmatpush.bf16.msra.mxu3 %v9518_v49  ;;  %v13550_v49 = vld [vmem:[%s22075_s1 + $0x26c] sm:$0xf]  ;;  %v9086_v22 = vor.u32 %v13486_v50, %v9083_v23  ;;  %v9195_v45 = vld [vmem:[%s22075_s1 + $0x158] sm:$0xf0] }
 0x315   :  { %7718 = vmatpush.bf16.msra.mxu0 %v9118_v42  ;;  %v9342_v42 = vor.u32 %v13550_v49, %v9339_v8  ;;  %v9323_v27 = vld [vmem:[%s22075_s1 + $0x258] sm:$0xf0]  ;;  %v9198_v18 = vor.u32 %v13514_v7, %v9195_v45  ;;  %v13510_v50 = vld [vmem:[%s22075_s1 + $0x12c] sm:$0xf] }
 0x316   :  { %7732 = vmatpush.bf16.msra.mxu1 %v9246_v5  ;;  %v13482_v5 = vld [vmem:[%s22075_s1 + $0x4c] sm:$0xf]  ;;  %v9451_v61 = vld [vmem:[%s22075_s1 + $0x358] sm:$0xf0] }
 0x317   :  { %7746 = vmatpush.bf16.msra.mxu2 %v9374_v30  ;;  %v9067_v30 = vld [vmem:[%s22075_s1 + $0x58] sm:$0xf0]  ;;  %v9454_v23 = vor.u32 %v13578_v14, %v9451_v61  ;;  %v13574_v49 = vld [vmem:[%s22075_s1 + $0x32c] sm:$0xf] }
 0x318   :  { %7760 = vmatpush.bf16.msra.mxu3 %v9502_v54  ;;  %v13546_v54 = vld [vmem:[%s22075_s1 + $0x24c] sm:$0xf]  ;;  %v9070_v11 = vor.u32 %v13482_v5, %v9067_v30  ;;  %v9179_v63 = vld [vmem:[%s22075_s1 + $0x138] sm:$0xf0] }
 0x319   :  { %7719 = vmatpush.bf16.msra.mxu0 %v9102_v19  ;;  %v9326_v19 = vor.u32 %v13546_v54, %v9323_v27  ;;  %v9307_v62 = vld [vmem:[%s22075_s1 + $0x238] sm:$0xf0]  ;;  %v13474_v29 = vld [vmem:[%s22075_s1 + $0xc] sm:$0xf] }
 0x31a   :  { %7733 = vmatpush.bf16.msra.mxu1 %v9230_v57  ;;  %v13478_v57 = vld [vmem:[%s22075_s1 + $0x2c] sm:$0xf]  ;;  %v9435_v8 = vld [vmem:[%s22075_s1 + $0x338] sm:$0xf0] }
 0x31b   :  { %7747 = vmatpush.bf16.msra.mxu2 %v9358_v53  ;;  %v9051_v53 = vld [vmem:[%s22075_s1 + $0x38] sm:$0xf0]  ;;  %v13506_v5 = vld [vmem:[%s22075_s1 + $0x10c] sm:$0xf] }
 0x31c   :  { %7761 = vmatpush.bf16.msra.mxu3 %v9486_v13  ;;  %v13542_v13 = vld [vmem:[%s22075_s1 + $0x22c] sm:$0xf]  ;;  %v9054_v52 = vor.u32 %v13478_v57, %v9051_v53  ;;  %v9163_v30 = vld [vmem:[%s22075_s1 + $0x118] sm:$0xf0] }
 0x31d   :  { %7720 = vmatpush.bf16.msra.mxu0 %v9086_v22  ;;  %v9035_v22 = vld [vmem:[%s22075_s1 + $0x18] sm:$0xf0]  ;;  %v13538_v7 = vld [vmem:[%s22075_s1 + $0x20c] sm:$0xf] }
 0x31e   :  { %7734 = vmatpush.bf16.msra.mxu1 %v9214_v12  ;;  %v9182_v12 = vor.u32 %v13510_v50, %v9179_v63  ;;  %v9291_v45 = vld [vmem:[%s22075_s1 + $0x218] sm:$0xf0]  ;;  %v13570_v54 = vld [vmem:[%s22075_s1 + $0x30c] sm:$0xf]  ;;  %v9166_v50 = vor.u32 %v13506_v5, %v9163_v30 }
 0x31f   :  { %7748 = vmatpush.bf16.msra.mxu2 %v9342_v42  ;;  %v9310_v42 = vor.u32 %v13542_v13, %v9307_v62  ;;  %v9419_v27 = vld [vmem:[%s22075_s1 + $0x318] sm:$0xf0]  ;;  %v13630_v14 = vld [vmem:[%s22075_s1 + $0x4ec] sm:$0xf] }
 0x320   :  { %7762 = vmatpush.bf16.msra.mxu3 %v9470_v6  ;;  %v9438_v6 = vor.u32 %v13574_v49, %v9435_v8  ;;  %v9659_v61 = vld [vmem:[%s22075_s1 + $0x4f8] sm:$0xf0]  ;;  %v13694_v57 = vld [vmem:[%s22075_s1 + $0x6ec] sm:$0xf]  ;;  %v9422_v62 = vor.u32 %v13570_v54, %v9419_v27  ;;  %v20035_v27 = vpop.f32.mrf.mxu1 }
 0x321   :  { %7721 = vmatpush.bf16.msra.mxu0 %v9070_v11  ;;  %v13662_v11 = vld [vmem:[%s22075_s1 + $0x5ec] sm:$0xf]  ;;  %v9915_v53 = vld [vmem:[%s22075_s1 + $0x6f8] sm:$0xf0]  ;;  %v9662_v49 = vor.u32 %v13630_v14, %v9659_v61 }
 0x322   :  { %7735 = vmatpush.bf16.msra.mxu1 %v9198_v18  ;;  %v9038_v18 = vor.u32 %v13474_v29, %v9035_v22  ;;  %v13726_v63 = vld [vmem:[%s22075_s1 + $0x7ec] sm:$0xf]  ;;  %v10043_v13 = vld [vmem:[%s22075_s1 + $0x7f8] sm:$0xf0] }
 0x323   :  { %7749 = vmatpush.bf16.msra.mxu2 %v9326_v19  ;;  %v9787_v19 = vld [vmem:[%s22075_s1 + $0x5f8] sm:$0xf0]  ;;  %v13626_v29 = vld [vmem:[%s22075_s1 + $0x4cc] sm:$0xf] }
 0x324   :  { %7763 = vmatpush.bf16.msra.mxu3 %v9454_v23  ;;  %v9294_v23 = vor.u32 %v13538_v7, %v9291_v45  ;;  %v9790_v8 = vor.u32 %v13662_v11, %v9787_v19  ;;  %v9643_v22 = vld [vmem:[%s22075_s1 + $0x4d8] sm:$0xf0]  ;;  %v13690_v30 = vld [vmem:[%s22075_s1 + $0x6cc] sm:$0xf] }
 0x325   :  { %7722 = vmatpush.bf16.msra.mxu0 %v9054_v52  ;;  %v9918_v52 = vor.u32 %v13694_v57, %v9915_v53  ;;  %v9771_v5 = vld [vmem:[%s22075_s1 + $0x5d8] sm:$0xf0]  ;;  %v13722_v45 = vld [vmem:[%s22075_s1 + $0x7cc] sm:$0xf]  ;;  %v9646_v14 = vor.u32 %v13626_v29, %v9643_v22 }
 0x326   :  { %7736 = vmatpush.bf16.msra.mxu1 %v9182_v12  ;;  %v13658_v12 = vld [vmem:[%s22075_s1 + $0x5cc] sm:$0xf]  ;;  %v9899_v7 = vld [vmem:[%s22075_s1 + $0x6d8] sm:$0xf0] }
 0x327   :  { %7750 = vmatpush.bf16.msra.mxu2 %v9310_v42  ;;  %v10046_v42 = vor.u32 %v13726_v63, %v10043_v13  ;;  %v10027_v54 = vld [vmem:[%s22075_s1 + $0x7d8] sm:$0xf0]  ;;  %v9774_v61 = vor.u32 %v13658_v12, %v9771_v5  ;;  %v9902_v11 = vor.u32 %v13690_v30, %v9899_v7  ;;  %v13654_v57 = vld [vmem:[%s22075_s1 + $0x5ac] sm:$0xf]  ;;  %v20085_v5 = vpop.f32.mrf.mxu3 }
 0x328   :  { %7764 = vmatpush.bf16.msra.mxu3 %v9438_v6  ;;  %v20027_v6 = vpop.f32.mrf.mxu0  ;;  %v9627_v19 = vld [vmem:[%s22075_s1 + $0x4b8] sm:$0xf0]  ;;  %v10030_v53 = vor.u32 %v13722_v45, %v10027_v54  ;;  %v13718_v13 = vld [vmem:[%s22075_s1 + $0x7ac] sm:$0xf]  ;;  %v20095_v54 = vpop.f32.mrf.mxu1 }
 0x329   :  { %7723 = vmatpush.bf16.msra.mxu0 %v9038_v18  ;;  %v13622_v18 = vld [vmem:[%s22075_s1 + $0x4ac] sm:$0xf]  ;;  %v9883_v63 = vld [vmem:[%s22075_s1 + $0x6b8] sm:$0xf0] }
 0x32a   :  { %7737 = vmatpush.bf16.msra.mxu1 %v9166_v50  ;;  %v9755_v50 = vld [vmem:[%s22075_s1 + $0x5b8] sm:$0xf0]  ;;  %v13682_v12 = vld [vmem:[%s22075_s1 + $0x68c] sm:$0xf] }
 0x32b   :  { %7751 = vmatpush.bf16.msra.mxu2 %v9294_v23  ;;  %v13686_v23 = vld [vmem:[%s22075_s1 + $0x6ac] sm:$0xf]  ;;  %v9611_v29 = vld [vmem:[%s22075_s1 + $0x498] sm:$0xf0] }
 0x32c   :  { %7765 = vmatpush.bf16.msra.mxu3 %v9422_v62  ;;  %7724 = vmatmul.bf16.vlgmr.msra.gmra.mxu0 %v14888_v58  ;;  %v10011_v62 = vld [vmem:[%s22075_s1 + $0x7b8] sm:$0xf0]  ;;  %v9886_v58 = vor.u32 %v13686_v23, %v9883_v63  ;;  %v13714_v7 = vld [vmem:[%s22075_s1 + $0x78c] sm:$0xf] }
 0x32d   :  { %7772 = vmatpush.bf16.msrb.mxu0 %v9662_v49  ;;  %7738 = vmatmul.bf16.vlgmr.msra.gmra.mxu1 %v14924_v10  ;;  %v9630_v49 = vor.u32 %v13622_v18, %v9627_v19  ;;  %v20074_v10 = vpop.f32.mrf.mxu2  ;;  %v9739_v22 = vld [vmem:[%s22075_s1 + $0x598] sm:$0xf0]  ;;  %v13614_v18 = vld [vmem:[%s22075_s1 + $0x46c] sm:$0xf] }
 0x32e   :  { %7786 = vmatpush.bf16.msrb.mxu1 %v9790_v8  ;;  %7752 = vmatmul.bf16.vlgmr.msra.gmra.mxu2 %v14902_v1  ;;  %v9758_v8 = vor.u32 %v13654_v57, %v9755_v50  ;;  %v13650_v1 = vld [vmem:[%s22075_s1 + $0x58c] sm:$0xf]  ;;  %v9995_v45 = vld [vmem:[%s22075_s1 + $0x798] sm:$0xf0] }
 0x32f   :  { %7800 = vmatpush.bf16.msrb.mxu2 %v9918_v52  ;;  %7766 = vmatmul.bf16.vlgmr.msra.gmra.mxu3 %v14938_v17  ;;  %v13618_v52 = vld [vmem:[%s22075_s1 + $0x48c] sm:$0xf]  ;;  %v10014_v17 = vor.u32 %v13718_v13, %v10011_v62  ;;  %v9595_v19 = vld [vmem:[%s22075_s1 + $0x478] sm:$0xf0] }
 0x330   :  { %7814 = vmatpush.bf16.msrb.mxu3 %v10046_v42  ;;  %v9867_v42 = vld [vmem:[%s22075_s1 + $0x698] sm:$0xf0]  ;;  %v20087_v30 = vpop.f32.mrf.mxu0  ;;  %v13646_v57 = vld [vmem:[%s22075_s1 + $0x56c] sm:$0xf] }
 0x331   :  { %7773 = vmatpush.bf16.msrb.mxu0 %v9646_v14  ;;  %v9614_v14 = vor.u32 %v13618_v52, %v9611_v29  ;;  %v9723_v50 = vld [vmem:[%s22075_s1 + $0x578] sm:$0xf0]  ;;  %v13678_v23 = vld [vmem:[%s22075_s1 + $0x66c] sm:$0xf] }
 0x332   :  { %7787 = vmatpush.bf16.msrb.mxu1 %v9774_v61  ;;  %v9742_v61 = vor.u32 %v13650_v1, %v9739_v22  ;;  %v9851_v63 = vld [vmem:[%s22075_s1 + $0x678] sm:$0xf0]  ;;  %v13710_v13 = vld [vmem:[%s22075_s1 + $0x76c] sm:$0xf] }
 0x333   :  { %7801 = vmatpush.bf16.msrb.mxu2 %v9902_v11  ;;  %v9870_v11 = vor.u32 %v13682_v12, %v9867_v42  ;;  %v9979_v62 = vld [vmem:[%s22075_s1 + $0x778] sm:$0xf0]  ;;  %v13610_v52 = vld [vmem:[%s22075_s1 + $0x44c] sm:$0xf] }
 0x334   :  { %7815 = vmatpush.bf16.msrb.mxu3 %v10030_v53  ;;  %v9998_v53 = vor.u32 %v13714_v7, %v9995_v45  ;;  %v9579_v29 = vld [vmem:[%s22075_s1 + $0x458] sm:$0xf0]  ;;  %v13642_v1 = vld [vmem:[%s22075_s1 + $0x54c] sm:$0xf]  ;;  %v9982_v22 = vor.u32 %v13710_v13, %v9979_v62  ;;  %v20141_v45 = vpop.f32.mrf.mxu3 }
 0x335   :  { %7774 = vmatpush.bf16.msrb.mxu0 %v9630_v49  ;;  %v9598_v49 = vor.u32 %v13614_v18, %v9595_v19  ;;  %v9707_v12 = vld [vmem:[%s22075_s1 + $0x558] sm:$0xf0]  ;;  %v13674_v42 = vld [vmem:[%s22075_s1 + $0x64c] sm:$0xf] }
 0x336   :  { %7788 = vmatpush.bf16.msrb.mxu1 %v9758_v8  ;;  %v9726_v8 = vor.u32 %v13646_v57, %v9723_v50  ;;  %v9835_v7 = vld [vmem:[%s22075_s1 + $0x658] sm:$0xf0]  ;;  %v9710_v19 = vor.u32 %v13642_v1, %v9707_v12  ;;  %v13602_v1 = vld [vmem:[%s22075_s1 + $0x40c] sm:$0xf] }
 0x337   :  { %7802 = vmatpush.bf16.msrb.mxu2 %v9886_v58  ;;  %v9854_v58 = vor.u32 %v13678_v23, %v9851_v63  ;;  %v9838_v57 = vor.u32 %v13674_v42, %v9835_v7  ;;  %v9563_v50 = vld [vmem:[%s22075_s1 + $0x438] sm:$0xf0]  ;;  %v13638_v23 = vld [vmem:[%s22075_s1 + $0x52c] sm:$0xf]  ;;  %v20160_v63 = vpop.f32.mrf.mxu1 }
 0x338   :  { %7816 = vmatpush.bf16.msrb.mxu3 %v10014_v17  ;;  %v20130_v17 = vpop.f32.mrf.mxu2  ;;  %v20149_v18 = vpop.f32.mrf.mxu0  ;;  %v9691_v62 = vld [vmem:[%s22075_s1 + $0x538] sm:$0xf0]  ;;  %v13634_v7 = vld [vmem:[%s22075_s1 + $0x50c] sm:$0xf] }
 0x339   :  { %7775 = vmatpush.bf16.msrb.mxu0 %v9614_v14  ;;  %v13706_v14 = vld [vmem:[%s22075_s1 + $0x74c] sm:$0xf]  ;;  %v9694_v12 = vor.u32 %v13638_v23, %v9691_v62  ;;  %v10171_v23 = vld [vmem:[%s22075_s1 + $0x8f8] sm:$0xf0] }
 0x33a   :  { %7789 = vmatpush.bf16.msrb.mxu1 %v9742_v61  ;;  %v9963_v61 = vld [vmem:[%s22075_s1 + $0x758] sm:$0xf0] }
 0x33b   :  { %7803 = vmatpush.bf16.msrb.mxu2 %v9870_v11  ;;  %v9582_v11 = vor.u32 %v13610_v52, %v9579_v29  ;;  %v9966_v13 = vor.u32 %v13706_v14, %v9963_v61  ;;  %v9947_v52 = vld [vmem:[%s22075_s1 + $0x738] sm:$0xf0]  ;;  %v13666_v61 = vld [vmem:[%s22075_s1 + $0x60c] sm:$0xf] }
 0x33c   :  { %7817 = vmatpush.bf16.msrb.mxu3 %v9998_v53  ;;  %v13606_v53 = vld [vmem:[%s22075_s1 + $0x42c] sm:$0xf]  ;;  %v9675_v14 = vld [vmem:[%s22075_s1 + $0x518] sm:$0xf0]  ;;  %v20221_v37 = vpop.f32.mrf.mxu3 }
 0x33d   :  { %7776 = vmatpush.bf16.msrb.mxu0 %v9598_v49  ;;  %v13670_v49 = vld [vmem:[%s22075_s1 + $0x62c] sm:$0xf]  ;;  %v9566_v29 = vor.u32 %v13606_v53, %v9563_v50  ;;  %v9931_v53 = vld [vmem:[%s22075_s1 + $0x718] sm:$0xf0] }
 0x33e   :  { %7790 = vmatpush.bf16.msrb.mxu1 %v9726_v8  ;;  %v9819_v8 = vld [vmem:[%s22075_s1 + $0x638] sm:$0xf0]  ;;  %v13758_v50 = vld [vmem:[%s22075_s1 + $0x8ec] sm:$0xf] }
 0x33f   :  { %7804 = vmatpush.bf16.msrb.mxu2 %v9854_v58  ;;  %v13702_v58 = vld [vmem:[%s22075_s1 + $0x72c] sm:$0xf]  ;;  %v9822_v42 = vor.u32 %v13670_v49, %v9819_v8  ;;  %v10299_v8 = vld [vmem:[%s22075_s1 + $0x9f8] sm:$0xf0]  ;;  %v20231_v16 = vpop.f32.mrf.mxu1  ;;  %v10174_v3 = vor.u32 %v13758_v50, %v10171_v23 }
 0x340   :  { %7818 = vmatpush.bf16.msrb.mxu3 %v9982_v22  ;;  %v9547_v22 = vld [vmem:[%s22075_s1 + $0x418] sm:$0xf0]  ;;  %v20210_v62 = vpop.f32.mrf.mxu2  ;;  %v20223_v24 = vpop.f32.mrf.mxu0 }
 0x341   :  { %7777 = vmatpush.bf16.msrb.mxu0 %v9582_v11  ;;  %v9950_v11 = vor.u32 %v13702_v58, %v9947_v52  ;;  %v9550_v49 = vor.u32 %v13602_v1, %v9547_v22  ;;  %v13822_v58 = vld [vmem:[%s22075_s1 + $0xaec] sm:$0xf]  ;;  %v10427_v52 = vld [vmem:[%s22075_s1 + $0xaf8] sm:$0xf0] }
 0x342   :  { %7791 = vmatpush.bf16.msrb.mxu1 %v9710_v19  ;;  %v9803_v19 = vld [vmem:[%s22075_s1 + $0x618] sm:$0xf0]  ;;  %v13854_v22 = vld [vmem:[%s22075_s1 + $0xbec] sm:$0xf]  ;;  %v10430_v59 = vor.u32 %v13822_v58, %v10427_v52 }
 0x343   :  { %7805 = vmatpush.bf16.msrb.mxu2 %v9838_v57  ;;  %v13698_v57 = vld [vmem:[%s22075_s1 + $0x70c] sm:$0xf]  ;;  %v9806_v1 = vor.u32 %v13666_v61, %v9803_v19  ;;  %v10555_v25 = vld [vmem:[%s22075_s1 + $0xbf8] sm:$0xf0] }
 0x344   :  { %7819 = vmatpush.bf16.msrb.mxu3 %v9966_v13  ;;  %v13790_v13 = vld [vmem:[%s22075_s1 + $0x9ec] sm:$0xf]  ;;  %v9934_v9 = vor.u32 %v13698_v57, %v9931_v53  ;;  %v10283_v61 = vld [vmem:[%s22075_s1 + $0x9d8] sm:$0xf0]  ;;  %v20278_v52 = vpop.f32.mrf.mxu3 }
 0x345   :  { %7778 = vmatpush.bf16.msrb.mxu0 %v9566_v29  ;;  %v9678_v29 = vor.u32 %v13634_v7, %v9675_v14  ;;  %v10302_v2 = vor.u32 %v13790_v13, %v10299_v8  ;;  %v13786_v7 = vld [vmem:[%s22075_s1 + $0x9cc] sm:$0xf]  ;;  %v10558_v14 = vor.u32 %v13854_v22, %v10555_v25  ;;  %v10411_v19 = vld [vmem:[%s22075_s1 + $0xad8] sm:$0xf0]  ;;  %v7336_v22 = vadd.f32 %v20027_v6, %v19416_v15 }
 0x346   :  { %7792 = vmatpush.bf16.msrb.mxu1 %v9694_v12  ;;  %v13754_v12 = vld [vmem:[%s22075_s1 + $0x8cc] sm:$0xf]  ;;  %v10539_v25 = vld [vmem:[%s22075_s1 + $0xbd8] sm:$0xf0]  ;;  %v10286_v50 = vor.u32 %v13786_v7, %v10283_v61 }
 0x347   :  { %7806 = vmatpush.bf16.msrb.mxu2 %v9822_v42  ;;  %v10155_v42 = vld [vmem:[%s22075_s1 + $0x8d8] sm:$0xf0]  ;;  %v13850_v57 = vld [vmem:[%s22075_s1 + $0xbcc] sm:$0xf] }
 0x348   :  { %7820 = vmatpush.bf16.msrb.mxu3 %v9950_v11  ;;  %v13818_v11 = vld [vmem:[%s22075_s1 + $0xacc] sm:$0xf]  ;;  %v10158_v53 = vor.u32 %v13754_v12, %v10155_v42  ;;  %v20266_v58 = vpop.f32.mrf.mxu2  ;;  %v20291_v12 = vpop.f32.mrf.mxu0  ;;  %v10123_v7 = vld [vmem:[%s22075_s1 + $0x898] sm:$0xf0] }
 0x349   :  { %7779 = vmatpush.bf16.msrb.mxu0 %v9550_v49  ;;  %v10414_v23 = vor.u32 %v13818_v11, %v10411_v19  ;;  %v13750_v13 = vld [vmem:[%s22075_s1 + $0x8ac] sm:$0xf]  ;;  %v10139_v49 = vld [vmem:[%s22075_s1 + $0x8b8] sm:$0xf0] }
 0x34a   :  { %7793 = vmatpush.bf16.msrb.mxu1 %v9678_v29  ;;  %v13782_v8 = vld [vmem:[%s22075_s1 + $0x9ac] sm:$0xf]  ;;  %v10523_v29 = vld [vmem:[%s22075_s1 + $0xbb8] sm:$0xf0] }
 0x34b   :  { %7807 = vmatpush.bf16.msrb.mxu2 %v9806_v1  ;;  %v10142_v1 = vor.u32 %v13750_v13, %v10139_v49  ;;  %v13746_v42 = vld [vmem:[%s22075_s1 + $0x88c] sm:$0xf]  ;;  %v10251_v6 = vld [vmem:[%s22075_s1 + $0x998] sm:$0xf0] }
 0x34c   :  { %7821 = vmatpush.bf16.msrb.mxu3 %v9934_v9  ;;  %7780 = vmatmul.bf16.vlgmr.msrb.gmra.mxu0 %v15110_v39  ;;  %v10395_v9 = vld [vmem:[%s22075_s1 + $0xab8] sm:$0xf0]  ;;  %v13846_v39 = vld [vmem:[%s22075_s1 + $0xbac] sm:$0xf] }
 0x34d   :  { %7828 = vmatpush.bf16.msra.mxu0 %v10174_v3  ;;  %v13814_v3 = vld [vmem:[%s22075_s1 + $0xaac] sm:$0xf]  ;;  %7794 = vmatmul.bf16.vlgmr.msrb.gmra.mxu1 %v15123_v44  ;;  %v10526_v15 = vor.u32 %v13846_v39, %v10523_v29  ;;  %v10379_v11 = vld [vmem:[%s22075_s1 + $0xa98] sm:$0xf0] }
 0x34e   :  { %7842 = vmatpush.bf16.msra.mxu1 %v10302_v2  ;;  %v10267_v2 = vld [vmem:[%s22075_s1 + $0x9b8] sm:$0xf0]  ;;  %7808 = vmatmul.bf16.vlgmr.msrb.gmra.mxu2 %v15121_v43  ;;  %v10398_v44 = vor.u32 %v13814_v3, %v10395_v9  ;;  %v13810_v61 = vld [vmem:[%s22075_s1 + $0xa8c] sm:$0xf] }
 0x34f   :  { %7856 = vmatpush.bf16.msra.mxu2 %v10430_v59  ;;  %v10542_v59 = vor.u32 %v13850_v57, %v10539_v25  ;;  %7822 = vmatmul.bf16.vlgmr.msrb.gmra.mxu3 %v15131_v47  ;;  %v10270_v43 = vor.u32 %v13782_v8, %v10267_v2  ;;  %v13778_v47 = vld [vmem:[%s22075_s1 + $0x98c] sm:$0xf]  ;;  %v10507_v57 = vld [vmem:[%s22075_s1 + $0xb98] sm:$0xf0]  ;;  %v10126_v25 = vor.u32 %v13746_v42, %v10123_v7 }
 0x350   :  { %7870 = vmatpush.bf16.msra.mxu3 %v10558_v14  ;;  %v20302_v14 = vpop.f32.mrf.mxu1  ;;  %v13842_v19 = vld [vmem:[%s22075_s1 + $0xb8c] sm:$0xf]  ;;  %v10107_v49 = vld [vmem:[%s22075_s1 + $0x878] sm:$0xf0]  ;;  %v20351_v42 = vpop.f32.mrf.mxu0 }
 0x351   :  { %7829 = vmatpush.bf16.msra.mxu0 %v10158_v53  ;;  %v7350_v53 = vadd.f32 %v20035_v27, %v7336_v22  ;;  %v13742_v13 = vld [vmem:[%s22075_s1 + $0x86c] sm:$0xf]  ;;  %v10235_v27 = vld [vmem:[%s22075_s1 + $0x978] sm:$0xf0]  ;;  %v20347_v22 = vpop.f32.mrf.mxu2 }
 0x352   :  { %7843 = vmatpush.bf16.msra.mxu1 %v10286_v50  ;;  %v10254_v50 = vor.u32 %v13778_v47, %v10251_v6  ;;  %v13774_v8 = vld [vmem:[%s22075_s1 + $0x96c] sm:$0xf]  ;;  %v10363_v3 = vld [vmem:[%s22075_s1 + $0xa78] sm:$0xf0] }
 0x353   :  { %7857 = vmatpush.bf16.msra.mxu2 %v10414_v23  ;;  %v10382_v23 = vor.u32 %v13810_v61, %v10379_v11  ;;  %v13806_v2 = vld [vmem:[%s22075_s1 + $0xa6c] sm:$0xf]  ;;  %v7364_v9 = vadd.f32 %v20074_v10, %v7350_v53  ;;  %v10491_v29 = vld [vmem:[%s22075_s1 + $0xb78] sm:$0xf0]  ;;  %v10238_v10 = vor.u32 %v13774_v8, %v10235_v27 }
 0x354   :  { %7871 = vmatpush.bf16.msra.mxu3 %v10542_v59  ;;  %v10510_v59 = vor.u32 %v13842_v19, %v10507_v57  ;;  %v13838_v39 = vld [vmem:[%s22075_s1 + $0xb6c] sm:$0xf]  ;;  %v10366_v7 = vor.u32 %v13806_v2, %v10363_v3  ;;  %v10219_v61 = vld [vmem:[%s22075_s1 + $0x958] sm:$0xf0] }
 0x355   :  { %7830 = vmatpush.bf16.msra.mxu0 %v10142_v1  ;;  %v7390_v1 = vadd.f32 %v20087_v30, %v19543_v20  ;;  %v13738_v47 = vld [vmem:[%s22075_s1 + $0x84c] sm:$0xf]  ;;  %v10091_v20 = vld [vmem:[%s22075_s1 + $0x858] sm:$0xf0]  ;;  %v10494_v6 = vor.u32 %v13838_v39, %v10491_v29  ;;  %v7378_v57 = vadd.f32 %v20085_v5, %v7364_v9 }
 0x356   :  { %7844 = vmatpush.bf16.msra.mxu1 %v10270_v43  ;;  %v10110_v43 = vor.u32 %v13742_v13, %v10107_v49  ;;  %v13770_v30 = vld [vmem:[%s22075_s1 + $0x94c] sm:$0xf]  ;;  %v10347_v19 = vld [vmem:[%s22075_s1 + $0xa58] sm:$0xf0] }
 0x357   :  { %7858 = vmatpush.bf16.msra.mxu2 %v10398_v44  ;;  %v20349_v44 = vpop.f32.mrf.mxu3  ;;  %v13802_v11 = vld [vmem:[%s22075_s1 + $0xa4c] sm:$0xf]  ;;  %v10475_v53 = vld [vmem:[%s22075_s1 + $0xb58] sm:$0xf0]  ;;  %v7392_v13 = vadd.f32 %v20149_v18, %v7378_v57  ;;  %v10222_v49 = vor.u32 %v13770_v30, %v10219_v61 }
 0x358   :  { %7872 = vmatpush.bf16.msra.mxu3 %v10526_v15  ;;  %v20362_v15 = vpop.f32.mrf.mxu1  ;;  %v10350_v8 = vor.u32 %v13802_v11, %v10347_v19  ;;  %v13734_v5 = vld [vmem:[%s22075_s1 + $0x82c] sm:$0xf]  ;;  %v10203_v2 = vld [vmem:[%s22075_s1 + $0x938] sm:$0xf0] }
 0x359   :  { %7831 = vmatpush.bf16.msra.mxu0 %v10126_v25  ;;  %v13834_v25 = vld [vmem:[%s22075_s1 + $0xb4c] sm:$0xf]  ;;  %v10331_v9 = vld [vmem:[%s22075_s1 + $0xa38] sm:$0xf0]  ;;  %v20407_v29 = vpop.f32.mrf.mxu2 }
 0x35a   :  { %7845 = vmatpush.bf16.msra.mxu1 %v10254_v50  ;;  %v7404_v50 = vadd.f32 %v20095_v54, %v7390_v1  ;;  %v13766_v54 = vld [vmem:[%s22075_s1 + $0x92c] sm:$0xf]  ;;  %v10478_v18 = vor.u32 %v13834_v25, %v10475_v53  ;;  %v10187_v61 = vld [vmem:[%s22075_s1 + $0x918] sm:$0xf0] }
 0x35b   :  { %7859 = vmatpush.bf16.msra.mxu2 %v10382_v23  ;;  %v10094_v23 = vor.u32 %v13738_v47, %v10091_v20  ;;  %v13798_v3 = vld [vmem:[%s22075_s1 + $0xa2c] sm:$0xf]  ;;  %v10206_v20 = vor.u32 %v13766_v54, %v10203_v2  ;;  %v10315_v57 = vld [vmem:[%s22075_s1 + $0xa18] sm:$0xf0] }
 0x35c   :  { %7873 = vmatpush.bf16.msra.mxu3 %v10510_v59  ;;  %v10075_v59 = vld [vmem:[%s22075_s1 + $0x838] sm:$0xf0]  ;;  %v7418_v27 = vadd.f32 %v20130_v17, %v7404_v50  ;;  %v13830_v39 = vld [vmem:[%s22075_s1 + $0xb2c] sm:$0xf]  ;;  %v10334_v30 = vor.u32 %v13798_v3, %v10331_v9 }
 0x35d   :  { %7832 = vmatpush.bf16.msra.mxu0 %v10110_v43  ;;  %v10459_v17 = vld [vmem:[%s22075_s1 + $0xb38] sm:$0xf0]  ;;  %v10078_v1 = vor.u32 %v13734_v5, %v10075_v59  ;;  %v13730_v43 = vld [vmem:[%s22075_s1 + $0x80c] sm:$0xf] }
 0x35e   :  { %7846 = vmatpush.bf16.msra.mxu1 %v10238_v10  ;;  %v10059_v10 = vld [vmem:[%s22075_s1 + $0x818] sm:$0xf0]  ;;  %v13794_v11 = vld [vmem:[%s22075_s1 + $0xa0c] sm:$0xf]  ;;  %v10462_v19 = vor.u32 %v13830_v39, %v10459_v17 }
 0x35f   :  { %7860 = vmatpush.bf16.msra.mxu2 %v10366_v7  ;;  %v7406_v7 = vadd.f32 %v20160_v63, %v7392_v13  ;;  %v20416_v47 = vpop.f32.mrf.mxu3  ;;  %v7432_v63 = vadd.f32 %v20141_v45, %v7418_v27  ;;  %v13826_v25 = vld [vmem:[%s22075_s1 + $0xb0c] sm:$0xf]  ;;  %v10443_v53 = vld [vmem:[%s22075_s1 + $0xb18] sm:$0xf0] }
 0x360   :  { %7874 = vmatpush.bf16.msra.mxu3 %v10494_v6  ;;  %v13762_v6 = vld [vmem:[%s22075_s1 + $0x90c] sm:$0xf]  ;;  %v10683_v13 = vld [vmem:[%s22075_s1 + $0xcf8] sm:$0xf0]  ;;  %v20450_v5 = vpop.f32.mrf.mxu1  ;;  %v10446_v9 = vor.u32 %v13826_v25, %v10443_v53 }
 0x361   :  { %7833 = vmatpush.bf16.msra.mxu0 %v10094_v23  ;;  %v7420_v50 = vadd.f32 %v20210_v62, %v7406_v7  ;;  %v20438_v23 = vpop.f32.mrf.mxu0  ;;  %v13886_v45 = vld [vmem:[%s22075_s1 + $0xcec] sm:$0xf]  ;;  %v10062_v62 = vor.u32 %v13730_v43, %v10059_v10  ;;  %v10811_v59 = vld [vmem:[%s22075_s1 + $0xdf8] sm:$0xf0]  ;;  %v20495_v25 = vpop.f32.mrf.mxu2 }
 0x362   :  { %7847 = vmatpush.bf16.msra.mxu1 %v10222_v49  ;;  %v13918_v49 = vld [vmem:[%s22075_s1 + $0xdec] sm:$0xf]  ;;  %v10939_v27 = vld [vmem:[%s22075_s1 + $0xef8] sm:$0xf0]  ;;  %v10686_v39 = vor.u32 %v13886_v45, %v10683_v13 }
 0x363   :  { %7861 = vmatpush.bf16.msra.mxu2 %v10350_v8  ;;  %v7446_v8 = vadd.f32 %v20223_v24, %v7432_v63  ;;  %v13950_v54 = vld [vmem:[%s22075_s1 + $0xeec] sm:$0xf]  ;;  %v10318_v24 = vor.u32 %v13794_v11, %v10315_v57  ;;  %v11067_v3 = vld [vmem:[%s22075_s1 + $0xff8] sm:$0xf0]  ;;  %v7434_v17 = vadd.f32 %v20221_v37, %v7420_v50 }
 0x364   :  { %7875 = vmatpush.bf16.msra.mxu3 %v10478_v18  ;;  %v10190_v18 = vor.u32 %v13762_v6, %v10187_v61  ;;  %v13982_v2 = vld [vmem:[%s22075_s1 + $0xfec] sm:$0xf]  ;;  %v10942_v43 = vor.u32 %v13950_v54, %v10939_v27  ;;  %v10667_v7 = vld [vmem:[%s22075_s1 + $0xcd8] sm:$0xf0] }
 0x365   :  { %7834 = vmatpush.bf16.msra.mxu0 %v10078_v1  ;;  %v10814_v1 = vor.u32 %v13918_v49, %v10811_v59  ;;  %v13882_v10 = vld [vmem:[%s22075_s1 + $0xccc] sm:$0xf]  ;;  %v11070_v6 = vor.u32 %v13982_v2, %v11067_v3  ;;  %v10795_v37 = vld [vmem:[%s22075_s1 + $0xdd8] sm:$0xf0]  ;;  %v7448_v63 = vadd.f32 %v20291_v12, %v7434_v17 }
 0x366   :  { %7848 = vmatpush.bf16.msra.mxu1 %v10206_v20  ;;  %v13914_v20 = vld [vmem:[%s22075_s1 + $0xdcc] sm:$0xf]  ;;  %v10923_v11 = vld [vmem:[%s22075_s1 + $0xed8] sm:$0xf0]  ;;  %v10670_v53 = vor.u32 %v13882_v10, %v10667_v7 }
 0x367   :  { %7862 = vmatpush.bf16.msra.mxu2 %v10334_v30  ;;  %v7460_v30 = vadd.f32 %v20231_v16, %v7446_v8  ;;  %v13946_v61 = vld [vmem:[%s22075_s1 + $0xecc] sm:$0xf]  ;;  %v20497_v50 = vpop.f32.mrf.mxu3  ;;  %v10798_v45 = vor.u32 %v13914_v20, %v10795_v37  ;;  %v10779_v54 = vld [vmem:[%s22075_s1 + $0xdb8] sm:$0xf0] }
 0x368   :  { %7876 = vmatpush.bf16.msra.mxu3 %v10462_v19  ;;  %v13978_v16 = vld [vmem:[%s22075_s1 + $0xfcc] sm:$0xf]  ;;  %v11051_v19 = vld [vmem:[%s22075_s1 + $0xfd8] sm:$0xf0]  ;;  %v10926_v13 = vor.u32 %v13946_v61, %v10923_v11 }
 0x369   :  { %7835 = vmatpush.bf16.msra.mxu0 %v10062_v62  ;;  %v7474_v57 = vadd.f32 %v20266_v58, %v7460_v30  ;;  %v20499_v12 = vpop.f32.mrf.mxu0  ;;  %v13878_v49 = vld [vmem:[%s22075_s1 + $0xcac] sm:$0xf]  ;;  %v10651_v58 = vld [vmem:[%s22075_s1 + $0xcb8] sm:$0xf0]  ;;  %v20510_v62 = vpop.f32.mrf.mxu1  ;;  %v11054_v59 = vor.u32 %v13978_v16, %v11051_v19 }
 0x36a   :  { %7849 = vmatpush.bf16.msra.mxu1 %v10190_v18  ;;  %v13910_v8 = vld [vmem:[%s22075_s1 + $0xdac] sm:$0xf]  ;;  %v10907_v18 = vld [vmem:[%s22075_s1 + $0xeb8] sm:$0xf0]  ;;  %v20559_v20 = vpop.f32.mrf.mxu2 }
 0x36b   :  { %7863 = vmatpush.bf16.msra.mxu2 %v10318_v24  ;;  %v13942_v27 = vld [vmem:[%s22075_s1 + $0xeac] sm:$0xf]  ;;  %v7462_v24 = vadd.f32 %v20302_v14, %v7448_v63  ;;  %v11035_v2 = vld [vmem:[%s22075_s1 + $0xfb8] sm:$0xf0]  ;;  %v7488_v3 = vadd.f32 %v20278_v52, %v7474_v57 }
 0x36c   :  { %7877 = vmatpush.bf16.msra.mxu3 %v10446_v9  ;;  %7836 = vmatmul.bf16.vlgmr.msra.gmra.mxu0 %v15338_v31  ;;  %v13974_v31 = vld [vmem:[%s22075_s1 + $0xfac] sm:$0xf]  ;;  %v10654_v9 = vor.u32 %v13878_v49, %v10651_v58  ;;  %v10635_v17 = vld [vmem:[%s22075_s1 + $0xc98] sm:$0xf0] }
 0x36d   :  { %7884 = vmatpush.bf16.msrb.mxu0 %v10686_v39  ;;  %7850 = vmatmul.bf16.vlgmr.msra.gmra.mxu1 %v15351_v36  ;;  %v7476_v14 = vadd.f32 %v20347_v22, %v7462_v24  ;;  %v10910_v36 = vor.u32 %v13942_v27, %v10907_v18  ;;  %v13874_v39 = vld [vmem:[%s22075_s1 + $0xc8c] sm:$0xf]  ;;  %v7502_v52 = vadd.f32 %v20351_v42, %v7488_v3  ;;  %v10891_v10 = vld [vmem:[%s22075_s1 + $0xe98] sm:$0xf0] }
 0x36e   :  { %7898 = vmatpush.bf16.msrb.mxu1 %v10814_v1  ;;  %7864 = vmatmul.bf16.vlgmr.msra.gmra.mxu2 %v15349_v35  ;;  %v10782_v35 = vor.u32 %v13910_v8, %v10779_v54  ;;  %v11038_v22 = vor.u32 %v13974_v31, %v11035_v2  ;;  %v10763_v1 = vld [vmem:[%s22075_s1 + $0xd98] sm:$0xf0]  ;;  %v13970_v7 = vld [vmem:[%s22075_s1 + $0xf8c] sm:$0xf]  ;;  %v10638_v30 = vor.u32 %v13874_v39, %v10635_v17 }
 0x36f   :  { %7912 = vmatpush.bf16.msrb.mxu2 %v10942_v43  ;;  %7878 = vmatmul.bf16.vlgmr.msra.gmra.mxu3 %v15359_v40  ;;  %v13906_v40 = vld [vmem:[%s22075_s1 + $0xd8c] sm:$0xf]  ;;  %v11019_v42 = vld [vmem:[%s22075_s1 + $0xf98] sm:$0xf0]  ;;  %v20562_v37 = vpop.f32.mrf.mxu3 }
 0x370   :  { %7926 = vmatpush.bf16.msrb.mxu3 %v11070_v6  ;;  %v13938_v43 = vld [vmem:[%s22075_s1 + $0xe8c] sm:$0xf]  ;;  %v7490_v6 = vadd.f32 %v20349_v44, %v7476_v14  ;;  %v10766_v61 = vor.u32 %v13906_v40, %v10763_v1  ;;  %v10619_v16 = vld [vmem:[%s22075_s1 + $0xc78] sm:$0xf0]  ;;  %v7516_v44 = vadd.f32 %v20362_v15, %v7502_v52  ;;  %v11022_v57 = vor.u32 %v13970_v7, %v11019_v42 }
 0x371   :  { %7885 = vmatpush.bf16.msrb.mxu0 %v10670_v53  ;;  %v10894_v11 = vor.u32 %v13938_v43, %v10891_v10  ;;  %v13870_v63 = vld [vmem:[%s22075_s1 + $0xc6c] sm:$0xf]  ;;  %v10747_v53 = vld [vmem:[%s22075_s1 + $0xd78] sm:$0xf0]  ;;  %v20584_v58 = vpop.f32.mrf.mxu0  ;;  %v20593_v54 = vpop.f32.mrf.mxu1 }
 0x372   :  { %7899 = vmatpush.bf16.msrb.mxu1 %v10798_v45  ;;  %v13902_v19 = vld [vmem:[%s22075_s1 + $0xd6c] sm:$0xf]  ;;  %v7504_v49 = vadd.f32 %v20438_v23, %v7490_v6  ;;  %v11003_v8 = vld [vmem:[%s22075_s1 + $0xf78] sm:$0xf0]  ;;  %v10622_v27 = vor.u32 %v13870_v63, %v10619_v16  ;;  %v20631_v10 = vpop.f32.mrf.mxu2 }
 0x373   :  { %7913 = vmatpush.bf16.msrb.mxu2 %v10926_v13  ;;  %v13934_v45 = vld [vmem:[%s22075_s1 + $0xe6c] sm:$0xf]  ;;  %v10875_v13 = vld [vmem:[%s22075_s1 + $0xe78] sm:$0xf0]  ;;  %v10750_v18 = vor.u32 %v13902_v19, %v10747_v53 }
 0x374   :  { %7927 = vmatpush.bf16.msrb.mxu3 %v11054_v59  ;;  %v13966_v15 = vld [vmem:[%s22075_s1 + $0xf6c] sm:$0xf]  ;;  %v7530_v59 = vadd.f32 %v20407_v29, %v7516_v44  ;;  %v10878_v23 = vor.u32 %v13934_v45, %v10875_v13  ;;  %v10603_v31 = vld [vmem:[%s22075_s1 + $0xc58] sm:$0xf0] }
 0x375   :  { %7886 = vmatpush.bf16.msrb.mxu0 %v10654_v9  ;;  %v13866_v24 = vld [vmem:[%s22075_s1 + $0xc4c] sm:$0xf]  ;;  %v11006_v2 = vor.u32 %v13966_v15, %v11003_v8  ;;  %v10731_v3 = vld [vmem:[%s22075_s1 + $0xd58] sm:$0xf0] }
 0x376   :  { %7900 = vmatpush.bf16.msrb.mxu1 %v10782_v35  ;;  %v13898_v29 = vld [vmem:[%s22075_s1 + $0xd4c] sm:$0xf]  ;;  %v10859_v14 = vld [vmem:[%s22075_s1 + $0xe58] sm:$0xf0]  ;;  %v7518_v35 = vadd.f32 %v20450_v5, %v7504_v49  ;;  %v7544_v17 = vadd.f32 %v20416_v47, %v7530_v59  ;;  %v10606_v40 = vor.u32 %v13866_v24, %v10603_v31 }
 0x377   :  { %7914 = vmatpush.bf16.msrb.mxu2 %v10910_v36  ;;  %v13930_v9 = vld [vmem:[%s22075_s1 + $0xe4c] sm:$0xf]  ;;  %v10987_v39 = vld [vmem:[%s22075_s1 + $0xf58] sm:$0xf0] }
 0x378   :  { %7928 = vmatpush.bf16.msrb.mxu3 %v11038_v22  ;;  %v13962_v36 = vld [vmem:[%s22075_s1 + $0xf4c] sm:$0xf]  ;;  %v7532_v52 = vadd.f32 %v20495_v25, %v7518_v35  ;;  %v10734_v22 = vor.u32 %v13898_v29, %v10731_v3  ;;  %v10862_v1 = vor.u32 %v13930_v9, %v10859_v14  ;;  %v10587_v43 = vld [vmem:[%s22075_s1 + $0xc38] sm:$0xf0]  ;;  %v7558_v6 = vadd.f32 %v20499_v12, %v7544_v17 }
 0x379   :  { %7887 = vmatpush.bf16.msrb.mxu0 %v10638_v30  ;;  %v13862_v5 = vld [vmem:[%s22075_s1 + $0xc2c] sm:$0xf]  ;;  %v10990_v25 = vor.u32 %v13962_v36, %v10987_v39  ;;  %v10715_v7 = vld [vmem:[%s22075_s1 + $0xd38] sm:$0xf0]  ;;  %v20653_v19 = vpop.f32.mrf.mxu1 }
 0x37a   :  { %7901 = vmatpush.bf16.msrb.mxu1 %v10766_v61  ;;  %v13894_v47 = vld [vmem:[%s22075_s1 + $0xd2c] sm:$0xf]  ;;  %v10843_v30 = vld [vmem:[%s22075_s1 + $0xe38] sm:$0xf0]  ;;  %v20643_v61 = vpop.f32.mrf.mxu3  ;;  %v10590_v44 = vor.u32 %v13862_v5, %v10587_v43  ;;  %v7546_v53 = vadd.f32 %v20497_v50, %v7532_v52 }
 0x37b   :  { %7915 = vmatpush.bf16.msrb.mxu2 %v10894_v11  ;;  %v13926_v42 = vld [vmem:[%s22075_s1 + $0xe2c] sm:$0xf]  ;;  %v20645_v11 = vpop.f32.mrf.mxu0  ;;  %v10971_v16 = vld [vmem:[%s22075_s1 + $0xf38] sm:$0xf0]  ;;  %v10718_v45 = vor.u32 %v13894_v47, %v10715_v7 }
 0x37c   :  { %7929 = vmatpush.bf16.msrb.mxu3 %v11022_v57  ;;  %v13958_v63 = vld [vmem:[%s22075_s1 + $0xf2c] sm:$0xf]  ;;  %v10571_v57 = vld [vmem:[%s22075_s1 + $0xc18] sm:$0xf0]  ;;  %v10846_v13 = vor.u32 %v13926_v42, %v10843_v30  ;;  %v7560_v24 = vadd.f32 %v20584_v58, %v7546_v53 }
 0x37d   :  { %7888 = vmatpush.bf16.msrb.mxu0 %v10622_v27  ;;  %v13858_v12 = vld [vmem:[%s22075_s1 + $0xc0c] sm:$0xf]  ;;  %v10699_v15 = vld [vmem:[%s22075_s1 + $0xd18] sm:$0xf0]  ;;  %v10974_v59 = vor.u32 %v13958_v63, %v10971_v16 }
 0x37e   :  { %7902 = vmatpush.bf16.msrb.mxu1 %v10750_v18  ;;  %v13890_v49 = vld [vmem:[%s22075_s1 + $0xd0c] sm:$0xf]  ;;  %v10827_v50 = vld [vmem:[%s22075_s1 + $0xe18] sm:$0xf0]  ;;  %v10574_v3 = vor.u32 %v13858_v12, %v10571_v57 }
 0x37f   :  { %7916 = vmatpush.bf16.msrb.mxu2 %v10878_v23  ;;  %v13922_v8 = vld [vmem:[%s22075_s1 + $0xe0c] sm:$0xf]  ;;  %v10955_v18 = vld [vmem:[%s22075_s1 + $0xf18] sm:$0xf0]  ;;  %v7572_v23 = vadd.f32 %v20510_v62, %v7558_v6  ;;  %v10702_v35 = vor.u32 %v13890_v49, %v10699_v15 }
 0x380   :  { %7930 = vmatpush.bf16.msrb.mxu3 %v11006_v2  ;;  %v13954_v27 = vld [vmem:[%s22075_s1 + $0xf0c] sm:$0xf]  ;;  %v11195_v29 = vld [vmem:[%s22075_s1 + $0x10f8] sm:$0xf0]  ;;  %v10830_v36 = vor.u32 %v13922_v8, %v10827_v50 }
 0x381   :  { %7889 = vmatpush.bf16.msrb.mxu0 %v10606_v40  ;;  %v14014_v31 = vld [vmem:[%s22075_s1 + $0x10ec] sm:$0xf]  ;;  %v11323_v62 = vld [vmem:[%s22075_s1 + $0x11f8] sm:$0xf0]  ;;  %v7586_v14 = vadd.f32 %v20559_v20, %v7572_v23  ;;  %v20707_v40 = vpop.f32.mrf.mxu2  ;;  %v10958_v52 = vor.u32 %v13954_v27, %v10955_v18  ;;  %v7629_v53 = vpop.f32.mrf.mxu1 }
 0x382   :  { %7903 = vmatpush.bf16.msrb.mxu1 %v10734_v22  ;;  %v14046_v2 = vld [vmem:[%s22075_s1 + $0x11ec] sm:$0xf]  ;;  %v11451_v9 = vld [vmem:[%s22075_s1 + $0x12f8] sm:$0xf0]  ;;  %v11198_v22 = vor.u32 %v14014_v31, %v11195_v29  ;;  %v20710_v20 = vpop.f32.mrf.mxu3 }
 0x383   :  { %7917 = vmatpush.bf16.msrb.mxu2 %v10862_v1  ;;  %v14078_v58 = vld [vmem:[%s22075_s1 + $0x12ec] sm:$0xf]  ;;  %v11579_v17 = vld [vmem:[%s22075_s1 + $0x13f8] sm:$0xf0]  ;;  %v7574_v1 = vadd.f32 %v20593_v54, %v7560_v24  ;;  %v11326_v5 = vor.u32 %v14046_v2, %v11323_v62  ;;  %v7600_v63 = vadd.f32 %v20562_v37, %v7586_v14 }
 0x384   :  { %7931 = vmatpush.bf16.msrb.mxu3 %v10990_v25  ;;  %v14110_v39 = vld [vmem:[%s22075_s1 + $0x13ec] sm:$0xf]  ;;  %v11454_v43 = vor.u32 %v14078_v58, %v11451_v9  ;;  %v11179_v25 = vld [vmem:[%s22075_s1 + $0x10d8] sm:$0xf0] }
 0x385   :  { %7890 = vmatpush.bf16.msrb.mxu0 %v10590_v44  ;;  %v14010_v47 = vld [vmem:[%s22075_s1 + $0x10cc] sm:$0xf]  ;;  %v11582_v42 = vor.u32 %v14110_v39, %v11579_v17  ;;  %v11307_v54 = vld [vmem:[%s22075_s1 + $0x11d8] sm:$0xf0]  ;;  %v7588_v16 = vadd.f32 %v20631_v10, %v7574_v1  ;;  %v7615_v44 = vpop.f32.mrf.mxu0  ;;  %v7614_v10 = vadd.f32 %v20645_v11, %v7600_v63 }
 0x386   :  { %7904 = vmatpush.bf16.msrb.mxu1 %v10718_v45  ;;  %v14042_v7 = vld [vmem:[%s22075_s1 + $0x11cc] sm:$0xf]  ;;  %v11435_v6 = vld [vmem:[%s22075_s1 + $0x12d8] sm:$0xf0]  ;;  %v11182_v45 = vor.u32 %v14010_v47, %v11179_v25 }
 0x387   :  { %7918 = vmatpush.bf16.msrb.mxu2 %v10846_v13  ;;  %v14074_v30 = vld [vmem:[%s22075_s1 + $0x12cc] sm:$0xf]  ;;  %v11563_v57 = vld [vmem:[%s22075_s1 + $0x13d8] sm:$0xf0]  ;;  %v11310_v13 = vor.u32 %v14042_v7, %v11307_v54  ;;  %v7602_v18 = vadd.f32 %v20643_v61, %v7588_v16  ;;  %v7628_v29 = vadd.f32 %v20653_v19, %v7614_v10 }
 0x388   :  { %7932 = vmatpush.bf16.msrb.mxu3 %v10974_v59  ;;  %v14106_v12 = vld [vmem:[%s22075_s1 + $0x13cc] sm:$0xf]  ;;  %v11438_v49 = vor.u32 %v14074_v30, %v11435_v6  ;;  %v11163_v15 = vld [vmem:[%s22075_s1 + $0x10b8] sm:$0xf0] }
 0x389   :  { %7891 = vmatpush.bf16.msrb.mxu0 %v10574_v3  ;;  %v14006_v37 = vld [vmem:[%s22075_s1 + $0x10ac] sm:$0xf]  ;;  %v11291_v59 = vld [vmem:[%s22075_s1 + $0x11b8] sm:$0xf0]  ;;  %v11566_v11 = vor.u32 %v14106_v12, %v11563_v57  ;;  %v7616_v61 = vadd.f32 %v7615_v44, %v7602_v18  ;;  %v7643_v3 = vpop.f32.mrf.mxu2  ;;  %v7642_v14 = vadd.f32 %v20707_v40, %v7628_v29 }
 0x38a   :  { %7905 = vmatpush.bf16.msrb.mxu1 %v10702_v35  ;;  %v14038_v8 = vld [vmem:[%s22075_s1 + $0x11ac] sm:$0xf]  ;;  %v11419_v27 = vld [vmem:[%s22075_s1 + $0x12b8] sm:$0xf0]  ;;  %v11166_v24 = vor.u32 %v14006_v37, %v11163_v15  ;;  %v7657_v35 = vpop.f32.mrf.mxu3 }
 0x38b   :  { %7919 = vmatpush.bf16.msrb.mxu2 %v10830_v36  ;;  %v14070_v50 = vld [vmem:[%s22075_s1 + $0x12ac] sm:$0xf]  ;;  %v11294_v31 = vor.u32 %v14038_v8, %v11291_v59  ;;  %v11147_v2 = vld [vmem:[%s22075_s1 + $0x1098] sm:$0xf0]  ;;  %v7630_v1 = vadd.f32 %v7629_v53, %v7616_v61  ;;  %v7656_v6 = vadd.f32 %v20710_v20, %v7642_v14 }
 0x38c   :  { %7933 = vmatpush.bf16.msrb.mxu3 %v10958_v52  ;;  %7892 = vmatmul.bf16.vlgmr.msrb.gmra.mxu0 %v15566_v32  ;;  %v14102_v23 = vld [vmem:[%s22075_s1 + $0x13ac] sm:$0xf]  ;;  %v11547_v32 = vld [vmem:[%s22075_s1 + $0x13b8] sm:$0xf0] }
 0x38d   :  { %7940 = vmatpush.bf16.msra.mxu0 %v11198_v22  ;;  %7906 = vmatmul.bf16.vlgmr.msrb.gmra.mxu1 %v15579_v41  ;;  %v14002_v41 = vld [vmem:[%s22075_s1 + $0x108c] sm:$0xf]  ;;  %v11550_v62 = vor.u32 %v14102_v23, %v11547_v32  ;;  %v11275_v19 = vld [vmem:[%s22075_s1 + $0x1198] sm:$0xf0]  ;;  %v7669_v36 = vpop.f32.mrf.mxu0  ;;  %v7683_v22 = vpop.f32.mrf.mxu1  ;;  %v7644_v63 = vadd.f32 %v7643_v3, %v7630_v1 }
 0x38e   :  { %7954 = vmatpush.bf16.msra.mxu1 %v11326_v5  ;;  %7920 = vmatmul.bf16.vlgmr.msrb.gmra.mxu2 %v15577_v38  ;;  %v11422_v38 = vor.u32 %v14070_v50, %v11419_v27  ;;  %v14066_v58 = vld [vmem:[%s22075_s1 + $0x128c] sm:$0xf]  ;;  %v11403_v9 = vld [vmem:[%s22075_s1 + $0x1298] sm:$0xf0]  ;;  %v11150_v52 = vor.u32 %v14002_v41, %v11147_v2  ;;  %v7670_v53 = vadd.f32 %v7669_v36, %v7656_v6 }
 0x38f   :  { %7968 = vmatpush.bf16.msra.mxu2 %v11454_v43  ;;  %7934 = vmatmul.bf16.vlgmr.msrb.gmra.mxu3 %v15587_v46  ;;  %v14034_v46 = vld [vmem:[%s22075_s1 + $0x118c] sm:$0xf]  ;;  %v11531_v17 = vld [vmem:[%s22075_s1 + $0x1398] sm:$0xf0]  ;;  %v11406_v43 = vor.u32 %v14066_v58, %v11403_v9 }
 0x390   :  { %7982 = vmatpush.bf16.msra.mxu3 %v11582_v42  ;;  %v14098_v39 = vld [vmem:[%s22075_s1 + $0x138c] sm:$0xf]  ;;  %v11278_v5 = vor.u32 %v14034_v46, %v11275_v19  ;;  %v11131_v47 = vld [vmem:[%s22075_s1 + $0x1078] sm:$0xf0] }
 0x391   :  { %7941 = vmatpush.bf16.msra.mxu0 %v11182_v45  ;;  %v13998_v40 = vld [vmem:[%s22075_s1 + $0x106c] sm:$0xf]  ;;  %v11534_v7 = vor.u32 %v14098_v39, %v11531_v17  ;;  %v11259_v42 = vld [vmem:[%s22075_s1 + $0x1178] sm:$0xf0]  ;;  %v7697_v15 = vpop.f32.mrf.mxu2 }
 0x392   :  { %7955 = vmatpush.bf16.msra.mxu1 %v11310_v13  ;;  %v14030_v25 = vld [vmem:[%s22075_s1 + $0x116c] sm:$0xf]  ;;  %v11387_v30 = vld [vmem:[%s22075_s1 + $0x1278] sm:$0xf0]  ;;  %v11134_v12 = vor.u32 %v13998_v40, %v11131_v47  ;;  %v7711_v27 = vpop.f32.mrf.mxu3 }
 0x393   :  { %7969 = vmatpush.bf16.msra.mxu2 %v11438_v49  ;;  %v14062_v54 = vld [vmem:[%s22075_s1 + $0x126c] sm:$0xf]  ;;  %v11515_v44 = vld [vmem:[%s22075_s1 + $0x1378] sm:$0xf0]  ;;  %v11262_v45 = vor.u32 %v14030_v25, %v11259_v42 }
 0x394   :  { %7983 = vmatpush.bf16.msra.mxu3 %v11566_v11  ;;  %v14094_v16 = vld [vmem:[%s22075_s1 + $0x136c] sm:$0xf]  ;;  %v11390_v20 = vor.u32 %v14062_v54, %v11387_v30  ;;  %v11115_v37 = vld [vmem:[%s22075_s1 + $0x1058] sm:$0xf0]  ;;  %v7658_v11 = vadd.f32 %v7657_v35, %v7644_v63 }
 0x395   :  { %7942 = vmatpush.bf16.msra.mxu0 %v11166_v24  ;;  %v13994_v57 = vld [vmem:[%s22075_s1 + $0x104c] sm:$0xf]  ;;  %v11243_v13 = vld [vmem:[%s22075_s1 + $0x1158] sm:$0xf0]  ;;  %v11518_v49 = vor.u32 %v14094_v16, %v11515_v44  ;;  %v7671_v50 = vpop.f32.mrf.mxu0  ;;  %v7685_v3 = vpop.f32.mrf.mxu1 }
 0x396   :  { %7956 = vmatpush.bf16.msra.mxu1 %v11294_v31  ;;  %v14026_v10 = vld [vmem:[%s22075_s1 + $0x114c] sm:$0xf]  ;;  %v11371_v59 = vld [vmem:[%s22075_s1 + $0x1258] sm:$0xf0]  ;;  %v11118_v32 = vor.u32 %v13994_v57, %v11115_v37  ;;  %v7684_v31 = vadd.f32 %v7683_v22, %v7670_v53  ;;  %v7672_v29 = vadd.f32 %v7671_v50, %v7658_v11 }
 0x397   :  { %7970 = vmatpush.bf16.msra.mxu2 %v11422_v38  ;;  %v14058_v8 = vld [vmem:[%s22075_s1 + $0x124c] sm:$0xf]  ;;  %v11499_v23 = vld [vmem:[%s22075_s1 + $0x1358] sm:$0xf0]  ;;  %v11246_v24 = vor.u32 %v14026_v10, %v11243_v13 }
 0x398   :  { %7984 = vmatpush.bf16.msra.mxu3 %v11550_v62  ;;  %v14090_v18 = vld [vmem:[%s22075_s1 + $0x134c] sm:$0xf]  ;;  %v11374_v61 = vor.u32 %v14058_v8, %v11371_v59  ;;  %v11099_v41 = vld [vmem:[%s22075_s1 + $0x1038] sm:$0xf0]  ;;  %v7698_v9 = vadd.f32 %v7697_v15, %v7684_v31 }
 0x399   :  { %7943 = vmatpush.bf16.msra.mxu0 %v11150_v52  ;;  %v13990_v38 = vld [vmem:[%s22075_s1 + $0x102c] sm:$0xf]  ;;  %v11502_v46 = vor.u32 %v14090_v18, %v11499_v23  ;;  %v11227_v62 = vld [vmem:[%s22075_s1 + $0x1138] sm:$0xf0]  ;;  %v7686_v52 = vadd.f32 %v7685_v3, %v7672_v29  ;;  %v7699_v25 = vpop.f32.mrf.mxu2 }
 0x39a   :  { %7957 = vmatpush.bf16.msra.mxu1 %v11278_v5  ;;  %v14022_v2 = vld [vmem:[%s22075_s1 + $0x112c] sm:$0xf]  ;;  %v11355_v58 = vld [vmem:[%s22075_s1 + $0x1238] sm:$0xf0]  ;;  %v11102_v36 = vor.u32 %v13990_v38, %v11099_v41  ;;  %v7712_v30 = vadd.f32 %v7711_v27, %v7698_v9  ;;  %v7713_v63 = vpop.f32.mrf.mxu3 }
 0x39b   :  { %7971 = vmatpush.bf16.msra.mxu2 %v11406_v43  ;;  %v14054_v19 = vld [vmem:[%s22075_s1 + $0x122c] sm:$0xf]  ;;  %v11483_v35 = vld [vmem:[%s22075_s1 + $0x1338] sm:$0xf0]  ;;  %v11230_v22 = vor.u32 %v14022_v2, %v11227_v62  ;;  %v7700_v6 = vadd.f32 %v7699_v25, %v7686_v52 }
 0x39c   :  { %7985 = vmatpush.bf16.msra.mxu3 %v11534_v7  ;;  %v14086_v14 = vld [vmem:[%s22075_s1 + $0x132c] sm:$0xf]  ;;  %v11083_v17 = vld [vmem:[%s22075_s1 + $0x1018] sm:$0xf0]  ;;  %v11358_v1 = vor.u32 %v14054_v19, %v11355_v58  ;;  %v8166_v50 = vmax.f32 %v7712_v30, 0.0 }
 0x39d   :  { %7944 = vmatpush.bf16.msra.mxu0 %v11134_v12  ;;  %v13986_v39 = vld [vmem:[%s22075_s1 + $0x100c] sm:$0xf]  ;;  %v11211_v43 = vld [vmem:[%s22075_s1 + $0x1118] sm:$0xf0]  ;;  %v11486_v47 = vor.u32 %v14086_v14, %v11483_v35  ;;  %v7714_v37 = vadd.f32 %v7713_v63, %v7700_v6 }
 0x39e   :  { %7958 = vmatpush.bf16.msra.mxu1 %v11262_v45  ;;  %v14018_v5 = vld [vmem:[%s22075_s1 + $0x110c] sm:$0xf]  ;;  %v11339_v7 = vld [vmem:[%s22075_s1 + $0x1218] sm:$0xf0]  ;;  %v11086_v57 = vor.u32 %v13986_v39, %v11083_v17 }
 0x39f   :  { %7972 = vmatpush.bf16.msra.mxu2 %v11390_v20  ;;  %v14050_v40 = vld [vmem:[%s22075_s1 + $0x120c] sm:$0xf]  ;;  %v11467_v54 = vld [vmem:[%s22075_s1 + $0x1318] sm:$0xf0]  ;;  %v11214_v10 = vor.u32 %v14018_v5, %v11211_v43  ;;  %v8170_v27 = vmax.f32 %v7714_v37, 0.0 }
 0x3a0   :  { %7986 = vmatpush.bf16.msra.mxu3 %v11518_v49  ;;  %v14082_v42 = vld [vmem:[%s22075_s1 + $0x130c] sm:$0xf]  ;;  %v11707_v44 = vld [vmem:[%s22075_s1 + $0x14f8] sm:$0xf0]  ;;  %v11342_v13 = vor.u32 %v14050_v40, %v11339_v7 }
 0x3a1   :  { %7945 = vmatpush.bf16.msra.mxu0 %v11118_v32  ;;  %v14142_v16 = vld [vmem:[%s22075_s1 + $0x14ec] sm:$0xf]  ;;  %v11835_v53 = vld [vmem:[%s22075_s1 + $0x15f8] sm:$0xf0]  ;;  %v11470_v8 = vor.u32 %v14082_v42, %v11467_v54  ;;  %v20933_v41 = vpack.c.bf16 %v8170_v27, %v8166_v50 }
 0x3a2   :  { %7959 = vmatpush.bf16.msra.mxu1 %v11246_v24  ;;  %v14174_v12 = vld [vmem:[%s22075_s1 + $0x15ec] sm:$0xf]  ;;  %v11963_v20 = vld [vmem:[%s22075_s1 + $0x16f8] sm:$0xf0]  ;;  %v11710_v59 = vor.u32 %v14142_v16, %v11707_v44 }
 0x3a3   :  { %7973 = vmatpush.bf16.msra.mxu2 %v11374_v61  ;;  %v14206_v45 = vld [vmem:[%s22075_s1 + $0x16ec] sm:$0xf]  ;;  %v12091_v15 = vld [vmem:[%s22075_s1 + $0x17f8] sm:$0xf0]  ;;  %v11838_v18 = vor.u32 %v14174_v12, %v11835_v53 }
 0x3a4   :  { %7987 = vmatpush.bf16.msra.mxu3 %v11502_v46  ;;  %v14238_v49 = vld [vmem:[%s22075_s1 + $0x17ec] sm:$0xf]  ;;  %v11966_v23 = vor.u32 %v14206_v45, %v11963_v20  ;;  %v11691_v32 = vld [vmem:[%s22075_s1 + $0x14d8] sm:$0xf0] }
 0x3a5   :  { %7946 = vmatpush.bf16.msra.mxu0 %v11102_v36  ;;  %v14138_v11 = vld [vmem:[%s22075_s1 + $0x14cc] sm:$0xf]  ;;  %v12094_v31 = vor.u32 %v14238_v49, %v12091_v15  ;;  %v11819_v29 = vld [vmem:[%s22075_s1 + $0x15d8] sm:$0xf0] }
 0x3a6   :  { %7960 = vmatpush.bf16.msra.mxu1 %v11230_v22  ;;  %v14170_v24 = vld [vmem:[%s22075_s1 + $0x15cc] sm:$0xf]  ;;  %v11947_v38 = vld [vmem:[%s22075_s1 + $0x16d8] sm:$0xf0]  ;;  %v11694_v3 = vor.u32 %v14138_v11, %v11691_v32  ;;  %v22165_v11 = vperm.slane %v15829_v4, 0 }
 0x3a7   :  { %7974 = vmatpush.bf16.msra.mxu2 %v11358_v1  ;;  %v14202_v61 = vld [vmem:[%s22075_s1 + $0x16cc] sm:$0xf]  ;;  %v12075_v46 = vld [vmem:[%s22075_s1 + $0x17d8] sm:$0xf0]  ;;  %v11822_v62 = vor.u32 %v14170_v24, %v11819_v29  ;;  %v20972_v1 = vld [vmem:[%s22077_s2] sm:$0xf] }
 0x3a8   :  { %7988 = vmatpush.bf16.msra.mxu3 %v11486_v47  ;;  %v14234_v2 = vld [vmem:[%s22075_s1 + $0x17cc] sm:$0xf]  ;;  %v11950_v19 = vor.u32 %v14202_v61, %v11947_v38  ;;  %v11675_v9 = vld [vmem:[%s22075_s1 + $0x14b8] sm:$0xf0]  ;;  %v6384_v50 = vadd.f32 %v16023_v21, %v22165_v11  ;;  %v22166_v21 = vperm.slane %v17603_v28, 1 }
 0x3a9   :  { %7947 = vmatpush.bf16.msra.mxu0 %v11086_v57  ;;  %v14134_v58 = vld [vmem:[%s22075_s1 + $0x14ac] sm:$0xf]  ;;  %v12078_v35 = vor.u32 %v14234_v2, %v12075_v46  ;;  %v11803_v36 = vld [vmem:[%s22075_s1 + $0x15b8] sm:$0xf0]  ;;  %v7725_v6 = vpop.f32.mrf.mxu0 }
 0x3aa   :  { %7961 = vmatpush.bf16.msra.mxu1 %v11214_v10  ;;  %v14166_v14 = vld [vmem:[%s22075_s1 + $0x15ac] sm:$0xf]  ;;  %v11931_v17 = vld [vmem:[%s22075_s1 + $0x16b8] sm:$0xf0]  ;;  %v11678_v22 = vor.u32 %v14134_v58, %v11675_v9  ;;  %v7739_v20 = vpop.f32.mrf.mxu1 }
 0x3ab   :  { %7975 = vmatpush.bf16.msra.mxu2 %v11342_v13  ;;  %v14198_v39 = vld [vmem:[%s22075_s1 + $0x16ac] sm:$0xf]  ;;  %v12059_v52 = vld [vmem:[%s22075_s1 + $0x17b8] sm:$0xf0] }
 0x3ac   :  { %7989 = vmatpush.bf16.msra.mxu3 %v11470_v8  ;;  %7948 = vmatmul.bf16.vlgmr.msra.gmra.mxu0 %v15794_v51  ;;  %v14230_v51 = vld [vmem:[%s22075_s1 + $0x17ac] sm:$0xf]  ;;  %v11934_v5 = vor.u32 %v14198_v39, %v11931_v17  ;;  %v11787_v25 = vld [vmem:[%s22075_s1 + $0x1598] sm:$0xf0] }
 0x3ad   :  { %7996 = vmatpush.bf16.msrb.mxu0 %v11710_v59  ;;  %7962 = vmatmul.bf16.vlgmr.msra.gmra.mxu1 %v15807_v56  ;;  %v11806_v56 = vor.u32 %v14166_v14, %v11803_v36  ;;  %v14130_v43 = vld [vmem:[%s22075_s1 + $0x148c] sm:$0xf]  ;;  %v12062_v47 = vor.u32 %v14230_v51, %v12059_v52  ;;  %v11915_v42 = vld [vmem:[%s22075_s1 + $0x1698] sm:$0xf0]  ;;  %v22168_v52 = vld [vmem:[#allocation42_spill] sm:$0xff] }
 0x3ae   :  { %8010 = vmatpush.bf16.msrb.mxu1 %v11838_v18  ;;  %7976 = vmatmul.bf16.vlgmr.msra.gmra.mxu2 %v15805_v55  ;;  %v1087_v55 = vperm.slane %v20972_v1, 3  ;;  %v14162_v40 = vld [vmem:[%s22075_s1 + $0x158c] sm:$0xf]  ;;  %v12043_v30 = vld [vmem:[%s22075_s1 + $0x1798] sm:$0xf0] }
 0x3af   :  { %8024 = vmatpush.bf16.msrb.mxu2 %v11966_v23  ;;  %7990 = vmatmul.bf16.vlgmr.msra.gmra.mxu3 %v15815_v60  ;;  %v11659_v60 = vld [vmem:[%s22075_s1 + $0x1498] sm:$0xf0]  ;;  %v14194_v7 = vld [vmem:[%s22075_s1 + $0x168c] sm:$0xf]  ;;  %v11790_v44 = vor.u32 %v14162_v40, %v11787_v25  ;;  %v14513_v1 = vld [vmem:[%s22078_s3 + $0x84] sm:$0xf] }
 0x3b0   :  { %8038 = vmatpush.bf16.msrb.mxu3 %v12094_v31  ;;  %v14226_v54 = vld [vmem:[%s22075_s1 + $0x178c] sm:$0xf]  ;;  %v11662_v63 = vor.u32 %v14130_v43, %v11659_v60  ;;  %v7726_v16 = vadd.f32 %v7725_v6, %v1087_v55  ;;  %v11918_v12 = vor.u32 %v14194_v7, %v11915_v42  ;;  %v11643_v53 = vld [vmem:[%s22075_s1 + $0x1478] sm:$0xf0]  ;;  %v6832_v31 = vadd.f32 %v17758_v0, %v22166_v21  ;;  %v22172_v21 = vld [vmem:[#allocation44_spill] sm:$0xff] }
 0x3b1   :  { %7997 = vmatpush.bf16.msrb.mxu0 %v11694_v3  ;;  %v14126_v57 = vld [vmem:[%s22075_s1 + $0x146c] sm:$0xf]  ;;  %v12046_v37 = vor.u32 %v14226_v54, %v12043_v30  ;;  %v11771_v10 = vld [vmem:[%s22075_s1 + $0x1578] sm:$0xf0]  ;;  %v7753_v46 = vpop.f32.mrf.mxu2 }
 0x3b2   :  { %8011 = vmatpush.bf16.msrb.mxu1 %v11822_v62  ;;  %v14158_v45 = vld [vmem:[%s22075_s1 + $0x156c] sm:$0xf]  ;;  %v11899_v49 = vld [vmem:[%s22075_s1 + $0x1678] sm:$0xf0]  ;;  %v7740_v15 = vadd.f32 %v7739_v20, %v7726_v16  ;;  %v11646_v27 = vor.u32 %v14126_v57, %v11643_v53  ;;  %v22167_v62 = vld [vmem:[#allocation2_spill] sm:$0xff]  ;;  %v7767_v9 = vpop.f32.mrf.mxu3 }
 0x3b3   :  { %8025 = vmatpush.bf16.msrb.mxu2 %v11950_v19  ;;  %v14190_v13 = vld [vmem:[%s22075_s1 + $0x166c] sm:$0xf]  ;;  %v12027_v59 = vld [vmem:[%s22075_s1 + $0x1778] sm:$0xf0]  ;;  %v11774_v18 = vor.u32 %v14158_v45, %v11771_v10  ;;  %v6398_v19 = vadd.f32 %v22167_v62, %v6384_v50 }
 0x3b4   :  { %8039 = vmatpush.bf16.msrb.mxu3 %v12078_v35  ;;  %v14222_v8 = vld [vmem:[%s22075_s1 + $0x176c] sm:$0xf]  ;;  %v11902_v23 = vor.u32 %v14190_v13, %v11899_v49  ;;  %v11627_v24 = vld [vmem:[%s22075_s1 + $0x1458] sm:$0xf0]  ;;  %v7754_v3 = vadd.f32 %v7753_v46, %v7740_v15 }
 0x3b5   :  { %7998 = vmatpush.bf16.msrb.mxu0 %v11678_v22  ;;  %v14122_v32 = vld [vmem:[%s22075_s1 + $0x144c] sm:$0xf]  ;;  %v12030_v29 = vor.u32 %v14222_v8, %v12027_v59  ;;  %v11755_v61 = vld [vmem:[%s22075_s1 + $0x1558] sm:$0xf0]  ;;  %v6846_v22 = vadd.f32 %v22168_v52, %v6832_v31 }
 0x3b6   :  { %8012 = vmatpush.bf16.msrb.mxu1 %v11806_v56  ;;  %v14154_v4 = vld [vmem:[%s22075_s1 + $0x154c] sm:$0xf]  ;;  %v11883_v2 = vld [vmem:[%s22075_s1 + $0x1658] sm:$0xf0]  ;;  %v11630_v58 = vor.u32 %v14122_v32, %v11627_v24  ;;  %v21065_v51 = vadd.f32 %v7767_v9, %v7754_v3  ;;  %v22173_v9 = vld [vmem:[#allocation6_spill] sm:$0xff] }
 0x3b7   :  { %8026 = vmatpush.bf16.msrb.mxu2 %v11934_v5  ;;  %v14186_v38 = vld [vmem:[%s22075_s1 + $0x164c] sm:$0xf]  ;;  %v12011_v0 = vld [vmem:[%s22075_s1 + $0x1758] sm:$0xf0]  ;;  %v11758_v14 = vor.u32 %v14154_v4, %v11755_v61 }
 0x3b8   :  { %8040 = vmatpush.bf16.msrb.mxu3 %v12062_v47  ;;  %v14218_v28 = vld [vmem:[%s22075_s1 + $0x174c] sm:$0xf]  ;;  %v11886_v35 = vor.u32 %v14186_v38, %v11883_v2  ;;  %v11611_v39 = vld [vmem:[%s22075_s1 + $0x1438] sm:$0xf0] }
 0x3b9   :  { %7999 = vmatpush.bf16.msrb.mxu0 %v11662_v63  ;;  %v14118_v36 = vld [vmem:[%s22075_s1 + $0x142c] sm:$0xf]  ;;  %v12014_v56 = vor.u32 %v14218_v28, %v12011_v0  ;;  %v11739_v5 = vld [vmem:[%s22075_s1 + $0x1538] sm:$0xf0] }
 0x3ba   :  { %8013 = vmatpush.bf16.msrb.mxu1 %v11790_v44  ;;  %v14150_v17 = vld [vmem:[%s22075_s1 + $0x152c] sm:$0xf]  ;;  %v11867_v60 = vld [vmem:[%s22075_s1 + $0x1638] sm:$0xf0]  ;;  %v11614_v25 = vor.u32 %v14118_v36, %v11611_v39 }
 0x3bb   :  { %8027 = vmatpush.bf16.msrb.mxu2 %v11918_v12  ;;  %v14182_v43 = vld [vmem:[%s22075_s1 + $0x162c] sm:$0xf]  ;;  %v11995_v47 = vld [vmem:[%s22075_s1 + $0x1738] sm:$0xf0]  ;;  %v11742_v6 = vor.u32 %v14150_v17, %v11739_v5 }
 0x3bc   :  { %8041 = vmatpush.bf16.msrb.mxu3 %v12046_v37  ;;  %v14214_v40 = vld [vmem:[%s22075_s1 + $0x172c] sm:$0xf]  ;;  %v11595_v42 = vld [vmem:[%s22075_s1 + $0x1418] sm:$0xf0]  ;;  %v11870_v63 = vor.u32 %v14182_v43, %v11867_v60 }
 0x3bd   :  { %8000 = vmatpush.bf16.msrb.mxu0 %v11646_v27  ;;  %v14114_v7 = vld [vmem:[%s22075_s1 + $0x140c] sm:$0xf]  ;;  %v11723_v44 = vld [vmem:[%s22075_s1 + $0x1518] sm:$0xf0]  ;;  %v11998_v45 = vor.u32 %v14214_v40, %v11995_v47  ;;  %v22171_v27 = vld [vmem:[#allocation4_spill] sm:$0xff] }
 0x3be   :  { %8014 = vmatpush.bf16.msrb.mxu1 %v11774_v18  ;;  %v22169_v54 = vld [vmem:[#allocation3_spill] sm:$0xff]  ;;  %v11851_v20 = vld [vmem:[%s22075_s1 + $0x1618] sm:$0xf0]  ;;  %v11598_v8 = vor.u32 %v14114_v7, %v11595_v42 }
 0x3bf   :  { %8028 = vmatpush.bf16.msrb.mxu2 %v11902_v23  ;;  %v6412_v30 = vadd.f32 %v22169_v54, %v6398_v19  ;;  %v14146_v16 = vld [vmem:[%s22075_s1 + $0x150c] sm:$0xf]  ;;  %v11979_v10 = vld [vmem:[%s22075_s1 + $0x1718] sm:$0xf0] }
 0x3c0   :  { %8042 = vmatpush.bf16.msrb.mxu3 %v12030_v29  ;;  %v14178_v12 = vld [vmem:[%s22075_s1 + $0x160c] sm:$0xf]  ;;  %v12219_v49 = vld [vmem:[%s22075_s1 + $0x18f8] sm:$0xf0]  ;;  %v11726_v23 = vor.u32 %v14146_v16, %v11723_v44 }
 0x3c1   :  { %8001 = vmatpush.bf16.msrb.mxu0 %v11630_v58  ;;  %v22170_v57 = vld [vmem:[#allocation43_spill] sm:$0xff]  ;;  %v12347_v59 = vld [vmem:[%s22075_s1 + $0x19f8] sm:$0xf0]  ;;  %v6426_v18 = vadd.f32 %v22171_v27, %v6412_v30  ;;  %v11854_v32 = vor.u32 %v14178_v12, %v11851_v20 }
 0x3c2   :  { %8015 = vmatpush.bf16.msrb.mxu1 %v11758_v14  ;;  %v6860_v53 = vadd.f32 %v22170_v57, %v6846_v22  ;;  %v14210_v37 = vld [vmem:[%s22075_s1 + $0x170c] sm:$0xf]  ;;  %v12475_v50 = vld [vmem:[%s22075_s1 + $0x1af8] sm:$0xf0] }
 0x3c3   :  { %8029 = vmatpush.bf16.msrb.mxu2 %v11886_v35  ;;  %v14270_v13 = vld [vmem:[%s22075_s1 + $0x18ec] sm:$0xf]  ;;  %v12603_v4 = vld [vmem:[%s22075_s1 + $0x1bf8] sm:$0xf0]  ;;  %v11982_v29 = vor.u32 %v14210_v37, %v11979_v10  ;;  %v6440_v14 = vadd.f32 %v22173_v9, %v6426_v18 }
 0x3c4   :  { %8043 = vmatpush.bf16.msrb.mxu3 %v12014_v56  ;;  %v14302_v15 = vld [vmem:[%s22075_s1 + $0x19ec] sm:$0xf]  ;;  %v6874_v31 = vadd.f32 %v22172_v21, %v6860_v53  ;;  %v12222_v61 = vor.u32 %v14270_v13, %v12219_v49  ;;  %v12203_v28 = vld [vmem:[%s22075_s1 + $0x18d8] sm:$0xf0] }
 0x3c5   :  { %8002 = vmatpush.bf16.msrb.mxu0 %v11614_v25  ;;  %v14334_v11 = vld [vmem:[%s22075_s1 + $0x1aec] sm:$0xf]  ;;  %v12350_v38 = vor.u32 %v14302_v15, %v12347_v59  ;;  %v12331_v62 = vld [vmem:[%s22075_s1 + $0x19d8] sm:$0xf0] }
 0x3c6   :  { %8016 = vmatpush.bf16.msrb.mxu1 %v11742_v6  ;;  %v14366_v24 = vld [vmem:[%s22075_s1 + $0x1bec] sm:$0xf]  ;;  %v12478_v2 = vor.u32 %v14334_v11, %v12475_v50  ;;  %v12459_v58 = vld [vmem:[%s22075_s1 + $0x1ad8] sm:$0xf0]  ;;  %v22176_v6 = vld [vmem:[#allocation46_spill] sm:$0xff] }
 0x3c7   :  { %8030 = vmatpush.bf16.msrb.mxu2 %v11870_v63  ;;  %v14266_v46 = vld [vmem:[%s22075_s1 + $0x18cc] sm:$0xf]  ;;  %v12606_v3 = vor.u32 %v14366_v24, %v12603_v4  ;;  %v12587_v36 = vld [vmem:[%s22075_s1 + $0x1bd8] sm:$0xf0]  ;;  %v22179_v11 = vld [vmem:[#allocation12_spill] sm:$0xff] }
 0x3c8   :  { %8044 = vmatpush.bf16.msrb.mxu3 %v11998_v45  ;;  %v14298_v0 = vld [vmem:[%s22075_s1 + $0x19cc] sm:$0xf]  ;;  %v22174_v39 = vld [vmem:[#allocation45_spill] sm:$0xff]  ;;  %v12206_v52 = vor.u32 %v14266_v46, %v12203_v28  ;;  %v22180_v4 = vld [vmem:[#allocation48_spill] sm:$0xff] }
 0x3c9   :  { %8003 = vmatpush.bf16.msrb.mxu0 %v11598_v8  ;;  %v14330_v19 = vld [vmem:[%s22075_s1 + $0x1acc] sm:$0xf]  ;;  %v6888_v17 = vadd.f32 %v22174_v39, %v6874_v31  ;;  %v12334_v22 = vor.u32 %v14298_v0, %v12331_v62  ;;  %v12187_v43 = vld [vmem:[%s22075_s1 + $0x18b8] sm:$0xf0] }
 0x3ca   :  { %8017 = vmatpush.bf16.msrb.mxu1 %v11726_v23  ;;  %v14362_v35 = vld [vmem:[%s22075_s1 + $0x1bcc] sm:$0xf]  ;;  %v12462_v56 = vor.u32 %v14330_v19, %v12459_v58  ;;  %v12315_v47 = vld [vmem:[%s22075_s1 + $0x19b8] sm:$0xf0] }
 0x3cb   :  { %8031 = vmatpush.bf16.msrb.mxu2 %v11854_v32  ;;  %v14262_v5 = vld [vmem:[%s22075_s1 + $0x18ac] sm:$0xf]  ;;  %v12590_v40 = vor.u32 %v14362_v35, %v12587_v36  ;;  %v12443_v7 = vld [vmem:[%s22075_s1 + $0x1ab8] sm:$0xf0]  ;;  %v6902_v63 = vadd.f32 %v22176_v6, %v6888_v17 }
 0x3cc   :  { %8045 = vmatpush.bf16.msrb.mxu3 %v11982_v29  ;;  %v14294_v60 = vld [vmem:[%s22075_s1 + $0x19ac] sm:$0xf]  ;;  %8004 = vmatmul.bf16.vlgmr.msrb.gmra.mxu0 %v16034_v26  ;;  %v22175_v42 = vld [vmem:[#allocation9_spill] sm:$0xff]  ;;  %v12190_v16 = vor.u32 %v14262_v5, %v12187_v43 }
 0x3cd   :  { %8052 = vmatpush.bf16.msra.mxu0 %v12222_v61  ;;  %v14326_v25 = vld [vmem:[%s22075_s1 + $0x1aac] sm:$0xf]  ;;  %v6454_v54 = vadd.f32 %v22175_v42, %v6440_v14  ;;  %8018 = vmatmul.bf16.vlgmr.msrb.gmra.mxu1 %v16047_v34  ;;  %v12571_v30 = vld [vmem:[%s22075_s1 + $0x1bb8] sm:$0xf0] }
 0x3ce   :  { %8066 = vmatpush.bf16.msra.mxu1 %v12350_v38  ;;  %8032 = vmatmul.bf16.vlgmr.msrb.gmra.mxu2 %v16045_v33  ;;  %v14358_v26 = vld [vmem:[%s22075_s1 + $0x1bac] sm:$0xf]  ;;  %v12318_v33 = vor.u32 %v14294_v60, %v12315_v47  ;;  %v12446_v34 = vor.u32 %v14326_v25, %v12443_v7  ;;  %v12171_v53 = vld [vmem:[%s22075_s1 + $0x1898] sm:$0xf0] }
 0x3cf   :  { %8080 = vmatpush.bf16.msra.mxu2 %v12478_v2  ;;  %8046 = vmatmul.bf16.vlgmr.msrb.gmra.mxu3 %v16057_v48  ;;  %v22177_v44 = vld [vmem:[#allocation11_spill] sm:$0xff]  ;;  %v12574_v37 = vor.u32 %v14358_v26, %v12571_v30  ;;  %v12299_v10 = vld [vmem:[%s22075_s1 + $0x1998] sm:$0xf0]  ;;  %v22181_v2 = vld [vmem:[#allocation14_spill] sm:$0xff] }
 0x3d0   :  { %8094 = vmatpush.bf16.msra.mxu3 %v12606_v3  ;;  %v6468_v12 = vadd.f32 %v22177_v44, %v6454_v54  ;;  %v14258_v57 = vld [vmem:[%s22075_s1 + $0x188c] sm:$0xf]  ;;  %v12427_v49 = vld [vmem:[%s22075_s1 + $0x1a98] sm:$0xf0] }
 0x3d1   :  { %8053 = vmatpush.bf16.msra.mxu0 %v12206_v52  ;;  %v14290_v48 = vld [vmem:[%s22075_s1 + $0x198c] sm:$0xf]  ;;  %v12555_v8 = vld [vmem:[%s22075_s1 + $0x1b98] sm:$0xf0]  ;;  %v12174_v59 = vor.u32 %v14258_v57, %v12171_v53 }
 0x3d2   :  { %8067 = vmatpush.bf16.msra.mxu1 %v12334_v22  ;;  %v22178_v45 = vld [vmem:[#allocation47_spill] sm:$0xff]  ;;  %v6482_v50 = vadd.f32 %v22179_v11, %v6468_v12  ;;  %v12302_v27 = vor.u32 %v14290_v48, %v12299_v10  ;;  %v12155_v32 = vld [vmem:[%s22075_s1 + $0x1878] sm:$0xf0]  ;;  %v22187_v10 = vld [vmem:[#allocation20_spill] sm:$0xff] }
 0x3d3   :  { %8081 = vmatpush.bf16.msra.mxu2 %v12462_v56  ;;  %v6916_v20 = vadd.f32 %v22178_v45, %v6902_v63  ;;  %v14322_v13 = vld [vmem:[%s22075_s1 + $0x1a8c] sm:$0xf]  ;;  %v12283_v29 = vld [vmem:[%s22075_s1 + $0x1978] sm:$0xf0] }
 0x3d4   :  { %8095 = vmatpush.bf16.msra.mxu3 %v12590_v40  ;;  %v14354_v15 = vld [vmem:[%s22075_s1 + $0x1b8c] sm:$0xf]  ;;  %v12430_v18 = vor.u32 %v14322_v13, %v12427_v49  ;;  %v12411_v38 = vld [vmem:[%s22075_s1 + $0x1a78] sm:$0xf0]  ;;  %v6496_v46 = vadd.f32 %v22181_v2, %v6482_v50  ;;  %v22184_v40 = vld [vmem:[#allocation50_spill] sm:$0xff] }
 0x3d5   :  { %8054 = vmatpush.bf16.msra.mxu0 %v12190_v16  ;;  %v14254_v23 = vld [vmem:[%s22075_s1 + $0x186c] sm:$0xf]  ;;  %v6930_v21 = vadd.f32 %v22180_v4, %v6916_v20  ;;  %v12558_v31 = vor.u32 %v14354_v15, %v12555_v8  ;;  %v12539_v0 = vld [vmem:[%s22075_s1 + $0x1b78] sm:$0xf0]  ;;  %v22188_v50 = vld [vmem:[#allocation52_spill] sm:$0xff] }
 0x3d6   :  { %8068 = vmatpush.bf16.msra.mxu1 %v12318_v33  ;;  %v14286_v24 = vld [vmem:[%s22075_s1 + $0x196c] sm:$0xf]  ;;  %v22182_v3 = vld [vmem:[#allocation49_spill] sm:$0xff]  ;;  %v12158_v19 = vor.u32 %v14254_v23, %v12155_v32 }
 0x3d7   :  { %8082 = vmatpush.bf16.msra.mxu2 %v12446_v34  ;;  %v14318_v61 = vld [vmem:[%s22075_s1 + $0x1a6c] sm:$0xf]  ;;  %v6944_v62 = vadd.f32 %v22182_v3, %v6930_v21  ;;  %v12286_v58 = vor.u32 %v14286_v24, %v12283_v29  ;;  %v12139_v35 = vld [vmem:[%s22075_s1 + $0x1858] sm:$0xf0] }
 0x3d8   :  { %8096 = vmatpush.bf16.msra.mxu3 %v12574_v37  ;;  %v14350_v28 = vld [vmem:[%s22075_s1 + $0x1b6c] sm:$0xf]  ;;  %v12414_v9 = vor.u32 %v14318_v61, %v12411_v38  ;;  %v12267_v17 = vld [vmem:[%s22075_s1 + $0x1958] sm:$0xf0] }
 0x3d9   :  { %8055 = vmatpush.bf16.msra.mxu0 %v12174_v59  ;;  %v14250_v14 = vld [vmem:[%s22075_s1 + $0x184c] sm:$0xf]  ;;  %v12542_v39 = vor.u32 %v14350_v28, %v12539_v0  ;;  %v12395_v22 = vld [vmem:[%s22075_s1 + $0x1a58] sm:$0xf0]  ;;  %v6958_v47 = vadd.f32 %v22184_v40, %v6944_v62 }
 0x3da   :  { %8069 = vmatpush.bf16.msra.mxu1 %v12302_v27  ;;  %v14282_v36 = vld [vmem:[%s22075_s1 + $0x194c] sm:$0xf]  ;;  %v22183_v56 = vld [vmem:[#allocation17_spill] sm:$0xff]  ;;  %v12142_v25 = vor.u32 %v14250_v14, %v12139_v35 }
 0x3db   :  { %8083 = vmatpush.bf16.msra.mxu2 %v12430_v18  ;;  %v14314_v52 = vld [vmem:[%s22075_s1 + $0x1a4c] sm:$0xf]  ;;  %v6510_v5 = vadd.f32 %v22183_v56, %v6496_v46  ;;  %v12523_v60 = vld [vmem:[%s22075_s1 + $0x1b58] sm:$0xf0]  ;;  %v12270_v54 = vor.u32 %v14282_v36, %v12267_v17  ;;  %v22191_v36 = vld [vmem:[#allocation22_spill] sm:$0xff] }
 0x3dc   :  { %8097 = vmatpush.bf16.msra.mxu3 %v12558_v31  ;;  %v14346_v43 = vld [vmem:[%s22075_s1 + $0x1b4c] sm:$0xf]  ;;  %v12398_v26 = vor.u32 %v14314_v52, %v12395_v22  ;;  %v12123_v6 = vld [vmem:[%s22075_s1 + $0x1838] sm:$0xf0] }
 0x3dd   :  { %8056 = vmatpush.bf16.msra.mxu0 %v12158_v19  ;;  %v22185_v7 = vld [vmem:[#allocation19_spill] sm:$0xff]  ;;  %v12526_v12 = vor.u32 %v14346_v43, %v12523_v60  ;;  %v12251_v33 = vld [vmem:[%s22075_s1 + $0x1938] sm:$0xf0]  ;;  %v22192_v43 = vld [vmem:[#allocation54_spill] sm:$0xff] }
 0x3de   :  { %v6524_v42 = vadd.f32 %v22185_v7, %v6510_v5  ;;  %8070 = vmatpush.bf16.msra.mxu1 %v12286_v58  ;;  %v14246_v30 = vld [vmem:[%s22075_s1 + $0x182c] sm:$0xf]  ;;  %v12379_v57 = vld [vmem:[%s22075_s1 + $0x1a38] sm:$0xf0] }
 0x3df   :  { %8084 = vmatpush.bf16.msra.mxu2 %v12414_v9  ;;  %v14278_v63 = vld [vmem:[%s22075_s1 + $0x192c] sm:$0xf]  ;;  %v12507_v48 = vld [vmem:[%s22075_s1 + $0x1b38] sm:$0xf0]  ;;  %v12126_v45 = vor.u32 %v14246_v30, %v12123_v6 }
 0x3e0   :  { %v22186_v16 = vld [vmem:[#allocation51_spill] sm:$0xff]  ;;  %8098 = vmatpush.bf16.msra.mxu3 %v12542_v39  ;;  %v12107_v37 = vld [vmem:[%s22075_s1 + $0x1818] sm:$0xf0]  ;;  %v6538_v13 = vadd.f32 %v22187_v10, %v6524_v42  ;;  %v12254_v49 = vor.u32 %v14278_v63, %v12251_v33  ;;  %v22196_v10 = vld [vmem:[#allocation24_spill] sm:$0xff] }
 0x3e1   :  { %v6972_v44 = vadd.f32 %v22186_v16, %v6958_v47  ;;  %v14310_v34 = vld [vmem:[%s22075_s1 + $0x1a2c] sm:$0xf]  ;;  %8057 = vmatpush.bf16.msra.mxu0 %v12142_v25  ;;  %v12235_v59 = vld [vmem:[%s22075_s1 + $0x1918] sm:$0xf0] }
 0x3e2   :  { %v14342_v53 = vld [vmem:[%s22075_s1 + $0x1b2c] sm:$0xf]  ;;  %8071 = vmatpush.bf16.msra.mxu1 %v12270_v54  ;;  %v12382_v15 = vor.u32 %v14310_v34, %v12379_v57  ;;  %v12363_v23 = vld [vmem:[%s22075_s1 + $0x1a18] sm:$0xf0] }
 0x3e3   :  { %v14242_v20 = vld [vmem:[%s22075_s1 + $0x180c] sm:$0xf]  ;;  %8085 = vmatpush.bf16.msra.mxu2 %v12398_v26  ;;  %v6986_v27 = vadd.f32 %v22188_v50, %v6972_v44  ;;  %v12510_v18 = vor.u32 %v14342_v53, %v12507_v48  ;;  %v12491_v24 = vld [vmem:[%s22075_s1 + $0x1b18] sm:$0xf0] }
 0x3e4   :  { %v14274_v8 = vld [vmem:[%s22075_s1 + $0x190c] sm:$0xf]  ;;  %8099 = vmatpush.bf16.msra.mxu3 %v12526_v12  ;;  %v22189_v4 = vld [vmem:[#allocation21_spill] sm:$0xff]  ;;  %v12110_v46 = vor.u32 %v14242_v20, %v12107_v37 }
 0x3e5   :  { %v14306_v11 = vld [vmem:[%s22075_s1 + $0x1a0c] sm:$0xf]  ;;  %v6552_v21 = vadd.f32 %v22189_v4, %v6538_v13  ;;  %v12731_v29 = vld [vmem:[%s22075_s1 + $0x1cf8] sm:$0xf0]  ;;  %8058 = vmatpush.bf16.msra.mxu0 %v12126_v45  ;;  %v12238_v62 = vor.u32 %v14274_v8, %v12235_v59 }
 0x3e6   :  { %v14338_v32 = vld [vmem:[%s22075_s1 + $0x1b0c] sm:$0xf]  ;;  %v22190_v38 = vld [vmem:[#allocation53_spill] sm:$0xff]  ;;  %8072 = vmatpush.bf16.msra.mxu1 %v12254_v49  ;;  %v12366_v19 = vor.u32 %v14306_v11, %v12363_v23  ;;  %v22199_v11 = vld [vmem:[#allocation56_spill] sm:$0xff] }
 0x3e7   :  { %v14398_v31 = vld [vmem:[%s22075_s1 + $0x1cec] sm:$0xf]  ;;  %v7000_v2 = vadd.f32 %v22190_v38, %v6986_v27  ;;  %v12859_v28 = vld [vmem:[%s22075_s1 + $0x1df8] sm:$0xf0]  ;;  %8086 = vmatpush.bf16.msra.mxu2 %v12382_v15  ;;  %v12494_v14 = vor.u32 %v14338_v32, %v12491_v24  ;;  %v6566_v39 = vadd.f32 %v22191_v36, %v6552_v21  ;;  %v22198_v15 = vld [vmem:[#allocation8_spill] sm:$0xff] }
 0x3e8   :  { %v14430_v61 = vld [vmem:[%s22075_s1 + $0x1dec] sm:$0xf]  ;;  %v12987_v3 = vld [vmem:[%s22075_s1 + $0x1ef8] sm:$0xf0]  ;;  %8100 = vmatpush.bf16.msra.mxu3 %v12510_v18  ;;  %v12734_v35 = vor.u32 %v14398_v31, %v12731_v29  ;;  %v22200_v27 = vld [vmem:[#allocation10_spill] sm:$0xff] }
 0x3e9   :  { %v14462_v0 = vld [vmem:[%s22075_s1 + $0x1eec] sm:$0xf]  ;;  %v13115_v9 = vld [vmem:[%s22075_s1 + $0x1ff8] sm:$0xf0]  ;;  %v12862_v17 = vor.u32 %v14430_v61, %v12859_v28  ;;  %v7014_v60 = vadd.f32 %v22192_v43, %v7000_v2  ;;  %8059 = vmatpush.bf16.msra.mxu0 %v12110_v46 }
 0x3ea   :  { %v14494_v58 = vld [vmem:[%s22075_s1 + $0x1fec] sm:$0xf]  ;;  %v12990_v52 = vor.u32 %v14462_v0, %v12987_v3  ;;  %v12715_v56 = vld [vmem:[%s22075_s1 + $0x1cd8] sm:$0xf0]  ;;  %8073 = vmatpush.bf16.msra.mxu1 %v12238_v62 }
 0x3eb   :  { %v14394_v22 = vld [vmem:[%s22075_s1 + $0x1ccc] sm:$0xf]  ;;  %v13118_v40 = vor.u32 %v14494_v58, %v13115_v9  ;;  %v12843_v47 = vld [vmem:[%s22075_s1 + $0x1dd8] sm:$0xf0]  ;;  %8087 = vmatpush.bf16.msra.mxu2 %v12366_v19  ;;  %v22203_v58 = vld [vmem:[#allocation26_spill] sm:$0xff] }
 0x3ec   :  { %v14426_v5 = vld [vmem:[%s22075_s1 + $0x1dcc] sm:$0xf]  ;;  %v12971_v7 = vld [vmem:[%s22075_s1 + $0x1ed8] sm:$0xf0]  ;;  %8101 = vmatpush.bf16.msra.mxu3 %v12494_v14  ;;  %v12718_v16 = vor.u32 %v14394_v22, %v12715_v56 }
 0x3ed   :  { %v14458_v25 = vld [vmem:[%s22075_s1 + $0x1ecc] sm:$0xf]  ;;  %v13099_v30 = vld [vmem:[%s22075_s1 + $0x1fd8] sm:$0xf0]  ;;  %8108 = vmatpush.bf16.msrb.mxu0 %v12734_v35  ;;  %v12846_v44 = vor.u32 %v14426_v5, %v12843_v47  ;;  %8074 = vmatmul.bf16.vlgmr.msra.gmra.mxu1 %v22198_v15 }
 0x3ee   :  { %v22193_v42 = vld [vmem:[#allocation23_spill] sm:$0xff]  ;;  %8122 = vmatpush.bf16.msrb.mxu1 %v12862_v17  ;;  %v12974_v12 = vor.u32 %v14458_v25, %v12971_v7  ;;  %v12699_v34 = vld [vmem:[%s22075_s1 + $0x1cb8] sm:$0xf0] }
 0x3ef   :  { %v6580_v54 = vadd.f32 %v22193_v42, %v6566_v39  ;;  %v14490_v26 = vld [vmem:[%s22075_s1 + $0x1fcc] sm:$0xf]  ;;  %8136 = vmatpush.bf16.msrb.mxu2 %v12990_v52  ;;  %v22195_v53 = vld [vmem:[#allocation5_spill] sm:$0xff]  ;;  %8102 = vmatmul.bf16.vlgmr.msra.gmra.mxu3 %v22200_v27  ;;  %v22204_v52 = vld [vmem:[#allocation58_spill] sm:$0xff] }
 0x3f0   :  { %v22194_v6 = vld [vmem:[#allocation55_spill] sm:$0xff]  ;;  %8150 = vmatpush.bf16.msrb.mxu3 %v13118_v40  ;;  %8060 = vmatmul.bf16.vlgmr.msra.gmra.mxu0 %v22195_v53  ;;  %v13102_v48 = vor.u32 %v14490_v26, %v13099_v30  ;;  %v12827_v45 = vld [vmem:[%s22075_s1 + $0x1db8] sm:$0xf0]  ;;  %v22207_v53 = vld [vmem:[#allocation28_spill] sm:$0xff] }
 0x3f1   :  { %v7028_v63 = vadd.f32 %v22194_v6, %v7014_v60  ;;  %v14390_v33 = vld [vmem:[%s22075_s1 + $0x1cac] sm:$0xf]  ;;  %v12955_v37 = vld [vmem:[%s22075_s1 + $0x1eb8] sm:$0xf0]  ;;  %v6594_v13 = vadd.f32 %v22196_v10, %v6580_v54  ;;  %8109 = vmatpush.bf16.msrb.mxu0 %v12718_v16 }
 0x3f2   :  { %v14422_v57 = vld [vmem:[%s22075_s1 + $0x1dac] sm:$0xf]  ;;  %v13083_v59 = vld [vmem:[%s22075_s1 + $0x1fb8] sm:$0xf0]  ;;  %v12702_v18 = vor.u32 %v14390_v33, %v12699_v34  ;;  %8123 = vmatpush.bf16.msrb.mxu1 %v12846_v44 }
 0x3f3   :  { %v14454_v20 = vld [vmem:[%s22075_s1 + $0x1eac] sm:$0xf]  ;;  %v7042_v50 = vadd.f32 %v22199_v11, %v7028_v63  ;;  %v22201_v23 = vld [vmem:[#allocation25_spill] sm:$0xff]  ;;  %8137 = vmatpush.bf16.msrb.mxu2 %v12974_v12  ;;  %v12830_v24 = vor.u32 %v14422_v57, %v12827_v45 }
 0x3f4   :  { %v22197_v49 = vld [vmem:[#allocation7_spill] sm:$0xff]  ;;  %v6608_v32 = vadd.f32 %v22201_v23, %v6594_v13  ;;  %v12958_v4 = vor.u32 %v14454_v20, %v12955_v37  ;;  %v12683_v31 = vld [vmem:[%s22075_s1 + $0x1c98] sm:$0xf0]  ;;  %8151 = vmatpush.bf16.msrb.mxu3 %v13102_v48  ;;  %v22208_v37 = vld [vmem:[#allocation60_spill] sm:$0xff] }
 0x3f5   :  { %8088 = vmatmul.bf16.vlgmr.msra.gmra.mxu2 %v22197_v49  ;;  %v14486_v8 = vld [vmem:[%s22075_s1 + $0x1fac] sm:$0xf]  ;;  %v22202_v61 = vld [vmem:[#allocation57_spill] sm:$0xff]  ;;  %8110 = vmatpush.bf16.msrb.mxu0 %v12702_v18 }
 0x3f6   :  { %v14386_v21 = vld [vmem:[%s22075_s1 + $0x1c8c] sm:$0xf]  ;;  %v7056_v38 = vadd.f32 %v22202_v61, %v7042_v50  ;;  %v13086_v2 = vor.u32 %v14486_v8, %v13083_v59  ;;  %v12811_v46 = vld [vmem:[%s22075_s1 + $0x1d98] sm:$0xf0]  ;;  %v6622_v9 = vadd.f32 %v22203_v58, %v6608_v32  ;;  %8124 = vmatpush.bf16.msrb.mxu1 %v12830_v24 }
 0x3f7   :  { %v14418_v29 = vld [vmem:[%s22075_s1 + $0x1d8c] sm:$0xf]  ;;  %v12939_v0 = vld [vmem:[%s22075_s1 + $0x1e98] sm:$0xf0]  ;;  %v12686_v19 = vor.u32 %v14386_v21, %v12683_v31  ;;  %8138 = vmatpush.bf16.msrb.mxu2 %v12958_v4 }
 0x3f8   :  { %v14450_v28 = vld [vmem:[%s22075_s1 + $0x1e8c] sm:$0xf]  ;;  %v13067_v62 = vld [vmem:[%s22075_s1 + $0x1f98] sm:$0xf0]  ;;  %v12814_v14 = vor.u32 %v14418_v29, %v12811_v46  ;;  %v7070_v22 = vadd.f32 %v22204_v52, %v7056_v38  ;;  %8152 = vmatpush.bf16.msrb.mxu3 %v13086_v2  ;;  %v22211_v46 = vld [vmem:[#allocation30_spill] sm:$0xff] }
 0x3f9   :  { %v14482_v3 = vld [vmem:[%s22075_s1 + $0x1f8c] sm:$0xf]  ;;  %v12942_v35 = vor.u32 %v14450_v28, %v12939_v0  ;;  %v12667_v39 = vld [vmem:[%s22075_s1 + $0x1c78] sm:$0xf0]  ;;  %8111 = vmatpush.bf16.msrb.mxu0 %v12686_v19 }
 0x3fa   :  { %v14382_v36 = vld [vmem:[%s22075_s1 + $0x1c6c] sm:$0xf]  ;;  %v13070_v56 = vor.u32 %v14482_v3, %v13067_v62  ;;  %v12795_v5 = vld [vmem:[%s22075_s1 + $0x1d78] sm:$0xf0]  ;;  %8125 = vmatpush.bf16.msrb.mxu1 %v12814_v14 }
 0x3fb   :  { %v14414_v17 = vld [vmem:[%s22075_s1 + $0x1d6c] sm:$0xf]  ;;  %v12923_v60 = vld [vmem:[%s22075_s1 + $0x1e78] sm:$0xf0]  ;;  %v12670_v26 = vor.u32 %v14382_v36, %v12667_v39  ;;  %8139 = vmatpush.bf16.msrb.mxu2 %v12942_v35 }
 0x3fc   :  { %v14446_v43 = vld [vmem:[%s22075_s1 + $0x1e6c] sm:$0xf]  ;;  %v13051_v7 = vld [vmem:[%s22075_s1 + $0x1f78] sm:$0xf0]  ;;  %v12798_v30 = vor.u32 %v14414_v17, %v12795_v5  ;;  %8153 = vmatpush.bf16.msrb.mxu3 %v13070_v56  ;;  %v13177_v56 = vld [vmem:[%s22078_s3 + $0x70] sm:$0xf] }
 0x3fd   :  { %v22205_v40 = vld [vmem:[#allocation27_spill] sm:$0xff]  ;;  %v12926_v6 = vor.u32 %v14446_v43, %v12923_v60  ;;  %v12651_v16 = vld [vmem:[%s22075_s1 + $0x1c58] sm:$0xf0]  ;;  %8112 = vmatpush.bf16.msrb.mxu0 %v12670_v26  ;;  %v14512_v5 = vld [vmem:[%s22078_s3 + $0x74] sm:$0xf0] }
 0x3fe   :  { %v6636_v47 = vadd.f32 %v22205_v40, %v6622_v9  ;;  %v14478_v25 = vld [vmem:[%s22075_s1 + $0x1f6c] sm:$0xf]  ;;  %v12779_v33 = vld [vmem:[%s22075_s1 + $0x1d58] sm:$0xf0]  ;;  %8126 = vmatpush.bf16.msrb.mxu1 %v12798_v30  ;;  %v22212_v9 = vld [vmem:[#allocation62_spill] sm:$0xff] }
 0x3ff   :  { %v22206_v42 = vld [vmem:[#allocation59_spill] sm:$0xff]  ;;  %v13054_v12 = vor.u32 %v14478_v25, %v13051_v7  ;;  %v12907_v57 = vld [vmem:[%s22075_s1 + $0x1e58] sm:$0xf0]  ;;  %8140 = vmatpush.bf16.msrb.mxu2 %v12926_v6  ;;  %v13241_v43 = vld [vmem:[%s22078_s3 + $0xf0] sm:$0xf]  ;;  %v13178_v6 = vor.u32 %v14512_v5, %v13177_v56 }
 0x400   :  { %v7084_v54 = vadd.f32 %v22206_v42, %v7070_v22  ;;  %v14378_v63 = vld [vmem:[%s22075_s1 + $0x1c4c] sm:$0xf]  ;;  %v6650_v48 = vadd.f32 %v22207_v53, %v6636_v47  ;;  %v13035_v20 = vld [vmem:[%s22075_s1 + $0x1f58] sm:$0xf0]  ;;  %v14528_v25 = vld [vmem:[%s22078_s3 + $0xf4] sm:$0xf0] }
 0x401   :  { %v14410_v44 = vld [vmem:[%s22075_s1 + $0x1d4c] sm:$0xf]  ;;  %v12654_v13 = vor.u32 %v14378_v63, %v12651_v16  ;;  %v22209_v49 = vld [vmem:[#allocation29_spill] sm:$0xff]  ;;  %8154 = vmatpush.bf16.msrb.mxu3 %v13054_v12  ;;  %v13305_v7 = vld [vmem:[%s22078_s3 + $0x170] sm:$0xf] }
 0x402   :  { %v14442_v34 = vld [vmem:[%s22075_s1 + $0x1e4c] sm:$0xf]  ;;  %v7098_v10 = vadd.f32 %v22208_v37, %v7084_v54  ;;  %v6664_v15 = vadd.f32 %v22209_v49, %v6650_v48  ;;  %v12782_v8 = vor.u32 %v14410_v44, %v12779_v33  ;;  %v12635_v50 = vld [vmem:[%s22075_s1 + $0x1c38] sm:$0xf0]  ;;  %v14544_v42 = vld [vmem:[%s22078_s3 + $0x174] sm:$0xf0]  ;;  %v13242_v44 = vor.u32 %v14528_v25, %v13241_v43  ;;  %v21626_v43 = vpop.f32.mrf.mxu0 }
 0x403   :  { %v14474_v45 = vld [vmem:[%s22075_s1 + $0x1f4c] sm:$0xf]  ;;  %v12910_v59 = vor.u32 %v14442_v34, %v12907_v57  ;;  %v22210_v18 = vld [vmem:[#allocation61_spill] sm:$0xff]  ;;  %8113 = vmatpush.bf16.msrb.mxu0 %v12654_v13  ;;  %v22215_v63 = vld [vmem:[#allocation32_spill] sm:$0xff]  ;;  %v13306_v12 = vor.u32 %v14544_v42, %v13305_v7 }
 0x404   :  { %v14374_v11 = vld [vmem:[%s22075_s1 + $0x1c2c] sm:$0xf]  ;;  %v7112_v23 = vadd.f32 %v22210_v18, %v7098_v10  ;;  %v13038_v32 = vor.u32 %v14474_v45, %v13035_v20  ;;  %v12763_v24 = vld [vmem:[%s22075_s1 + $0x1d38] sm:$0xf0]  ;;  %v6678_v28 = vadd.f32 %v22211_v46, %v6664_v15  ;;  %8127 = vmatpush.bf16.msrb.mxu1 %v12782_v8  ;;  %v13169_v33 = vld [vmem:[%s22078_s3 + $0x60] sm:$0xf] }
 0x405   :  { %v14406_v27 = vld [vmem:[%s22075_s1 + $0x1d2c] sm:$0xf]  ;;  %v12891_v21 = vld [vmem:[%s22075_s1 + $0x1e38] sm:$0xf0]  ;;  %v12638_v61 = vor.u32 %v14374_v11, %v12635_v50  ;;  %8141 = vmatpush.bf16.msrb.mxu2 %v12910_v59  ;;  %v14510_v34 = vld [vmem:[%s22078_s3 + $0x64] sm:$0xf0] }
 0x406   :  { %v14438_v4 = vld [vmem:[%s22075_s1 + $0x1e2c] sm:$0xf]  ;;  %v13019_v29 = vld [vmem:[%s22075_s1 + $0x1f38] sm:$0xf0]  ;;  %v12766_v0 = vor.u32 %v14406_v27, %v12763_v24  ;;  %v7126_v14 = vadd.f32 %v22212_v9, %v7112_v23  ;;  %8155 = vmatpush.bf16.msrb.mxu3 %v13038_v32  ;;  %v13233_v57 = vld [vmem:[%s22078_s3 + $0xe0] sm:$0xf]  ;;  %v13170_v8 = vor.u32 %v14510_v34, %v13169_v33  ;;  %v21649_v33 = vpop.f32.mrf.mxu1 }
 0x407   :  { %v14470_v31 = vld [vmem:[%s22075_s1 + $0x1f2c] sm:$0xf]  ;;  %v12619_v2 = vld [vmem:[%s22075_s1 + $0x1c18] sm:$0xf0]  ;;  %v12894_v3 = vor.u32 %v14438_v4, %v12891_v21  ;;  %8114 = vmatpush.bf16.msrb.mxu0 %v12638_v61  ;;  %v22216_v53 = vld [vmem:[#allocation64_spill] sm:$0xff] }
 0x408   :  { %v14370_v38 = vld [vmem:[%s22075_s1 + $0x1c0c] sm:$0xf]  ;;  %v12747_v19 = vld [vmem:[%s22075_s1 + $0x1d18] sm:$0xf0]  ;;  %v13022_v35 = vor.u32 %v14470_v31, %v13019_v29  ;;  %8128 = vmatpush.bf16.msrb.mxu1 %v12766_v0  ;;  %v14526_v45 = vld [vmem:[%s22078_s3 + $0xe4] sm:$0xf0] }
 0x409   :  { %v14402_v62 = vld [vmem:[%s22075_s1 + $0x1d0c] sm:$0xf]  ;;  %v12875_v36 = vld [vmem:[%s22075_s1 + $0x1e18] sm:$0xf0]  ;;  %v12622_v47 = vor.u32 %v14370_v38, %v12619_v2  ;;  %8142 = vmatpush.bf16.msrb.mxu2 %v12894_v3  ;;  %v13297_v20 = vld [vmem:[%s22078_s3 + $0x160] sm:$0xf]  ;;  %v13234_v59 = vor.u32 %v14526_v45, %v13233_v57 }
 0x40a   :  { %v14434_v58 = vld [vmem:[%s22075_s1 + $0x1e0c] sm:$0xf]  ;;  %v13003_v17 = vld [vmem:[%s22075_s1 + $0x1f18] sm:$0xf0]  ;;  %v12750_v54 = vor.u32 %v14402_v62, %v12747_v19  ;;  %8156 = vmatpush.bf16.msrb.mxu3 %v13022_v35  ;;  %v14542_v37 = vld [vmem:[%s22078_s3 + $0x164] sm:$0xf0] }
 0x40b   :  { %v14466_v39 = vld [vmem:[%s22075_s1 + $0x1f0c] sm:$0xf]  ;;  %v12878_v26 = vor.u32 %v14434_v58, %v12875_v36  ;;  %8115 = vmatpush.bf16.msrb.mxu0 %v12622_v47  ;;  %v22217_v10 = vld [vmem:[#allocation33_spill] sm:$0xff]  ;;  %v13298_v11 = vor.u32 %v14542_v37, %v13297_v20  ;;  %v13161_v50 = vld [vmem:[%s22078_s3 + $0x50] sm:$0xf] }
 0x40c   :  { %v22213_v52 = vld [vmem:[#allocation31_spill] sm:$0xff]  ;;  %v13006_v30 = vor.u32 %v14466_v39, %v13003_v17  ;;  %8129 = vmatpush.bf16.msrb.mxu1 %v12750_v54  ;;  %v22218_v49 = vld [vmem:[#allocation65_spill] sm:$0xff]  ;;  %v13225_v18 = vld [vmem:[%s22078_s3 + $0xd0] sm:$0xf] }
 0x40d   :  { %v6692_v22 = vadd.f32 %v22213_v52, %v6678_v28  ;;  %v22214_v60 = vld [vmem:[#allocation63_spill] sm:$0xff]  ;;  %8143 = vmatpush.bf16.msrb.mxu2 %v12878_v26  ;;  %v14508_v27 = vld [vmem:[%s22078_s3 + $0x54] sm:$0xf0]  ;;  %v22220_v32 = vld [vmem:[#allocation16_spill] sm:$0xff] }
 0x40e   :  { %v7140_v40 = vadd.f32 %v22214_v60, %v7126_v14  ;;  %8157 = vmatpush.bf16.msrb.mxu3 %v13006_v30  ;;  %v22219_v23 = vld [vmem:[#allocation13_spill] sm:$0xff]  ;;  %v13289_v4 = vld [vmem:[%s22078_s3 + $0x150] sm:$0xf]  ;;  %v22221_v31 = vld [vmem:[#allocation34_spill] sm:$0xff]  ;;  %v13162_v28 = vor.u32 %v14508_v27, %v13161_v50  ;;  %v21673_v50 = vpop.f32.mrf.mxu3 }
 0x40f   :  { %v6706_v16 = vadd.f32 %v22215_v63, %v6692_v22  ;;  %8566 = vmatpush.bf16.msra.mxu0 %v13178_v6  ;;  %8130 = vmatmul.bf16.vlgmr.msrb.gmra.mxu1 %v22220_v32  ;;  %v14524_v24 = vld [vmem:[%s22078_s3 + $0xd4] sm:$0xf0]  ;;  %v22222_v61 = vld [vmem:[#allocation15_spill] sm:$0xff]  ;;  %v22223_v38 = vld [vmem:[#allocation18_spill] sm:$0xff] }
 0x410   :  { %v7154_v48 = vadd.f32 %v22216_v53, %v7140_v40  ;;  %8580 = vmatpush.bf16.msra.mxu1 %v13242_v44  ;;  %8116 = vmatmul.bf16.vlgmr.msrb.gmra.mxu0 %v22219_v23  ;;  %v14540_v21 = vld [vmem:[%s22078_s3 + $0x154] sm:$0xf0]  ;;  %v22224_v2 = vld [vmem:[#allocation66_spill] sm:$0xff]  ;;  %v22225_v0 = vld [vmem:[#allocation35_spill] sm:$0xff]  ;;  %v13226_v62 = vor.u32 %v14524_v24, %v13225_v18 }
 0x411   :  { %v6720_v13 = vadd.f32 %v22217_v10, %v6706_v16  ;;  %8594 = vmatpush.bf16.msra.mxu2 %v13306_v12  ;;  %8158 = vmatmul.bf16.vlgmr.msrb.gmra.mxu3 %v22223_v38  ;;  %v13290_v19 = vor.u32 %v14540_v21, %v13289_v4  ;;  %v13153_v58 = vld [vmem:[%s22078_s3 + $0x40] sm:$0xf]  ;;  %v14506_v9 = vld [vmem:[%s22078_s3 + $0x44] sm:$0xf0]  ;;  %v22227_v56 = vld [vmem:[#allocation36_spill] sm:$0xff] }
 0x412   :  { %v7168_v15 = vadd.f32 %v22218_v49, %v7154_v48  ;;  %8144 = vmatmul.bf16.vlgmr.msrb.gmra.mxu2 %v22222_v61  ;;  %v13217_v14 = vld [vmem:[%s22078_s3 + $0xc0] sm:$0xf]  ;;  %v22226_v35 = vld [vmem:[#allocation67_spill] sm:$0xff]  ;;  %v13154_v22 = vor.u32 %v14506_v9, %v13153_v58  ;;  %v13145_v47 = vld [vmem:[%s22078_s3 + $0x30] sm:$0xf] }
 0x413   :  { %v6734_v29 = vadd.f32 %v22221_v31, %v6720_v13  ;;  %8567 = vmatpush.bf16.msra.mxu0 %v13170_v8  ;;  %v14522_v39 = vld [vmem:[%s22078_s3 + $0xc4] sm:$0xf0]  ;;  %v13281_v17 = vld [vmem:[%s22078_s3 + $0x140] sm:$0xf]  ;;  %v14504_v25 = vld [vmem:[%s22078_s3 + $0x34] sm:$0xf0] }
 0x414   :  { %v7182_v46 = vadd.f32 %v22224_v2, %v7168_v15  ;;  %8581 = vmatpush.bf16.msra.mxu1 %v13234_v59  ;;  %v14538_v52 = vld [vmem:[%s22078_s3 + $0x144] sm:$0xf0]  ;;  %v13218_v60 = vor.u32 %v14522_v39, %v13217_v14  ;;  %v13209_v7 = vld [vmem:[%s22078_s3 + $0xb0] sm:$0xf]  ;;  %v14520_v26 = vld [vmem:[%s22078_s3 + $0xb4] sm:$0xf0]  ;;  %v13146_v34 = vor.u32 %v14504_v25, %v13145_v47 }
 0x415   :  { %v6748_v3 = vadd.f32 %v22225_v0, %v6734_v29  ;;  %8595 = vmatpush.bf16.msra.mxu2 %v13298_v11  ;;  %v13282_v40 = vor.u32 %v14538_v52, %v13281_v17  ;;  %v22228_v42 = vld [vmem:[#allocation68_spill] sm:$0xff]  ;;  %v14536_v6 = vld [vmem:[%s22078_s3 + $0x134] sm:$0xf0]  ;;  %v22229_v63 = vld [vmem:[#allocation38_spill] sm:$0xff]  ;;  %v13210_v57 = vor.u32 %v14520_v26, %v13209_v7  ;;  %v21671_v11 = vpop.f32.mrf.mxu2  ;;  %v21711_v52 = vpop.f32.mrf.mxu1 }
 0x416   :  { %v7196_v36 = vadd.f32 %v22226_v35, %v7182_v46  ;;  %v13273_v30 = vld [vmem:[%s22078_s3 + $0x130] sm:$0xf]  ;;  %v22230_v44 = vld [vmem:[#allocation70_spill] sm:$0xff]  ;;  %v14502_v45 = vld [vmem:[%s22078_s3 + $0x24] sm:$0xf0] }
 0x417   :  { %8568 = vmatpush.bf16.msra.mxu0 %v13162_v28  ;;  %v6762_v5 = vadd.f32 %v22227_v56, %v6748_v3  ;;  %v13274_v53 = vor.u32 %v14536_v6, %v13273_v30  ;;  %v13137_v48 = vld [vmem:[%s22078_s3 + $0x20] sm:$0xf]  ;;  %v14518_v37 = vld [vmem:[%s22078_s3 + $0xa4] sm:$0xf0]  ;;  %v22233_v18 = vld [vmem:[#allocation40_spill] sm:$0xff]  ;;  %v21695_v28 = vpop.f32.mrf.mxu0 }
 0x418   :  { %8582 = vmatpush.bf16.msra.mxu1 %v13226_v62  ;;  %v7210_v54 = vadd.f32 %v22228_v42, %v7196_v36  ;;  %v13201_v20 = vld [vmem:[%s22078_s3 + $0xa0] sm:$0xf]  ;;  %v14534_v13 = vld [vmem:[%s22078_s3 + $0x124] sm:$0xf0]  ;;  %v13138_v27 = vor.u32 %v14502_v45, %v13137_v48  ;;  %v13129_v4 = vld [vmem:[%s22078_s3 + $0x10] sm:$0xf] }
 0x419   :  { %8596 = vmatpush.bf16.msra.mxu2 %v13290_v19  ;;  %v6776_v16 = vadd.f32 %v22229_v63, %v6762_v5  ;;  %v13265_v10 = vld [vmem:[%s22078_s3 + $0x120] sm:$0xf]  ;;  %v22231_v49 = vld [vmem:[#allocation39_spill] sm:$0xff]  ;;  %v13202_v32 = vor.u32 %v14518_v37, %v13201_v20  ;;  %v14500_v21 = vld [vmem:[%s22078_s3 + $0x14] sm:$0xf0] }
 0x41a   :  { %v7224_v12 = vadd.f32 %v22230_v44, %v7210_v54  ;;  %v22232_v8 = vld [vmem:[#allocation71_spill] sm:$0xff]  ;;  %v13266_v24 = vor.u32 %v14534_v13, %v13265_v10  ;;  %v13193_v31 = vld [vmem:[%s22078_s3 + $0x90] sm:$0xf]  ;;  %v14516_v38 = vld [vmem:[%s22078_s3 + $0x94] sm:$0xf0]  ;;  %v13130_v0 = vor.u32 %v14500_v21, %v13129_v4 }
 0x41b   :  { %8569 = vmatpush.bf16.msra.mxu0 %v13154_v22  ;;  %v6790_v15 = vadd.f32 %v22231_v49, %v6776_v16  ;;  %v22234_v29 = vld [vmem:[#allocation72_spill] sm:$0xff]  ;;  %v14532_v46 = vld [vmem:[%s22078_s3 + $0x114] sm:$0xf0]  ;;  %v13121_v3 = vld [vmem:[%s22078_s3] sm:$0xf]  ;;  %v13194_v58 = vor.u32 %v14516_v38, %v13193_v31 }
 0x41c   :  { %8583 = vmatpush.bf16.msra.mxu1 %v13218_v60  ;;  %v7238_v59 = vadd.f32 %v22232_v8, %v7224_v12  ;;  %v13257_v2 = vld [vmem:[%s22078_s3 + $0x110] sm:$0xf]  ;;  %v22235_v62 = vld [vmem:[#allocation41_spill] sm:$0xff]  ;;  %v14498_v14 = vld [vmem:[%s22078_s3 + $0x4] sm:$0xf0]  ;;  %v21740_v12 = vpop.f32.mrf.mxu3 }
 0x41d   :  { %8597 = vmatpush.bf16.msra.mxu2 %v13282_v40  ;;  %v6804_v23 = vadd.f32 %v22233_v18, %v6790_v15  ;;  %v13258_v9 = vor.u32 %v14532_v46, %v13257_v2  ;;  %v13185_v35 = vld [vmem:[%s22078_s3 + $0x80] sm:$0xf]  ;;  %v14514_v36 = vld [vmem:[%s22078_s3 + $0x84] sm:$0xf0]  ;;  %v22236_v39 = vld [vmem:[#allocation73_spill] sm:$0xff]  ;;  %v13122_v25 = vor.u32 %v14498_v14, %v13121_v3  ;;  %v21738_v44 = vpop.f32.mrf.mxu2 }
 0x41e   :  { %v7252_v61 = vadd.f32 %v22234_v29, %v7238_v59  ;;  %v13249_v22 = vld [vmem:[%s22078_s3 + $0x100] sm:$0xf]  ;;  %v14530_v56 = vld [vmem:[%s22078_s3 + $0x104] sm:$0xf0]  ;;  %v14511_v5 = vld [vmem:[%s22078_s3 + $0x74] sm:$0xf]  ;;  %v13186_v26 = vor.u32 %v14514_v36, %v13185_v35  ;;  %v21780_v29 = vpop.f32.mrf.mxu1 }
 0x41f   :  { %8570 = vmatpush.bf16.msra.mxu0 %v13146_v34  ;;  %v6818_v19 = vadd.f32 %v22235_v62, %v6804_v23  ;;  %v13179_v60 = vld [vmem:[%s22078_s3 + $0x78] sm:$0xf0]  ;;  %v14527_v40 = vld [vmem:[%s22078_s3 + $0xf4] sm:$0xf]  ;;  %v13250_v30 = vor.u32 %v14530_v56, %v13249_v22  ;;  %v13171_v45 = vld [vmem:[%s22078_s3 + $0x68] sm:$0xf0]  ;;  %v21763_v59 = vpop.f32.mrf.mxu0 }
 0x420   :  { %8584 = vmatpush.bf16.msra.mxu1 %v13210_v57  ;;  %v7266_v17 = vadd.f32 %v22236_v39, %v7252_v61  ;;  %v13243_v47 = vld [vmem:[%s22078_s3 + $0xf8] sm:$0xf0]  ;;  %v14543_v7 = vld [vmem:[%s22078_s3 + $0x174] sm:$0xf]  ;;  %v13182_v34 = vor.u32 %v14511_v5, %v13179_v60  ;;  %v14525_v20 = vld [vmem:[%s22078_s3 + $0xe4] sm:$0xf] }
 0x421   :  { %8598 = vmatpush.bf16.msra.mxu2 %v13274_v53  ;;  %v13307_v42 = vld [vmem:[%s22078_s3 + $0x178] sm:$0xf0]  ;;  %v8168_v54 = vmax.f32 %v6818_v19, 0.0  ;;  %v13246_v57 = vor.u32 %v14527_v40, %v13243_v47  ;;  %v14509_v53 = vld [vmem:[%s22078_s3 + $0x64] sm:$0xf] }
 0x422   :  { %v22237_v6 = vld [vmem:[#allocation37_spill] sm:$0xff]  ;;  %v8169_v16 = vmax.f32 %v7266_v17, 0.0  ;;  %v13310_v48 = vor.u32 %v14543_v7, %v13307_v42  ;;  %v13235_v37 = vld [vmem:[%s22078_s3 + $0xe8] sm:$0xf0]  ;;  %v14541_v49 = vld [vmem:[%s22078_s3 + $0x164] sm:$0xf]  ;;  %v13174_v18 = vor.u32 %v14509_v53, %v13171_v45 }
 0x423   :  { %8571 = vmatpush.bf16.msra.mxu0 %v13138_v27  ;;  %v8164_v63 = vmax.f32 %v22237_v6, 0.0  ;;  %v22238_v10 = vld [vmem:[#allocation69_spill] sm:$0xff]  ;;  %v13299_v15 = vld [vmem:[%s22078_s3 + $0x168] sm:$0xf0]  ;;  %v13238_v23 = vor.u32 %v14525_v20, %v13235_v37  ;;  %v14523_v21 = vld [vmem:[%s22078_s3 + $0xd4] sm:$0xf] }
 0x424   :  { %8585 = vmatpush.bf16.msra.mxu1 %v13202_v32  ;;  %v8165_v13 = vmax.f32 %v22238_v10, 0.0  ;;  %v14507_v32 = vld [vmem:[%s22078_s3 + $0x54] sm:$0xf]  ;;  %v13163_v4 = vld [vmem:[%s22078_s3 + $0x58] sm:$0xf0]  ;;  %v21804_v14 = vpop.f32.mrf.mxu3 }
 0x425   :  { %8599 = vmatpush.bf16.msra.mxu2 %v13266_v24  ;;  %v21761_v8 = vpack.c.bf16 %v8168_v54, %v8164_v63  ;;  %v13302_v24 = vor.u32 %v14541_v49, %v13299_v15  ;;  %v13227_v31 = vld [vmem:[%s22078_s3 + $0xd8] sm:$0xf0]  ;;  %v14539_v61 = vld [vmem:[%s22078_s3 + $0x154] sm:$0xf]  ;;  %v13166_v2 = vor.u32 %v14507_v32, %v13163_v4  ;;  %v13155_v62 = vld [vmem:[%s22078_s3 + $0x48] sm:$0xf0]  ;;  %v7728_v4 = vadd.f32 %v21626_v43, %v1087_v55 }
 0x426   :  { %v21765_v27 = vpack.c.bf16 %v8169_v16, %v8165_v13  ;;  %v13291_v38 = vld [vmem:[%s22078_s3 + $0x158] sm:$0xf0]  ;;  %v13230_v46 = vor.u32 %v14523_v21, %v13227_v31  ;;  %v14521_v19 = vld [vmem:[%s22078_s3 + $0xc4] sm:$0xf]  ;;  %v13283_v36 = vld [vmem:[%s22078_s3 + $0x148] sm:$0xf0] }
 0x427   :  { %8572 = vmatpush.bf16.msra.mxu0 %v13130_v0  ;;  %v14505_v0 = vld [vmem:[%s22078_s3 + $0x44] sm:$0xf]  ;;  %v13294_v3 = vor.u32 %v14539_v61, %v13291_v38  ;;  %v21812_v39 = vpop.f32.mrf.mxu0  ;;  %v14503_v56 = vld [vmem:[%s22078_s3 + $0x34] sm:$0xf]  ;;  %v13147_v60 = vld [vmem:[%s22078_s3 + $0x38] sm:$0xf0] }
 0x428   :  { %8586 = vmatpush.bf16.msra.mxu1 %v13194_v58  ;;  %v13219_v58 = vld [vmem:[%s22078_s3 + $0xc8] sm:$0xf0]  ;;  %v14537_v35 = vld [vmem:[%s22078_s3 + $0x144] sm:$0xf]  ;;  %v13158_v17 = vor.u32 %v14505_v0, %v13155_v62  ;;  %v14519_v40 = vld [vmem:[%s22078_s3 + $0xb4] sm:$0xf]  ;;  %v13150_v54 = vor.u32 %v14503_v56, %v13147_v60 }
 0x429   :  { %8600 = vmatpush.bf16.msra.mxu2 %v13258_v9  ;;  %v21802_v9 = vpop.f32.mrf.mxu2  ;;  %v13222_v22 = vor.u32 %v14521_v19, %v13219_v58  ;;  %v13286_v5 = vor.u32 %v14537_v35, %v13283_v36  ;;  %v13211_v47 = vld [vmem:[%s22078_s3 + $0xb8] sm:$0xf0]  ;;  %v14535_v7 = vld [vmem:[%s22078_s3 + $0x134] sm:$0xf]  ;;  %v13139_v63 = vld [vmem:[%s22078_s3 + $0x28] sm:$0xf0] }
 0x42a   :  { %v13275_v42 = vld [vmem:[%s22078_s3 + $0x138] sm:$0xf0]  ;;  %v14517_v16 = vld [vmem:[%s22078_s3 + $0xa4] sm:$0xf]  ;;  %v13267_v45 = vld [vmem:[%s22078_s3 + $0x128] sm:$0xf0] }
 0x42b   :  { %8573 = vmatpush.bf16.msra.mxu0 %v13122_v25  ;;  %v21826_v25 = vpop.f32.mrf.mxu1  ;;  %v13278_v6 = vor.u32 %v14535_v7, %v13275_v42  ;;  %v14499_v10 = vld [vmem:[%s22078_s3 + $0x14] sm:$0xf]  ;;  %v13131_v15 = vld [vmem:[%s22078_s3 + $0x18] sm:$0xf0]  ;;  %v14497_v38 = vld [vmem:[%s22078_s3 + $0x4] sm:$0xf] }
 0x42c   :  { %8587 = vmatpush.bf16.msra.mxu1 %v13186_v26  ;;  %v13214_v26 = vor.u32 %v14519_v40, %v13211_v47  ;;  %v21848_v53 = vpop.f32.mrf.mxu3  ;;  %v14531_v32 = vld [vmem:[%s22078_s3 + $0x114] sm:$0xf]  ;;  %v13134_v31 = vor.u32 %v14499_v10, %v13131_v15  ;;  %v13187_v55 = vld [vmem:[%s22078_s3 + $0x88] sm:$0xf0]  ;;  %v14529_v43 = vld [vmem:[%s22078_s3 + $0x104] sm:$0xf] }
 0x42d   :  { %8601 = vmatpush.bf16.msra.mxu2 %v13250_v30  ;;  %v14501_v30 = vld [vmem:[%s22078_s3 + $0x24] sm:$0xf]  ;;  %v13251_v0 = vld [vmem:[%s22078_s3 + $0x108] sm:$0xf0]  ;;  %v13190_v35 = vor.u32 %v14513_v1, %v13187_v55 }
 0x42e   :  { %8574 = vmatmul.bf16.vlgmr.msra.gmra.mxu0 %v21761_v8  ;;  %v13142_v20 = vor.u32 %v14501_v30, %v13139_v63 }
 0x42f   :  { %8622 = vmatpush.bf16.msrb.mxu0 %v13182_v34  ;;  %8588 = vmatmul.bf16.vlgmr.msra.gmra.mxu1 %v21765_v27  ;;  %v13203_v34 = vld [vmem:[%s22078_s3 + $0xa8] sm:$0xf0]  ;;  %v21859_v13 = vpop.f32.mrf.mxu0 }
 0x430   :  { %8636 = vmatpush.bf16.msrb.mxu1 %v13246_v57  ;;  %8602 = vmatmul.bf16.vlgmr.msra.gmra.mxu2 %v20933_v41  ;;  %v13206_v37 = vor.u32 %v14517_v16, %v13203_v34 }
 0x431   :  { %8650 = vmatpush.bf16.msrb.mxu2 %v13310_v48  ;;  %v21846_v57 = vpop.f32.mrf.mxu2  ;;  %v14533_v48 = vld [vmem:[%s22078_s3 + $0x124] sm:$0xf] }
 0x432   :  { %v13270_v49 = vor.u32 %v14533_v48, %v13267_v45  ;;  %v13353_v45 = vld [vmem:[%s22078_s3 + $0x1d0] sm:$0xf] }
 0x433   :  { %8623 = vmatpush.bf16.msrb.mxu0 %v13174_v18  ;;  %v14515_v18 = vld [vmem:[%s22078_s3 + $0x94] sm:$0xf]  ;;  %v7853_v21 = vpop.f32.mrf.mxu1 }
 0x434   :  { %8637 = vmatpush.bf16.msrb.mxu1 %v13238_v23  ;;  %v13195_v23 = vld [vmem:[%s22078_s3 + $0x98] sm:$0xf0]  ;;  %v7881_v19 = vpop.f32.mrf.mxu3 }
 0x435   :  { %8651 = vmatpush.bf16.msrb.mxu2 %v13302_v24  ;;  %v13259_v24 = vld [vmem:[%s22078_s3 + $0x118] sm:$0xf0]  ;;  %v13198_v61 = vor.u32 %v14515_v18, %v13195_v23  ;;  %v13337_v23 = vld [vmem:[%s22078_s3 + $0x1b0] sm:$0xf] }
 0x437   :  { %8624 = vmatpush.bf16.msrb.mxu0 %v13166_v2  ;;  %v13262_v2 = vor.u32 %v14531_v32, %v13259_v24  ;;  %v7893_v36 = vpop.f32.mrf.mxu0 }
 0x438   :  { %8638 = vmatpush.bf16.msrb.mxu1 %v13230_v46  ;;  %v13123_v46 = vld [vmem:[%s22078_s3 + $0x8] sm:$0xf0] }
 0x439   :  { %8652 = vmatpush.bf16.msrb.mxu2 %v13294_v3  ;;  %v7742_v3 = vadd.f32 %v21649_v33, %v7728_v4  ;;  %v7867_v62 = vpop.f32.mrf.mxu2  ;;  %v13126_v58 = vor.u32 %v14497_v38, %v13123_v46  ;;  %v14550_v38 = vld [vmem:[%s22078_s3 + $0x1a4] sm:$0xf0] }
 0x43b   :  { %8625 = vmatpush.bf16.msrb.mxu0 %v13158_v17  ;;  %v13254_v17 = vor.u32 %v14529_v43, %v13251_v0  ;;  %v7907_v56 = vpop.f32.mrf.mxu1 }
 0x43c   :  { %8639 = vmatpush.bf16.msrb.mxu1 %v13222_v22  ;;  %v7756_v22 = vadd.f32 %v21671_v11, %v7742_v3  ;;  %v7935_v40 = vpop.f32.mrf.mxu3 }
 0x43d   :  { %8653 = vmatpush.bf16.msrb.mxu2 %v13286_v5  ;;  %v7782_v5 = vadd.f32 %v21695_v28, %v21065_v51 }
 0x43e   :  { %v7770_v33 = vadd.f32 %v21673_v50, %v7756_v22 }
 0x43f   :  { %8626 = vmatpush.bf16.msrb.mxu0 %v13150_v54  ;;  %v7796_v47 = vadd.f32 %v21711_v52, %v7782_v5  ;;  %v7895_v7 = vpop.f32.mrf.mxu0  ;;  %v14560_v52 = vld [vmem:[%s22078_s3 + $0x1f4] sm:$0xf0] }
 0x440   :  { %8640 = vmatpush.bf16.msrb.mxu1 %v13214_v26  ;;  %v7784_v11 = vadd.f32 %v21763_v59, %v7770_v33 }
 0x441   :  { %8654 = vmatpush.bf16.msrb.mxu2 %v13278_v6  ;;  %v7921_v60 = vpop.f32.mrf.mxu2  ;;  %v7810_v42 = vadd.f32 %v21738_v44, %v7796_v47 }
 0x442   :  { %v7798_v51 = vadd.f32 %v21780_v29, %v7784_v11  ;;  %v14546_v11 = vld [vmem:[%s22078_s3 + $0x184] sm:$0xf0] }
 0x443   :  { %8627 = vmatpush.bf16.msrb.mxu0 %v13142_v20  ;;  %v7909_v54 = vpop.f32.mrf.mxu1  ;;  %v7824_v50 = vadd.f32 %v21740_v12, %v7810_v42  ;;  %v13361_v12 = vld [vmem:[%s22078_s3 + $0x1e0] sm:$0xf]  ;;  %v14556_v20 = vld [vmem:[%s22078_s3 + $0x1d4] sm:$0xf0]  ;;  %v14559_v42 = vld [vmem:[%s22078_s3 + $0x1f4] sm:$0xf] }
 0x444   :  { %8641 = vmatpush.bf16.msrb.mxu1 %v13206_v37  ;;  %v7812_v28 = vadd.f32 %v21802_v9, %v7798_v51  ;;  %v14558_v9 = vld [vmem:[%s22078_s3 + $0x1e4] sm:$0xf0]  ;;  %v13354_v37 = vor.u32 %v14556_v20, %v13353_v45  ;;  %v13347_v45 = vld [vmem:[%s22078_s3 + $0x1c8] sm:$0xf0] }
 0x445   :  { %8655 = vmatpush.bf16.msrb.mxu2 %v13270_v49  ;;  %v7838_v26 = vadd.f32 %v21812_v39, %v7824_v50  ;;  %v13362_v63 = vor.u32 %v14558_v9, %v13361_v12  ;;  %v14554_v49 = vld [vmem:[%s22078_s3 + $0x1c4] sm:$0xf0]  ;;  %v14555_v9 = vld [vmem:[%s22078_s3 + $0x1d4] sm:$0xf] }
 0x446   :  { %v7826_v59 = vadd.f32 %v21804_v14, %v7812_v28 }
 0x447   :  { %8628 = vmatpush.bf16.msrb.mxu0 %v13134_v31  ;;  %v7949_v30 = vpop.f32.mrf.mxu0  ;;  %v7852_v39 = vadd.f32 %v21826_v25, %v7838_v26  ;;  %v13363_v26 = vld [vmem:[%s22078_s3 + $0x1e8] sm:$0xf0] }
 0x448   :  { %8642 = vmatpush.bf16.msrb.mxu1 %v13198_v61  ;;  %v7840_v6 = vadd.f32 %v21859_v13, %v7826_v59  ;;  %v13329_v61 = vld [vmem:[%s22078_s3 + $0x1a0] sm:$0xf] }
 0x449   :  { %8656 = vmatpush.bf16.msrb.mxu2 %v13262_v2  ;;  %v7866_v16 = vadd.f32 %v21846_v57, %v7852_v39  ;;  %v13345_v57 = vld [vmem:[%s22078_s3 + $0x1c0] sm:$0xf]  ;;  %v13330_v43 = vor.u32 %v14550_v38, %v13329_v61  ;;  %v13355_v39 = vld [vmem:[%s22078_s3 + $0x1d8] sm:$0xf0] }
 0x44a   :  { %v7854_v14 = vadd.f32 %v7853_v21, %v7840_v6  ;;  %v13346_v15 = vor.u32 %v14554_v49, %v13345_v57  ;;  %v14551_v57 = vld [vmem:[%s22078_s3 + $0x1b4] sm:$0xf]  ;;  %v13339_v49 = vld [vmem:[%s22078_s3 + $0x1b8] sm:$0xf0] }
 0x44b   :  { %8629 = vmatpush.bf16.msrb.mxu0 %v13126_v58  ;;  %v7963_v29 = vpop.f32.mrf.mxu1  ;;  %v7880_v25 = vadd.f32 %v21848_v53, %v7866_v16  ;;  %v14552_v53 = vld [vmem:[%s22078_s3 + $0x1b4] sm:$0xf0] }
 0x44c   :  { %8643 = vmatpush.bf16.msrb.mxu1 %v13190_v35  ;;  %v7868_v10 = vadd.f32 %v7867_v62, %v7854_v14  ;;  %v13338_v4 = vor.u32 %v14552_v53, %v13337_v23  ;;  %v13321_v35 = vld [vmem:[%s22078_s3 + $0x190] sm:$0xf]  ;;  %v14553_v14 = vld [vmem:[%s22078_s3 + $0x1c4] sm:$0xf]  ;;  %v13342_v53 = vor.u32 %v14551_v57, %v13339_v49 }
 0x44d   :  { %8657 = vmatpush.bf16.msrb.mxu2 %v13254_v17  ;;  %v7894_v18 = vadd.f32 %v7893_v36, %v7880_v25  ;;  %v14548_v36 = vld [vmem:[%s22078_s3 + $0x194] sm:$0xf0] }
 0x44e   :  { %8630 = vmatmul.bf16.vlgmr.msrb.gmra.mxu0 %v21761_v8  ;;  %v7923_v8 = vpop.f32.mrf.mxu2  ;;  %v7882_v24 = vadd.f32 %v7881_v19, %v7868_v10 }
 0x44f   :  { %8644 = vmatmul.bf16.vlgmr.msrb.gmra.mxu1 %v21765_v27  ;;  %v7937_v27 = vpop.f32.mrf.mxu3  ;;  %v7951_v13 = vpop.f32.mrf.mxu0  ;;  %v7908_v21 = vadd.f32 %v7907_v56, %v7894_v18  ;;  %v13322_v56 = vor.u32 %v14548_v36, %v13321_v35  ;;  %v14545_v35 = vld [vmem:[%s22078_s3 + $0x184] sm:$0xf]  ;;  %v13315_v36 = vld [vmem:[%s22078_s3 + $0x188] sm:$0xf0] }
 0x450   :  { %8658 = vmatmul.bf16.vlgmr.msrb.gmra.mxu2 %v20933_v41  ;;  %v13369_v41 = vld [vmem:[%s22078_s3 + $0x1f0] sm:$0xf]  ;;  %v7896_v31 = vadd.f32 %v7895_v7, %v7882_v24  ;;  %v13331_v24 = vld [vmem:[%s22078_s3 + $0x1a8] sm:$0xf0] }
 0x451   :  { %v13370_v44 = vor.u32 %v14560_v52, %v13369_v41  ;;  %v7922_v1 = vadd.f32 %v7921_v60, %v7908_v21 }
 0x452   :  { %v7910_v0 = vadd.f32 %v7909_v54, %v7896_v31  ;;  %v13371_v54 = vld [vmem:[%s22078_s3 + $0x1f8] sm:$0xf0] }
 0x453   :  { %8608 = vmatpush.bf16.msra.mxu3 %v13370_v44  ;;  %v7965_v32 = vpop.f32.mrf.mxu1  ;;  %v7936_v62 = vadd.f32 %v7935_v40, %v7922_v1  ;;  %v13313_v40 = vld [vmem:[%s22078_s3 + $0x180] sm:$0xf]  ;;  %v13374_v50 = vor.u32 %v14559_v42, %v13371_v54 }
 0x454   :  { %v7924_v19 = vadd.f32 %v7923_v8, %v7910_v0  ;;  %v13314_v7 = vor.u32 %v14546_v11, %v13313_v40 }
 0x455   :  { %v7950_v58 = vadd.f32 %v7949_v30, %v7936_v62 }
 0x456   :  { %v7977_v34 = vpop.f32.mrf.mxu2  ;;  %v7938_v5 = vadd.f32 %v7937_v27, %v7924_v19  ;;  %v14557_v27 = vld [vmem:[%s22078_s3 + $0x1e4] sm:$0xf] }
 0x457   :  { %v7991_v48 = vpop.f32.mrf.mxu3  ;;  %8609 = vmatpush.bf16.msra.mxu3 %v13362_v63  ;;  %v8005_v55 = vpop.f32.mrf.mxu0  ;;  %v7964_v33 = vadd.f32 %v7963_v29, %v7950_v58  ;;  %v13366_v52 = vor.u32 %v14557_v27, %v13363_v26  ;;  %v13358_v63 = vor.u32 %v14555_v9, %v13355_v39  ;;  %v14564_v9 = vld [vmem:[%s22079_s5 + $0x18] sm:$0xff] }
 0x458   :  { %v7952_v60 = vadd.f32 %v7951_v13, %v7938_v5  ;;  %v14576_v39 = vld [vmem:[%s22079_s5 + $0x78] sm:$0xff] }
 0x459   :  { %v7978_v51 = vadd.f32 %v7977_v34, %v7964_v33  ;;  %8830 = vmatpush.bf16.msra.mxu1 %v14576_v39 }
 0x45a   :  { %v7966_v8 = vadd.f32 %v7965_v32, %v7952_v60  ;;  %v14549_v32 = vld [vmem:[%s22078_s3 + $0x1a4] sm:$0xf] }
 0x45b   :  { %8610 = vmatpush.bf16.msra.mxu3 %v13354_v37  ;;  %v8019_v3 = vpop.f32.mrf.mxu1  ;;  %v7992_v30 = vadd.f32 %v7991_v48, %v7978_v51  ;;  %v13350_v37 = vor.u32 %v14553_v14, %v13347_v45  ;;  %v13334_v21 = vor.u32 %v14549_v32, %v13331_v24  ;;  %v14573_v14 = vld [vmem:[%s22079_s5 + $0x60] sm:$0xff]  ;;  %v14572_v45 = vld [vmem:[%s22079_s5 + $0x58] sm:$0xff] }
 0x45d   :  { %v8006_v29 = vadd.f32 %v8005_v55, %v7992_v30  ;;  %v14547_v55 = vld [vmem:[%s22078_s3 + $0x194] sm:$0xf] }
 0x45e   :  { %v7979_v2 = vpop.f32.mrf.mxu2 }
 0x45f   :  { %8611 = vmatpush.bf16.msra.mxu3 %v13346_v15  ;;  %v7993_v46 = vpop.f32.mrf.mxu3  ;;  %v8007_v47 = vpop.f32.mrf.mxu0  ;;  %v7980_v41 = vadd.f32 %v7979_v2, %v7966_v8  ;;  %v8020_v34 = vadd.f32 %v8019_v3, %v8006_v29  ;;  %v14566_v29 = vld [vmem:[%s22079_s5 + $0x28] sm:$0xff] }
 0x461   :  { %v7994_v6 = vadd.f32 %v7993_v46, %v7980_v41 }
 0x463   :  { %8612 = vmatpush.bf16.msra.mxu3 %v13338_v4  ;;  %v8021_v28 = vpop.f32.mrf.mxu1  ;;  %v8008_v48 = vadd.f32 %v8007_v47, %v7994_v6  ;;  %v14563_v6 = vld [vmem:[%s22079_s5 + $0x10] sm:$0xff] }
 0x465   :  { %v8022_v13 = vadd.f32 %v8021_v28, %v8008_v48  ;;  %v14561_v48 = vld [vmem:[%s22079_s5] sm:$0xff] }
 0x466   :  { %v8033_v17 = vpop.f32.mrf.mxu2 }
 0x467   :  { %8613 = vmatpush.bf16.msra.mxu3 %v13330_v43  ;;  %v8047_v22 = vpop.f32.mrf.mxu3  ;;  %v8034_v20 = vadd.f32 %v8033_v17, %v8020_v34  ;;  %v13323_v43 = vld [vmem:[%s22078_s3 + $0x198] sm:$0xf0]  ;;  %v14574_v34 = vld [vmem:[%s22079_s5 + $0x68] sm:$0xff] }
 0x468   :  { %v13326_v62 = vor.u32 %v14547_v55, %v13323_v43 }
 0x469   :  { %v8048_v15 = vadd.f32 %v8047_v22, %v8034_v20 }
 0x46b   :  { %8614 = vmatpush.bf16.msra.mxu3 %v13322_v56  ;;  %v8075_v16 = vpop.f32.mrf.mxu1  ;;  %v13318_v56 = vor.u32 %v14545_v35, %v13315_v36 }
 0x46d   :  { %v8061_v12 = vpop.f32.mrf.mxu0 }
 0x46e   :  { %v8035_v44 = vpop.f32.mrf.mxu2  ;;  %v8062_v4 = vadd.f32 %v8061_v12, %v8048_v15  ;;  %v14565_v12 = vld [vmem:[%s22079_s5 + $0x20] sm:$0xff] }
 0x46f   :  { %8615 = vmatpush.bf16.msra.mxu3 %v13314_v7  ;;  %v8049_v59 = vpop.f32.mrf.mxu3  ;;  %v8036_v18 = vadd.f32 %v8035_v44, %v8022_v13  ;;  %v14568_v44 = vld [vmem:[%s22079_s5 + $0x38] sm:$0xff]  ;;  %v14569_v15 = vld [vmem:[%s22079_s5 + $0x40] sm:$0xff] }
 0x470   :  { %v8076_v38 = vadd.f32 %v8075_v16, %v8062_v4  ;;  %8816 = vmatpush.bf16.msra.mxu0 %v14568_v44  ;;  %v14562_v16 = vld [vmem:[%s22079_s5 + $0x8] sm:$0xff] }
 0x471   :  { %v8050_v61 = vadd.f32 %v8049_v59, %v8036_v18  ;;  %v14567_v59 = vld [vmem:[%s22079_s5 + $0x30] sm:$0xff] }
 0x473   :  { %8664 = vmatpush.bf16.msrb.mxu3 %v13374_v50  ;;  %v8077_v31 = vpop.f32.mrf.mxu1 }
 0x474   :  { %8817 = vmatpush.bf16.msra.mxu0 %v14567_v59 }
 0x475   :  { %v8063_v23 = vpop.f32.mrf.mxu0 }
 0x476   :  { %v8064_v2 = vadd.f32 %v8063_v23, %v8050_v61 }
 0x477   :  { %8665 = vmatpush.bf16.msrb.mxu3 %v13366_v52  ;;  %v8103_v10 = vpop.f32.mrf.mxu3 }
 0x478   :  { %v8089_v25 = vpop.f32.mrf.mxu2  ;;  %v8078_v19 = vadd.f32 %v8077_v31, %v8064_v2  ;;  %8818 = vmatpush.bf16.msra.mxu0 %v14566_v29 }
 0x479   :  { %v8090_v0 = vadd.f32 %v8089_v25, %v8076_v38  ;;  %v14570_v25 = vld [vmem:[%s22079_s5 + $0x48] sm:$0xff] }
 0x47b   :  { %8666 = vmatpush.bf16.msrb.mxu3 %v13358_v63  ;;  %v8104_v17 = vadd.f32 %v8103_v10, %v8090_v0  ;;  %v14575_v63 = vld [vmem:[%s22079_s5 + $0x70] sm:$0xff]  ;;  %v8240_v10 = vld [vmem:[%s22081_s4] sm:$0x3] }
 0x47c   :  { %8819 = vmatpush.bf16.msra.mxu0 %v14565_v12  ;;  %8831 = vmatpush.bf16.msra.mxu1 %v14575_v63  ;;  %v8242_v49 = vperm.slane %v8240_v10, 0 }
 0x47f   :  { %8667 = vmatpush.bf16.msrb.mxu3 %v13350_v37  ;;  %v8105_v1 = vpop.f32.mrf.mxu3  ;;  %v14571_v37 = vld [vmem:[%s22079_s5 + $0x50] sm:$0xff] }
 0x480   :  { %v8091_v46 = vpop.f32.mrf.mxu2  ;;  %8820 = vmatpush.bf16.msra.mxu0 %v14564_v9  ;;  %8832 = vmatpush.bf16.msra.mxu1 %v14574_v34 }
 0x481   :  { %v8092_v22 = vadd.f32 %v8091_v46, %v8078_v19 }
 0x483   :  { %8668 = vmatpush.bf16.msrb.mxu3 %v13342_v53  ;;  %v8106_v47 = vadd.f32 %v8105_v1, %v8092_v22 }
 0x484   :  { %8821 = vmatpush.bf16.msra.mxu0 %v14563_v6  ;;  %8833 = vmatpush.bf16.msra.mxu1 %v14573_v14 }
 0x487   :  { %8669 = vmatpush.bf16.msrb.mxu3 %v13334_v21 }
 0x488   :  { %8822 = vmatpush.bf16.msra.mxu0 %v14562_v16  ;;  %8834 = vmatpush.bf16.msra.mxu1 %v14572_v45  ;;  %v8844_v16 = vlaneseq }
 0x48a   :  { %v8845_v45 = vand.u32 127, %v8844_v16 }
 0x48b   :  { %8670 = vmatpush.bf16.msrb.mxu3 %v13326_v62 }
 0x48c   :  { %v8131_v58 = vpop.f32.mrf.mxu1  ;;  %8823 = vmatpush.bf16.msra.mxu0 %v14561_v48  ;;  %8835 = vmatpush.bf16.msra.mxu1 %v14571_v37  ;;  %vm8846_vm2 = vcmp.eq.s32.totalorder %v8845_v45, 0 }
 0x48d   :  { %v8117_v3 = vpop.f32.mrf.mxu0 }
 0x48e   :  { %v8118_v5 = vadd.f32 %v8117_v3, %v8104_v17  ;;  %v8243_v3 = vperm.slane %v8240_v10, 1 }
 0x48f   :  { %8671 = vmatpush.bf16.msrb.mxu3 %v13318_v56 }
 0x490   :  { %v8132_v11 = vadd.f32 %v8131_v58, %v8118_v5  ;;  %8836 = vmatpush.bf16.msra.mxu1 %v14570_v25 }
 0x494   :  { %v8159_v60 = vpop.f32.mrf.mxu3  ;;  %v8133_v54 = vpop.f32.mrf.mxu1  ;;  %8837 = vmatpush.bf16.msra.mxu1 %v14569_v15 }
 0x495   :  { %v8145_v33 = vpop.f32.mrf.mxu2  ;;  %v8119_v40 = vpop.f32.mrf.mxu0 }
 0x496   :  { %v8120_v7 = vadd.f32 %v8119_v40, %v8106_v47  ;;  %v8146_v42 = vadd.f32 %v8145_v33, %v8132_v11 }
 0x498   :  { %v8134_v51 = vadd.f32 %v8133_v54, %v8120_v7  ;;  %v8160_v28 = vadd.f32 %v8159_v60, %v8146_v42 }
 0x49a   :  { %v8167_v30 = vmax.f32 %v8160_v28, 0.0 }
 0x49c   :  { %v8161_v27 = vpop.f32.mrf.mxu3 }
 0x49d   :  { %v8147_v50 = vpop.f32.mrf.mxu2 }
 0x49e   :  { %v8148_v8 = vadd.f32 %v8147_v50, %v8134_v51 }
 0x4a0   :  { %v8162_v26 = vadd.f32 %v8161_v27, %v8148_v8  ;;  %v14577_v8 = vld [vmem:[%s22080_s6] ss:$0 sm:$0xff] }
 0x4a2   :  { %v8171_v41 = vmax.f32 %v8162_v26, 0.0 }
 0x4a4   :  { %v8175_v52 = vpack.c.bf16 %v8171_v41, %v8167_v30 }
 0x4a6   :  { %8616 = vmatmul.bf16.vlgmr.msra.gmra.mxu3 %v8175_v52 }
 0x4ab   :  { %v8575_v20 = vpop.f32.mrf.mxu0 }
 0x4ac   :  { %v8589_v13 = vpop.f32.mrf.mxu1  ;;  %v8576_v23 = vadd.f32 %v8575_v20, %v8242_v49 }
 0x4ae   :  { %v8590_v21 = vadd.f32 %v8589_v13, %v8576_v23 }
 0x4b3   :  { %v8603_v57 = vpop.f32.mrf.mxu2  ;;  %v8577_v18 = vpop.f32.mrf.mxu0 }
 0x4b4   :  { %v8578_v32 = vadd.f32 %v8577_v18, %v8242_v49  ;;  %v8591_v24 = vpop.f32.mrf.mxu1  ;;  %v8604_v61 = vadd.f32 %v8603_v57, %v8590_v21 }
 0x4b6   :  { %8672 = vmatmul.bf16.vlgmr.msrb.gmra.mxu3 %v8175_v52  ;;  %v8592_v38 = vadd.f32 %v8591_v24, %v8578_v32 }
 0x4bb   :  { %v8605_v4 = vpop.f32.mrf.mxu2 }
 0x4bc   :  { %v8606_v2 = vadd.f32 %v8605_v4, %v8592_v38 }
 0x4cb   :  { %v8631_v31 = vpop.f32.mrf.mxu0 }
 0x4cc   :  { %v8645_v43 = vpop.f32.mrf.mxu1  ;;  %v8632_v36 = vadd.f32 %v8631_v31, %v8243_v3 }
 0x4ce   :  { %v8646_v56 = vadd.f32 %v8645_v43, %v8632_v36 }
 0x4d3   :  { %v8659_v0 = vpop.f32.mrf.mxu2  ;;  %v8633_v35 = vpop.f32.mrf.mxu0 }
 0x4d4   :  { %v8634_v22 = vadd.f32 %v8633_v35, %v8243_v3  ;;  %v8647_v5 = vpop.f32.mrf.mxu1  ;;  %v8660_v60 = vadd.f32 %v8659_v0, %v8646_v56 }
 0x4d6   :  { %v8648_v47 = vadd.f32 %v8647_v5, %v8634_v22 }
 0x4db   :  { %v8661_v33 = vpop.f32.mrf.mxu2 }
 0x4dc   :  { %v8662_v40 = vadd.f32 %v8661_v33, %v8648_v47 }
 0x529   :  { %v8617_v53 = vpop.f32.mrf.mxu3 }
 0x52a   :  { %v8618_v46 = vadd.f32 %v8617_v53, %v8604_v61 }
 0x52c   :  { %v8678_v62 = vmax.f32 %v8618_v46, 0.0 }
 0x531   :  { %v8619_v1 = vpop.f32.mrf.mxu3 }
 0x532   :  { %v8620_v55 = vadd.f32 %v8619_v1, %v8606_v2 }
 0x534   :  { %v8680_v19 = vmax.f32 %v8620_v55, 0.0 }
 0x536   :  { %v8682_v58 = vpack.c.bf16 %v8680_v19, %v8678_v62 }
 0x538   :  { %8824 = vmatmul.bf16.vlgmr.msra.gmra.mxu0 %v8682_v58 }
 0x539   :  { %v8673_v17 = vpop.f32.mrf.mxu3 }
 0x53a   :  { %v8674_v11 = vadd.f32 %v8673_v17, %v8660_v60 }
 0x53c   :  { %v8679_v54 = vmax.f32 %v8674_v11, 0.0 }
 0x541   :  { %v8675_v7 = vpop.f32.mrf.mxu3 }
 0x542   :  { %v8676_v42 = vadd.f32 %v8675_v7, %v8662_v40 }
 0x544   :  { %v8681_v51 = vmax.f32 %v8676_v42, 0.0 }
 0x546   :  { %v8683_v50 = vpack.c.bf16 %v8681_v51, %v8679_v54 }
 0x548   :  { %8838 = vmatmul.bf16.vlgmr.msra.gmra.mxu1 %v8683_v50 }
 0x5b5   :  { %v8825_v28 = vpop.f32.mrf.mxu0 }
 0x5b6   :  { %v8826_v27 = vadd.f32 %v14577_v8, %v8825_v28 }
 0x5bd   :  { %v8827_v52 = vpop.f32.mrf.mxu0 }
 0x5be   :  { %v8828_v44 = vadd.f32 %v14577_v8, %v8827_v52 }
 0x5c5   :  { %v8839_v26 = vpop.f32.mrf.mxu1 }
 0x5c6   :  { %v8840_v30 = vadd.f32 %v8839_v26, %v8826_v27 }
 0x5c8   :  { %v13439_v41 = vmul.f32 -1.442695, %v8840_v30 }
 0x5ca   :  { %14578 = vpow2.f32 %v13439_v41 }
 0x5cd   :  { %v8841_v59 = vpop.f32.mrf.mxu1 }
 0x5ce   :  { %v8842_v29 = vadd.f32 %v8841_v59, %v8828_v44 }
 0x5d0   :  { %v14579_v12 = vpop.eup %14578  ;;  %v13440_v9 = vmul.f32 -1.442695, %v8842_v29 }
 0x5d1   :  { %v8855_v39 = vadd.f32 1.0, %v14579_v12 }
 0x5d2   :  { %14580 = vpow2.f32 %v13440_v9 }
 0x5d3   :  { %14582 = vrcp.f32 %v8855_v39  ;;  %v8868_v20 = vand.u32 2147483648, %v8855_v39  ;;  %v8866_v25 = vand.u32 2147483647, %v8855_v39  ;;  %vm8862_vm1 = vweird.f32 %v8855_v39 }
 0x5d5   :  { %v8869_v57 = vor.u32 1.1754944e-38, %v8868_v20  ;;  %vm8867_vm4 = vcmp.eq.f32.partialorder %v8866_v25, 8.507059e+37 }
 0x5d8   :  { %v14581_v6 = vpop.eup %14580 }
 0x5d9   :  { %v14583_v63 = vpop.eup %14582  ;;  %v8856_v34 = vadd.f32 1.0, %v14581_v6 }
 0x5da   :  { %v8858_v48 = vmul.f32 %v14583_v63, %v8855_v39  ;;  %vm8863_vm0 = vweird.f32 %v14583_v63 }
 0x5db   :  { %14584 = vrcp.f32 %v8856_v34  ;;  %vm8864_vm3 = vmor %vm8862_vm1, %vm8863_vm0  ;;  %v8883_v24 = vand.u32 2147483648, %v8856_v34  ;;  %v8881_v21 = vand.u32 2147483647, %v8856_v34  ;;  %vm8877_vm6 = vweird.f32 %v8856_v34 }
 0x5dc   :  { %v8859_v14 = vsub.f32 1.0, %v8858_v48  ;;  %14586 = vtanh.f32 %v8840_v30 }
 0x5dd   :  { %14588 = vtanh.f32 %v8842_v29  ;;  %v8884_v61 = vor.u32 1.1754944e-38, %v8883_v24  ;;  %vm8882_vm8 = vcmp.eq.f32.partialorder %v8881_v21, 8.507059e+37 }
 0x5de   :  { %v8860_v37 = vmul.f32 %v14583_v63, %v8859_v14 }
 0x5e0   :  { %v8861_v10 = vadd.f32 %v14583_v63, %v8860_v37 }
 0x5e1   :  { %v14585_v13 = vpop.eup %14584 }
 0x5e2   :  { %v8865_v49 = vsel %vm8864_vm3, %v14583_v63, %v8861_v10  ;;  %v8873_v15 = vmul.f32 %v14585_v13, %v8856_v34  ;;  %v14587_v18 = vpop.eup %14586  ;;  %vm8878_vm5 = vweird.f32 %v14585_v13 }
 0x5e3   :  { %v8870_v23 = vsel %vm8867_vm4, %v8869_v57, %v8865_v49  ;;  %vm8879_vm7 = vmor %vm8877_vm6, %vm8878_vm5  ;;  %v14589_v2 = vpop.eup %14588 }
 0x5e4   :  { %v8887_v53 = vsel %vm8846_vm2, %v14587_v18, %v8870_v23  ;;  %v8874_v32 = vsub.f32 1.0, %v8873_v15 }
 0x5e5   :  { %8889 = vst [vmem:[%s22082_s7] sm:$0xff] %v8887_v53 }
 0x5e6   :  { %v8875_v4 = vmul.f32 %v14585_v13, %v8874_v32 }
 0x5e8   :  { %v8876_v31 = vadd.f32 %v14585_v13, %v8875_v4 }
 0x5ea   :  { %v8880_v38 = vsel %vm8879_vm7, %v14585_v13, %v8876_v31 }
 0x5eb   :  { %v8885_v46 = vsel %vm8882_vm8, %v8884_v61, %v8880_v38 }
 0x5ec   :  { %v8888_v1 = vsel %vm8846_vm2, %v14589_v2, %v8885_v46 }
 0x5ed   :  { %8890 = vst [vmem:[%s22082_s7 + $0x8] sm:$0xff] %v8888_v1 }

</bundles_post_ra>
